<compile_context>
chip_gen: v7x
topology: tpu7x:2x2x1
jax: 0.10.0
libtpu: 0.0.40
codegen_flags: <defaults>
</compile_context>

<pallas_src>
import math

import jax
import jax.numpy as jnp
from jax.experimental import pallas as pl
from jax.experimental.pallas import tpu as pltpu

D_MODEL = 80
NHEAD = 10
HEAD_DIM = D_MODEL // NHEAD
D_FF = 2048            # nn.TransformerEncoder/DecoderLayer default dim_feedforward
NUM_LAYERS = 8
LN_EPS = 1e-5
NEG_INF = -1e30        # additive-mask "minus infinity" (softmax-safe)


# ----------------------------- in-kernel helpers ----------------------------

def _layernorm(x, w, b):
    # PyTorch LayerNorm semantics: biased variance, eps inside the sqrt.
    mean = jnp.mean(x, axis=-1, keepdims=True)
    var = jnp.mean(jnp.square(x - mean), axis=-1, keepdims=True)
    return (x - mean) * jax.lax.rsqrt(var + LN_EPS) * w + b


def _mha_accum(q, k, v, ow, mask):
    """Multi-head attention on row-flattened activations.

    q: (Nq, D), k/v: (Nk, D) f32 (already projected, bias added)
    ow: (D, D) f32 output-projection weight
    mask: (Nq, Nk) additive mask (block-diagonal across batch, optionally causal)

    Per-head softmax(q k^T / sqrt(hd)) v is accumulated directly through the
    matching rows of the output projection (no concat, no per-batch grid).
    """
    scale = jnp.float32(1.0 / math.sqrt(HEAD_DIM))
    acc = jnp.zeros((q.shape[0], D_MODEL), jnp.float32)
    for h in range(NHEAD):
        sl = slice(h * HEAD_DIM, (h + 1) * HEAD_DIM)
        qh, kh, vh = q[:, sl], k[:, sl], v[:, sl]
        s = jax.lax.dot_general(qh, kh, (((1,), (1,)), ((), ())),
                                preferred_element_type=jnp.float32)
        s = s * scale + mask
        s = s - jnp.max(s, axis=-1, keepdims=True)
        p = jnp.exp(s)
        p = p / jnp.sum(p, axis=-1, keepdims=True)
        oh = jnp.dot(p, vh, preferred_element_type=jnp.float32)
        acc = acc + jnp.dot(oh, ow[sl, :], preferred_element_type=jnp.float32)
    return acc


# ------------------------------ Pallas kernels ------------------------------

def _encoder_stack_kernel(src_ref, pe_ref, mask_ref, in_w_ref, in_b_ref,
                          qkv_w_ref, qkv_b_ref, ow_ref, ob_ref,
                          w1_ref, b1_ref, w2_ref, b2_ref, ln_ref,
                          mem_ref, x_scr):
    D = D_MODEL
    l = pl.program_id(0)

    @pl.when(l == 0)
    def _():
        # input embedding (80 -> D) + positional encoding, fused into layer 0.
        x0 = jnp.dot(src_ref[...].astype(jnp.bfloat16), in_w_ref[...],
                     preferred_element_type=jnp.float32)
        x_scr[...] = x0 + in_b_ref[...] + pe_ref[...]

    x = x_scr[...]
    mask = mask_ref[...]
    ln = ln_ref[0]                       # (4, D): [ln1_w, ln1_b, ln2_w, ln2_b]

    # --- self-attention (combined QKV projection over all B*S rows) ---
    qkv = jnp.dot(x.astype(jnp.bfloat16), qkv_w_ref[0],
                  preferred_element_type=jnp.float32) + qkv_b_ref[0]
    attn = _mha_accum(qkv[:, :D], qkv[:, D:2 * D], qkv[:, 2 * D:],
                      ow_ref[0], mask) + ob_ref[0]
    x = _layernorm(x + attn, ln[0:1], ln[1:2])

    # --- feed-forward (D -> 2048 -> D, ReLU) ---
    # TODO(synk): for production row counts add a row grid here (tile ~256 rows)
    #             so the (N, 2048) intermediate stays bounded on v7x.
    h = jnp.dot(x.astype(jnp.bfloat16), w1_ref[0],
                preferred_element_type=jnp.float32) + b1_ref[0]
    h = jnp.maximum(h, 0.0)
    f = jnp.dot(h.astype(jnp.bfloat16), w2_ref[0],
                preferred_element_type=jnp.float32) + b2_ref[0]
    x = _layernorm(x + f, ln[2:3], ln[3:4])

    x_scr[...] = x

    @pl.when(l == pl.num_programs(0) - 1)
    def _():
        mem_ref[...] = x


def _decoder_stack_kernel(tgt_oh_ref, emb_ref, pe_ref, mem_ref,
                          self_mask_ref, cross_mask_ref,
                          sa_qkv_w_ref, sa_qkv_b_ref, sa_ow_ref, sa_ob_ref,
                          ca_qw_ref, ca_qb_ref, ca_kvw_ref, ca_kvb_ref,
                          ca_ow_ref, ca_ob_ref,
                          w1_ref, b1_ref, w2_ref, b2_ref, ln_ref,
                          out_w_ref, out_b_ref,
                          o_ref, y_scr):
    D = D_MODEL
    l = pl.program_id(0)

    @pl.when(l == 0)
    def _():
        # target embedding as one-hot @ table, + positional encoding.
        y0 = jnp.dot(tgt_oh_ref[...], emb_ref[...],
                     preferred_element_type=jnp.float32)
        y_scr[...] = y0 + pe_ref[...]

    y = y_scr[...]
    mem = mem_ref[...]
    ln = ln_ref[0]           # (6, D): [ln1_w, ln1_b, ln2_w, ln2_b, ln3_w, ln3_b]

    # --- masked self-attention ---
    qkv = jnp.dot(y.astype(jnp.bfloat16), sa_qkv_w_ref[0],
                  preferred_element_type=jnp.float32) + sa_qkv_b_ref[0]
    attn = _mha_accum(qkv[:, :D], qkv[:, D:2 * D], qkv[:, 2 * D:],
                      sa_ow_ref[0], self_mask_ref[...]) + sa_ob_ref[0]
    y = _layernorm(y + attn, ln[0:1], ln[1:2])

    # --- cross-attention over the (VMEM-resident) encoder memory ---
    qc = jnp.dot(y.astype(jnp.bfloat16), ca_qw_ref[0],
                 preferred_element_type=jnp.float32) + ca_qb_ref[0]
    kv = jnp.dot(mem.astype(jnp.bfloat16), ca_kvw_ref[0],
                 preferred_element_type=jnp.float32) + ca_kvb_ref[0]
    cattn = _mha_accum(qc, kv[:, :D], kv[:, D:],
                       ca_ow_ref[0], cross_mask_ref[...]) + ca_ob_ref[0]
    y = _layernorm(y + cattn, ln[2:3], ln[3:4])

    # --- feed-forward ---
    h = jnp.maximum(jnp.dot(y.astype(jnp.bfloat16), w1_ref[0],
                            preferred_element_type=jnp.float32) + b1_ref[0], 0.0)
    f = jnp.dot(h.astype(jnp.bfloat16), w2_ref[0],
                preferred_element_type=jnp.float32) + b2_ref[0]
    y = _layernorm(y + f, ln[4:5], ln[5:6])

    y_scr[...] = y

    @pl.when(l == pl.num_programs(0) - 1)
    def _():
        # final linear + numerically-stable sigmoid fused into the epilogue.
        z = (jnp.dot(y, out_w_ref[...], preferred_element_type=jnp.float32)
             + out_b_ref[...])
        ez = jnp.exp(-jnp.abs(z))
        o_ref[...] = jnp.where(z >= 0, 1.0 / (1.0 + ez), ez / (1.0 + ez))


# ------------------------------ spec helpers --------------------------------

def _const_spec(shape):
    zeros = (0,) * len(shape)
    return pl.BlockSpec(tuple(shape), lambda l, _z=zeros: _z)


def _layer_spec(rest):
    rest = tuple(rest)
    zeros = (0,) * len(rest)
    return pl.BlockSpec((1,) + rest, lambda l, _z=zeros: (l,) + _z)


# --------------------------- parameters / masks ------------------------------

def _positional_encoding(max_len, d):
    position = jnp.arange(max_len, dtype=jnp.float32)[:, None]
    div_term = jnp.exp(jnp.arange(0, d, 2, dtype=jnp.float32) *
                       (-jnp.log(jnp.float32(10000.0)) / d))
    pe = jnp.zeros((max_len, d), jnp.float32)
    pe = pe.at[:, 0::2].set(jnp.sin(position * div_term))
    pe = pe.at[:, 1::2].set(jnp.cos(position * div_term))
    return pe


def _batch_mask(B, Tq, Tk, causal=False):
    """Additive mask over row-flattened (B*Tq, B*Tk) scores: 0 inside each batch
    element's block (optionally lower-triangular), NEG_INF elsewhere, so
    cross-batch attention is exactly zeroed by the softmax."""
    bq = jnp.repeat(jnp.arange(B), Tq)
    bk = jnp.repeat(jnp.arange(B), Tk)
    allowed = bq[:, None] == bk[None, :]
    if causal:
        pq = jnp.tile(jnp.arange(Tq), B)
        pk = jnp.tile(jnp.arange(Tk), B)
        allowed = allowed & (pk[None, :] <= pq[:, None])
    return jnp.where(allowed, 0.0, NEG_INF).astype(jnp.float32)


def init_params(key):
    D, F, L = D_MODEL, D_FF, NUM_LAYERS
    keys = iter(jax.random.split(key, 64))
    nk = lambda: next(keys)

    def dense(shape, fan_in, dtype=jnp.float32):
        w = jax.random.normal(nk(), shape, jnp.float32) / jnp.sqrt(jnp.float32(fan_in))
        return w.astype(dtype)

    bf = jnp.bfloat16
    ln2 = jnp.tile(jnp.stack([jnp.ones(D, jnp.float32), jnp.zeros(D, jnp.float32)] * 2)[None],
                   (L, 1, 1))
    ln3 = jnp.tile(jnp.stack([jnp.ones(D, jnp.float32), jnp.zeros(D, jnp.float32)] * 3)[None],
                   (L, 1, 1))
    return {
        "in_w": dense((80, D), 80, bf), "in_b": jnp.zeros((1, D), jnp.float32),
        "emb": jax.random.normal(nk(), (3, D), jnp.float32) * 0.1,
        "pe": _positional_encoding(5000, D),
        "out_w": dense((D, 1), D), "out_b": jnp.zeros((1, 1), jnp.float32),
        # encoder stack (per-layer weights stacked along the layer axis)
        "e_qkv_w": dense((L, D, 3 * D), D, bf), "e_qkv_b": jnp.zeros((L, 1, 3 * D), jnp.float32),
        "e_ow": dense((L, D, D), D), "e_ob": jnp.zeros((L, 1, D), jnp.float32),
        "e_w1": dense((L, D, F), D, bf), "e_b1": jnp.zeros((L, 1, F), jnp.float32),
        "e_w2": dense((L, F, D), F, bf), "e_b2": jnp.zeros((L, 1, D), jnp.float32),
        "e_ln": ln2,
        # decoder stack
        "d_sa_qkv_w": dense((L, D, 3 * D), D, bf), "d_sa_qkv_b": jnp.zeros((L, 1, 3 * D), jnp.float32),
        "d_sa_ow": dense((L, D, D), D), "d_sa_ob": jnp.zeros((L, 1, D), jnp.float32),
        "d_ca_qw": dense((L, D, D), D, bf), "d_ca_qb": jnp.zeros((L, 1, D), jnp.float32),
        "d_ca_kvw": dense((L, D, 2 * D), D, bf), "d_ca_kvb": jnp.zeros((L, 1, 2 * D), jnp.float32),
        "d_ca_ow": dense((L, D, D), D), "d_ca_ob": jnp.zeros((L, 1, D), jnp.float32),
        "d_w1": dense((L, D, F), D, bf), "d_b1": jnp.zeros((L, 1, F), jnp.float32),
        "d_w2": dense((L, F, D), F, bf), "d_b2": jnp.zeros((L, 1, D), jnp.float32),
        "d_ln": ln3,
    }


# --------------------------------- forward ----------------------------------

def forward(params, src, tgt_idx):
    # src: (S, B, 80) f32, tgt_idx: (T, B, 1) int32 (PyTorch seq-first convention)
    S, B, _ = src.shape
    T = tgt_idx.shape[0]
    D, F, L = D_MODEL, D_FF, NUM_LAYERS
    pe = params["pe"]

    # layout plumbing (seq-first -> batch-major flat rows) stays in the wrapper.
    src2d = jnp.transpose(src, (1, 0, 2)).reshape(B * S, 80)
    pe_src = jnp.tile(pe[:S], (B, 1))
    enc_mask = _batch_mask(B, S, S, causal=False)

    # ---- fused encoder stack: one pallas_call, grid = layers ----
    memory = pl.pallas_call(
        _encoder_stack_kernel,
        grid=(L,),
        in_specs=[
            _const_spec((B * S, 80)),        # src2d
            _const_spec((B * S, D)),         # positional encoding (tiled)
            _const_spec((B * S, B * S)),     # block-diagonal batch mask
            _const_spec((80, D)), _const_spec((1, D)),          # in_w, in_b
            _layer_spec((D, 3 * D)), _layer_spec((1, 3 * D)),   # qkv_w, qkv_b
            _layer_spec((D, D)), _layer_spec((1, D)),           # ow, ob
            _layer_spec((D, F)), _layer_spec((1, F)),           # w1, b1
            _layer_spec((F, D)), _layer_spec((1, D)),           # w2, b2
            _layer_spec((4, D)),                                # ln params
        ],
        out_specs=pl.BlockSpec((B * S, D), lambda l: (0, 0)),
        out_shape=jax.ShapeDtypeStruct((B * S, D), jnp.float32),
        scratch_shapes=[pltpu.VMEM((B * S, D), jnp.float32)],
        compiler_params=pltpu.CompilerParams(dimension_semantics=("arbitrary",)),
    )(src2d, pe_src, enc_mask, params["in_w"], params["in_b"],
      params["e_qkv_w"], params["e_qkv_b"], params["e_ow"], params["e_ob"],
      params["e_w1"], params["e_b1"], params["e_w2"], params["e_b2"],
      params["e_ln"])

    # TODO(synk): on v7x (2 TensorCores) the sequential layer grid uses one core;
    #             a batch/row split across cores would be needed to use both.
    tgt_oh = jax.nn.one_hot(tgt_idx[..., 0], 3, dtype=jnp.float32)   # (T, B, 3)
    tgt_oh = jnp.transpose(tgt_oh, (1, 0, 2)).reshape(B * T, 3)
    pe_tgt = jnp.tile(pe[:T], (B, 1))
    self_mask = _batch_mask(B, T, T, causal=True)
    cross_mask = _batch_mask(B, T, S, causal=False)

    # ---- fused decoder stack (incl. final linear + sigmoid) ----
    out = pl.pallas_call(
        _decoder_stack_kernel,
        grid=(L,),
        in_specs=[
            _const_spec((B * T, 3)),         # one-hot target ids
            _const_spec((3, D)),             # embedding table
            _const_spec((B * T, D)),         # positional encoding (tiled)
            _const_spec((B * S, D)),         # encoder memory
            _const_spec((B * T, B * T)),     # causal + batch mask
            _const_spec((B * T, B * S)),     # cross-attention batch mask
            _layer_spec((D, 3 * D)), _layer_spec((1, 3 * D)),   # sa qkv_w, qkv_b
            _layer_spec((D, D)), _layer_spec((1, D)),           # sa ow, ob
            _layer_spec((D, D)), _layer_spec((1, D)),           # ca qw, qb
            _layer_spec((D, 2 * D)), _layer_spec((1, 2 * D)),   # ca kvw, kvb
            _layer_spec((D, D)), _layer_spec((1, D)),           # ca ow, ob
            _layer_spec((D, F)), _layer_spec((1, F)),           # w1, b1
            _layer_spec((F, D)), _layer_spec((1, D)),           # w2, b2
            _layer_spec((6, D)),                                # ln params
            _const_spec((D, 1)), _const_spec((1, 1)),           # out_w, out_b
        ],
        out_specs=pl.BlockSpec((B * T, 1), lambda l: (0, 0)),
        out_shape=jax.ShapeDtypeStruct((B * T, 1), jnp.float32),
        scratch_shapes=[pltpu.VMEM((B * T, D), jnp.float32)],
        compiler_params=pltpu.CompilerParams(dimension_semantics=("arbitrary",)),
    )(tgt_oh, params["emb"], pe_tgt, memory, self_mask, cross_mask,
      params["d_sa_qkv_w"], params["d_sa_qkv_b"], params["d_sa_ow"], params["d_sa_ob"],
      params["d_ca_qw"], params["d_ca_qb"], params["d_ca_kvw"], params["d_ca_kvb"],
      params["d_ca_ow"], params["d_ca_ob"],
      params["d_w1"], params["d_b1"], params["d_w2"], params["d_b2"], params["d_ln"],
      params["out_w"], params["out_b"])

    return out.reshape(B, T, 1).transpose(1, 0, 2)                   # (T, B, 1)


if __name__ == "__main__":
    key = jax.random.PRNGKey(0)
    kp, ks, kt = jax.random.split(key, 3)
    params = init_params(kp)

    S, T, B = 8, 6, 2
    src = jax.random.normal(ks, (S, B, 80), jnp.float32)
    tgt = jax.random.randint(kt, (T, B, 1), 0, 3, dtype=jnp.int32)

    out = jax.jit(forward)(params, src, tgt)
    jax.block_until_ready(out)
    assert out.shape == (T, B, 1), out.shape
    assert bool(jnp.all(jnp.isfinite(out)))
    assert bool(jnp.all((out >= 0.0) & (out <= 1.0)))
    print("KERNEL_OK")
</pallas_src>

<mosaic_0001>
module attributes {stable_mosaic.version = 11 : i64} {
  func.func @_encoder_stack_kernel(%arg0: i32, %arg1: memref<16x80xf32, #tpu.memory_space<vmem>>, %arg2: memref<16x80xf32, #tpu.memory_space<vmem>>, %arg3: memref<16x16xf32, #tpu.memory_space<vmem>>, %arg4: memref<80x80xbf16, #tpu.memory_space<vmem>>, %arg5: memref<1x80xf32, #tpu.memory_space<vmem>>, %arg6: memref<1x80x240xbf16, #tpu.memory_space<vmem>>, %arg7: memref<1x1x240xf32, #tpu.memory_space<vmem>>, %arg8: memref<1x80x80xf32, #tpu.memory_space<vmem>>, %arg9: memref<1x1x80xf32, #tpu.memory_space<vmem>>, %arg10: memref<1x80x2048xbf16, #tpu.memory_space<vmem>>, %arg11: memref<1x1x2048xf32, #tpu.memory_space<vmem>>, %arg12: memref<1x2048x80xbf16, #tpu.memory_space<vmem>>, %arg13: memref<1x1x80xf32, #tpu.memory_space<vmem>>, %arg14: memref<1x4x80xf32, #tpu.memory_space<vmem>>, %arg15: memref<16x80xf32, #tpu.memory_space<vmem>>, %arg16: memref<16x80xf32, #tpu.memory_space<vmem>>) attributes {dimension_semantics = [#tpu.dimension_semantics<arbitrary>], iteration_bounds = array<i64: 8>, scalar_prefetch = 0 : i64, scratch_operands = 1 : i64, tpu.core_type = #tpu.core_type<tc>, window_params = [{pipeline_mode = #tpu.pipeline_mode<synchronous>, transform_indices = @transform_0, window_bounds = array<i64: 16, 80>}, {pipeline_mode = #tpu.pipeline_mode<synchronous>, transform_indices = @transform_1, window_bounds = array<i64: 16, 80>}, {pipeline_mode = #tpu.pipeline_mode<synchronous>, transform_indices = @transform_2, window_bounds = array<i64: 16, 16>}, {pipeline_mode = #tpu.pipeline_mode<synchronous>, transform_indices = @transform_3, window_bounds = array<i64: 80, 80>}, {pipeline_mode = #tpu.pipeline_mode<synchronous>, transform_indices = @transform_4, window_bounds = array<i64: 1, 80>}, {transform_indices = @transform_5, window_bounds = array<i64: 1, 80, 240>}, {transform_indices = @transform_6, window_bounds = array<i64: 1, 1, 240>}, {transform_indices = @transform_7, window_bounds = array<i64: 1, 80, 80>}, {transform_indices = @transform_8, window_bounds = array<i64: 1, 1, 80>}, {transform_indices = @transform_9, window_bounds = array<i64: 1, 80, 2048>}, {transform_indices = @transform_10, window_bounds = array<i64: 1, 1, 2048>}, {transform_indices = @transform_11, window_bounds = array<i64: 1, 2048, 80>}, {transform_indices = @transform_12, window_bounds = array<i64: 1, 1, 80>}, {transform_indices = @transform_13, window_bounds = array<i64: 1, 4, 80>}, {pipeline_mode = #tpu.pipeline_mode<synchronous>, transform_indices = @transform_14, window_bounds = array<i64: 16, 80>}]} {
    %c0_i32 = arith.constant 0 : i32
    %0 = arith.cmpi eq, %arg0, %c0_i32 : i32
    %1 = arith.extui %0 : i1 to i32
    %c0_i32_0 = arith.constant 0 : i32
    %2 = arith.cmpi ne, %1, %c0_i32_0 : i32
    scf.if %2 {
      %c0_108 = arith.constant 0 : index
      %c0_109 = arith.constant 0 : index
      %297 = vector.load %arg1[%c0_108, %c0_109] : memref<16x80xf32, #tpu.memory_space<vmem>>, vector<16x80xf32>
      %298 = arith.truncf %297 : vector<16x80xf32> to vector<16x80xbf16>
      %c0_110 = arith.constant 0 : index
      %c0_111 = arith.constant 0 : index
      %299 = vector.load %arg4[%c0_110, %c0_111] : memref<80x80xbf16, #tpu.memory_space<vmem>>, vector<80x80xbf16>
      %cst_112 = arith.constant dense<0.000000e+00> : vector<16x80xf32>
      %300 = tpu.matmul %298, %299, %cst_112 {dimension_numbers = #tpu.dot_dimension_numbers<[1], [0], [0], [1], [0, 0, 1, 1], [], []>} : vector<16x80xbf16>, vector<80x80xbf16>, vector<16x80xf32> -> vector<16x80xf32>
      %c0_113 = arith.constant 0 : index
      %c0_114 = arith.constant 0 : index
      %301 = vector.load %arg5[%c0_113, %c0_114] : memref<1x80xf32, #tpu.memory_space<vmem>>, vector<1x80xf32>
      %302 = vector.broadcast %301 : vector<1x80xf32> to vector<16x80xf32>
      %303 = arith.addf %300, %302 : vector<16x80xf32>
      %c0_115 = arith.constant 0 : index
      %c0_116 = arith.constant 0 : index
      %304 = vector.load %arg2[%c0_115, %c0_116] : memref<16x80xf32, #tpu.memory_space<vmem>>, vector<16x80xf32>
      %305 = arith.addf %303, %304 : vector<16x80xf32>
      %c0_117 = arith.constant 0 : index
      %c0_118 = arith.constant 0 : index
      %306 = vector.load %arg16[%c0_117, %c0_118] : memref<16x80xf32, #tpu.memory_space<vmem>>, vector<16x80xf32>
      tpu.vector_store %arg16[%c0_117, %c0_118], %305 {strides = array<i32>} : memref<16x80xf32, #tpu.memory_space<vmem>>, vector<16x80xf32>,
    } else {
    }
    %c0 = arith.constant 0 : index
    %c0_1 = arith.constant 0 : index
    %3 = vector.load %arg16[%c0, %c0_1] : memref<16x80xf32, #tpu.memory_space<vmem>>, vector<16x80xf32>
    %c0_2 = arith.constant 0 : index
    %c0_3 = arith.constant 0 : index
    %4 = vector.load %arg3[%c0_2, %c0_3] : memref<16x16xf32, #tpu.memory_space<vmem>>, vector<16x16xf32>
    %c0_4 = arith.constant 0 : index
    %c0_5 = arith.constant 0 : index
    %c0_6 = arith.constant 0 : index
    %5 = vector.load %arg14[%c0_4, %c0_5, %c0_6] : memref<1x4x80xf32, #tpu.memory_space<vmem>>, vector<1x4x80xf32>
    %6 = vector.shape_cast %5 : vector<1x4x80xf32> to vector<4x80xf32>
    %7 = arith.truncf %3 : vector<16x80xf32> to vector<16x80xbf16>
    %c0_7 = arith.constant 0 : index
    %c0_8 = arith.constant 0 : index
    %c0_9 = arith.constant 0 : index
    %8 = vector.load %arg6[%c0_7, %c0_8, %c0_9] : memref<1x80x240xbf16, #tpu.memory_space<vmem>>, vector<1x80x240xbf16>
    %9 = vector.shape_cast %8 : vector<1x80x240xbf16> to vector<80x240xbf16>
    %cst = arith.constant dense<0.000000e+00> : vector<16x240xf32>
    %10 = tpu.matmul %7, %9, %cst {dimension_numbers = #tpu.dot_dimension_numbers<[1], [0], [0], [1], [0, 0, 1, 1], [], []>} : vector<16x80xbf16>, vector<80x240xbf16>, vector<16x240xf32> -> vector<16x240xf32>
    %c0_10 = arith.constant 0 : index
    %c0_11 = arith.constant 0 : index
    %c0_12 = arith.constant 0 : index
    %11 = vector.load %arg7[%c0_10, %c0_11, %c0_12] : memref<1x1x240xf32, #tpu.memory_space<vmem>>, vector<1x1x240xf32>
    %12 = vector.shape_cast %11 : vector<1x1x240xf32> to vector<1x240xf32>
    %13 = vector.broadcast %12 : vector<1x240xf32> to vector<16x240xf32>
    %14 = arith.addf %10, %13 : vector<16x240xf32>
    %15 = vector.extract_strided_slice %14 {offsets = [0, 0], sizes = [16, 80], strides = [1, 1]} : vector<16x240xf32> to vector<16x80xf32>
    %16 = vector.extract_strided_slice %14 {offsets = [0, 80], sizes = [16, 80], strides = [1, 1]} : vector<16x240xf32> to vector<16x80xf32>
    %17 = vector.extract_strided_slice %14 {offsets = [0, 160], sizes = [16, 80], strides = [1, 1]} : vector<16x240xf32> to vector<16x80xf32>
    %c0_13 = arith.constant 0 : index
    %c0_14 = arith.constant 0 : index
    %c0_15 = arith.constant 0 : index
    %18 = vector.load %arg8[%c0_13, %c0_14, %c0_15] : memref<1x80x80xf32, #tpu.memory_space<vmem>>, vector<1x80x80xf32>
    %19 = vector.shape_cast %18 : vector<1x80x80xf32> to vector<80x80xf32>
    %cst_16 = arith.constant 0.000000e+00 : f32
    %20 = vector.broadcast %cst_16 : f32 to vector<16x80xf32>
    %21 = vector.extract_strided_slice %15 {offsets = [0, 0], sizes = [16, 8], strides = [1, 1]} : vector<16x80xf32> to vector<16x8xf32>
    %22 = vector.extract_strided_slice %16 {offsets = [0, 0], sizes = [16, 8], strides = [1, 1]} : vector<16x80xf32> to vector<16x8xf32>
    %23 = vector.extract_strided_slice %17 {offsets = [0, 0], sizes = [16, 8], strides = [1, 1]} : vector<16x80xf32> to vector<16x8xf32>
    %cst_17 = arith.constant dense<0.000000e+00> : vector<16x16xf32>
    %24 = tpu.matmul %21, %22, %cst_17 {dimension_numbers = #tpu.dot_dimension_numbers<[1], [1], [0], [0], [0, 0, 1, 0], [], []>} : vector<16x8xf32>, vector<16x8xf32>, vector<16x16xf32> -> vector<16x16xf32>
    %cst_18 = arith.constant 0.353553385 : f32
    %25 = vector.broadcast %cst_18 : f32 to vector<16x16xf32>
    %26 = arith.mulf %24, %25 : vector<16x16xf32>
    %27 = arith.addf %26, %4 : vector<16x16xf32>
    %cst_19 = arith.constant dense<0xFF800000> : vector<16xf32>
    %28 = vector.multi_reduction <maximumf>, %27, %cst_19 [1] : vector<16x16xf32> to vector<16xf32>
    %29 = vector.shape_cast %28 : vector<16xf32> to vector<16x1xf32>
    %30 = vector.broadcast %29 : vector<16x1xf32> to vector<16x16xf32>
    %31 = arith.subf %27, %30 : vector<16x16xf32>
    %32 = math.exp %31 : vector<16x16xf32>
    %cst_20 = arith.constant dense<0.000000e+00> : vector<16xf32>
    %33 = vector.multi_reduction <add>, %32, %cst_20 [1] : vector<16x16xf32> to vector<16xf32>
    %34 = vector.shape_cast %33 : vector<16xf32> to vector<16x1xf32>
    %35 = vector.broadcast %34 : vector<16x1xf32> to vector<16x16xf32>
    %36 = arith.divf %32, %35 : vector<16x16xf32>
    %cst_21 = arith.constant dense<0.000000e+00> : vector<16x8xf32>
    %37 = tpu.matmul %36, %23, %cst_21 {dimension_numbers = #tpu.dot_dimension_numbers<[1], [0], [0], [1], [0, 0, 1, 1], [], []>} : vector<16x16xf32>, vector<16x8xf32>, vector<16x8xf32> -> vector<16x8xf32>
    %38 = vector.extract_strided_slice %19 {offsets = [0, 0], sizes = [8, 80], strides = [1, 1]} : vector<80x80xf32> to vector<8x80xf32>
    %cst_22 = arith.constant dense<0.000000e+00> : vector<16x80xf32>
    %39 = tpu.matmul %37, %38, %cst_22 {dimension_numbers = #tpu.dot_dimension_numbers<[1], [0], [0], [1], [0, 0, 1, 1], [], []>} : vector<16x8xf32>, vector<8x80xf32>, vector<16x80xf32> -> vector<16x80xf32>
    %40 = arith.addf %20, %39 : vector<16x80xf32>
    %41 = vector.extract_strided_slice %15 {offsets = [0, 8], sizes = [16, 8], strides = [1, 1]} : vector<16x80xf32> to vector<16x8xf32>
    %42 = vector.extract_strided_slice %16 {offsets = [0, 8], sizes = [16, 8], strides = [1, 1]} : vector<16x80xf32> to vector<16x8xf32>
    %43 = vector.extract_strided_slice %17 {offsets = [0, 8], sizes = [16, 8], strides = [1, 1]} : vector<16x80xf32> to vector<16x8xf32>
    %cst_23 = arith.constant dense<0.000000e+00> : vector<16x16xf32>
    %44 = tpu.matmul %41, %42, %cst_23 {dimension_numbers = #tpu.dot_dimension_numbers<[1], [1], [0], [0], [0, 0, 1, 0], [], []>} : vector<16x8xf32>, vector<16x8xf32>, vector<16x16xf32> -> vector<16x16xf32>
    %cst_24 = arith.constant 0.353553385 : f32
    %45 = vector.broadcast %cst_24 : f32 to vector<16x16xf32>
    %46 = arith.mulf %44, %45 : vector<16x16xf32>
    %47 = arith.addf %46, %4 : vector<16x16xf32>
    %cst_25 = arith.constant dense<0xFF800000> : vector<16xf32>
    %48 = vector.multi_reduction <maximumf>, %47, %cst_25 [1] : vector<16x16xf32> to vector<16xf32>
    %49 = vector.shape_cast %48 : vector<16xf32> to vector<16x1xf32>
    %50 = vector.broadcast %49 : vector<16x1xf32> to vector<16x16xf32>
    %51 = arith.subf %47, %50 : vector<16x16xf32>
    %52 = math.exp %51 : vector<16x16xf32>
    %cst_26 = arith.constant dense<0.000000e+00> : vector<16xf32>
    %53 = vector.multi_reduction <add>, %52, %cst_26 [1] : vector<16x16xf32> to vector<16xf32>
    %54 = vector.shape_cast %53 : vector<16xf32> to vector<16x1xf32>
    %55 = vector.broadcast %54 : vector<16x1xf32> to vector<16x16xf32>
    %56 = arith.divf %52, %55 : vector<16x16xf32>
    %cst_27 = arith.constant dense<0.000000e+00> : vector<16x8xf32>
    %57 = tpu.matmul %56, %43, %cst_27 {dimension_numbers = #tpu.dot_dimension_numbers<[1], [0], [0], [1], [0, 0, 1, 1], [], []>} : vector<16x16xf32>, vector<16x8xf32>, vector<16x8xf32> -> vector<16x8xf32>
    %58 = vector.extract_strided_slice %19 {offsets = [8, 0], sizes = [8, 80], strides = [1, 1]} : vector<80x80xf32> to vector<8x80xf32>
    %cst_28 = arith.constant dense<0.000000e+00> : vector<16x80xf32>
    %59 = tpu.matmul %57, %58, %cst_28 {dimension_numbers = #tpu.dot_dimension_numbers<[1], [0], [0], [1], [0, 0, 1, 1], [], []>} : vector<16x8xf32>, vector<8x80xf32>, vector<16x80xf32> -> vector<16x80xf32>
    %60 = arith.addf %40, %59 : vector<16x80xf32>
    %61 = vector.extract_strided_slice %15 {offsets = [0, 16], sizes = [16, 8], strides = [1, 1]} : vector<16x80xf32> to vector<16x8xf32>
    %62 = vector.extract_strided_slice %16 {offsets = [0, 16], sizes = [16, 8], strides = [1, 1]} : vector<16x80xf32> to vector<16x8xf32>
    %63 = vector.extract_strided_slice %17 {offsets = [0, 16], sizes = [16, 8], strides = [1, 1]} : vector<16x80xf32> to vector<16x8xf32>
    %cst_29 = arith.constant dense<0.000000e+00> : vector<16x16xf32>
    %64 = tpu.matmul %61, %62, %cst_29 {dimension_numbers = #tpu.dot_dimension_numbers<[1], [1], [0], [0], [0, 0, 1, 0], [], []>} : vector<16x8xf32>, vector<16x8xf32>, vector<16x16xf32> -> vector<16x16xf32>
    %cst_30 = arith.constant 0.353553385 : f32
    %65 = vector.broadcast %cst_30 : f32 to vector<16x16xf32>
    %66 = arith.mulf %64, %65 : vector<16x16xf32>
    %67 = arith.addf %66, %4 : vector<16x16xf32>
    %cst_31 = arith.constant dense<0xFF800000> : vector<16xf32>
    %68 = vector.multi_reduction <maximumf>, %67, %cst_31 [1] : vector<16x16xf32> to vector<16xf32>
    %69 = vector.shape_cast %68 : vector<16xf32> to vector<16x1xf32>
    %70 = vector.broadcast %69 : vector<16x1xf32> to vector<16x16xf32>
    %71 = arith.subf %67, %70 : vector<16x16xf32>
    %72 = math.exp %71 : vector<16x16xf32>
    %cst_32 = arith.constant dense<0.000000e+00> : vector<16xf32>
    %73 = vector.multi_reduction <add>, %72, %cst_32 [1] : vector<16x16xf32> to vector<16xf32>
    %74 = vector.shape_cast %73 : vector<16xf32> to vector<16x1xf32>
    %75 = vector.broadcast %74 : vector<16x1xf32> to vector<16x16xf32>
    %76 = arith.divf %72, %75 : vector<16x16xf32>
    %cst_33 = arith.constant dense<0.000000e+00> : vector<16x8xf32>
    %77 = tpu.matmul %76, %63, %cst_33 {dimension_numbers = #tpu.dot_dimension_numbers<[1], [0], [0], [1], [0, 0, 1, 1], [], []>} : vector<16x16xf32>, vector<16x8xf32>, vector<16x8xf32> -> vector<16x8xf32>
    %78 = vector.extract_strided_slice %19 {offsets = [16, 0], sizes = [8, 80], strides = [1, 1]} : vector<80x80xf32> to vector<8x80xf32>
    %cst_34 = arith.constant dense<0.000000e+00> : vector<16x80xf32>
    %79 = tpu.matmul %77, %78, %cst_34 {dimension_numbers = #tpu.dot_dimension_numbers<[1], [0], [0], [1], [0, 0, 1, 1], [], []>} : vector<16x8xf32>, vector<8x80xf32>, vector<16x80xf32> -> vector<16x80xf32>
    %80 = arith.addf %60, %79 : vector<16x80xf32>
    %81 = vector.extract_strided_slice %15 {offsets = [0, 24], sizes = [16, 8], strides = [1, 1]} : vector<16x80xf32> to vector<16x8xf32>
    %82 = vector.extract_strided_slice %16 {offsets = [0, 24], sizes = [16, 8], strides = [1, 1]} : vector<16x80xf32> to vector<16x8xf32>
    %83 = vector.extract_strided_slice %17 {offsets = [0, 24], sizes = [16, 8], strides = [1, 1]} : vector<16x80xf32> to vector<16x8xf32>
    %cst_35 = arith.constant dense<0.000000e+00> : vector<16x16xf32>
    %84 = tpu.matmul %81, %82, %cst_35 {dimension_numbers = #tpu.dot_dimension_numbers<[1], [1], [0], [0], [0, 0, 1, 0], [], []>} : vector<16x8xf32>, vector<16x8xf32>, vector<16x16xf32> -> vector<16x16xf32>
    %cst_36 = arith.constant 0.353553385 : f32
    %85 = vector.broadcast %cst_36 : f32 to vector<16x16xf32>
    %86 = arith.mulf %84, %85 : vector<16x16xf32>
    %87 = arith.addf %86, %4 : vector<16x16xf32>
    %cst_37 = arith.constant dense<0xFF800000> : vector<16xf32>
    %88 = vector.multi_reduction <maximumf>, %87, %cst_37 [1] : vector<16x16xf32> to vector<16xf32>
    %89 = vector.shape_cast %88 : vector<16xf32> to vector<16x1xf32>
    %90 = vector.broadcast %89 : vector<16x1xf32> to vector<16x16xf32>
    %91 = arith.subf %87, %90 : vector<16x16xf32>
    %92 = math.exp %91 : vector<16x16xf32>
    %cst_38 = arith.constant dense<0.000000e+00> : vector<16xf32>
    %93 = vector.multi_reduction <add>, %92, %cst_38 [1] : vector<16x16xf32> to vector<16xf32>
    %94 = vector.shape_cast %93 : vector<16xf32> to vector<16x1xf32>
    %95 = vector.broadcast %94 : vector<16x1xf32> to vector<16x16xf32>
    %96 = arith.divf %92, %95 : vector<16x16xf32>
    %cst_39 = arith.constant dense<0.000000e+00> : vector<16x8xf32>
    %97 = tpu.matmul %96, %83, %cst_39 {dimension_numbers = #tpu.dot_dimension_numbers<[1], [0], [0], [1], [0, 0, 1, 1], [], []>} : vector<16x16xf32>, vector<16x8xf32>, vector<16x8xf32> -> vector<16x8xf32>
    %98 = vector.extract_strided_slice %19 {offsets = [24, 0], sizes = [8, 80], strides = [1, 1]} : vector<80x80xf32> to vector<8x80xf32>
    %cst_40 = arith.constant dense<0.000000e+00> : vector<16x80xf32>
    %99 = tpu.matmul %97, %98, %cst_40 {dimension_numbers = #tpu.dot_dimension_numbers<[1], [0], [0], [1], [0, 0, 1, 1], [], []>} : vector<16x8xf32>, vector<8x80xf32>, vector<16x80xf32> -> vector<16x80xf32>
    %100 = arith.addf %80, %99 : vector<16x80xf32>
    %101 = vector.extract_strided_slice %15 {offsets = [0, 32], sizes = [16, 8], strides = [1, 1]} : vector<16x80xf32> to vector<16x8xf32>
    %102 = vector.extract_strided_slice %16 {offsets = [0, 32], sizes = [16, 8], strides = [1, 1]} : vector<16x80xf32> to vector<16x8xf32>
    %103 = vector.extract_strided_slice %17 {offsets = [0, 32], sizes = [16, 8], strides = [1, 1]} : vector<16x80xf32> to vector<16x8xf32>
    %cst_41 = arith.constant dense<0.000000e+00> : vector<16x16xf32>
    %104 = tpu.matmul %101, %102, %cst_41 {dimension_numbers = #tpu.dot_dimension_numbers<[1], [1], [0], [0], [0, 0, 1, 0], [], []>} : vector<16x8xf32>, vector<16x8xf32>, vector<16x16xf32> -> vector<16x16xf32>
    %cst_42 = arith.constant 0.353553385 : f32
    %105 = vector.broadcast %cst_42 : f32 to vector<16x16xf32>
    %106 = arith.mulf %104, %105 : vector<16x16xf32>
    %107 = arith.addf %106, %4 : vector<16x16xf32>
    %cst_43 = arith.constant dense<0xFF800000> : vector<16xf32>
    %108 = vector.multi_reduction <maximumf>, %107, %cst_43 [1] : vector<16x16xf32> to vector<16xf32>
    %109 = vector.shape_cast %108 : vector<16xf32> to vector<16x1xf32>
    %110 = vector.broadcast %109 : vector<16x1xf32> to vector<16x16xf32>
    %111 = arith.subf %107, %110 : vector<16x16xf32>
    %112 = math.exp %111 : vector<16x16xf32>
    %cst_44 = arith.constant dense<0.000000e+00> : vector<16xf32>
    %113 = vector.multi_reduction <add>, %112, %cst_44 [1] : vector<16x16xf32> to vector<16xf32>
    %114 = vector.shape_cast %113 : vector<16xf32> to vector<16x1xf32>
    %115 = vector.broadcast %114 : vector<16x1xf32> to vector<16x16xf32>
    %116 = arith.divf %112, %115 : vector<16x16xf32>
    %cst_45 = arith.constant dense<0.000000e+00> : vector<16x8xf32>
    %117 = tpu.matmul %116, %103, %cst_45 {dimension_numbers = #tpu.dot_dimension_numbers<[1], [0], [0], [1], [0, 0, 1, 1], [], []>} : vector<16x16xf32>, vector<16x8xf32>, vector<16x8xf32> -> vector<16x8xf32>
    %118 = vector.extract_strided_slice %19 {offsets = [32, 0], sizes = [8, 80], strides = [1, 1]} : vector<80x80xf32> to vector<8x80xf32>
    %cst_46 = arith.constant dense<0.000000e+00> : vector<16x80xf32>
    %119 = tpu.matmul %117, %118, %cst_46 {dimension_numbers = #tpu.dot_dimension_numbers<[1], [0], [0], [1], [0, 0, 1, 1], [], []>} : vector<16x8xf32>, vector<8x80xf32>, vector<16x80xf32> -> vector<16x80xf32>
    %120 = arith.addf %100, %119 : vector<16x80xf32>
    %121 = vector.extract_strided_slice %15 {offsets = [0, 40], sizes = [16, 8], strides = [1, 1]} : vector<16x80xf32> to vector<16x8xf32>
    %122 = vector.extract_strided_slice %16 {offsets = [0, 40], sizes = [16, 8], strides = [1, 1]} : vector<16x80xf32> to vector<16x8xf32>
    %123 = vector.extract_strided_slice %17 {offsets = [0, 40], sizes = [16, 8], strides = [1, 1]} : vector<16x80xf32> to vector<16x8xf32>
    %cst_47 = arith.constant dense<0.000000e+00> : vector<16x16xf32>
    %124 = tpu.matmul %121, %122, %cst_47 {dimension_numbers = #tpu.dot_dimension_numbers<[1], [1], [0], [0], [0, 0, 1, 0], [], []>} : vector<16x8xf32>, vector<16x8xf32>, vector<16x16xf32> -> vector<16x16xf32>
    %cst_48 = arith.constant 0.353553385 : f32
    %125 = vector.broadcast %cst_48 : f32 to vector<16x16xf32>
    %126 = arith.mulf %124, %125 : vector<16x16xf32>
    %127 = arith.addf %126, %4 : vector<16x16xf32>
    %cst_49 = arith.constant dense<0xFF800000> : vector<16xf32>
    %128 = vector.multi_reduction <maximumf>, %127, %cst_49 [1] : vector<16x16xf32> to vector<16xf32>
    %129 = vector.shape_cast %128 : vector<16xf32> to vector<16x1xf32>
    %130 = vector.broadcast %129 : vector<16x1xf32> to vector<16x16xf32>
    %131 = arith.subf %127, %130 : vector<16x16xf32>
    %132 = math.exp %131 : vector<16x16xf32>
    %cst_50 = arith.constant dense<0.000000e+00> : vector<16xf32>
    %133 = vector.multi_reduction <add>, %132, %cst_50 [1] : vector<16x16xf32> to vector<16xf32>
    %134 = vector.shape_cast %133 : vector<16xf32> to vector<16x1xf32>
    %135 = vector.broadcast %134 : vector<16x1xf32> to vector<16x16xf32>
    %136 = arith.divf %132, %135 : vector<16x16xf32>
    %cst_51 = arith.constant dense<0.000000e+00> : vector<16x8xf32>
    %137 = tpu.matmul %136, %123, %cst_51 {dimension_numbers = #tpu.dot_dimension_numbers<[1], [0], [0], [1], [0, 0, 1, 1], [], []>} : vector<16x16xf32>, vector<16x8xf32>, vector<16x8xf32> -> vector<16x8xf32>
    %138 = vector.extract_strided_slice %19 {offsets = [40, 0], sizes = [8, 80], strides = [1, 1]} : vector<80x80xf32> to vector<8x80xf32>
    %cst_52 = arith.constant dense<0.000000e+00> : vector<16x80xf32>
    %139 = tpu.matmul %137, %138, %cst_52 {dimension_numbers = #tpu.dot_dimension_numbers<[1], [0], [0], [1], [0, 0, 1, 1], [], []>} : vector<16x8xf32>, vector<8x80xf32>, vector<16x80xf32> -> vector<16x80xf32>
    %140 = arith.addf %120, %139 : vector<16x80xf32>
    %141 = vector.extract_strided_slice %15 {offsets = [0, 48], sizes = [16, 8], strides = [1, 1]} : vector<16x80xf32> to vector<16x8xf32>
    %142 = vector.extract_strided_slice %16 {offsets = [0, 48], sizes = [16, 8], strides = [1, 1]} : vector<16x80xf32> to vector<16x8xf32>
    %143 = vector.extract_strided_slice %17 {offsets = [0, 48], sizes = [16, 8], strides = [1, 1]} : vector<16x80xf32> to vector<16x8xf32>
    %cst_53 = arith.constant dense<0.000000e+00> : vector<16x16xf32>
    %144 = tpu.matmul %141, %142, %cst_53 {dimension_numbers = #tpu.dot_dimension_numbers<[1], [1], [0], [0], [0, 0, 1, 0], [], []>} : vector<16x8xf32>, vector<16x8xf32>, vector<16x16xf32> -> vector<16x16xf32>
    %cst_54 = arith.constant 0.353553385 : f32
    %145 = vector.broadcast %cst_54 : f32 to vector<16x16xf32>
    %146 = arith.mulf %144, %145 : vector<16x16xf32>
    %147 = arith.addf %146, %4 : vector<16x16xf32>
    %cst_55 = arith.constant dense<0xFF800000> : vector<16xf32>
    %148 = vector.multi_reduction <maximumf>, %147, %cst_55 [1] : vector<16x16xf32> to vector<16xf32>
    %149 = vector.shape_cast %148 : vector<16xf32> to vector<16x1xf32>
    %150 = vector.broadcast %149 : vector<16x1xf32> to vector<16x16xf32>
    %151 = arith.subf %147, %150 : vector<16x16xf32>
    %152 = math.exp %151 : vector<16x16xf32>
    %cst_56 = arith.constant dense<0.000000e+00> : vector<16xf32>
    %153 = vector.multi_reduction <add>, %152, %cst_56 [1] : vector<16x16xf32> to vector<16xf32>
    %154 = vector.shape_cast %153 : vector<16xf32> to vector<16x1xf32>
    %155 = vector.broadcast %154 : vector<16x1xf32> to vector<16x16xf32>
    %156 = arith.divf %152, %155 : vector<16x16xf32>
    %cst_57 = arith.constant dense<0.000000e+00> : vector<16x8xf32>
    %157 = tpu.matmul %156, %143, %cst_57 {dimension_numbers = #tpu.dot_dimension_numbers<[1], [0], [0], [1], [0, 0, 1, 1], [], []>} : vector<16x16xf32>, vector<16x8xf32>, vector<16x8xf32> -> vector<16x8xf32>
    %158 = vector.extract_strided_slice %19 {offsets = [48, 0], sizes = [8, 80], strides = [1, 1]} : vector<80x80xf32> to vector<8x80xf32>
    %cst_58 = arith.constant dense<0.000000e+00> : vector<16x80xf32>
    %159 = tpu.matmul %157, %158, %cst_58 {dimension_numbers = #tpu.dot_dimension_numbers<[1], [0], [0], [1], [0, 0, 1, 1], [], []>} : vector<16x8xf32>, vector<8x80xf32>, vector<16x80xf32> -> vector<16x80xf32>
    %160 = arith.addf %140, %159 : vector<16x80xf32>
    %161 = vector.extract_strided_slice %15 {offsets = [0, 56], sizes = [16, 8], strides = [1, 1]} : vector<16x80xf32> to vector<16x8xf32>
    %162 = vector.extract_strided_slice %16 {offsets = [0, 56], sizes = [16, 8], strides = [1, 1]} : vector<16x80xf32> to vector<16x8xf32>
    %163 = vector.extract_strided_slice %17 {offsets = [0, 56], sizes = [16, 8], strides = [1, 1]} : vector<16x80xf32> to vector<16x8xf32>
    %cst_59 = arith.constant dense<0.000000e+00> : vector<16x16xf32>
    %164 = tpu.matmul %161, %162, %cst_59 {dimension_numbers = #tpu.dot_dimension_numbers<[1], [1], [0], [0], [0, 0, 1, 0], [], []>} : vector<16x8xf32>, vector<16x8xf32>, vector<16x16xf32> -> vector<16x16xf32>
    %cst_60 = arith.constant 0.353553385 : f32
    %165 = vector.broadcast %cst_60 : f32 to vector<16x16xf32>
    %166 = arith.mulf %164, %165 : vector<16x16xf32>
    %167 = arith.addf %166, %4 : vector<16x16xf32>
    %cst_61 = arith.constant dense<0xFF800000> : vector<16xf32>
    %168 = vector.multi_reduction <maximumf>, %167, %cst_61 [1] : vector<16x16xf32> to vector<16xf32>
    %169 = vector.shape_cast %168 : vector<16xf32> to vector<16x1xf32>
    %170 = vector.broadcast %169 : vector<16x1xf32> to vector<16x16xf32>
    %171 = arith.subf %167, %170 : vector<16x16xf32>
    %172 = math.exp %171 : vector<16x16xf32>
    %cst_62 = arith.constant dense<0.000000e+00> : vector<16xf32>
    %173 = vector.multi_reduction <add>, %172, %cst_62 [1] : vector<16x16xf32> to vector<16xf32>
    %174 = vector.shape_cast %173 : vector<16xf32> to vector<16x1xf32>
    %175 = vector.broadcast %174 : vector<16x1xf32> to vector<16x16xf32>
    %176 = arith.divf %172, %175 : vector<16x16xf32>
    %cst_63 = arith.constant dense<0.000000e+00> : vector<16x8xf32>
    %177 = tpu.matmul %176, %163, %cst_63 {dimension_numbers = #tpu.dot_dimension_numbers<[1], [0], [0], [1], [0, 0, 1, 1], [], []>} : vector<16x16xf32>, vector<16x8xf32>, vector<16x8xf32> -> vector<16x8xf32>
    %178 = vector.extract_strided_slice %19 {offsets = [56, 0], sizes = [8, 80], strides = [1, 1]} : vector<80x80xf32> to vector<8x80xf32>
    %cst_64 = arith.constant dense<0.000000e+00> : vector<16x80xf32>
    %179 = tpu.matmul %177, %178, %cst_64 {dimension_numbers = #tpu.dot_dimension_numbers<[1], [0], [0], [1], [0, 0, 1, 1], [], []>} : vector<16x8xf32>, vector<8x80xf32>, vector<16x80xf32> -> vector<16x80xf32>
    %180 = arith.addf %160, %179 : vector<16x80xf32>
    %181 = vector.extract_strided_slice %15 {offsets = [0, 64], sizes = [16, 8], strides = [1, 1]} : vector<16x80xf32> to vector<16x8xf32>
    %182 = vector.extract_strided_slice %16 {offsets = [0, 64], sizes = [16, 8], strides = [1, 1]} : vector<16x80xf32> to vector<16x8xf32>
    %183 = vector.extract_strided_slice %17 {offsets = [0, 64], sizes = [16, 8], strides = [1, 1]} : vector<16x80xf32> to vector<16x8xf32>
    %cst_65 = arith.constant dense<0.000000e+00> : vector<16x16xf32>
    %184 = tpu.matmul %181, %182, %cst_65 {dimension_numbers = #tpu.dot_dimension_numbers<[1], [1], [0], [0], [0, 0, 1, 0], [], []>} : vector<16x8xf32>, vector<16x8xf32>, vector<16x16xf32> -> vector<16x16xf32>
    %cst_66 = arith.constant 0.353553385 : f32
    %185 = vector.broadcast %cst_66 : f32 to vector<16x16xf32>
    %186 = arith.mulf %184, %185 : vector<16x16xf32>
    %187 = arith.addf %186, %4 : vector<16x16xf32>
    %cst_67 = arith.constant dense<0xFF800000> : vector<16xf32>
    %188 = vector.multi_reduction <maximumf>, %187, %cst_67 [1] : vector<16x16xf32> to vector<16xf32>
    %189 = vector.shape_cast %188 : vector<16xf32> to vector<16x1xf32>
    %190 = vector.broadcast %189 : vector<16x1xf32> to vector<16x16xf32>
    %191 = arith.subf %187, %190 : vector<16x16xf32>
    %192 = math.exp %191 : vector<16x16xf32>
    %cst_68 = arith.constant dense<0.000000e+00> : vector<16xf32>
    %193 = vector.multi_reduction <add>, %192, %cst_68 [1] : vector<16x16xf32> to vector<16xf32>
    %194 = vector.shape_cast %193 : vector<16xf32> to vector<16x1xf32>
    %195 = vector.broadcast %194 : vector<16x1xf32> to vector<16x16xf32>
    %196 = arith.divf %192, %195 : vector<16x16xf32>
    %cst_69 = arith.constant dense<0.000000e+00> : vector<16x8xf32>
    %197 = tpu.matmul %196, %183, %cst_69 {dimension_numbers = #tpu.dot_dimension_numbers<[1], [0], [0], [1], [0, 0, 1, 1], [], []>} : vector<16x16xf32>, vector<16x8xf32>, vector<16x8xf32> -> vector<16x8xf32>
    %198 = vector.extract_strided_slice %19 {offsets = [64, 0], sizes = [8, 80], strides = [1, 1]} : vector<80x80xf32> to vector<8x80xf32>
    %cst_70 = arith.constant dense<0.000000e+00> : vector<16x80xf32>
    %199 = tpu.matmul %197, %198, %cst_70 {dimension_numbers = #tpu.dot_dimension_numbers<[1], [0], [0], [1], [0, 0, 1, 1], [], []>} : vector<16x8xf32>, vector<8x80xf32>, vector<16x80xf32> -> vector<16x80xf32>
    %200 = arith.addf %180, %199 : vector<16x80xf32>
    %201 = vector.extract_strided_slice %15 {offsets = [0, 72], sizes = [16, 8], strides = [1, 1]} : vector<16x80xf32> to vector<16x8xf32>
    %202 = vector.extract_strided_slice %16 {offsets = [0, 72], sizes = [16, 8], strides = [1, 1]} : vector<16x80xf32> to vector<16x8xf32>
    %203 = vector.extract_strided_slice %17 {offsets = [0, 72], sizes = [16, 8], strides = [1, 1]} : vector<16x80xf32> to vector<16x8xf32>
    %cst_71 = arith.constant dense<0.000000e+00> : vector<16x16xf32>
    %204 = tpu.matmul %201, %202, %cst_71 {dimension_numbers = #tpu.dot_dimension_numbers<[1], [1], [0], [0], [0, 0, 1, 0], [], []>} : vector<16x8xf32>, vector<16x8xf32>, vector<16x16xf32> -> vector<16x16xf32>
    %cst_72 = arith.constant 0.353553385 : f32
    %205 = vector.broadcast %cst_72 : f32 to vector<16x16xf32>
    %206 = arith.mulf %204, %205 : vector<16x16xf32>
    %207 = arith.addf %206, %4 : vector<16x16xf32>
    %cst_73 = arith.constant dense<0xFF800000> : vector<16xf32>
    %208 = vector.multi_reduction <maximumf>, %207, %cst_73 [1] : vector<16x16xf32> to vector<16xf32>
    %209 = vector.shape_cast %208 : vector<16xf32> to vector<16x1xf32>
    %210 = vector.broadcast %209 : vector<16x1xf32> to vector<16x16xf32>
    %211 = arith.subf %207, %210 : vector<16x16xf32>
    %212 = math.exp %211 : vector<16x16xf32>
    %cst_74 = arith.constant dense<0.000000e+00> : vector<16xf32>
    %213 = vector.multi_reduction <add>, %212, %cst_74 [1] : vector<16x16xf32> to vector<16xf32>
    %214 = vector.shape_cast %213 : vector<16xf32> to vector<16x1xf32>
    %215 = vector.broadcast %214 : vector<16x1xf32> to vector<16x16xf32>
    %216 = arith.divf %212, %215 : vector<16x16xf32>
    %cst_75 = arith.constant dense<0.000000e+00> : vector<16x8xf32>
    %217 = tpu.matmul %216, %203, %cst_75 {dimension_numbers = #tpu.dot_dimension_numbers<[1], [0], [0], [1], [0, 0, 1, 1], [], []>} : vector<16x16xf32>, vector<16x8xf32>, vector<16x8xf32> -> vector<16x8xf32>
    %218 = vector.extract_strided_slice %19 {offsets = [72, 0], sizes = [8, 80], strides = [1, 1]} : vector<80x80xf32> to vector<8x80xf32>
    %cst_76 = arith.constant dense<0.000000e+00> : vector<16x80xf32>
    %219 = tpu.matmul %217, %218, %cst_76 {dimension_numbers = #tpu.dot_dimension_numbers<[1], [0], [0], [1], [0, 0, 1, 1], [], []>} : vector<16x8xf32>, vector<8x80xf32>, vector<16x80xf32> -> vector<16x80xf32>
    %220 = arith.addf %200, %219 : vector<16x80xf32>
    %c0_77 = arith.constant 0 : index
    %c0_78 = arith.constant 0 : index
    %c0_79 = arith.constant 0 : index
    %221 = vector.load %arg9[%c0_77, %c0_78, %c0_79] : memref<1x1x80xf32, #tpu.memory_space<vmem>>, vector<1x1x80xf32>
    %222 = vector.shape_cast %221 : vector<1x1x80xf32> to vector<1x80xf32>
    %223 = vector.broadcast %222 : vector<1x80xf32> to vector<16x80xf32>
    %224 = arith.addf %220, %223 : vector<16x80xf32>
    %225 = arith.addf %3, %224 : vector<16x80xf32>
    %226 = vector.extract_strided_slice %6 {offsets = [0, 0], sizes = [1, 80], strides = [1, 1]} : vector<4x80xf32> to vector<1x80xf32>
    %227 = vector.extract_strided_slice %6 {offsets = [1, 0], sizes = [1, 80], strides = [1, 1]} : vector<4x80xf32> to vector<1x80xf32>
    %cst_80 = arith.constant dense<0.000000e+00> : vector<16xf32>
    %228 = vector.multi_reduction <add>, %225, %cst_80 [1] : vector<16x80xf32> to vector<16xf32>
    %229 = vector.shape_cast %228 : vector<16xf32> to vector<16x1xf32>
    %cst_81 = arith.constant 8.000000e+01 : f32
    %230 = vector.broadcast %cst_81 : f32 to vector<16x1xf32>
    %231 = arith.divf %229, %230 : vector<16x1xf32>
    %232 = vector.broadcast %231 : vector<16x1xf32> to vector<16x80xf32>
    %233 = arith.subf %225, %232 : vector<16x80xf32>
    %234 = arith.mulf %233, %233 : vector<16x80xf32>
    %cst_82 = arith.constant dense<0.000000e+00> : vector<16xf32>
    %235 = vector.multi_reduction <add>, %234, %cst_82 [1] : vector<16x80xf32> to vector<16xf32>
    %236 = vector.shape_cast %235 : vector<16xf32> to vector<16x1xf32>
    %cst_83 = arith.constant 8.000000e+01 : f32
    %237 = vector.broadcast %cst_83 : f32 to vector<16x1xf32>
    %238 = arith.divf %236, %237 : vector<16x1xf32>
    %239 = vector.broadcast %231 : vector<16x1xf32> to vector<16x80xf32>
    %240 = arith.subf %225, %239 : vector<16x80xf32>
    %cst_84 = arith.constant 9.99999974E-6 : f32
    %241 = vector.broadcast %cst_84 : f32 to vector<16x1xf32>
    %242 = arith.addf %238, %241 : vector<16x1xf32>
    %243 = math.rsqrt %242 : vector<16x1xf32>
    %244 = vector.broadcast %243 : vector<16x1xf32> to vector<16x80xf32>
    %245 = arith.mulf %240, %244 : vector<16x80xf32>
    %246 = vector.broadcast %226 : vector<1x80xf32> to vector<16x80xf32>
    %247 = arith.mulf %245, %246 : vector<16x80xf32>
    %248 = vector.broadcast %227 : vector<1x80xf32> to vector<16x80xf32>
    %249 = arith.addf %247, %248 : vector<16x80xf32>
    %250 = arith.truncf %249 : vector<16x80xf32> to vector<16x80xbf16>
    %c0_85 = arith.constant 0 : index
    %c0_86 = arith.constant 0 : index
    %c0_87 = arith.constant 0 : index
    %251 = vector.load %arg10[%c0_85, %c0_86, %c0_87] : memref<1x80x2048xbf16, #tpu.memory_space<vmem>>, vector<1x80x2048xbf16>
    %252 = vector.shape_cast %251 : vector<1x80x2048xbf16> to vector<80x2048xbf16>
    %cst_88 = arith.constant dense<0.000000e+00> : vector<16x2048xf32>
    %253 = tpu.matmul %250, %252, %cst_88 {dimension_numbers = #tpu.dot_dimension_numbers<[1], [0], [0], [1], [0, 0, 1, 1], [], []>} : vector<16x80xbf16>, vector<80x2048xbf16>, vector<16x2048xf32> -> vector<16x2048xf32>
    %c0_89 = arith.constant 0 : index
    %c0_90 = arith.constant 0 : index
    %c0_91 = arith.constant 0 : index
    %254 = vector.load %arg11[%c0_89, %c0_90, %c0_91] : memref<1x1x2048xf32, #tpu.memory_space<vmem>>, vector<1x1x2048xf32>
    %255 = vector.shape_cast %254 : vector<1x1x2048xf32> to vector<1x2048xf32>
    %256 = vector.broadcast %255 : vector<1x2048xf32> to vector<16x2048xf32>
    %257 = arith.addf %253, %256 : vector<16x2048xf32>
    %cst_92 = arith.constant 0.000000e+00 : f32
    %258 = vector.broadcast %cst_92 : f32 to vector<16x2048xf32>
    %259 = arith.maximumf %257, %258 : vector<16x2048xf32>
    %260 = arith.truncf %259 : vector<16x2048xf32> to vector<16x2048xbf16>
    %c0_93 = arith.constant 0 : index
    %c0_94 = arith.constant 0 : index
    %c0_95 = arith.constant 0 : index
    %261 = vector.load %arg12[%c0_93, %c0_94, %c0_95] : memref<1x2048x80xbf16, #tpu.memory_space<vmem>>, vector<1x2048x80xbf16>
    %262 = vector.shape_cast %261 : vector<1x2048x80xbf16> to vector<2048x80xbf16>
    %cst_96 = arith.constant dense<0.000000e+00> : vector<16x80xf32>
    %263 = tpu.matmul %260, %262, %cst_96 {dimension_numbers = #tpu.dot_dimension_numbers<[1], [0], [0], [1], [0, 0, 1, 1], [], []>} : vector<16x2048xbf16>, vector<2048x80xbf16>, vector<16x80xf32> -> vector<16x80xf32>
    %c0_97 = arith.constant 0 : index
    %c0_98 = arith.constant 0 : index
    %c0_99 = arith.constant 0 : index
    %264 = vector.load %arg13[%c0_97, %c0_98, %c0_99] : memref<1x1x80xf32, #tpu.memory_space<vmem>>, vector<1x1x80xf32>
    %265 = vector.shape_cast %264 : vector<1x1x80xf32> to vector<1x80xf32>
    %266 = vector.broadcast %265 : vector<1x80xf32> to vector<16x80xf32>
    %267 = arith.addf %263, %266 : vector<16x80xf32>
    %268 = arith.addf %249, %267 : vector<16x80xf32>
    %269 = vector.extract_strided_slice %6 {offsets = [2, 0], sizes = [1, 80], strides = [1, 1]} : vector<4x80xf32> to vector<1x80xf32>
    %270 = vector.extract_strided_slice %6 {offsets = [3, 0], sizes = [1, 80], strides = [1, 1]} : vector<4x80xf32> to vector<1x80xf32>
    %cst_100 = arith.constant dense<0.000000e+00> : vector<16xf32>
    %271 = vector.multi_reduction <add>, %268, %cst_100 [1] : vector<16x80xf32> to vector<16xf32>
    %272 = vector.shape_cast %271 : vector<16xf32> to vector<16x1xf32>
    %cst_101 = arith.constant 8.000000e+01 : f32
    %273 = vector.broadcast %cst_101 : f32 to vector<16x1xf32>
    %274 = arith.divf %272, %273 : vector<16x1xf32>
    %275 = vector.broadcast %274 : vector<16x1xf32> to vector<16x80xf32>
    %276 = arith.subf %268, %275 : vector<16x80xf32>
    %277 = arith.mulf %276, %276 : vector<16x80xf32>
    %cst_102 = arith.constant dense<0.000000e+00> : vector<16xf32>
    %278 = vector.multi_reduction <add>, %277, %cst_102 [1] : vector<16x80xf32> to vector<16xf32>
    %279 = vector.shape_cast %278 : vector<16xf32> to vector<16x1xf32>
    %cst_103 = arith.constant 8.000000e+01 : f32
    %280 = vector.broadcast %cst_103 : f32 to vector<16x1xf32>
    %281 = arith.divf %279, %280 : vector<16x1xf32>
    %282 = vector.broadcast %274 : vector<16x1xf32> to vector<16x80xf32>
    %283 = arith.subf %268, %282 : vector<16x80xf32>
    %cst_104 = arith.constant 9.99999974E-6 : f32
    %284 = vector.broadcast %cst_104 : f32 to vector<16x1xf32>
    %285 = arith.addf %281, %284 : vector<16x1xf32>
    %286 = math.rsqrt %285 : vector<16x1xf32>
    %287 = vector.broadcast %286 : vector<16x1xf32> to vector<16x80xf32>
    %288 = arith.mulf %283, %287 : vector<16x80xf32>
    %289 = vector.broadcast %269 : vector<1x80xf32> to vector<16x80xf32>
    %290 = arith.mulf %288, %289 : vector<16x80xf32>
    %291 = vector.broadcast %270 : vector<1x80xf32> to vector<16x80xf32>
    %292 = arith.addf %290, %291 : vector<16x80xf32>
    %c0_105 = arith.constant 0 : index
    %c0_106 = arith.constant 0 : index
    %293 = vector.load %arg16[%c0_105, %c0_106] : memref<16x80xf32, #tpu.memory_space<vmem>>, vector<16x80xf32>
    tpu.vector_store %arg16[%c0_105, %c0_106], %292 {strides = array<i32>} : memref<16x80xf32, #tpu.memory_space<vmem>>, vector<16x80xf32>,
    %c7_i32 = arith.constant 7 : i32
    %294 = arith.cmpi eq, %arg0, %c7_i32 : i32
    %295 = arith.extui %294 : i1 to i32
    %c0_i32_107 = arith.constant 0 : i32
    %296 = arith.cmpi ne, %295, %c0_i32_107 : i32
    scf.if %296 {
      %c0_108 = arith.constant 0 : index
      %c0_109 = arith.constant 0 : index
      %297 = vector.load %arg15[%c0_108, %c0_109] : memref<16x80xf32, #tpu.memory_space<vmem>>, vector<16x80xf32>
      tpu.vector_store %arg15[%c0_108, %c0_109], %292 {strides = array<i32>} : memref<16x80xf32, #tpu.memory_space<vmem>>, vector<16x80xf32>,
    } else {
    }
    return
  }
  func.func @transform_0(%arg0: i32) -> (i32, i32) {
    %c0_i32 = arith.constant 0 : i32
    %c0_i32_0 = arith.constant 0 : i32
    %c0_i32_1 = arith.constant 0 : i32
    return %c0_i32, %c0_i32_0 : i32, i32
  }
  func.func @transform_1(%arg0: i32) -> (i32, i32) {
    %c0_i32 = arith.constant 0 : i32
    %c0_i32_0 = arith.constant 0 : i32
    %c0_i32_1 = arith.constant 0 : i32
    return %c0_i32, %c0_i32_0 : i32, i32
  }
  func.func @transform_2(%arg0: i32) -> (i32, i32) {
    %c0_i32 = arith.constant 0 : i32
    %c0_i32_0 = arith.constant 0 : i32
    %c0_i32_1 = arith.constant 0 : i32
    return %c0_i32, %c0_i32_0 : i32, i32
  }
  func.func @transform_3(%arg0: i32) -> (i32, i32) {
    %c0_i32 = arith.constant 0 : i32
    %c0_i32_0 = arith.constant 0 : i32
    %c0_i32_1 = arith.constant 0 : i32
    return %c0_i32, %c0_i32_0 : i32, i32
  }
  func.func @transform_4(%arg0: i32) -> (i32, i32) {
    %c0_i32 = arith.constant 0 : i32
    %c0_i32_0 = arith.constant 0 : i32
    %c0_i32_1 = arith.constant 0 : i32
    return %c0_i32, %c0_i32_0 : i32, i32
  }
  func.func @transform_5(%arg0: i32) -> (i32, i32, i32) {
    %c0_i32 = arith.constant 0 : i32
    %c0_i32_0 = arith.constant 0 : i32
    %c0_i32_1 = arith.constant 0 : i32
    return %arg0, %c0_i32, %c0_i32_0 : i32, i32, i32
  }
  func.func @transform_6(%arg0: i32) -> (i32, i32, i32) {
    %c0_i32 = arith.constant 0 : i32
    %c0_i32_0 = arith.constant 0 : i32
    %c0_i32_1 = arith.constant 0 : i32
    return %arg0, %c0_i32, %c0_i32_0 : i32, i32, i32
  }
  func.func @transform_7(%arg0: i32) -> (i32, i32, i32) {
    %c0_i32 = arith.constant 0 : i32
    %c0_i32_0 = arith.constant 0 : i32
    %c0_i32_1 = arith.constant 0 : i32
    return %arg0, %c0_i32, %c0_i32_0 : i32, i32, i32
  }
  func.func @transform_8(%arg0: i32) -> (i32, i32, i32) {
    %c0_i32 = arith.constant 0 : i32
    %c0_i32_0 = arith.constant 0 : i32
    %c0_i32_1 = arith.constant 0 : i32
    return %arg0, %c0_i32, %c0_i32_0 : i32, i32, i32
  }
  func.func @transform_9(%arg0: i32) -> (i32, i32, i32) {
    %c0_i32 = arith.constant 0 : i32
    %c0_i32_0 = arith.constant 0 : i32
    %c0_i32_1 = arith.constant 0 : i32
    return %arg0, %c0_i32, %c0_i32_0 : i32, i32, i32
  }
  func.func @transform_10(%arg0: i32) -> (i32, i32, i32) {
    %c0_i32 = arith.constant 0 : i32
    %c0_i32_0 = arith.constant 0 : i32
    %c0_i32_1 = arith.constant 0 : i32
    return %arg0, %c0_i32, %c0_i32_0 : i32, i32, i32
  }
  func.func @transform_11(%arg0: i32) -> (i32, i32, i32) {
    %c0_i32 = arith.constant 0 : i32
    %c0_i32_0 = arith.constant 0 : i32
    %c0_i32_1 = arith.constant 0 : i32
    return %arg0, %c0_i32, %c0_i32_0 : i32, i32, i32
  }
  func.func @transform_12(%arg0: i32) -> (i32, i32, i32) {
    %c0_i32 = arith.constant 0 : i32
    %c0_i32_0 = arith.constant 0 : i32
    %c0_i32_1 = arith.constant 0 : i32
    return %arg0, %c0_i32, %c0_i32_0 : i32, i32, i32
  }
  func.func @transform_13(%arg0: i32) -> (i32, i32, i32) {
    %c0_i32 = arith.constant 0 : i32
    %c0_i32_0 = arith.constant 0 : i32
    %c0_i32_1 = arith.constant 0 : i32
    return %arg0, %c0_i32, %c0_i32_0 : i32, i32, i32
  }
  func.func @transform_14(%arg0: i32) -> (i32, i32) {
    %c0_i32 = arith.constant 0 : i32
    %c0_i32_0 = arith.constant 0 : i32
    %c0_i32_1 = arith.constant 0 : i32
    return %c0_i32, %c0_i32_0 : i32, i32
  }
}

module attributes {stable_mosaic.version = 11 : i64} {
  func.func @_decoder_stack_kernel(%arg0: i32, %arg1: memref<12x3xf32, #tpu.memory_space<vmem>>, %arg2: memref<3x80xf32, #tpu.memory_space<vmem>>, %arg3: memref<12x80xf32, #tpu.memory_space<vmem>>, %arg4: memref<16x80xf32, #tpu.memory_space<vmem>>, %arg5: memref<12x12xf32, #tpu.memory_space<vmem>>, %arg6: memref<12x16xf32, #tpu.memory_space<vmem>>, %arg7: memref<1x80x240xbf16, #tpu.memory_space<vmem>>, %arg8: memref<1x1x240xf32, #tpu.memory_space<vmem>>, %arg9: memref<1x80x80xf32, #tpu.memory_space<vmem>>, %arg10: memref<1x1x80xf32, #tpu.memory_space<vmem>>, %arg11: memref<1x80x80xbf16, #tpu.memory_space<vmem>>, %arg12: memref<1x1x80xf32, #tpu.memory_space<vmem>>, %arg13: memref<1x80x160xbf16, #tpu.memory_space<vmem>>, %arg14: memref<1x1x160xf32, #tpu.memory_space<vmem>>, %arg15: memref<1x80x80xf32, #tpu.memory_space<vmem>>, %arg16: memref<1x1x80xf32, #tpu.memory_space<vmem>>, %arg17: memref<1x80x2048xbf16, #tpu.memory_space<vmem>>, %arg18: memref<1x1x2048xf32, #tpu.memory_space<vmem>>, %arg19: memref<1x2048x80xbf16, #tpu.memory_space<vmem>>, %arg20: memref<1x1x80xf32, #tpu.memory_space<vmem>>, %arg21: memref<1x6x80xf32, #tpu.memory_space<vmem>>, %arg22: memref<80x1xf32, #tpu.memory_space<vmem>>, %arg23: memref<1x1xf32, #tpu.memory_space<vmem>>, %arg24: memref<12x1xf32, #tpu.memory_space<vmem>>, %arg25: memref<12x80xf32, #tpu.memory_space<vmem>>) attributes {dimension_semantics = [#tpu.dimension_semantics<arbitrary>], iteration_bounds = array<i64: 8>, scalar_prefetch = 0 : i64, scratch_operands = 1 : i64, tpu.core_type = #tpu.core_type<tc>, window_params = [{pipeline_mode = #tpu.pipeline_mode<synchronous>, transform_indices = @transform_0, window_bounds = array<i64: 12, 3>}, {pipeline_mode = #tpu.pipeline_mode<synchronous>, transform_indices = @transform_1, window_bounds = array<i64: 3, 80>}, {pipeline_mode = #tpu.pipeline_mode<synchronous>, transform_indices = @transform_2, window_bounds = array<i64: 12, 80>}, {pipeline_mode = #tpu.pipeline_mode<synchronous>, transform_indices = @transform_3, window_bounds = array<i64: 16, 80>}, {pipeline_mode = #tpu.pipeline_mode<synchronous>, transform_indices = @transform_4, window_bounds = array<i64: 12, 12>}, {pipeline_mode = #tpu.pipeline_mode<synchronous>, transform_indices = @transform_5, window_bounds = array<i64: 12, 16>}, {transform_indices = @transform_6, window_bounds = array<i64: 1, 80, 240>}, {transform_indices = @transform_7, window_bounds = array<i64: 1, 1, 240>}, {transform_indices = @transform_8, window_bounds = array<i64: 1, 80, 80>}, {transform_indices = @transform_9, window_bounds = array<i64: 1, 1, 80>}, {transform_indices = @transform_10, window_bounds = array<i64: 1, 80, 80>}, {transform_indices = @transform_11, window_bounds = array<i64: 1, 1, 80>}, {transform_indices = @transform_12, window_bounds = array<i64: 1, 80, 160>}, {transform_indices = @transform_13, window_bounds = array<i64: 1, 1, 160>}, {transform_indices = @transform_14, window_bounds = array<i64: 1, 80, 80>}, {transform_indices = @transform_15, window_bounds = array<i64: 1, 1, 80>}, {transform_indices = @transform_16, window_bounds = array<i64: 1, 80, 2048>}, {transform_indices = @transform_17, window_bounds = array<i64: 1, 1, 2048>}, {transform_indices = @transform_18, window_bounds = array<i64: 1, 2048, 80>}, {transform_indices = @transform_19, window_bounds = array<i64: 1, 1, 80>}, {transform_indices = @transform_20, window_bounds = array<i64: 1, 6, 80>}, {pipeline_mode = #tpu.pipeline_mode<synchronous>, transform_indices = @transform_21, window_bounds = array<i64: 80, 1>}, {pipeline_mode = #tpu.pipeline_mode<synchronous>, transform_indices = @transform_22, window_bounds = array<i64: 1, 1>}, {pipeline_mode = #tpu.pipeline_mode<synchronous>, transform_indices = @transform_23, window_bounds = array<i64: 12, 1>}]} {
    %c0_i32 = arith.constant 0 : i32
    %0 = arith.cmpi eq, %arg0, %c0_i32 : i32
    %1 = arith.extui %0 : i1 to i32
    %c0_i32_0 = arith.constant 0 : i32
    %2 = arith.cmpi ne, %1, %c0_i32_0 : i32
    scf.if %2 {
      %c0_198 = arith.constant 0 : index
      %c0_199 = arith.constant 0 : index
      %549 = vector.load %arg1[%c0_198, %c0_199] : memref<12x3xf32, #tpu.memory_space<vmem>>, vector<12x3xf32>
      %c0_200 = arith.constant 0 : index
      %c0_201 = arith.constant 0 : index
      %550 = vector.load %arg2[%c0_200, %c0_201] : memref<3x80xf32, #tpu.memory_space<vmem>>, vector<3x80xf32>
      %cst_202 = arith.constant dense<0.000000e+00> : vector<12x80xf32>
      %551 = tpu.matmul %549, %550, %cst_202 {dimension_numbers = #tpu.dot_dimension_numbers<[1], [0], [0], [1], [0, 0, 1, 1], [], []>} : vector<12x3xf32>, vector<3x80xf32>, vector<12x80xf32> -> vector<12x80xf32>
      %c0_203 = arith.constant 0 : index
      %c0_204 = arith.constant 0 : index
      %552 = vector.load %arg3[%c0_203, %c0_204] : memref<12x80xf32, #tpu.memory_space<vmem>>, vector<12x80xf32>
      %553 = arith.addf %551, %552 : vector<12x80xf32>
      %c0_205 = arith.constant 0 : index
      %c0_206 = arith.constant 0 : index
      %554 = vector.load %arg25[%c0_205, %c0_206] : memref<12x80xf32, #tpu.memory_space<vmem>>, vector<12x80xf32>
      tpu.vector_store %arg25[%c0_205, %c0_206], %553 {strides = array<i32>} : memref<12x80xf32, #tpu.memory_space<vmem>>, vector<12x80xf32>,
    } else {
    }
    %c0 = arith.constant 0 : index
    %c0_1 = arith.constant 0 : index
    %3 = vector.load %arg25[%c0, %c0_1] : memref<12x80xf32, #tpu.memory_space<vmem>>, vector<12x80xf32>
    %c0_2 = arith.constant 0 : index
    %c0_3 = arith.constant 0 : index
    %4 = vector.load %arg4[%c0_2, %c0_3] : memref<16x80xf32, #tpu.memory_space<vmem>>, vector<16x80xf32>
    %c0_4 = arith.constant 0 : index
    %c0_5 = arith.constant 0 : index
    %c0_6 = arith.constant 0 : index
    %5 = vector.load %arg21[%c0_4, %c0_5, %c0_6] : memref<1x6x80xf32, #tpu.memory_space<vmem>>, vector<1x6x80xf32>
    %6 = vector.shape_cast %5 : vector<1x6x80xf32> to vector<6x80xf32>
    %7 = arith.truncf %3 : vector<12x80xf32> to vector<12x80xbf16>
    %c0_7 = arith.constant 0 : index
    %c0_8 = arith.constant 0 : index
    %c0_9 = arith.constant 0 : index
    %8 = vector.load %arg7[%c0_7, %c0_8, %c0_9] : memref<1x80x240xbf16, #tpu.memory_space<vmem>>, vector<1x80x240xbf16>
    %9 = vector.shape_cast %8 : vector<1x80x240xbf16> to vector<80x240xbf16>
    %cst = arith.constant dense<0.000000e+00> : vector<12x240xf32>
    %10 = tpu.matmul %7, %9, %cst {dimension_numbers = #tpu.dot_dimension_numbers<[1], [0], [0], [1], [0, 0, 1, 1], [], []>} : vector<12x80xbf16>, vector<80x240xbf16>, vector<12x240xf32> -> vector<12x240xf32>
    %c0_10 = arith.constant 0 : index
    %c0_11 = arith.constant 0 : index
    %c0_12 = arith.constant 0 : index
    %11 = vector.load %arg8[%c0_10, %c0_11, %c0_12] : memref<1x1x240xf32, #tpu.memory_space<vmem>>, vector<1x1x240xf32>
    %12 = vector.shape_cast %11 : vector<1x1x240xf32> to vector<1x240xf32>
    %13 = vector.broadcast %12 : vector<1x240xf32> to vector<12x240xf32>
    %14 = arith.addf %10, %13 : vector<12x240xf32>
    %15 = vector.extract_strided_slice %14 {offsets = [0, 0], sizes = [12, 80], strides = [1, 1]} : vector<12x240xf32> to vector<12x80xf32>
    %16 = vector.extract_strided_slice %14 {offsets = [0, 80], sizes = [12, 80], strides = [1, 1]} : vector<12x240xf32> to vector<12x80xf32>
    %17 = vector.extract_strided_slice %14 {offsets = [0, 160], sizes = [12, 80], strides = [1, 1]} : vector<12x240xf32> to vector<12x80xf32>
    %c0_13 = arith.constant 0 : index
    %c0_14 = arith.constant 0 : index
    %c0_15 = arith.constant 0 : index
    %18 = vector.load %arg9[%c0_13, %c0_14, %c0_15] : memref<1x80x80xf32, #tpu.memory_space<vmem>>, vector<1x80x80xf32>
    %19 = vector.shape_cast %18 : vector<1x80x80xf32> to vector<80x80xf32>
    %c0_16 = arith.constant 0 : index
    %c0_17 = arith.constant 0 : index
    %20 = vector.load %arg5[%c0_16, %c0_17] : memref<12x12xf32, #tpu.memory_space<vmem>>, vector<12x12xf32>
    %cst_18 = arith.constant 0.000000e+00 : f32
    %21 = vector.broadcast %cst_18 : f32 to vector<12x80xf32>
    %22 = vector.extract_strided_slice %15 {offsets = [0, 0], sizes = [12, 8], strides = [1, 1]} : vector<12x80xf32> to vector<12x8xf32>
    %23 = vector.extract_strided_slice %16 {offsets = [0, 0], sizes = [12, 8], strides = [1, 1]} : vector<12x80xf32> to vector<12x8xf32>
    %24 = vector.extract_strided_slice %17 {offsets = [0, 0], sizes = [12, 8], strides = [1, 1]} : vector<12x80xf32> to vector<12x8xf32>
    %cst_19 = arith.constant dense<0.000000e+00> : vector<12x12xf32>
    %25 = tpu.matmul %22, %23, %cst_19 {dimension_numbers = #tpu.dot_dimension_numbers<[1], [1], [0], [0], [0, 0, 1, 0], [], []>} : vector<12x8xf32>, vector<12x8xf32>, vector<12x12xf32> -> vector<12x12xf32>
    %cst_20 = arith.constant 0.353553385 : f32
    %26 = vector.broadcast %cst_20 : f32 to vector<12x12xf32>
    %27 = arith.mulf %25, %26 : vector<12x12xf32>
    %28 = arith.addf %27, %20 : vector<12x12xf32>
    %cst_21 = arith.constant dense<0xFF800000> : vector<12xf32>
    %29 = vector.multi_reduction <maximumf>, %28, %cst_21 [1] : vector<12x12xf32> to vector<12xf32>
    %30 = vector.shape_cast %29 : vector<12xf32> to vector<12x1xf32>
    %31 = vector.broadcast %30 : vector<12x1xf32> to vector<12x12xf32>
    %32 = arith.subf %28, %31 : vector<12x12xf32>
    %33 = math.exp %32 : vector<12x12xf32>
    %cst_22 = arith.constant dense<0.000000e+00> : vector<12xf32>
    %34 = vector.multi_reduction <add>, %33, %cst_22 [1] : vector<12x12xf32> to vector<12xf32>
    %35 = vector.shape_cast %34 : vector<12xf32> to vector<12x1xf32>
    %36 = vector.broadcast %35 : vector<12x1xf32> to vector<12x12xf32>
    %37 = arith.divf %33, %36 : vector<12x12xf32>
    %cst_23 = arith.constant dense<0.000000e+00> : vector<12x8xf32>
    %38 = tpu.matmul %37, %24, %cst_23 {dimension_numbers = #tpu.dot_dimension_numbers<[1], [0], [0], [1], [0, 0, 1, 1], [], []>} : vector<12x12xf32>, vector<12x8xf32>, vector<12x8xf32> -> vector<12x8xf32>
    %39 = vector.extract_strided_slice %19 {offsets = [0, 0], sizes = [8, 80], strides = [1, 1]} : vector<80x80xf32> to vector<8x80xf32>
    %cst_24 = arith.constant dense<0.000000e+00> : vector<12x80xf32>
    %40 = tpu.matmul %38, %39, %cst_24 {dimension_numbers = #tpu.dot_dimension_numbers<[1], [0], [0], [1], [0, 0, 1, 1], [], []>} : vector<12x8xf32>, vector<8x80xf32>, vector<12x80xf32> -> vector<12x80xf32>
    %41 = arith.addf %21, %40 : vector<12x80xf32>
    %42 = vector.extract_strided_slice %15 {offsets = [0, 8], sizes = [12, 8], strides = [1, 1]} : vector<12x80xf32> to vector<12x8xf32>
    %43 = vector.extract_strided_slice %16 {offsets = [0, 8], sizes = [12, 8], strides = [1, 1]} : vector<12x80xf32> to vector<12x8xf32>
    %44 = vector.extract_strided_slice %17 {offsets = [0, 8], sizes = [12, 8], strides = [1, 1]} : vector<12x80xf32> to vector<12x8xf32>
    %cst_25 = arith.constant dense<0.000000e+00> : vector<12x12xf32>
    %45 = tpu.matmul %42, %43, %cst_25 {dimension_numbers = #tpu.dot_dimension_numbers<[1], [1], [0], [0], [0, 0, 1, 0], [], []>} : vector<12x8xf32>, vector<12x8xf32>, vector<12x12xf32> -> vector<12x12xf32>
    %cst_26 = arith.constant 0.353553385 : f32
    %46 = vector.broadcast %cst_26 : f32 to vector<12x12xf32>
    %47 = arith.mulf %45, %46 : vector<12x12xf32>
    %48 = arith.addf %47, %20 : vector<12x12xf32>
    %cst_27 = arith.constant dense<0xFF800000> : vector<12xf32>
    %49 = vector.multi_reduction <maximumf>, %48, %cst_27 [1] : vector<12x12xf32> to vector<12xf32>
    %50 = vector.shape_cast %49 : vector<12xf32> to vector<12x1xf32>
    %51 = vector.broadcast %50 : vector<12x1xf32> to vector<12x12xf32>
    %52 = arith.subf %48, %51 : vector<12x12xf32>
    %53 = math.exp %52 : vector<12x12xf32>
    %cst_28 = arith.constant dense<0.000000e+00> : vector<12xf32>
    %54 = vector.multi_reduction <add>, %53, %cst_28 [1] : vector<12x12xf32> to vector<12xf32>
    %55 = vector.shape_cast %54 : vector<12xf32> to vector<12x1xf32>
    %56 = vector.broadcast %55 : vector<12x1xf32> to vector<12x12xf32>
    %57 = arith.divf %53, %56 : vector<12x12xf32>
    %cst_29 = arith.constant dense<0.000000e+00> : vector<12x8xf32>
    %58 = tpu.matmul %57, %44, %cst_29 {dimension_numbers = #tpu.dot_dimension_numbers<[1], [0], [0], [1], [0, 0, 1, 1], [], []>} : vector<12x12xf32>, vector<12x8xf32>, vector<12x8xf32> -> vector<12x8xf32>
    %59 = vector.extract_strided_slice %19 {offsets = [8, 0], sizes = [8, 80], strides = [1, 1]} : vector<80x80xf32> to vector<8x80xf32>
    %cst_30 = arith.constant dense<0.000000e+00> : vector<12x80xf32>
    %60 = tpu.matmul %58, %59, %cst_30 {dimension_numbers = #tpu.dot_dimension_numbers<[1], [0], [0], [1], [0, 0, 1, 1], [], []>} : vector<12x8xf32>, vector<8x80xf32>, vector<12x80xf32> -> vector<12x80xf32>
    %61 = arith.addf %41, %60 : vector<12x80xf32>
    %62 = vector.extract_strided_slice %15 {offsets = [0, 16], sizes = [12, 8], strides = [1, 1]} : vector<12x80xf32> to vector<12x8xf32>
    %63 = vector.extract_strided_slice %16 {offsets = [0, 16], sizes = [12, 8], strides = [1, 1]} : vector<12x80xf32> to vector<12x8xf32>
    %64 = vector.extract_strided_slice %17 {offsets = [0, 16], sizes = [12, 8], strides = [1, 1]} : vector<12x80xf32> to vector<12x8xf32>
    %cst_31 = arith.constant dense<0.000000e+00> : vector<12x12xf32>
    %65 = tpu.matmul %62, %63, %cst_31 {dimension_numbers = #tpu.dot_dimension_numbers<[1], [1], [0], [0], [0, 0, 1, 0], [], []>} : vector<12x8xf32>, vector<12x8xf32>, vector<12x12xf32> -> vector<12x12xf32>
    %cst_32 = arith.constant 0.353553385 : f32
    %66 = vector.broadcast %cst_32 : f32 to vector<12x12xf32>
    %67 = arith.mulf %65, %66 : vector<12x12xf32>
    %68 = arith.addf %67, %20 : vector<12x12xf32>
    %cst_33 = arith.constant dense<0xFF800000> : vector<12xf32>
    %69 = vector.multi_reduction <maximumf>, %68, %cst_33 [1] : vector<12x12xf32> to vector<12xf32>
    %70 = vector.shape_cast %69 : vector<12xf32> to vector<12x1xf32>
    %71 = vector.broadcast %70 : vector<12x1xf32> to vector<12x12xf32>
    %72 = arith.subf %68, %71 : vector<12x12xf32>
    %73 = math.exp %72 : vector<12x12xf32>
    %cst_34 = arith.constant dense<0.000000e+00> : vector<12xf32>
    %74 = vector.multi_reduction <add>, %73, %cst_34 [1] : vector<12x12xf32> to vector<12xf32>
    %75 = vector.shape_cast %74 : vector<12xf32> to vector<12x1xf32>
    %76 = vector.broadcast %75 : vector<12x1xf32> to vector<12x12xf32>
    %77 = arith.divf %73, %76 : vector<12x12xf32>
    %cst_35 = arith.constant dense<0.000000e+00> : vector<12x8xf32>
    %78 = tpu.matmul %77, %64, %cst_35 {dimension_numbers = #tpu.dot_dimension_numbers<[1], [0], [0], [1], [0, 0, 1, 1], [], []>} : vector<12x12xf32>, vector<12x8xf32>, vector<12x8xf32> -> vector<12x8xf32>
    %79 = vector.extract_strided_slice %19 {offsets = [16, 0], sizes = [8, 80], strides = [1, 1]} : vector<80x80xf32> to vector<8x80xf32>
    %cst_36 = arith.constant dense<0.000000e+00> : vector<12x80xf32>
    %80 = tpu.matmul %78, %79, %cst_36 {dimension_numbers = #tpu.dot_dimension_numbers<[1], [0], [0], [1], [0, 0, 1, 1], [], []>} : vector<12x8xf32>, vector<8x80xf32>, vector<12x80xf32> -> vector<12x80xf32>
    %81 = arith.addf %61, %80 : vector<12x80xf32>
    %82 = vector.extract_strided_slice %15 {offsets = [0, 24], sizes = [12, 8], strides = [1, 1]} : vector<12x80xf32> to vector<12x8xf32>
    %83 = vector.extract_strided_slice %16 {offsets = [0, 24], sizes = [12, 8], strides = [1, 1]} : vector<12x80xf32> to vector<12x8xf32>
    %84 = vector.extract_strided_slice %17 {offsets = [0, 24], sizes = [12, 8], strides = [1, 1]} : vector<12x80xf32> to vector<12x8xf32>
    %cst_37 = arith.constant dense<0.000000e+00> : vector<12x12xf32>
    %85 = tpu.matmul %82, %83, %cst_37 {dimension_numbers = #tpu.dot_dimension_numbers<[1], [1], [0], [0], [0, 0, 1, 0], [], []>} : vector<12x8xf32>, vector<12x8xf32>, vector<12x12xf32> -> vector<12x12xf32>
    %cst_38 = arith.constant 0.353553385 : f32
    %86 = vector.broadcast %cst_38 : f32 to vector<12x12xf32>
    %87 = arith.mulf %85, %86 : vector<12x12xf32>
    %88 = arith.addf %87, %20 : vector<12x12xf32>
    %cst_39 = arith.constant dense<0xFF800000> : vector<12xf32>
    %89 = vector.multi_reduction <maximumf>, %88, %cst_39 [1] : vector<12x12xf32> to vector<12xf32>
    %90 = vector.shape_cast %89 : vector<12xf32> to vector<12x1xf32>
    %91 = vector.broadcast %90 : vector<12x1xf32> to vector<12x12xf32>
    %92 = arith.subf %88, %91 : vector<12x12xf32>
    %93 = math.exp %92 : vector<12x12xf32>
    %cst_40 = arith.constant dense<0.000000e+00> : vector<12xf32>
    %94 = vector.multi_reduction <add>, %93, %cst_40 [1] : vector<12x12xf32> to vector<12xf32>
    %95 = vector.shape_cast %94 : vector<12xf32> to vector<12x1xf32>
    %96 = vector.broadcast %95 : vector<12x1xf32> to vector<12x12xf32>
    %97 = arith.divf %93, %96 : vector<12x12xf32>
    %cst_41 = arith.constant dense<0.000000e+00> : vector<12x8xf32>
    %98 = tpu.matmul %97, %84, %cst_41 {dimension_numbers = #tpu.dot_dimension_numbers<[1], [0], [0], [1], [0, 0, 1, 1], [], []>} : vector<12x12xf32>, vector<12x8xf32>, vector<12x8xf32> -> vector<12x8xf32>
    %99 = vector.extract_strided_slice %19 {offsets = [24, 0], sizes = [8, 80], strides = [1, 1]} : vector<80x80xf32> to vector<8x80xf32>
    %cst_42 = arith.constant dense<0.000000e+00> : vector<12x80xf32>
    %100 = tpu.matmul %98, %99, %cst_42 {dimension_numbers = #tpu.dot_dimension_numbers<[1], [0], [0], [1], [0, 0, 1, 1], [], []>} : vector<12x8xf32>, vector<8x80xf32>, vector<12x80xf32> -> vector<12x80xf32>
    %101 = arith.addf %81, %100 : vector<12x80xf32>
    %102 = vector.extract_strided_slice %15 {offsets = [0, 32], sizes = [12, 8], strides = [1, 1]} : vector<12x80xf32> to vector<12x8xf32>
    %103 = vector.extract_strided_slice %16 {offsets = [0, 32], sizes = [12, 8], strides = [1, 1]} : vector<12x80xf32> to vector<12x8xf32>
    %104 = vector.extract_strided_slice %17 {offsets = [0, 32], sizes = [12, 8], strides = [1, 1]} : vector<12x80xf32> to vector<12x8xf32>
    %cst_43 = arith.constant dense<0.000000e+00> : vector<12x12xf32>
    %105 = tpu.matmul %102, %103, %cst_43 {dimension_numbers = #tpu.dot_dimension_numbers<[1], [1], [0], [0], [0, 0, 1, 0], [], []>} : vector<12x8xf32>, vector<12x8xf32>, vector<12x12xf32> -> vector<12x12xf32>
    %cst_44 = arith.constant 0.353553385 : f32
    %106 = vector.broadcast %cst_44 : f32 to vector<12x12xf32>
    %107 = arith.mulf %105, %106 : vector<12x12xf32>
    %108 = arith.addf %107, %20 : vector<12x12xf32>
    %cst_45 = arith.constant dense<0xFF800000> : vector<12xf32>
    %109 = vector.multi_reduction <maximumf>, %108, %cst_45 [1] : vector<12x12xf32> to vector<12xf32>
    %110 = vector.shape_cast %109 : vector<12xf32> to vector<12x1xf32>
    %111 = vector.broadcast %110 : vector<12x1xf32> to vector<12x12xf32>
    %112 = arith.subf %108, %111 : vector<12x12xf32>
    %113 = math.exp %112 : vector<12x12xf32>
    %cst_46 = arith.constant dense<0.000000e+00> : vector<12xf32>
    %114 = vector.multi_reduction <add>, %113, %cst_46 [1] : vector<12x12xf32> to vector<12xf32>
    %115 = vector.shape_cast %114 : vector<12xf32> to vector<12x1xf32>
    %116 = vector.broadcast %115 : vector<12x1xf32> to vector<12x12xf32>
    %117 = arith.divf %113, %116 : vector<12x12xf32>
    %cst_47 = arith.constant dense<0.000000e+00> : vector<12x8xf32>
    %118 = tpu.matmul %117, %104, %cst_47 {dimension_numbers = #tpu.dot_dimension_numbers<[1], [0], [0], [1], [0, 0, 1, 1], [], []>} : vector<12x12xf32>, vector<12x8xf32>, vector<12x8xf32> -> vector<12x8xf32>
    %119 = vector.extract_strided_slice %19 {offsets = [32, 0], sizes = [8, 80], strides = [1, 1]} : vector<80x80xf32> to vector<8x80xf32>
    %cst_48 = arith.constant dense<0.000000e+00> : vector<12x80xf32>
    %120 = tpu.matmul %118, %119, %cst_48 {dimension_numbers = #tpu.dot_dimension_numbers<[1], [0], [0], [1], [0, 0, 1, 1], [], []>} : vector<12x8xf32>, vector<8x80xf32>, vector<12x80xf32> -> vector<12x80xf32>
    %121 = arith.addf %101, %120 : vector<12x80xf32>
    %122 = vector.extract_strided_slice %15 {offsets = [0, 40], sizes = [12, 8], strides = [1, 1]} : vector<12x80xf32> to vector<12x8xf32>
    %123 = vector.extract_strided_slice %16 {offsets = [0, 40], sizes = [12, 8], strides = [1, 1]} : vector<12x80xf32> to vector<12x8xf32>
    %124 = vector.extract_strided_slice %17 {offsets = [0, 40], sizes = [12, 8], strides = [1, 1]} : vector<12x80xf32> to vector<12x8xf32>
    %cst_49 = arith.constant dense<0.000000e+00> : vector<12x12xf32>
    %125 = tpu.matmul %122, %123, %cst_49 {dimension_numbers = #tpu.dot_dimension_numbers<[1], [1], [0], [0], [0, 0, 1, 0], [], []>} : vector<12x8xf32>, vector<12x8xf32>, vector<12x12xf32> -> vector<12x12xf32>
    %cst_50 = arith.constant 0.353553385 : f32
    %126 = vector.broadcast %cst_50 : f32 to vector<12x12xf32>
    %127 = arith.mulf %125, %126 : vector<12x12xf32>
    %128 = arith.addf %127, %20 : vector<12x12xf32>
    %cst_51 = arith.constant dense<0xFF800000> : vector<12xf32>
    %129 = vector.multi_reduction <maximumf>, %128, %cst_51 [1] : vector<12x12xf32> to vector<12xf32>
    %130 = vector.shape_cast %129 : vector<12xf32> to vector<12x1xf32>
    %131 = vector.broadcast %130 : vector<12x1xf32> to vector<12x12xf32>
    %132 = arith.subf %128, %131 : vector<12x12xf32>
    %133 = math.exp %132 : vector<12x12xf32>
    %cst_52 = arith.constant dense<0.000000e+00> : vector<12xf32>
    %134 = vector.multi_reduction <add>, %133, %cst_52 [1] : vector<12x12xf32> to vector<12xf32>
    %135 = vector.shape_cast %134 : vector<12xf32> to vector<12x1xf32>
    %136 = vector.broadcast %135 : vector<12x1xf32> to vector<12x12xf32>
    %137 = arith.divf %133, %136 : vector<12x12xf32>
    %cst_53 = arith.constant dense<0.000000e+00> : vector<12x8xf32>
    %138 = tpu.matmul %137, %124, %cst_53 {dimension_numbers = #tpu.dot_dimension_numbers<[1], [0], [0], [1], [0, 0, 1, 1], [], []>} : vector<12x12xf32>, vector<12x8xf32>, vector<12x8xf32> -> vector<12x8xf32>
    %139 = vector.extract_strided_slice %19 {offsets = [40, 0], sizes = [8, 80], strides = [1, 1]} : vector<80x80xf32> to vector<8x80xf32>
    %cst_54 = arith.constant dense<0.000000e+00> : vector<12x80xf32>
    %140 = tpu.matmul %138, %139, %cst_54 {dimension_numbers = #tpu.dot_dimension_numbers<[1], [0], [0], [1], [0, 0, 1, 1], [], []>} : vector<12x8xf32>, vector<8x80xf32>, vector<12x80xf32> -> vector<12x80xf32>
    %141 = arith.addf %121, %140 : vector<12x80xf32>
    %142 = vector.extract_strided_slice %15 {offsets = [0, 48], sizes = [12, 8], strides = [1, 1]} : vector<12x80xf32> to vector<12x8xf32>
    %143 = vector.extract_strided_slice %16 {offsets = [0, 48], sizes = [12, 8], strides = [1, 1]} : vector<12x80xf32> to vector<12x8xf32>
    %144 = vector.extract_strided_slice %17 {offsets = [0, 48], sizes = [12, 8], strides = [1, 1]} : vector<12x80xf32> to vector<12x8xf32>
    %cst_55 = arith.constant dense<0.000000e+00> : vector<12x12xf32>
    %145 = tpu.matmul %142, %143, %cst_55 {dimension_numbers = #tpu.dot_dimension_numbers<[1], [1], [0], [0], [0, 0, 1, 0], [], []>} : vector<12x8xf32>, vector<12x8xf32>, vector<12x12xf32> -> vector<12x12xf32>
    %cst_56 = arith.constant 0.353553385 : f32
    %146 = vector.broadcast %cst_56 : f32 to vector<12x12xf32>
    %147 = arith.mulf %145, %146 : vector<12x12xf32>
    %148 = arith.addf %147, %20 : vector<12x12xf32>
    %cst_57 = arith.constant dense<0xFF800000> : vector<12xf32>
    %149 = vector.multi_reduction <maximumf>, %148, %cst_57 [1] : vector<12x12xf32> to vector<12xf32>
    %150 = vector.shape_cast %149 : vector<12xf32> to vector<12x1xf32>
    %151 = vector.broadcast %150 : vector<12x1xf32> to vector<12x12xf32>
    %152 = arith.subf %148, %151 : vector<12x12xf32>
    %153 = math.exp %152 : vector<12x12xf32>
    %cst_58 = arith.constant dense<0.000000e+00> : vector<12xf32>
    %154 = vector.multi_reduction <add>, %153, %cst_58 [1] : vector<12x12xf32> to vector<12xf32>
    %155 = vector.shape_cast %154 : vector<12xf32> to vector<12x1xf32>
    %156 = vector.broadcast %155 : vector<12x1xf32> to vector<12x12xf32>
    %157 = arith.divf %153, %156 : vector<12x12xf32>
    %cst_59 = arith.constant dense<0.000000e+00> : vector<12x8xf32>
    %158 = tpu.matmul %157, %144, %cst_59 {dimension_numbers = #tpu.dot_dimension_numbers<[1], [0], [0], [1], [0, 0, 1, 1], [], []>} : vector<12x12xf32>, vector<12x8xf32>, vector<12x8xf32> -> vector<12x8xf32>
    %159 = vector.extract_strided_slice %19 {offsets = [48, 0], sizes = [8, 80], strides = [1, 1]} : vector<80x80xf32> to vector<8x80xf32>
    %cst_60 = arith.constant dense<0.000000e+00> : vector<12x80xf32>
    %160 = tpu.matmul %158, %159, %cst_60 {dimension_numbers = #tpu.dot_dimension_numbers<[1], [0], [0], [1], [0, 0, 1, 1], [], []>} : vector<12x8xf32>, vector<8x80xf32>, vector<12x80xf32> -> vector<12x80xf32>
    %161 = arith.addf %141, %160 : vector<12x80xf32>
    %162 = vector.extract_strided_slice %15 {offsets = [0, 56], sizes = [12, 8], strides = [1, 1]} : vector<12x80xf32> to vector<12x8xf32>
    %163 = vector.extract_strided_slice %16 {offsets = [0, 56], sizes = [12, 8], strides = [1, 1]} : vector<12x80xf32> to vector<12x8xf32>
    %164 = vector.extract_strided_slice %17 {offsets = [0, 56], sizes = [12, 8], strides = [1, 1]} : vector<12x80xf32> to vector<12x8xf32>
    %cst_61 = arith.constant dense<0.000000e+00> : vector<12x12xf32>
    %165 = tpu.matmul %162, %163, %cst_61 {dimension_numbers = #tpu.dot_dimension_numbers<[1], [1], [0], [0], [0, 0, 1, 0], [], []>} : vector<12x8xf32>, vector<12x8xf32>, vector<12x12xf32> -> vector<12x12xf32>
    %cst_62 = arith.constant 0.353553385 : f32
    %166 = vector.broadcast %cst_62 : f32 to vector<12x12xf32>
    %167 = arith.mulf %165, %166 : vector<12x12xf32>
    %168 = arith.addf %167, %20 : vector<12x12xf32>
    %cst_63 = arith.constant dense<0xFF800000> : vector<12xf32>
    %169 = vector.multi_reduction <maximumf>, %168, %cst_63 [1] : vector<12x12xf32> to vector<12xf32>
    %170 = vector.shape_cast %169 : vector<12xf32> to vector<12x1xf32>
    %171 = vector.broadcast %170 : vector<12x1xf32> to vector<12x12xf32>
    %172 = arith.subf %168, %171 : vector<12x12xf32>
    %173 = math.exp %172 : vector<12x12xf32>
    %cst_64 = arith.constant dense<0.000000e+00> : vector<12xf32>
    %174 = vector.multi_reduction <add>, %173, %cst_64 [1] : vector<12x12xf32> to vector<12xf32>
    %175 = vector.shape_cast %174 : vector<12xf32> to vector<12x1xf32>
    %176 = vector.broadcast %175 : vector<12x1xf32> to vector<12x12xf32>
    %177 = arith.divf %173, %176 : vector<12x12xf32>
    %cst_65 = arith.constant dense<0.000000e+00> : vector<12x8xf32>
    %178 = tpu.matmul %177, %164, %cst_65 {dimension_numbers = #tpu.dot_dimension_numbers<[1], [0], [0], [1], [0, 0, 1, 1], [], []>} : vector<12x12xf32>, vector<12x8xf32>, vector<12x8xf32> -> vector<12x8xf32>
    %179 = vector.extract_strided_slice %19 {offsets = [56, 0], sizes = [8, 80], strides = [1, 1]} : vector<80x80xf32> to vector<8x80xf32>
    %cst_66 = arith.constant dense<0.000000e+00> : vector<12x80xf32>
    %180 = tpu.matmul %178, %179, %cst_66 {dimension_numbers = #tpu.dot_dimension_numbers<[1], [0], [0], [1], [0, 0, 1, 1], [], []>} : vector<12x8xf32>, vector<8x80xf32>, vector<12x80xf32> -> vector<12x80xf32>
    %181 = arith.addf %161, %180 : vector<12x80xf32>
    %182 = vector.extract_strided_slice %15 {offsets = [0, 64], sizes = [12, 8], strides = [1, 1]} : vector<12x80xf32> to vector<12x8xf32>
    %183 = vector.extract_strided_slice %16 {offsets = [0, 64], sizes = [12, 8], strides = [1, 1]} : vector<12x80xf32> to vector<12x8xf32>
    %184 = vector.extract_strided_slice %17 {offsets = [0, 64], sizes = [12, 8], strides = [1, 1]} : vector<12x80xf32> to vector<12x8xf32>
    %cst_67 = arith.constant dense<0.000000e+00> : vector<12x12xf32>
    %185 = tpu.matmul %182, %183, %cst_67 {dimension_numbers = #tpu.dot_dimension_numbers<[1], [1], [0], [0], [0, 0, 1, 0], [], []>} : vector<12x8xf32>, vector<12x8xf32>, vector<12x12xf32> -> vector<12x12xf32>
    %cst_68 = arith.constant 0.353553385 : f32
    %186 = vector.broadcast %cst_68 : f32 to vector<12x12xf32>
    %187 = arith.mulf %185, %186 : vector<12x12xf32>
    %188 = arith.addf %187, %20 : vector<12x12xf32>
    %cst_69 = arith.constant dense<0xFF800000> : vector<12xf32>
    %189 = vector.multi_reduction <maximumf>, %188, %cst_69 [1] : vector<12x12xf32> to vector<12xf32>
    %190 = vector.shape_cast %189 : vector<12xf32> to vector<12x1xf32>
    %191 = vector.broadcast %190 : vector<12x1xf32> to vector<12x12xf32>
    %192 = arith.subf %188, %191 : vector<12x12xf32>
    %193 = math.exp %192 : vector<12x12xf32>
    %cst_70 = arith.constant dense<0.000000e+00> : vector<12xf32>
    %194 = vector.multi_reduction <add>, %193, %cst_70 [1] : vector<12x12xf32> to vector<12xf32>
    %195 = vector.shape_cast %194 : vector<12xf32> to vector<12x1xf32>
    %196 = vector.broadcast %195 : vector<12x1xf32> to vector<12x12xf32>
    %197 = arith.divf %193, %196 : vector<12x12xf32>
    %cst_71 = arith.constant dense<0.000000e+00> : vector<12x8xf32>
    %198 = tpu.matmul %197, %184, %cst_71 {dimension_numbers = #tpu.dot_dimension_numbers<[1], [0], [0], [1], [0, 0, 1, 1], [], []>} : vector<12x12xf32>, vector<12x8xf32>, vector<12x8xf32> -> vector<12x8xf32>
    %199 = vector.extract_strided_slice %19 {offsets = [64, 0], sizes = [8, 80], strides = [1, 1]} : vector<80x80xf32> to vector<8x80xf32>
    %cst_72 = arith.constant dense<0.000000e+00> : vector<12x80xf32>
    %200 = tpu.matmul %198, %199, %cst_72 {dimension_numbers = #tpu.dot_dimension_numbers<[1], [0], [0], [1], [0, 0, 1, 1], [], []>} : vector<12x8xf32>, vector<8x80xf32>, vector<12x80xf32> -> vector<12x80xf32>
    %201 = arith.addf %181, %200 : vector<12x80xf32>
    %202 = vector.extract_strided_slice %15 {offsets = [0, 72], sizes = [12, 8], strides = [1, 1]} : vector<12x80xf32> to vector<12x8xf32>
    %203 = vector.extract_strided_slice %16 {offsets = [0, 72], sizes = [12, 8], strides = [1, 1]} : vector<12x80xf32> to vector<12x8xf32>
    %204 = vector.extract_strided_slice %17 {offsets = [0, 72], sizes = [12, 8], strides = [1, 1]} : vector<12x80xf32> to vector<12x8xf32>
    %cst_73 = arith.constant dense<0.000000e+00> : vector<12x12xf32>
    %205 = tpu.matmul %202, %203, %cst_73 {dimension_numbers = #tpu.dot_dimension_numbers<[1], [1], [0], [0], [0, 0, 1, 0], [], []>} : vector<12x8xf32>, vector<12x8xf32>, vector<12x12xf32> -> vector<12x12xf32>
    %cst_74 = arith.constant 0.353553385 : f32
    %206 = vector.broadcast %cst_74 : f32 to vector<12x12xf32>
    %207 = arith.mulf %205, %206 : vector<12x12xf32>
    %208 = arith.addf %207, %20 : vector<12x12xf32>
    %cst_75 = arith.constant dense<0xFF800000> : vector<12xf32>
    %209 = vector.multi_reduction <maximumf>, %208, %cst_75 [1] : vector<12x12xf32> to vector<12xf32>
    %210 = vector.shape_cast %209 : vector<12xf32> to vector<12x1xf32>
    %211 = vector.broadcast %210 : vector<12x1xf32> to vector<12x12xf32>
    %212 = arith.subf %208, %211 : vector<12x12xf32>
    %213 = math.exp %212 : vector<12x12xf32>
    %cst_76 = arith.constant dense<0.000000e+00> : vector<12xf32>
    %214 = vector.multi_reduction <add>, %213, %cst_76 [1] : vector<12x12xf32> to vector<12xf32>
    %215 = vector.shape_cast %214 : vector<12xf32> to vector<12x1xf32>
    %216 = vector.broadcast %215 : vector<12x1xf32> to vector<12x12xf32>
    %217 = arith.divf %213, %216 : vector<12x12xf32>
    %cst_77 = arith.constant dense<0.000000e+00> : vector<12x8xf32>
    %218 = tpu.matmul %217, %204, %cst_77 {dimension_numbers = #tpu.dot_dimension_numbers<[1], [0], [0], [1], [0, 0, 1, 1], [], []>} : vector<12x12xf32>, vector<12x8xf32>, vector<12x8xf32> -> vector<12x8xf32>
    %219 = vector.extract_strided_slice %19 {offsets = [72, 0], sizes = [8, 80], strides = [1, 1]} : vector<80x80xf32> to vector<8x80xf32>
    %cst_78 = arith.constant dense<0.000000e+00> : vector<12x80xf32>
    %220 = tpu.matmul %218, %219, %cst_78 {dimension_numbers = #tpu.dot_dimension_numbers<[1], [0], [0], [1], [0, 0, 1, 1], [], []>} : vector<12x8xf32>, vector<8x80xf32>, vector<12x80xf32> -> vector<12x80xf32>
    %221 = arith.addf %201, %220 : vector<12x80xf32>
    %c0_79 = arith.constant 0 : index
    %c0_80 = arith.constant 0 : index
    %c0_81 = arith.constant 0 : index
    %222 = vector.load %arg10[%c0_79, %c0_80, %c0_81] : memref<1x1x80xf32, #tpu.memory_space<vmem>>, vector<1x1x80xf32>
    %223 = vector.shape_cast %222 : vector<1x1x80xf32> to vector<1x80xf32>
    %224 = vector.broadcast %223 : vector<1x80xf32> to vector<12x80xf32>
    %225 = arith.addf %221, %224 : vector<12x80xf32>
    %226 = arith.addf %3, %225 : vector<12x80xf32>
    %227 = vector.extract_strided_slice %6 {offsets = [0, 0], sizes = [1, 80], strides = [1, 1]} : vector<6x80xf32> to vector<1x80xf32>
    %228 = vector.extract_strided_slice %6 {offsets = [1, 0], sizes = [1, 80], strides = [1, 1]} : vector<6x80xf32> to vector<1x80xf32>
    %cst_82 = arith.constant dense<0.000000e+00> : vector<12xf32>
    %229 = vector.multi_reduction <add>, %226, %cst_82 [1] : vector<12x80xf32> to vector<12xf32>
    %230 = vector.shape_cast %229 : vector<12xf32> to vector<12x1xf32>
    %cst_83 = arith.constant 8.000000e+01 : f32
    %231 = vector.broadcast %cst_83 : f32 to vector<12x1xf32>
    %232 = arith.divf %230, %231 : vector<12x1xf32>
    %233 = vector.broadcast %232 : vector<12x1xf32> to vector<12x80xf32>
    %234 = arith.subf %226, %233 : vector<12x80xf32>
    %235 = arith.mulf %234, %234 : vector<12x80xf32>
    %cst_84 = arith.constant dense<0.000000e+00> : vector<12xf32>
    %236 = vector.multi_reduction <add>, %235, %cst_84 [1] : vector<12x80xf32> to vector<12xf32>
    %237 = vector.shape_cast %236 : vector<12xf32> to vector<12x1xf32>
    %cst_85 = arith.constant 8.000000e+01 : f32
    %238 = vector.broadcast %cst_85 : f32 to vector<12x1xf32>
    %239 = arith.divf %237, %238 : vector<12x1xf32>
    %240 = vector.broadcast %232 : vector<12x1xf32> to vector<12x80xf32>
    %241 = arith.subf %226, %240 : vector<12x80xf32>
    %cst_86 = arith.constant 9.99999974E-6 : f32
    %242 = vector.broadcast %cst_86 : f32 to vector<12x1xf32>
    %243 = arith.addf %239, %242 : vector<12x1xf32>
    %244 = math.rsqrt %243 : vector<12x1xf32>
    %245 = vector.broadcast %244 : vector<12x1xf32> to vector<12x80xf32>
    %246 = arith.mulf %241, %245 : vector<12x80xf32>
    %247 = vector.broadcast %227 : vector<1x80xf32> to vector<12x80xf32>
    %248 = arith.mulf %246, %247 : vector<12x80xf32>
    %249 = vector.broadcast %228 : vector<1x80xf32> to vector<12x80xf32>
    %250 = arith.addf %248, %249 : vector<12x80xf32>
    %251 = arith.truncf %250 : vector<12x80xf32> to vector<12x80xbf16>
    %c0_87 = arith.constant 0 : index
    %c0_88 = arith.constant 0 : index
    %c0_89 = arith.constant 0 : index
    %252 = vector.load %arg11[%c0_87, %c0_88, %c0_89] : memref<1x80x80xbf16, #tpu.memory_space<vmem>>, vector<1x80x80xbf16>
    %253 = vector.shape_cast %252 : vector<1x80x80xbf16> to vector<80x80xbf16>
    %cst_90 = arith.constant dense<0.000000e+00> : vector<12x80xf32>
    %254 = tpu.matmul %251, %253, %cst_90 {dimension_numbers = #tpu.dot_dimension_numbers<[1], [0], [0], [1], [0, 0, 1, 1], [], []>} : vector<12x80xbf16>, vector<80x80xbf16>, vector<12x80xf32> -> vector<12x80xf32>
    %c0_91 = arith.constant 0 : index
    %c0_92 = arith.constant 0 : index
    %c0_93 = arith.constant 0 : index
    %255 = vector.load %arg12[%c0_91, %c0_92, %c0_93] : memref<1x1x80xf32, #tpu.memory_space<vmem>>, vector<1x1x80xf32>
    %256 = vector.shape_cast %255 : vector<1x1x80xf32> to vector<1x80xf32>
    %257 = vector.broadcast %256 : vector<1x80xf32> to vector<12x80xf32>
    %258 = arith.addf %254, %257 : vector<12x80xf32>
    %259 = arith.truncf %4 : vector<16x80xf32> to vector<16x80xbf16>
    %c0_94 = arith.constant 0 : index
    %c0_95 = arith.constant 0 : index
    %c0_96 = arith.constant 0 : index
    %260 = vector.load %arg13[%c0_94, %c0_95, %c0_96] : memref<1x80x160xbf16, #tpu.memory_space<vmem>>, vector<1x80x160xbf16>
    %261 = vector.shape_cast %260 : vector<1x80x160xbf16> to vector<80x160xbf16>
    %cst_97 = arith.constant dense<0.000000e+00> : vector<16x160xf32>
    %262 = tpu.matmul %259, %261, %cst_97 {dimension_numbers = #tpu.dot_dimension_numbers<[1], [0], [0], [1], [0, 0, 1, 1], [], []>} : vector<16x80xbf16>, vector<80x160xbf16>, vector<16x160xf32> -> vector<16x160xf32>
    %c0_98 = arith.constant 0 : index
    %c0_99 = arith.constant 0 : index
    %c0_100 = arith.constant 0 : index
    %263 = vector.load %arg14[%c0_98, %c0_99, %c0_100] : memref<1x1x160xf32, #tpu.memory_space<vmem>>, vector<1x1x160xf32>
    %264 = vector.shape_cast %263 : vector<1x1x160xf32> to vector<1x160xf32>
    %265 = vector.broadcast %264 : vector<1x160xf32> to vector<16x160xf32>
    %266 = arith.addf %262, %265 : vector<16x160xf32>
    %267 = vector.extract_strided_slice %266 {offsets = [0, 0], sizes = [16, 80], strides = [1, 1]} : vector<16x160xf32> to vector<16x80xf32>
    %268 = vector.extract_strided_slice %266 {offsets = [0, 80], sizes = [16, 80], strides = [1, 1]} : vector<16x160xf32> to vector<16x80xf32>
    %c0_101 = arith.constant 0 : index
    %c0_102 = arith.constant 0 : index
    %c0_103 = arith.constant 0 : index
    %269 = vector.load %arg15[%c0_101, %c0_102, %c0_103] : memref<1x80x80xf32, #tpu.memory_space<vmem>>, vector<1x80x80xf32>
    %270 = vector.shape_cast %269 : vector<1x80x80xf32> to vector<80x80xf32>
    %c0_104 = arith.constant 0 : index
    %c0_105 = arith.constant 0 : index
    %271 = vector.load %arg6[%c0_104, %c0_105] : memref<12x16xf32, #tpu.memory_space<vmem>>, vector<12x16xf32>
    %cst_106 = arith.constant 0.000000e+00 : f32
    %272 = vector.broadcast %cst_106 : f32 to vector<12x80xf32>
    %273 = vector.extract_strided_slice %258 {offsets = [0, 0], sizes = [12, 8], strides = [1, 1]} : vector<12x80xf32> to vector<12x8xf32>
    %274 = vector.extract_strided_slice %267 {offsets = [0, 0], sizes = [16, 8], strides = [1, 1]} : vector<16x80xf32> to vector<16x8xf32>
    %275 = vector.extract_strided_slice %268 {offsets = [0, 0], sizes = [16, 8], strides = [1, 1]} : vector<16x80xf32> to vector<16x8xf32>
    %cst_107 = arith.constant dense<0.000000e+00> : vector<12x16xf32>
    %276 = tpu.matmul %273, %274, %cst_107 {dimension_numbers = #tpu.dot_dimension_numbers<[1], [1], [0], [0], [0, 0, 1, 0], [], []>} : vector<12x8xf32>, vector<16x8xf32>, vector<12x16xf32> -> vector<12x16xf32>
    %cst_108 = arith.constant 0.353553385 : f32
    %277 = vector.broadcast %cst_108 : f32 to vector<12x16xf32>
    %278 = arith.mulf %276, %277 : vector<12x16xf32>
    %279 = arith.addf %278, %271 : vector<12x16xf32>
    %cst_109 = arith.constant dense<0xFF800000> : vector<12xf32>
    %280 = vector.multi_reduction <maximumf>, %279, %cst_109 [1] : vector<12x16xf32> to vector<12xf32>
    %281 = vector.shape_cast %280 : vector<12xf32> to vector<12x1xf32>
    %282 = vector.broadcast %281 : vector<12x1xf32> to vector<12x16xf32>
    %283 = arith.subf %279, %282 : vector<12x16xf32>
    %284 = math.exp %283 : vector<12x16xf32>
    %cst_110 = arith.constant dense<0.000000e+00> : vector<12xf32>
    %285 = vector.multi_reduction <add>, %284, %cst_110 [1] : vector<12x16xf32> to vector<12xf32>
    %286 = vector.shape_cast %285 : vector<12xf32> to vector<12x1xf32>
    %287 = vector.broadcast %286 : vector<12x1xf32> to vector<12x16xf32>
    %288 = arith.divf %284, %287 : vector<12x16xf32>
    %cst_111 = arith.constant dense<0.000000e+00> : vector<12x8xf32>
    %289 = tpu.matmul %288, %275, %cst_111 {dimension_numbers = #tpu.dot_dimension_numbers<[1], [0], [0], [1], [0, 0, 1, 1], [], []>} : vector<12x16xf32>, vector<16x8xf32>, vector<12x8xf32> -> vector<12x8xf32>
    %290 = vector.extract_strided_slice %270 {offsets = [0, 0], sizes = [8, 80], strides = [1, 1]} : vector<80x80xf32> to vector<8x80xf32>
    %cst_112 = arith.constant dense<0.000000e+00> : vector<12x80xf32>
    %291 = tpu.matmul %289, %290, %cst_112 {dimension_numbers = #tpu.dot_dimension_numbers<[1], [0], [0], [1], [0, 0, 1, 1], [], []>} : vector<12x8xf32>, vector<8x80xf32>, vector<12x80xf32> -> vector<12x80xf32>
    %292 = arith.addf %272, %291 : vector<12x80xf32>
    %293 = vector.extract_strided_slice %258 {offsets = [0, 8], sizes = [12, 8], strides = [1, 1]} : vector<12x80xf32> to vector<12x8xf32>
    %294 = vector.extract_strided_slice %267 {offsets = [0, 8], sizes = [16, 8], strides = [1, 1]} : vector<16x80xf32> to vector<16x8xf32>
    %295 = vector.extract_strided_slice %268 {offsets = [0, 8], sizes = [16, 8], strides = [1, 1]} : vector<16x80xf32> to vector<16x8xf32>
    %cst_113 = arith.constant dense<0.000000e+00> : vector<12x16xf32>
    %296 = tpu.matmul %293, %294, %cst_113 {dimension_numbers = #tpu.dot_dimension_numbers<[1], [1], [0], [0], [0, 0, 1, 0], [], []>} : vector<12x8xf32>, vector<16x8xf32>, vector<12x16xf32> -> vector<12x16xf32>
    %cst_114 = arith.constant 0.353553385 : f32
    %297 = vector.broadcast %cst_114 : f32 to vector<12x16xf32>
    %298 = arith.mulf %296, %297 : vector<12x16xf32>
    %299 = arith.addf %298, %271 : vector<12x16xf32>
    %cst_115 = arith.constant dense<0xFF800000> : vector<12xf32>
    %300 = vector.multi_reduction <maximumf>, %299, %cst_115 [1] : vector<12x16xf32> to vector<12xf32>
    %301 = vector.shape_cast %300 : vector<12xf32> to vector<12x1xf32>
    %302 = vector.broadcast %301 : vector<12x1xf32> to vector<12x16xf32>
    %303 = arith.subf %299, %302 : vector<12x16xf32>
    %304 = math.exp %303 : vector<12x16xf32>
    %cst_116 = arith.constant dense<0.000000e+00> : vector<12xf32>
    %305 = vector.multi_reduction <add>, %304, %cst_116 [1] : vector<12x16xf32> to vector<12xf32>
    %306 = vector.shape_cast %305 : vector<12xf32> to vector<12x1xf32>
    %307 = vector.broadcast %306 : vector<12x1xf32> to vector<12x16xf32>
    %308 = arith.divf %304, %307 : vector<12x16xf32>
    %cst_117 = arith.constant dense<0.000000e+00> : vector<12x8xf32>
    %309 = tpu.matmul %308, %295, %cst_117 {dimension_numbers = #tpu.dot_dimension_numbers<[1], [0], [0], [1], [0, 0, 1, 1], [], []>} : vector<12x16xf32>, vector<16x8xf32>, vector<12x8xf32> -> vector<12x8xf32>
    %310 = vector.extract_strided_slice %270 {offsets = [8, 0], sizes = [8, 80], strides = [1, 1]} : vector<80x80xf32> to vector<8x80xf32>
    %cst_118 = arith.constant dense<0.000000e+00> : vector<12x80xf32>
    %311 = tpu.matmul %309, %310, %cst_118 {dimension_numbers = #tpu.dot_dimension_numbers<[1], [0], [0], [1], [0, 0, 1, 1], [], []>} : vector<12x8xf32>, vector<8x80xf32>, vector<12x80xf32> -> vector<12x80xf32>
    %312 = arith.addf %292, %311 : vector<12x80xf32>
    %313 = vector.extract_strided_slice %258 {offsets = [0, 16], sizes = [12, 8], strides = [1, 1]} : vector<12x80xf32> to vector<12x8xf32>
    %314 = vector.extract_strided_slice %267 {offsets = [0, 16], sizes = [16, 8], strides = [1, 1]} : vector<16x80xf32> to vector<16x8xf32>
    %315 = vector.extract_strided_slice %268 {offsets = [0, 16], sizes = [16, 8], strides = [1, 1]} : vector<16x80xf32> to vector<16x8xf32>
    %cst_119 = arith.constant dense<0.000000e+00> : vector<12x16xf32>
    %316 = tpu.matmul %313, %314, %cst_119 {dimension_numbers = #tpu.dot_dimension_numbers<[1], [1], [0], [0], [0, 0, 1, 0], [], []>} : vector<12x8xf32>, vector<16x8xf32>, vector<12x16xf32> -> vector<12x16xf32>
    %cst_120 = arith.constant 0.353553385 : f32
    %317 = vector.broadcast %cst_120 : f32 to vector<12x16xf32>
    %318 = arith.mulf %316, %317 : vector<12x16xf32>
    %319 = arith.addf %318, %271 : vector<12x16xf32>
    %cst_121 = arith.constant dense<0xFF800000> : vector<12xf32>
    %320 = vector.multi_reduction <maximumf>, %319, %cst_121 [1] : vector<12x16xf32> to vector<12xf32>
    %321 = vector.shape_cast %320 : vector<12xf32> to vector<12x1xf32>
    %322 = vector.broadcast %321 : vector<12x1xf32> to vector<12x16xf32>
    %323 = arith.subf %319, %322 : vector<12x16xf32>
    %324 = math.exp %323 : vector<12x16xf32>
    %cst_122 = arith.constant dense<0.000000e+00> : vector<12xf32>
    %325 = vector.multi_reduction <add>, %324, %cst_122 [1] : vector<12x16xf32> to vector<12xf32>
    %326 = vector.shape_cast %325 : vector<12xf32> to vector<12x1xf32>
    %327 = vector.broadcast %326 : vector<12x1xf32> to vector<12x16xf32>
    %328 = arith.divf %324, %327 : vector<12x16xf32>
    %cst_123 = arith.constant dense<0.000000e+00> : vector<12x8xf32>
    %329 = tpu.matmul %328, %315, %cst_123 {dimension_numbers = #tpu.dot_dimension_numbers<[1], [0], [0], [1], [0, 0, 1, 1], [], []>} : vector<12x16xf32>, vector<16x8xf32>, vector<12x8xf32> -> vector<12x8xf32>
    %330 = vector.extract_strided_slice %270 {offsets = [16, 0], sizes = [8, 80], strides = [1, 1]} : vector<80x80xf32> to vector<8x80xf32>
    %cst_124 = arith.constant dense<0.000000e+00> : vector<12x80xf32>
    %331 = tpu.matmul %329, %330, %cst_124 {dimension_numbers = #tpu.dot_dimension_numbers<[1], [0], [0], [1], [0, 0, 1, 1], [], []>} : vector<12x8xf32>, vector<8x80xf32>, vector<12x80xf32> -> vector<12x80xf32>
    %332 = arith.addf %312, %331 : vector<12x80xf32>
    %333 = vector.extract_strided_slice %258 {offsets = [0, 24], sizes = [12, 8], strides = [1, 1]} : vector<12x80xf32> to vector<12x8xf32>
    %334 = vector.extract_strided_slice %267 {offsets = [0, 24], sizes = [16, 8], strides = [1, 1]} : vector<16x80xf32> to vector<16x8xf32>
    %335 = vector.extract_strided_slice %268 {offsets = [0, 24], sizes = [16, 8], strides = [1, 1]} : vector<16x80xf32> to vector<16x8xf32>
    %cst_125 = arith.constant dense<0.000000e+00> : vector<12x16xf32>
    %336 = tpu.matmul %333, %334, %cst_125 {dimension_numbers = #tpu.dot_dimension_numbers<[1], [1], [0], [0], [0, 0, 1, 0], [], []>} : vector<12x8xf32>, vector<16x8xf32>, vector<12x16xf32> -> vector<12x16xf32>
    %cst_126 = arith.constant 0.353553385 : f32
    %337 = vector.broadcast %cst_126 : f32 to vector<12x16xf32>
    %338 = arith.mulf %336, %337 : vector<12x16xf32>
    %339 = arith.addf %338, %271 : vector<12x16xf32>
    %cst_127 = arith.constant dense<0xFF800000> : vector<12xf32>
    %340 = vector.multi_reduction <maximumf>, %339, %cst_127 [1] : vector<12x16xf32> to vector<12xf32>
    %341 = vector.shape_cast %340 : vector<12xf32> to vector<12x1xf32>
    %342 = vector.broadcast %341 : vector<12x1xf32> to vector<12x16xf32>
    %343 = arith.subf %339, %342 : vector<12x16xf32>
    %344 = math.exp %343 : vector<12x16xf32>
    %cst_128 = arith.constant dense<0.000000e+00> : vector<12xf32>
    %345 = vector.multi_reduction <add>, %344, %cst_128 [1] : vector<12x16xf32> to vector<12xf32>
    %346 = vector.shape_cast %345 : vector<12xf32> to vector<12x1xf32>
    %347 = vector.broadcast %346 : vector<12x1xf32> to vector<12x16xf32>
    %348 = arith.divf %344, %347 : vector<12x16xf32>
    %cst_129 = arith.constant dense<0.000000e+00> : vector<12x8xf32>
    %349 = tpu.matmul %348, %335, %cst_129 {dimension_numbers = #tpu.dot_dimension_numbers<[1], [0], [0], [1], [0, 0, 1, 1], [], []>} : vector<12x16xf32>, vector<16x8xf32>, vector<12x8xf32> -> vector<12x8xf32>
    %350 = vector.extract_strided_slice %270 {offsets = [24, 0], sizes = [8, 80], strides = [1, 1]} : vector<80x80xf32> to vector<8x80xf32>
    %cst_130 = arith.constant dense<0.000000e+00> : vector<12x80xf32>
    %351 = tpu.matmul %349, %350, %cst_130 {dimension_numbers = #tpu.dot_dimension_numbers<[1], [0], [0], [1], [0, 0, 1, 1], [], []>} : vector<12x8xf32>, vector<8x80xf32>, vector<12x80xf32> -> vector<12x80xf32>
    %352 = arith.addf %332, %351 : vector<12x80xf32>
    %353 = vector.extract_strided_slice %258 {offsets = [0, 32], sizes = [12, 8], strides = [1, 1]} : vector<12x80xf32> to vector<12x8xf32>
    %354 = vector.extract_strided_slice %267 {offsets = [0, 32], sizes = [16, 8], strides = [1, 1]} : vector<16x80xf32> to vector<16x8xf32>
    %355 = vector.extract_strided_slice %268 {offsets = [0, 32], sizes = [16, 8], strides = [1, 1]} : vector<16x80xf32> to vector<16x8xf32>
    %cst_131 = arith.constant dense<0.000000e+00> : vector<12x16xf32>
    %356 = tpu.matmul %353, %354, %cst_131 {dimension_numbers = #tpu.dot_dimension_numbers<[1], [1], [0], [0], [0, 0, 1, 0], [], []>} : vector<12x8xf32>, vector<16x8xf32>, vector<12x16xf32> -> vector<12x16xf32>
    %cst_132 = arith.constant 0.353553385 : f32
    %357 = vector.broadcast %cst_132 : f32 to vector<12x16xf32>
    %358 = arith.mulf %356, %357 : vector<12x16xf32>
    %359 = arith.addf %358, %271 : vector<12x16xf32>
    %cst_133 = arith.constant dense<0xFF800000> : vector<12xf32>
    %360 = vector.multi_reduction <maximumf>, %359, %cst_133 [1] : vector<12x16xf32> to vector<12xf32>
    %361 = vector.shape_cast %360 : vector<12xf32> to vector<12x1xf32>
    %362 = vector.broadcast %361 : vector<12x1xf32> to vector<12x16xf32>
    %363 = arith.subf %359, %362 : vector<12x16xf32>
    %364 = math.exp %363 : vector<12x16xf32>
    %cst_134 = arith.constant dense<0.000000e+00> : vector<12xf32>
    %365 = vector.multi_reduction <add>, %364, %cst_134 [1] : vector<12x16xf32> to vector<12xf32>
    %366 = vector.shape_cast %365 : vector<12xf32> to vector<12x1xf32>
    %367 = vector.broadcast %366 : vector<12x1xf32> to vector<12x16xf32>
    %368 = arith.divf %364, %367 : vector<12x16xf32>
    %cst_135 = arith.constant dense<0.000000e+00> : vector<12x8xf32>
    %369 = tpu.matmul %368, %355, %cst_135 {dimension_numbers = #tpu.dot_dimension_numbers<[1], [0], [0], [1], [0, 0, 1, 1], [], []>} : vector<12x16xf32>, vector<16x8xf32>, vector<12x8xf32> -> vector<12x8xf32>
    %370 = vector.extract_strided_slice %270 {offsets = [32, 0], sizes = [8, 80], strides = [1, 1]} : vector<80x80xf32> to vector<8x80xf32>
    %cst_136 = arith.constant dense<0.000000e+00> : vector<12x80xf32>
    %371 = tpu.matmul %369, %370, %cst_136 {dimension_numbers = #tpu.dot_dimension_numbers<[1], [0], [0], [1], [0, 0, 1, 1], [], []>} : vector<12x8xf32>, vector<8x80xf32>, vector<12x80xf32> -> vector<12x80xf32>
    %372 = arith.addf %352, %371 : vector<12x80xf32>
    %373 = vector.extract_strided_slice %258 {offsets = [0, 40], sizes = [12, 8], strides = [1, 1]} : vector<12x80xf32> to vector<12x8xf32>
    %374 = vector.extract_strided_slice %267 {offsets = [0, 40], sizes = [16, 8], strides = [1, 1]} : vector<16x80xf32> to vector<16x8xf32>
    %375 = vector.extract_strided_slice %268 {offsets = [0, 40], sizes = [16, 8], strides = [1, 1]} : vector<16x80xf32> to vector<16x8xf32>
    %cst_137 = arith.constant dense<0.000000e+00> : vector<12x16xf32>
    %376 = tpu.matmul %373, %374, %cst_137 {dimension_numbers = #tpu.dot_dimension_numbers<[1], [1], [0], [0], [0, 0, 1, 0], [], []>} : vector<12x8xf32>, vector<16x8xf32>, vector<12x16xf32> -> vector<12x16xf32>
    %cst_138 = arith.constant 0.353553385 : f32
    %377 = vector.broadcast %cst_138 : f32 to vector<12x16xf32>
    %378 = arith.mulf %376, %377 : vector<12x16xf32>
    %379 = arith.addf %378, %271 : vector<12x16xf32>
    %cst_139 = arith.constant dense<0xFF800000> : vector<12xf32>
    %380 = vector.multi_reduction <maximumf>, %379, %cst_139 [1] : vector<12x16xf32> to vector<12xf32>
    %381 = vector.shape_cast %380 : vector<12xf32> to vector<12x1xf32>
    %382 = vector.broadcast %381 : vector<12x1xf32> to vector<12x16xf32>
    %383 = arith.subf %379, %382 : vector<12x16xf32>
    %384 = math.exp %383 : vector<12x16xf32>
    %cst_140 = arith.constant dense<0.000000e+00> : vector<12xf32>
    %385 = vector.multi_reduction <add>, %384, %cst_140 [1] : vector<12x16xf32> to vector<12xf32>
    %386 = vector.shape_cast %385 : vector<12xf32> to vector<12x1xf32>
    %387 = vector.broadcast %386 : vector<12x1xf32> to vector<12x16xf32>
    %388 = arith.divf %384, %387 : vector<12x16xf32>
    %cst_141 = arith.constant dense<0.000000e+00> : vector<12x8xf32>
    %389 = tpu.matmul %388, %375, %cst_141 {dimension_numbers = #tpu.dot_dimension_numbers<[1], [0], [0], [1], [0, 0, 1, 1], [], []>} : vector<12x16xf32>, vector<16x8xf32>, vector<12x8xf32> -> vector<12x8xf32>
    %390 = vector.extract_strided_slice %270 {offsets = [40, 0], sizes = [8, 80], strides = [1, 1]} : vector<80x80xf32> to vector<8x80xf32>
    %cst_142 = arith.constant dense<0.000000e+00> : vector<12x80xf32>
    %391 = tpu.matmul %389, %390, %cst_142 {dimension_numbers = #tpu.dot_dimension_numbers<[1], [0], [0], [1], [0, 0, 1, 1], [], []>} : vector<12x8xf32>, vector<8x80xf32>, vector<12x80xf32> -> vector<12x80xf32>
    %392 = arith.addf %372, %391 : vector<12x80xf32>
    %393 = vector.extract_strided_slice %258 {offsets = [0, 48], sizes = [12, 8], strides = [1, 1]} : vector<12x80xf32> to vector<12x8xf32>
    %394 = vector.extract_strided_slice %267 {offsets = [0, 48], sizes = [16, 8], strides = [1, 1]} : vector<16x80xf32> to vector<16x8xf32>
    %395 = vector.extract_strided_slice %268 {offsets = [0, 48], sizes = [16, 8], strides = [1, 1]} : vector<16x80xf32> to vector<16x8xf32>
    %cst_143 = arith.constant dense<0.000000e+00> : vector<12x16xf32>
    %396 = tpu.matmul %393, %394, %cst_143 {dimension_numbers = #tpu.dot_dimension_numbers<[1], [1], [0], [0], [0, 0, 1, 0], [], []>} : vector<12x8xf32>, vector<16x8xf32>, vector<12x16xf32> -> vector<12x16xf32>
    %cst_144 = arith.constant 0.353553385 : f32
    %397 = vector.broadcast %cst_144 : f32 to vector<12x16xf32>
    %398 = arith.mulf %396, %397 : vector<12x16xf32>
    %399 = arith.addf %398, %271 : vector<12x16xf32>
    %cst_145 = arith.constant dense<0xFF800000> : vector<12xf32>
    %400 = vector.multi_reduction <maximumf>, %399, %cst_145 [1] : vector<12x16xf32> to vector<12xf32>
    %401 = vector.shape_cast %400 : vector<12xf32> to vector<12x1xf32>
    %402 = vector.broadcast %401 : vector<12x1xf32> to vector<12x16xf32>
    %403 = arith.subf %399, %402 : vector<12x16xf32>
    %404 = math.exp %403 : vector<12x16xf32>
    %cst_146 = arith.constant dense<0.000000e+00> : vector<12xf32>
    %405 = vector.multi_reduction <add>, %404, %cst_146 [1] : vector<12x16xf32> to vector<12xf32>
    %406 = vector.shape_cast %405 : vector<12xf32> to vector<12x1xf32>
    %407 = vector.broadcast %406 : vector<12x1xf32> to vector<12x16xf32>
    %408 = arith.divf %404, %407 : vector<12x16xf32>
    %cst_147 = arith.constant dense<0.000000e+00> : vector<12x8xf32>
    %409 = tpu.matmul %408, %395, %cst_147 {dimension_numbers = #tpu.dot_dimension_numbers<[1], [0], [0], [1], [0, 0, 1, 1], [], []>} : vector<12x16xf32>, vector<16x8xf32>, vector<12x8xf32> -> vector<12x8xf32>
    %410 = vector.extract_strided_slice %270 {offsets = [48, 0], sizes = [8, 80], strides = [1, 1]} : vector<80x80xf32> to vector<8x80xf32>
    %cst_148 = arith.constant dense<0.000000e+00> : vector<12x80xf32>
    %411 = tpu.matmul %409, %410, %cst_148 {dimension_numbers = #tpu.dot_dimension_numbers<[1], [0], [0], [1], [0, 0, 1, 1], [], []>} : vector<12x8xf32>, vector<8x80xf32>, vector<12x80xf32> -> vector<12x80xf32>
    %412 = arith.addf %392, %411 : vector<12x80xf32>
    %413 = vector.extract_strided_slice %258 {offsets = [0, 56], sizes = [12, 8], strides = [1, 1]} : vector<12x80xf32> to vector<12x8xf32>
    %414 = vector.extract_strided_slice %267 {offsets = [0, 56], sizes = [16, 8], strides = [1, 1]} : vector<16x80xf32> to vector<16x8xf32>
    %415 = vector.extract_strided_slice %268 {offsets = [0, 56], sizes = [16, 8], strides = [1, 1]} : vector<16x80xf32> to vector<16x8xf32>
    %cst_149 = arith.constant dense<0.000000e+00> : vector<12x16xf32>
    %416 = tpu.matmul %413, %414, %cst_149 {dimension_numbers = #tpu.dot_dimension_numbers<[1], [1], [0], [0], [0, 0, 1, 0], [], []>} : vector<12x8xf32>, vector<16x8xf32>, vector<12x16xf32> -> vector<12x16xf32>
    %cst_150 = arith.constant 0.353553385 : f32
    %417 = vector.broadcast %cst_150 : f32 to vector<12x16xf32>
    %418 = arith.mulf %416, %417 : vector<12x16xf32>
    %419 = arith.addf %418, %271 : vector<12x16xf32>
    %cst_151 = arith.constant dense<0xFF800000> : vector<12xf32>
    %420 = vector.multi_reduction <maximumf>, %419, %cst_151 [1] : vector<12x16xf32> to vector<12xf32>
    %421 = vector.shape_cast %420 : vector<12xf32> to vector<12x1xf32>
    %422 = vector.broadcast %421 : vector<12x1xf32> to vector<12x16xf32>
    %423 = arith.subf %419, %422 : vector<12x16xf32>
    %424 = math.exp %423 : vector<12x16xf32>
    %cst_152 = arith.constant dense<0.000000e+00> : vector<12xf32>
    %425 = vector.multi_reduction <add>, %424, %cst_152 [1] : vector<12x16xf32> to vector<12xf32>
    %426 = vector.shape_cast %425 : vector<12xf32> to vector<12x1xf32>
    %427 = vector.broadcast %426 : vector<12x1xf32> to vector<12x16xf32>
    %428 = arith.divf %424, %427 : vector<12x16xf32>
    %cst_153 = arith.constant dense<0.000000e+00> : vector<12x8xf32>
    %429 = tpu.matmul %428, %415, %cst_153 {dimension_numbers = #tpu.dot_dimension_numbers<[1], [0], [0], [1], [0, 0, 1, 1], [], []>} : vector<12x16xf32>, vector<16x8xf32>, vector<12x8xf32> -> vector<12x8xf32>
    %430 = vector.extract_strided_slice %270 {offsets = [56, 0], sizes = [8, 80], strides = [1, 1]} : vector<80x80xf32> to vector<8x80xf32>
    %cst_154 = arith.constant dense<0.000000e+00> : vector<12x80xf32>
    %431 = tpu.matmul %429, %430, %cst_154 {dimension_numbers = #tpu.dot_dimension_numbers<[1], [0], [0], [1], [0, 0, 1, 1], [], []>} : vector<12x8xf32>, vector<8x80xf32>, vector<12x80xf32> -> vector<12x80xf32>
    %432 = arith.addf %412, %431 : vector<12x80xf32>
    %433 = vector.extract_strided_slice %258 {offsets = [0, 64], sizes = [12, 8], strides = [1, 1]} : vector<12x80xf32> to vector<12x8xf32>
    %434 = vector.extract_strided_slice %267 {offsets = [0, 64], sizes = [16, 8], strides = [1, 1]} : vector<16x80xf32> to vector<16x8xf32>
    %435 = vector.extract_strided_slice %268 {offsets = [0, 64], sizes = [16, 8], strides = [1, 1]} : vector<16x80xf32> to vector<16x8xf32>
    %cst_155 = arith.constant dense<0.000000e+00> : vector<12x16xf32>
    %436 = tpu.matmul %433, %434, %cst_155 {dimension_numbers = #tpu.dot_dimension_numbers<[1], [1], [0], [0], [0, 0, 1, 0], [], []>} : vector<12x8xf32>, vector<16x8xf32>, vector<12x16xf32> -> vector<12x16xf32>
    %cst_156 = arith.constant 0.353553385 : f32
    %437 = vector.broadcast %cst_156 : f32 to vector<12x16xf32>
    %438 = arith.mulf %436, %437 : vector<12x16xf32>
    %439 = arith.addf %438, %271 : vector<12x16xf32>
    %cst_157 = arith.constant dense<0xFF800000> : vector<12xf32>
    %440 = vector.multi_reduction <maximumf>, %439, %cst_157 [1] : vector<12x16xf32> to vector<12xf32>
    %441 = vector.shape_cast %440 : vector<12xf32> to vector<12x1xf32>
    %442 = vector.broadcast %441 : vector<12x1xf32> to vector<12x16xf32>
    %443 = arith.subf %439, %442 : vector<12x16xf32>
    %444 = math.exp %443 : vector<12x16xf32>
    %cst_158 = arith.constant dense<0.000000e+00> : vector<12xf32>
    %445 = vector.multi_reduction <add>, %444, %cst_158 [1] : vector<12x16xf32> to vector<12xf32>
    %446 = vector.shape_cast %445 : vector<12xf32> to vector<12x1xf32>
    %447 = vector.broadcast %446 : vector<12x1xf32> to vector<12x16xf32>
    %448 = arith.divf %444, %447 : vector<12x16xf32>
    %cst_159 = arith.constant dense<0.000000e+00> : vector<12x8xf32>
    %449 = tpu.matmul %448, %435, %cst_159 {dimension_numbers = #tpu.dot_dimension_numbers<[1], [0], [0], [1], [0, 0, 1, 1], [], []>} : vector<12x16xf32>, vector<16x8xf32>, vector<12x8xf32> -> vector<12x8xf32>
    %450 = vector.extract_strided_slice %270 {offsets = [64, 0], sizes = [8, 80], strides = [1, 1]} : vector<80x80xf32> to vector<8x80xf32>
    %cst_160 = arith.constant dense<0.000000e+00> : vector<12x80xf32>
    %451 = tpu.matmul %449, %450, %cst_160 {dimension_numbers = #tpu.dot_dimension_numbers<[1], [0], [0], [1], [0, 0, 1, 1], [], []>} : vector<12x8xf32>, vector<8x80xf32>, vector<12x80xf32> -> vector<12x80xf32>
    %452 = arith.addf %432, %451 : vector<12x80xf32>
    %453 = vector.extract_strided_slice %258 {offsets = [0, 72], sizes = [12, 8], strides = [1, 1]} : vector<12x80xf32> to vector<12x8xf32>
    %454 = vector.extract_strided_slice %267 {offsets = [0, 72], sizes = [16, 8], strides = [1, 1]} : vector<16x80xf32> to vector<16x8xf32>
    %455 = vector.extract_strided_slice %268 {offsets = [0, 72], sizes = [16, 8], strides = [1, 1]} : vector<16x80xf32> to vector<16x8xf32>
    %cst_161 = arith.constant dense<0.000000e+00> : vector<12x16xf32>
    %456 = tpu.matmul %453, %454, %cst_161 {dimension_numbers = #tpu.dot_dimension_numbers<[1], [1], [0], [0], [0, 0, 1, 0], [], []>} : vector<12x8xf32>, vector<16x8xf32>, vector<12x16xf32> -> vector<12x16xf32>
    %cst_162 = arith.constant 0.353553385 : f32
    %457 = vector.broadcast %cst_162 : f32 to vector<12x16xf32>
    %458 = arith.mulf %456, %457 : vector<12x16xf32>
    %459 = arith.addf %458, %271 : vector<12x16xf32>
    %cst_163 = arith.constant dense<0xFF800000> : vector<12xf32>
    %460 = vector.multi_reduction <maximumf>, %459, %cst_163 [1] : vector<12x16xf32> to vector<12xf32>
    %461 = vector.shape_cast %460 : vector<12xf32> to vector<12x1xf32>
    %462 = vector.broadcast %461 : vector<12x1xf32> to vector<12x16xf32>
    %463 = arith.subf %459, %462 : vector<12x16xf32>
    %464 = math.exp %463 : vector<12x16xf32>
    %cst_164 = arith.constant dense<0.000000e+00> : vector<12xf32>
    %465 = vector.multi_reduction <add>, %464, %cst_164 [1] : vector<12x16xf32> to vector<12xf32>
    %466 = vector.shape_cast %465 : vector<12xf32> to vector<12x1xf32>
    %467 = vector.broadcast %466 : vector<12x1xf32> to vector<12x16xf32>
    %468 = arith.divf %464, %467 : vector<12x16xf32>
    %cst_165 = arith.constant dense<0.000000e+00> : vector<12x8xf32>
    %469 = tpu.matmul %468, %455, %cst_165 {dimension_numbers = #tpu.dot_dimension_numbers<[1], [0], [0], [1], [0, 0, 1, 1], [], []>} : vector<12x16xf32>, vector<16x8xf32>, vector<12x8xf32> -> vector<12x8xf32>
    %470 = vector.extract_strided_slice %270 {offsets = [72, 0], sizes = [8, 80], strides = [1, 1]} : vector<80x80xf32> to vector<8x80xf32>
    %cst_166 = arith.constant dense<0.000000e+00> : vector<12x80xf32>
    %471 = tpu.matmul %469, %470, %cst_166 {dimension_numbers = #tpu.dot_dimension_numbers<[1], [0], [0], [1], [0, 0, 1, 1], [], []>} : vector<12x8xf32>, vector<8x80xf32>, vector<12x80xf32> -> vector<12x80xf32>
    %472 = arith.addf %452, %471 : vector<12x80xf32>
    %c0_167 = arith.constant 0 : index
    %c0_168 = arith.constant 0 : index
    %c0_169 = arith.constant 0 : index
    %473 = vector.load %arg16[%c0_167, %c0_168, %c0_169] : memref<1x1x80xf32, #tpu.memory_space<vmem>>, vector<1x1x80xf32>
    %474 = vector.shape_cast %473 : vector<1x1x80xf32> to vector<1x80xf32>
    %475 = vector.broadcast %474 : vector<1x80xf32> to vector<12x80xf32>
    %476 = arith.addf %472, %475 : vector<12x80xf32>
    %477 = arith.addf %250, %476 : vector<12x80xf32>
    %478 = vector.extract_strided_slice %6 {offsets = [2, 0], sizes = [1, 80], strides = [1, 1]} : vector<6x80xf32> to vector<1x80xf32>
    %479 = vector.extract_strided_slice %6 {offsets = [3, 0], sizes = [1, 80], strides = [1, 1]} : vector<6x80xf32> to vector<1x80xf32>
    %cst_170 = arith.constant dense<0.000000e+00> : vector<12xf32>
    %480 = vector.multi_reduction <add>, %477, %cst_170 [1] : vector<12x80xf32> to vector<12xf32>
    %481 = vector.shape_cast %480 : vector<12xf32> to vector<12x1xf32>
    %cst_171 = arith.constant 8.000000e+01 : f32
    %482 = vector.broadcast %cst_171 : f32 to vector<12x1xf32>
    %483 = arith.divf %481, %482 : vector<12x1xf32>
    %484 = vector.broadcast %483 : vector<12x1xf32> to vector<12x80xf32>
    %485 = arith.subf %477, %484 : vector<12x80xf32>
    %486 = arith.mulf %485, %485 : vector<12x80xf32>
    %cst_172 = arith.constant dense<0.000000e+00> : vector<12xf32>
    %487 = vector.multi_reduction <add>, %486, %cst_172 [1] : vector<12x80xf32> to vector<12xf32>
    %488 = vector.shape_cast %487 : vector<12xf32> to vector<12x1xf32>
    %cst_173 = arith.constant 8.000000e+01 : f32
    %489 = vector.broadcast %cst_173 : f32 to vector<12x1xf32>
    %490 = arith.divf %488, %489 : vector<12x1xf32>
    %491 = vector.broadcast %483 : vector<12x1xf32> to vector<12x80xf32>
    %492 = arith.subf %477, %491 : vector<12x80xf32>
    %cst_174 = arith.constant 9.99999974E-6 : f32
    %493 = vector.broadcast %cst_174 : f32 to vector<12x1xf32>
    %494 = arith.addf %490, %493 : vector<12x1xf32>
    %495 = math.rsqrt %494 : vector<12x1xf32>
    %496 = vector.broadcast %495 : vector<12x1xf32> to vector<12x80xf32>
    %497 = arith.mulf %492, %496 : vector<12x80xf32>
    %498 = vector.broadcast %478 : vector<1x80xf32> to vector<12x80xf32>
    %499 = arith.mulf %497, %498 : vector<12x80xf32>
    %500 = vector.broadcast %479 : vector<1x80xf32> to vector<12x80xf32>
    %501 = arith.addf %499, %500 : vector<12x80xf32>
    %502 = arith.truncf %501 : vector<12x80xf32> to vector<12x80xbf16>
    %c0_175 = arith.constant 0 : index
    %c0_176 = arith.constant 0 : index
    %c0_177 = arith.constant 0 : index
    %503 = vector.load %arg17[%c0_175, %c0_176, %c0_177] : memref<1x80x2048xbf16, #tpu.memory_space<vmem>>, vector<1x80x2048xbf16>
    %504 = vector.shape_cast %503 : vector<1x80x2048xbf16> to vector<80x2048xbf16>
    %cst_178 = arith.constant dense<0.000000e+00> : vector<12x2048xf32>
    %505 = tpu.matmul %502, %504, %cst_178 {dimension_numbers = #tpu.dot_dimension_numbers<[1], [0], [0], [1], [0, 0, 1, 1], [], []>} : vector<12x80xbf16>, vector<80x2048xbf16>, vector<12x2048xf32> -> vector<12x2048xf32>
    %c0_179 = arith.constant 0 : index
    %c0_180 = arith.constant 0 : index
    %c0_181 = arith.constant 0 : index
    %506 = vector.load %arg18[%c0_179, %c0_180, %c0_181] : memref<1x1x2048xf32, #tpu.memory_space<vmem>>, vector<1x1x2048xf32>
    %507 = vector.shape_cast %506 : vector<1x1x2048xf32> to vector<1x2048xf32>
    %508 = vector.broadcast %507 : vector<1x2048xf32> to vector<12x2048xf32>
    %509 = arith.addf %505, %508 : vector<12x2048xf32>
    %cst_182 = arith.constant 0.000000e+00 : f32
    %510 = vector.broadcast %cst_182 : f32 to vector<12x2048xf32>
    %511 = arith.maximumf %509, %510 : vector<12x2048xf32>
    %512 = arith.truncf %511 : vector<12x2048xf32> to vector<12x2048xbf16>
    %c0_183 = arith.constant 0 : index
    %c0_184 = arith.constant 0 : index
    %c0_185 = arith.constant 0 : index
    %513 = vector.load %arg19[%c0_183, %c0_184, %c0_185] : memref<1x2048x80xbf16, #tpu.memory_space<vmem>>, vector<1x2048x80xbf16>
    %514 = vector.shape_cast %513 : vector<1x2048x80xbf16> to vector<2048x80xbf16>
    %cst_186 = arith.constant dense<0.000000e+00> : vector<12x80xf32>
    %515 = tpu.matmul %512, %514, %cst_186 {dimension_numbers = #tpu.dot_dimension_numbers<[1], [0], [0], [1], [0, 0, 1, 1], [], []>} : vector<12x2048xbf16>, vector<2048x80xbf16>, vector<12x80xf32> -> vector<12x80xf32>
    %c0_187 = arith.constant 0 : index
    %c0_188 = arith.constant 0 : index
    %c0_189 = arith.constant 0 : index
    %516 = vector.load %arg20[%c0_187, %c0_188, %c0_189] : memref<1x1x80xf32, #tpu.memory_space<vmem>>, vector<1x1x80xf32>
    %517 = vector.shape_cast %516 : vector<1x1x80xf32> to vector<1x80xf32>
    %518 = vector.broadcast %517 : vector<1x80xf32> to vector<12x80xf32>
    %519 = arith.addf %515, %518 : vector<12x80xf32>
    %520 = arith.addf %501, %519 : vector<12x80xf32>
    %521 = vector.extract_strided_slice %6 {offsets = [4, 0], sizes = [1, 80], strides = [1, 1]} : vector<6x80xf32> to vector<1x80xf32>
    %522 = vector.extract_strided_slice %6 {offsets = [5, 0], sizes = [1, 80], strides = [1, 1]} : vector<6x80xf32> to vector<1x80xf32>
    %cst_190 = arith.constant dense<0.000000e+00> : vector<12xf32>
    %523 = vector.multi_reduction <add>, %520, %cst_190 [1] : vector<12x80xf32> to vector<12xf32>
    %524 = vector.shape_cast %523 : vector<12xf32> to vector<12x1xf32>
    %cst_191 = arith.constant 8.000000e+01 : f32
    %525 = vector.broadcast %cst_191 : f32 to vector<12x1xf32>
    %526 = arith.divf %524, %525 : vector<12x1xf32>
    %527 = vector.broadcast %526 : vector<12x1xf32> to vector<12x80xf32>
    %528 = arith.subf %520, %527 : vector<12x80xf32>
    %529 = arith.mulf %528, %528 : vector<12x80xf32>
    %cst_192 = arith.constant dense<0.000000e+00> : vector<12xf32>
    %530 = vector.multi_reduction <add>, %529, %cst_192 [1] : vector<12x80xf32> to vector<12xf32>
    %531 = vector.shape_cast %530 : vector<12xf32> to vector<12x1xf32>
    %cst_193 = arith.constant 8.000000e+01 : f32
    %532 = vector.broadcast %cst_193 : f32 to vector<12x1xf32>
    %533 = arith.divf %531, %532 : vector<12x1xf32>
    %534 = vector.broadcast %526 : vector<12x1xf32> to vector<12x80xf32>
    %535 = arith.subf %520, %534 : vector<12x80xf32>
    %cst_194 = arith.constant 9.99999974E-6 : f32
    %536 = vector.broadcast %cst_194 : f32 to vector<12x1xf32>
    %537 = arith.addf %533, %536 : vector<12x1xf32>
    %538 = math.rsqrt %537 : vector<12x1xf32>
    %539 = vector.broadcast %538 : vector<12x1xf32> to vector<12x80xf32>
    %540 = arith.mulf %535, %539 : vector<12x80xf32>
    %541 = vector.broadcast %521 : vector<1x80xf32> to vector<12x80xf32>
    %542 = arith.mulf %540, %541 : vector<12x80xf32>
    %543 = vector.broadcast %522 : vector<1x80xf32> to vector<12x80xf32>
    %544 = arith.addf %542, %543 : vector<12x80xf32>
    %c0_195 = arith.constant 0 : index
    %c0_196 = arith.constant 0 : index
    %545 = vector.load %arg25[%c0_195, %c0_196] : memref<12x80xf32, #tpu.memory_space<vmem>>, vector<12x80xf32>
    tpu.vector_store %arg25[%c0_195, %c0_196], %544 {strides = array<i32>} : memref<12x80xf32, #tpu.memory_space<vmem>>, vector<12x80xf32>,
    %c7_i32 = arith.constant 7 : i32
    %546 = arith.cmpi eq, %arg0, %c7_i32 : i32
    %547 = arith.extui %546 : i1 to i32
    %c0_i32_197 = arith.constant 0 : i32
    %548 = arith.cmpi ne, %547, %c0_i32_197 : i32
    scf.if %548 {
      %c0_198 = arith.constant 0 : index
      %c0_199 = arith.constant 0 : index
      %549 = vector.load %arg22[%c0_198, %c0_199] : memref<80x1xf32, #tpu.memory_space<vmem>>, vector<80x1xf32>
      %cst_200 = arith.constant dense<0.000000e+00> : vector<12x1xf32>
      %550 = tpu.matmul %544, %549, %cst_200 {dimension_numbers = #tpu.dot_dimension_numbers<[1], [0], [0], [1], [0, 0, 1, 1], [], []>} : vector<12x80xf32>, vector<80x1xf32>, vector<12x1xf32> -> vector<12x1xf32>
      %c0_201 = arith.constant 0 : index
      %c0_202 = arith.constant 0 : index
      %551 = vector.load %arg23[%c0_201, %c0_202] : memref<1x1xf32, #tpu.memory_space<vmem>>, vector<1x1xf32>
      %552 = vector.broadcast %551 : vector<1x1xf32> to vector<12x1xf32>
      %553 = arith.addf %550, %552 : vector<12x1xf32>
      %554 = math.absf %553 : vector<12x1xf32>
      %cst_203 = arith.constant 0.000000e+00 : f32
      %555 = vector.broadcast %cst_203 : f32 to vector<12x1xf32>
      %556 = arith.subf %555, %554 : vector<12x1xf32>
      %557 = math.exp %556 : vector<12x1xf32>
      %cst_204 = arith.constant 0.000000e+00 : f32
      %558 = vector.broadcast %cst_204 : f32 to vector<12x1xf32>
      %559 = arith.cmpf oge, %553, %558 : vector<12x1xf32>
      %cst_205 = arith.constant 1.000000e+00 : f32
      %560 = vector.broadcast %cst_205 : f32 to vector<12x1xf32>
      %561 = arith.addf %560, %557 : vector<12x1xf32>
      %cst_206 = arith.constant 1.000000e+00 : f32
      %562 = vector.broadcast %cst_206 : f32 to vector<12x1xf32>
      %563 = arith.divf %562, %561 : vector<12x1xf32>
      %cst_207 = arith.constant 1.000000e+00 : f32
      %564 = vector.broadcast %cst_207 : f32 to vector<12x1xf32>
      %565 = arith.addf %564, %557 : vector<12x1xf32>
      %566 = arith.divf %557, %565 : vector<12x1xf32>
      %567 = arith.select %559, %563, %566 : vector<12x1xi1>, vector<12x1xf32>
      %c0_208 = arith.constant 0 : index
      %c0_209 = arith.constant 0 : index
      %568 = vector.load %arg24[%c0_208, %c0_209] : memref<12x1xf32, #tpu.memory_space<vmem>>, vector<12x1xf32>
      tpu.vector_store %arg24[%c0_208, %c0_209], %567 {strides = array<i32>} : memref<12x1xf32, #tpu.memory_space<vmem>>, vector<12x1xf32>,
    } else {
    }
    return
  }
  func.func @transform_0(%arg0: i32) -> (i32, i32) {
    %c0_i32 = arith.constant 0 : i32
    %c0_i32_0 = arith.constant 0 : i32
    %c0_i32_1 = arith.constant 0 : i32
    return %c0_i32, %c0_i32_0 : i32, i32
  }
  func.func @transform_1(%arg0: i32) -> (i32, i32) {
    %c0_i32 = arith.constant 0 : i32
    %c0_i32_0 = arith.constant 0 : i32
    %c0_i32_1 = arith.constant 0 : i32
    return %c0_i32, %c0_i32_0 : i32, i32
  }
  func.func @transform_2(%arg0: i32) -> (i32, i32) {
    %c0_i32 = arith.constant 0 : i32
    %c0_i32_0 = arith.constant 0 : i32
    %c0_i32_1 = arith.constant 0 : i32
    return %c0_i32, %c0_i32_0 : i32, i32
  }
  func.func @transform_3(%arg0: i32) -> (i32, i32) {
    %c0_i32 = arith.constant 0 : i32
    %c0_i32_0 = arith.constant 0 : i32
    %c0_i32_1 = arith.constant 0 : i32
    return %c0_i32, %c0_i32_0 : i32, i32
  }
  func.func @transform_4(%arg0: i32) -> (i32, i32) {
    %c0_i32 = arith.constant 0 : i32
    %c0_i32_0 = arith.constant 0 : i32
    %c0_i32_1 = arith.constant 0 : i32
    return %c0_i32, %c0_i32_0 : i32, i32
  }
  func.func @transform_5(%arg0: i32) -> (i32, i32) {
    %c0_i32 = arith.constant 0 : i32
    %c0_i32_0 = arith.constant 0 : i32
    %c0_i32_1 = arith.constant 0 : i32
    return %c0_i32, %c0_i32_0 : i32, i32
  }
  func.func @transform_6(%arg0: i32) -> (i32, i32, i32) {
    %c0_i32 = arith.constant 0 : i32
    %c0_i32_0 = arith.constant 0 : i32
    %c0_i32_1 = arith.constant 0 : i32
    return %arg0, %c0_i32, %c0_i32_0 : i32, i32, i32
  }
  func.func @transform_7(%arg0: i32) -> (i32, i32, i32) {
    %c0_i32 = arith.constant 0 : i32
    %c0_i32_0 = arith.constant 0 : i32
    %c0_i32_1 = arith.constant 0 : i32
    return %arg0, %c0_i32, %c0_i32_0 : i32, i32, i32
  }
  func.func @transform_8(%arg0: i32) -> (i32, i32, i32) {
    %c0_i32 = arith.constant 0 : i32
    %c0_i32_0 = arith.constant 0 : i32
    %c0_i32_1 = arith.constant 0 : i32
    return %arg0, %c0_i32, %c0_i32_0 : i32, i32, i32
  }
  func.func @transform_9(%arg0: i32) -> (i32, i32, i32) {
    %c0_i32 = arith.constant 0 : i32
    %c0_i32_0 = arith.constant 0 : i32
    %c0_i32_1 = arith.constant 0 : i32
    return %arg0, %c0_i32, %c0_i32_0 : i32, i32, i32
  }
  func.func @transform_10(%arg0: i32) -> (i32, i32, i32) {
    %c0_i32 = arith.constant 0 : i32
    %c0_i32_0 = arith.constant 0 : i32
    %c0_i32_1 = arith.constant 0 : i32
    return %arg0, %c0_i32, %c0_i32_0 : i32, i32, i32
  }
  func.func @transform_11(%arg0: i32) -> (i32, i32, i32) {
    %c0_i32 = arith.constant 0 : i32
    %c0_i32_0 = arith.constant 0 : i32
    %c0_i32_1 = arith.constant 0 : i32
    return %arg0, %c0_i32, %c0_i32_0 : i32, i32, i32
  }
  func.func @transform_12(%arg0: i32) -> (i32, i32, i32) {
    %c0_i32 = arith.constant 0 : i32
    %c0_i32_0 = arith.constant 0 : i32
    %c0_i32_1 = arith.constant 0 : i32
    return %arg0, %c0_i32, %c0_i32_0 : i32, i32, i32
  }
  func.func @transform_13(%arg0: i32) -> (i32, i32, i32) {
    %c0_i32 = arith.constant 0 : i32
    %c0_i32_0 = arith.constant 0 : i32
    %c0_i32_1 = arith.constant 0 : i32
    return %arg0, %c0_i32, %c0_i32_0 : i32, i32, i32
  }
  func.func @transform_14(%arg0: i32) -> (i32, i32, i32) {
    %c0_i32 = arith.constant 0 : i32
    %c0_i32_0 = arith.constant 0 : i32
    %c0_i32_1 = arith.constant 0 : i32
    return %arg0, %c0_i32, %c0_i32_0 : i32, i32, i32
  }
  func.func @transform_15(%arg0: i32) -> (i32, i32, i32) {
    %c0_i32 = arith.constant 0 : i32
    %c0_i32_0 = arith.constant 0 : i32
    %c0_i32_1 = arith.constant 0 : i32
    return %arg0, %c0_i32, %c0_i32_0 : i32, i32, i32
  }
  func.func @transform_16(%arg0: i32) -> (i32, i32, i32) {
    %c0_i32 = arith.constant 0 : i32
    %c0_i32_0 = arith.constant 0 : i32
    %c0_i32_1 = arith.constant 0 : i32
    return %arg0, %c0_i32, %c0_i32_0 : i32, i32, i32
  }
  func.func @transform_17(%arg0: i32) -> (i32, i32, i32) {
    %c0_i32 = arith.constant 0 : i32
    %c0_i32_0 = arith.constant 0 : i32
    %c0_i32_1 = arith.constant 0 : i32
    return %arg0, %c0_i32, %c0_i32_0 : i32, i32, i32
  }
  func.func @transform_18(%arg0: i32) -> (i32, i32, i32) {
    %c0_i32 = arith.constant 0 : i32
    %c0_i32_0 = arith.constant 0 : i32
    %c0_i32_1 = arith.constant 0 : i32
    return %arg0, %c0_i32, %c0_i32_0 : i32, i32, i32
  }
  func.func @transform_19(%arg0: i32) -> (i32, i32, i32) {
    %c0_i32 = arith.constant 0 : i32
    %c0_i32_0 = arith.constant 0 : i32
    %c0_i32_1 = arith.constant 0 : i32
    return %arg0, %c0_i32, %c0_i32_0 : i32, i32, i32
  }
  func.func @transform_20(%arg0: i32) -> (i32, i32, i32) {
    %c0_i32 = arith.constant 0 : i32
    %c0_i32_0 = arith.constant 0 : i32
    %c0_i32_1 = arith.constant 0 : i32
    return %arg0, %c0_i32, %c0_i32_0 : i32, i32, i32
  }
  func.func @transform_21(%arg0: i32) -> (i32, i32) {
    %c0_i32 = arith.constant 0 : i32
    %c0_i32_0 = arith.constant 0 : i32
    %c0_i32_1 = arith.constant 0 : i32
    return %c0_i32, %c0_i32_0 : i32, i32
  }
  func.func @transform_22(%arg0: i32) -> (i32, i32) {
    %c0_i32 = arith.constant 0 : i32
    %c0_i32_0 = arith.constant 0 : i32
    %c0_i32_1 = arith.constant 0 : i32
    return %c0_i32, %c0_i32_0 : i32, i32
  }
  func.func @transform_23(%arg0: i32) -> (i32, i32) {
    %c0_i32 = arith.constant 0 : i32
    %c0_i32_0 = arith.constant 0 : i32
    %c0_i32_1 = arith.constant 0 : i32
    return %c0_i32, %c0_i32_0 : i32, i32
  }
}

</mosaic_0001>

<bundles_post_ra>
// kernel: eq.36
= control target key start
LH: loop header
LB: loop body
LE: loop exit
PB: predicated region body
PF: predicated region fallthrough
CT: control target
= control target key end

     0   :  { %vm7_vm0 = vcmask 64512   ;;  %vm13_vm1 = vcmask 130112   ;;  %s39_s0 = inlined_call_operand.vmem [shape: s32[2,8], index: 0, kind: input, shape index: {}]   ;;  %s40_s1 = inlined_call_operand.vmem [shape: s32[16], index: 1, kind: output, shape index: {}]  }
   0x1   :  { %v4_v0 = vld [vmem:[%s39_s0] sm:$0x3]  ;;  %s22_s0 = smov 8  }
   0x2   :  { %5 = vst [vmem:[#allocation1] sm:$0x3] %v4_v0 }
   0x9   :  { %v10_v1 = vld [vmem:[#allocation1 + $0x1] sm:$0x1]   ;;  %v6_v2 = vld [vmem:[#allocation1] sm:$0x1]  }
   0xa   :  { %11 = vrot.lane.b32.xlu0 %v10_v1, %s22_s0  ;;  %8 = vst.msk [vmem:[#allocation0] sm:$0x1] %vm7_vm0, %v6_v2  }
  0x7c   :  { %v12_v3 = vpop.permute.xlu0 %11  }
  0x7d   :  { %14 = vst.msk [vmem:[#allocation0] sm:$0x1] %vm13_vm1, %v12_v3  }
  0x84   :  { %v18_v4 = vld [vmem:[#allocation0] sm:$0x1] }
  0x85   :  { %20 = vst [vmem:[%s40_s1] sm:$0x1] %v18_v4 }

// kernel: eq.43
= control target key start
LH: loop header
LB: loop body
LE: loop exit
PB: predicated region body
PF: predicated region fallthrough
CT: control target
= control target key end

     0   :  { %vm7_vm0 = vcmask 48128   ;;  %vm13_vm1 = vcmask 97328   ;;  %s39_s0 = inlined_call_operand.vmem [shape: s32[2,6], index: 0, kind: input, shape index: {}]   ;;  %s40_s1 = inlined_call_operand.vmem [shape: s32[12], index: 1, kind: output, shape index: {}]  }
   0x1   :  { %v4_v0 = vld [vmem:[%s39_s0] sm:$0x3]  ;;  %s22_s0 = smov 6  }
   0x2   :  { %5 = vst [vmem:[#allocation1] sm:$0x3] %v4_v0 }
   0x9   :  { %v10_v1 = vld [vmem:[#allocation1 + $0x1] sm:$0x1]   ;;  %v6_v2 = vld [vmem:[#allocation1] sm:$0x1]  }
   0xa   :  { %11 = vrot.lane.b32.xlu0 %v10_v1, %s22_s0  ;;  %8 = vst.msk [vmem:[#allocation0] sm:$0x1] %vm7_vm0, %v6_v2  }
  0x7c   :  { %v12_v3 = vpop.permute.xlu0 %11  }
  0x7d   :  { %14 = vst.msk [vmem:[#allocation0] sm:$0x1] %vm13_vm1, %v12_v3  }
  0x84   :  { %v18_v4 = vld [vmem:[#allocation0] sm:$0x1] }
  0x85   :  { %20 = vst [vmem:[%s40_s1] sm:$0x1] %v18_v4 }

// kernel: tile.29
= control target key start
LH: loop header
LB: loop body
LE: loop exit
PB: predicated region body
PF: predicated region fallthrough
CT: control target
= control target key end

     0   :  { %vm3_vm0 = vcmask 654336   ;;  %s34_s0 = inlined_call_operand.vmem [shape: f32[2,6,80], index: 0, kind: input, shape index: {}]   ;;  %s35_s1 = inlined_call_operand.vmem [shape: f32[12,80], index: 1, kind: output, shape index: {}]  }
   0x1   :  { %v2_v0 = vld [vmem:[%s34_s0] sm:$0x3f]   ;;  %v10_v1 = vld [vmem:[%s34_s0 + $0x8] sm:$0x3f]  }
   0x2   :  { %4 = vst.msk [vmem:[%s35_s1] sm:$0x3f] %vm3_vm0, %v2_v0   ;;  %11 = vst.msk [vmem:[%s35_s1 + $0x6] sm:$0x3f] %vm3_vm0, %v10_v1  }

// kernel: forward.2
= control target key start
LH: loop header
LB: loop body
LE: loop exit
PB: predicated region body
PF: predicated region fallthrough
CT: control target
= control target key end

     0   :  { %s7644_s29 = smov 0   ;;  %s8407_s0 = inlined_call_operand.vmem [shape: f32[16,80], index: 0, kind: input, shape index: {}]   ;;  %s8408_s1 = inlined_call_operand.vmem [shape: f32[16,80], index: 1, kind: input, shape index: {}]   ;;  %s8409_s2 = inlined_call_operand.vmem [shape: f32[16,16], index: 2, kind: input, shape index: {}]   ;;  %s8410_s3 = inlined_call_operand.vmem [shape: bf16[80,80], index: 3, kind: input, shape index: {}]   ;;  %s8411_s4 = inlined_call_operand.vmem [shape: f32[1,80], index: 4, kind: input, shape index: {}]   ;;  %s8412_s5 = inlined_call_operand.vmem [shape: bf16[8,80,240], index: 5, kind: input, shape index: {}]   ;;  %s8413_s6 = inlined_call_operand.vmem [shape: f32[8,1,240], index: 6, kind: input, shape index: {}]   ;;  %s8414_s7 = inlined_call_operand.vmem [shape: f32[8,80,80], index: 7, kind: input, shape index: {}]   ;;  %s8415_s8 = inlined_call_operand.vmem [shape: f32[8,1,80], index: 8, kind: input, shape index: {}]   ;;  %s8416_s9 = inlined_call_operand.vmem [shape: bf16[8,80,2048], index: 9, kind: input, shape index: {}]   ;;  %s8417_s10 = inlined_call_operand.vmem [shape: f32[8,1,2048], index: 10, kind: input, shape index: {}]   ;;  %s8418_s11 = inlined_call_operand.vmem [shape: bf16[8,2048,80], index: 11, kind: input, shape index: {}]   ;;  %s8419_s12 = inlined_call_operand.vmem [shape: f32[8,1,80], index: 12, kind: input, shape index: {}]   ;;  %s8420_s13 = inlined_call_operand.vmem [shape: f32[8,4,80], index: 13, kind: input, shape index: {}]   ;;  %s8421_s14 = inlined_call_operand.vmem [shape: f32[16,80], index: 14, kind: output, shape index: {}]  }
   0x1   :  { %8426 = sst [smem:[#allocation4_spill]] %s8408_s1 }
   0x2   :  { %8427 = sst [smem:[#allocation5_spill]] %s8409_s2 }
   0x3   :  { %8428 = sst [smem:[#allocation6_spill]] %s8412_s5 }
   0x4   :  { %8429 = sst [smem:[#allocation7_spill]] %s8413_s6 }
   0x5   :  { %8430 = sst [smem:[#allocation8_spill]] %s8414_s7 }
   0x6   :  { %8431 = sst [smem:[#allocation9_spill]] %s8421_s14 }
   0x7 LB: > { %8432 = sst [smem:[#allocation3_spill]] %s7549_s29  ;;  %s7650_s30 = sadd.s32 4294967295, %s7549_s29   ;;  %s7549_s29 = sphi %s7644_s29, %s24_s29  }
   0x8   : > { %p6235_p0 = scmp.ge.s32.totalorder %s7549_s29, 1  ;;  %p480_p1 = scmp.lt.s32.totalorder %s7549_s29, 9 }
   0xa   : > { %p481_p2 = pnand %p6235_p0, %p480_p1 }
   0xb   : > { %p554_p3 = scmp.lt.s32.totalorder (!%p481_p2), %s7650_s30, 7  ;;  %s8433_s6 = sld [smem:[#allocation7_spill]] (!%p481_p2) }
   0xc   : > { %484 = sbr.rel (%p481_p2) target bundleno = 5896 (0x1708), region = 76  ;;  %s8434_s5 = sld [smem:[#allocation6_spill]] (!%p481_p2) }
   0xd   : > { %s8435_s7 = sld [smem:[#allocation8_spill]] (!%p481_p2)  ;;  %p6244_p4 = scmp.ne.s32.totalorder (!%p481_p2), %s7650_s30, 0 }
  0x13   : > { %s7656_s15 = scalar_select %p554_p3, %s7650_s30, 7 }
  0x14   : > { %v7207_v0 = vld [vmem:[%s8410_s3] sm:$0xff] (!%p6244_p4)   ;;  %v7551_v1 = vmov (!%p6244_p4), 0.0   ;;  %v7208_v2 = vld [vmem:[%s8410_s3 + $0x8] sm:$0xff] (!%p6244_p4)   ;;  %vm7552_vm0 = vmmov (!%p6244_p4), 0   ;;  %v7209_v3 = vld [vmem:[%s8410_s3 + $0x10] sm:$0xff] (!%p6244_p4)   ;;  %vm647_vm1 = vcmask (!%p6244_p4), 654336  }
  0x15   : > { %s7179_s16 = smul.u32 80, %s7656_s15  ;;  %s6237_s17 = sshll.u32 %s7656_s15, 1  ;;  %6857 = vmatprep.subr.bf16.mxu0 (!%p6244_p4), %v7551_v1  ;;  %6867 = vmatprep.mubr.msk.bf16.mxu0 (!%p6244_p4), %vm7552_vm0, %v7551_v1  ;;  %v7210_v4 = vld [vmem:[%s8410_s3 + $0x18] sm:$0xff] (!%p6244_p4)   ;;  %v7211_v5 = vld [vmem:[%s8410_s3 + $0x20] sm:$0xff] (!%p6244_p4)   ;;  %v598_v7 = vld [vmem:[%s8407_s0 + $0x8] sm:$0xff] (!%p6244_p4) }
  0x16   : > { %s7663_s20 = scalar_lea.vmem %s8433_s6, %s6237_s17  ;;  %s7180_s14 = smul.u32 640, %s7656_s15  ;;  %6858 = vmatpush3.bf16.msra.mxu0 (!%p6244_p4), %v7207_v0  ;;  %v597_v6 = vld [vmem:[%s8407_s0] sm:$0xff] (!%p6244_p4) }
  0x17   : > { %s7672_s26 = scalar_lea.vmem %s8434_s5, %s7179_s16  ;;  %s7677_s29 = scalar_lea.vmem %s8435_s7, %s7179_s16  ;;  %6859 = vmatprep.subr.bf16.mxu0 (!%p6244_p4), %v7551_v1  ;;  %v599_v8 = vpack.c.bf16 (!%p6244_p4), %v598_v7, %v597_v6  ;;  %v6245_v9 = vld [vmem:[%s8411_s4] ss:$0 sm:$0xff] (!%p6244_p4) }
  0x18   : > { %s6240_s2 = sshll.u32 %s7656_s15, 4  ;;  %s6564_s19 = sshll.u32 %s7656_s15, 10 }
  0x19   : > { %s7684_s17 = scalar_lea.vmem %s8417_s10, %s6240_s2  ;;  %s7690_s23 = scalar_lea.vmem %s8416_s9, %s7180_s14 }
  0x1a   : > { %s7695_s5 = scalar_lea.vmem %s8418_s11, %s6564_s19  ;;  %s587_s28 = scalar_lea.vmem %s8419_s12, %s7656_s15  ;;  %6860 = vmatpush3.bf16.msra.mxu0 (!%p6244_p4), %v7208_v2 }
  0x1b   : > { %s6243_s6 = sshll.u32 %s7656_s15, 2  ;;  %596 = sbr.rel (%p6244_p4) target bundleno = 260 (0x104), region = 80  ;;  %6861 = vmatprep.subr.bf16.mxu0 (!%p6244_p4), %v7551_v1 }
  0x1c   : > { %s7705_s2 = scalar_lea.vmem %s8420_s13, %s6243_s6  ;;  %s8436_s22 = sld [smem:[#allocation4_spill]] (!%p6244_p4) }
  0x1e   : > { %6862 = vmatpush3.bf16.msra.mxu0 (!%p6244_p4), %v7209_v3 }
  0x1f   : > { %6863 = vmatprep.subr.bf16.mxu0 (!%p6244_p4), %v7551_v1 }
  0x22   : > { %6864 = vmatpush3.bf16.msra.mxu0 %v7210_v4  ;;  %v692_v11 = vld [vmem:[%s8436_s22] sm:$0xff]  ;;  %v693_v15 = vld [vmem:[%s8436_s22 + $0x8] sm:$0xff] }
  0x23   : > { %6865 = vmatprep.subr.bf16.mxu0 %v7551_v1 }
  0x26   : > { %6866 = vmatpush3.bf16.msra.mxu0 %v7211_v5 }
  0x29   : > { %6868 = vmatmul.mubr.msk.bf16.vlgmr.msra.gmra.mrb[0].mxu0 %vm647_vm1, %v599_v8 }
  0xfc   : > { %v685_v10 = vpop.f32.mrb[0].mxu0 }
  0xfd   : > { %v686_v12 = vadd.f32 %v6245_v9, %v685_v10  ;;  %v6869_v13 = vpop.f32.mrb[1].mxu0 }
  0xfe   : > { %v688_v14 = vpop.f32.mrb[2].mxu0 }
  0xff   : > { %v694_v16 = vadd.f32 %v692_v11, %v686_v12  ;;  %v689_v17 = vadd.f32 %v6245_v9, %v688_v14  ;;  %v6870_v18 = vpop.f32.mrb[3].mxu0 }
 0x101   : > { %696 = vst.msk [vmem:[#allocation2] sm:$0xff] %vm647_vm1, %v694_v16  ;;  %v695_v19 = vadd.f32 %v693_v15, %v689_v17 }
 0x103   : > { %697 = vst.msk [vmem:[#allocation2 + $0x8] sm:$0xff] %vm647_vm1, %v695_v19 }
 0x104 PF: > { %v7307_v20 = vld [vmem:[%s7672_s26 + $0x4] ss:$8 sps:$4 sm:$0xff]   ;;  %v7309_v21 = vld [vmem:[%s7672_s26] ss:$8 sps:$4 sm:$0xff]   ;;  %v7553_v22 = vmov 0   ;;  %vm776_vm2 = vcmask 654336   ;;  %v716_v34 = vlaneseq }
 0x105   : > { %812 = vmatprep.mubr.bf16.mxu0 %v7553_v22  ;;  %780 = vmatprep.subr.bf16.mxu0 %v7307_v20  ;;  %v7310_v23 = vld [vmem:[%s7672_s26 + $0x14] ss:$8 sps:$4 sm:$0xff]   ;;  %v7312_v24 = vld [vmem:[%s7672_s26 + $0x10] ss:$8 sps:$4 sm:$0xff]   ;;  %v7313_v25 = vld [vmem:[%s7672_s26 + $0x24] ss:$8 sps:$4 sm:$0xff]  }
 0x106   : > { %781 = vmatpush1.bf16.msra.mxu0 %v7309_v21  ;;  %v7315_v26 = vld [vmem:[%s7672_s26 + $0x20] ss:$8 sps:$4 sm:$0xff]   ;;  %v7316_v27 = vld [vmem:[%s7672_s26 + $0x34] ss:$8 sps:$4 sm:$0xff]   ;;  %v7318_v28 = vld [vmem:[%s7672_s26 + $0x30] ss:$8 sps:$4 sm:$0xff]  }
 0x107   : > { %782 = vmatprep.subr.bf16.mxu0 %v7310_v23  ;;  %v7319_v29 = vld [vmem:[%s7672_s26 + $0x44] ss:$8 sps:$4 sm:$0xff]   ;;  %v7321_v30 = vld [vmem:[%s7672_s26 + $0x40] ss:$8 sps:$4 sm:$0xff]   ;;  %v7750_v35 = vshrl.u32 %v716_v34, 7  ;;  %vm839_vm3 = vcmask 64512  }
 0x108   : > { %v698_v31 = vld [vmem:[#allocation2] sm:$0xff]  ;;  %vm7779_vm4 = vmpackc.low %vm839_vm3, %vm839_vm3  ;;  %s8439_s27 = sld [smem:[#allocation5_spill]]  ;;  %vm927_vm5 = vcmask 130048   ;;  %s7555_s18 = smov 96   ;;  %v830_v55 = vld [vmem:[%s7677_s29 + $0x38] sm:$0xff] }
 0x109   : > { %v7753_v36 = vsub.s32 0, %v7750_v35  ;;  %v714_v37 = vld [vmem:[%s7663_s20] sm:$0x3]  ;;  %v7757_v38 = vsub.s32 1, %v7750_v35  ;;  %s7554_s20 = smov 48   ;;  %s7556_s19 = smov 40  }
 0x10a   : > { %783 = vmatpush1.bf16.msra.mxu0 %v7312_v24  ;;  %v699_v32 = vld [vmem:[#allocation2 + $0x8] sm:$0xff]  ;;  %s7557_s21 = smov 120   ;;  %s7558_s6 = smov 32  }
 0x10b   : > { %784 = vmatprep.subr.bf16.mxu0 %v7313_v25  ;;  %v703_v33 = vpack.c.bf16 %v699_v32, %v698_v31  ;;  %v719_v39 = vrot.slane %v714_v37, %v7753_v36  ;;  %v723_v41 = vrot.slane %v714_v37, %v7757_v38  ;;  %s7559_s7 = smov 104   ;;  %s7560_s24 = smov 88  }
 0x10c   : > { %s7561_s25 = smov 112   ;;  %s7562_s26 = smov 24  }
 0x10d   : > { %s7563_s16 = smov 80   ;;  %s7564_s1 = smov 72  }
 0x10e   : > { %785 = vmatpush1.bf16.msra.mxu0 %v7315_v26  ;;  %v7792_v58 = vld [vmem:[%s8439_s27 + $0x8] sm:$0xff]  ;;  %v7797_v61 = vld [vmem:[%s8439_s27] sm:$0xff]  ;;  %s7565_s14 = smov 16   ;;  %p6561_p5 = scmp.ne.s32.totalorder %s7650_s30, 7 }
 0x10f   : > { %786 = vmatprep.subr.bf16.mxu0 %v7316_v27 }
 0x112   : > { %787 = vmatpush1.bf16.msra.mxu0 %v7318_v28 }
 0x113   : > { %788 = vmatprep.subr.bf16.mxu0 %v7319_v29 }
 0x116   : > { %789 = vmatpush1.bf16.msra.mxu0 %v7321_v30  ;;  %v823_v30 = vld [vmem:[%s7677_s29] sm:$0xff] }
 0x117   : > { %6904 = vmatprep.subr.mxu0 %v823_v30 }
 0x119   : > { %6262 = vmatmul.mubr.msk.bf16.vlgmr.msra.gmra.mrb[0].mxu0 %vm776_vm2, %v703_v33 }
 0x11a   : > { %6905 = vmatpush3.msra.mxu0 %v823_v30 }
 0x1ec   : > { %v814_v40 = vpop.f32.mrb[0].mxu0 }
 0x1ed   : > { %v7761_v42 = vadd.f32 %v814_v40, %v719_v39  ;;  %v816_v43 = vpop.f32.mrb[1].mxu0 }
 0x1ee   : > { %v818_v44 = vpop.f32.mrb[2].mxu0  ;;  %v817_v47 = vadd.f32 %v816_v43, %v723_v41 }
 0x1ef   : > { %v7763_v45 = vadd.f32 %v818_v44, %v719_v39  ;;  %v820_v46 = vpop.f32.mrb[3].mxu0  ;;  %6875 = vmatprep.mubr.msk.f32.mxu1 %vm839_vm3, %v7761_v42 }
 0x1f0   : > { %v821_v48 = vadd.f32 %v820_v46, %v723_v41 }
 0x1f1   : > { %v7769_v49 = vpack.i.bf16 %v7763_v45, %v7761_v42 }
 0x1f2   : > { %v7771_v50 = vpack.i.bf16 %v821_v48, %v817_v47  ;;  %v7775_v51 = vpack.c.bf16 %v821_v48, %v817_v47 }
 0x1f3   : > { %7213 = vrot.lane.b32.xlu0 %v7769_v49, %s7554_s20 }
 0x265   : > { %v7214_v52 = vpop.permute.xlu0 %7213 }
 0x266   : > { %v7216_v53 = vunpack.i.h.bf16 %v7214_v52  ;;  %v7215_v54 = vunpack.i.l.bf16 %v7214_v52 }
 0x268   : > { %v7061_v56 = vpack.c.bf16 %v7216_v53, %v7215_v54 }
 0x26a   : > { %7063 = vmatprep.subr.msk.bf16.mxu1 %vm7779_vm4, %v7061_v56 }
 0x26b   : > { %7066 = vmatpush3.bf16.xpose.msk.msra.mxu1 %vm7779_vm4, %v7061_v56 }
 0x272   : > { %6876 = vmatmul.mubr.msk.f32.vlgmr.msra.gmra.mrb[0].mxu1 %vm839_vm3, %v7763_v45 }
 0x345   : > { %v6877_v57 = vpop.f32.mrb[0].mxu1 }
 0x346   : > { %v924_v59 = vmul.f32 0.35355338, %v6877_v57  ;;  %v914_v60 = vpop.f32.mrb[1].mxu1 }
 0x347   : > { %v923_v62 = vmul.f32 0.35355338, %v914_v60 }
 0x348   : > { %v926_v63 = vadd.f32 %v924_v59, %v7792_v58 }
 0x349   : > { %v925_v0 = vadd.f32 %v923_v62, %v7797_v61 }
 0x34a   : > { %v931_v1 = vsel %vm927_vm5, %v926_v63, -inf }
 0x34b   : > { %932 = vmax.xlane.f32.xlu1 %v931_v1  ;;  %v928_v2 = vsel %vm927_vm5, %v925_v0, -inf }
 0x34c   : > { %929 = vmax.xlane.f32.xlu0 %v928_v2 }
 0x35c   : > { %7218 = vrot.lane.b32.xlu1 %v7771_v50, %s7555_s18 }
 0x360   : > { %7223 = vrot.lane.b32.xlu1 %v7769_v49, %s7556_s19 }
 0x362   : > { %1041 = vrot.lane.b32.xlu0 %v7763_v45, %s7557_s21 }
 0x3d8   : > { %v933_v3 = vpop.xlane.xlu1 %932 }
 0x3d9   : > { %v935_v4 = vsub.f32 %v926_v63, %v933_v3  ;;  %v930_v5 = vpop.xlane.xlu0 %929 }
 0x3da   : > { %v934_v6 = vsub.f32 %v925_v0, %v930_v5  ;;  %v824_v5 = vld [vmem:[%s7677_s29 + $0x8] sm:$0xff] }
 0x3db   : > { %v938_v7 = vmul.f32 1.442695, %v935_v4 }
 0x3dc   : > { %v936_v8 = vmul.f32 1.442695, %v934_v6  ;;  %v7219_v9 = vpop.permute.xlu1 %7218 }
 0x3dd   : > { %7450 = vpow2.f32 %v938_v7  ;;  %v7221_v10 = vunpack.i.h.bf16 %v7219_v9  ;;  %v7220_v11 = vunpack.i.l.bf16 %v7219_v9  ;;  %v1042_v29 = vpop.permute.xlu0 %1041 }
 0x3de   : > { %7452 = vpow2.f32 %v936_v8 }
 0x3df   : > { %v7067_v12 = vpack.c.bf16 %v7221_v10, %v7220_v11 }
 0x3e0   : > { %v7224_v13 = vpop.permute.xlu1 %7223 }
 0x3e1   : > { %v7226_v14 = vunpack.i.h.bf16 %v7224_v13  ;;  %v7225_v15 = vunpack.i.l.bf16 %v7224_v13  ;;  %7068 = vmatprep.subr.bf16.mxu1 %v7067_v12 }
 0x3e2   : > { %7070 = vmatpush3.bf16.msra.mxu1 %v7067_v12 }
 0x3e3   : > { %v7071_v16 = vpack.c.bf16 %v7226_v14, %v7225_v15 }
 0x3e5   : > { %7073 = vmatprep.subr.msk.bf16.mxu1 %vm7779_vm4, %v7071_v16 }
 0x3e7   : > { %v7451_v17 = vpop.eup %7450 }
 0x3e8   : > { %v943_v18 = vsel %vm927_vm5, %v7451_v17, 0.0  ;;  %v7453_v19 = vpop.eup %7452 }
 0x3e9   : > { %944 = vadd.xlane.f32.xlu1 %v943_v18  ;;  %v940_v20 = vsel %vm927_vm5, %v7453_v19, 0.0 }
 0x3ed   : > { %941 = vadd.xlane.f32.xlu1 %v940_v20 }
 0x3fe   : > { %1039 = vrot.lane.b32.xlu1 %v7761_v42, %s7557_s21 }
 0x476   : > { %v945_v21 = vpop.xlane.xlu1 %944 }
 0x477   : > { %7454 = vrcp.f32 %v945_v21 }
 0x47a   : > { %v942_v23 = vpop.xlane.xlu1 %941 }
 0x47b   : > { %7456 = vrcp.f32 %v942_v23 }
 0x47e   : > { %v1040_v28 = vpop.permute.xlu1 %1039 }
 0x481   : > { %v7455_v24 = vpop.eup %7454 }
 0x482   : > { %v949_v27 = vmul.f32 %v7455_v24, %v7451_v17 }
 0x485   : > { %v7457_v25 = vpop.eup %7456 }
 0x486   : > { %v947_v26 = vmul.f32 %v7457_v25, %v7453_v19 }
 0x488   : > { %6882 = vmatprep.mubr.msk.f32.mxu1 %vm927_vm5, %v947_v26 }
 0x489   : > { %6883 = vmatmul.mubr.msk.f32.vlgmr.msra.gmra.mrb[2].mxu1 %vm927_vm5, %v949_v27 }
 0x48a   : > { %7076 = vmatpush3.bf16.xpose.msk.msra.mxu1 %vm7779_vm4, %v7071_v16  ;;  %6889 = vmatprep.mubr.msk.f32.mxu1 %vm839_vm3, %v1040_v28 }
 0x491   : > { %6890 = vmatmul.mubr.msk.f32.vlgmr.msra.gmra.mrb[4].mxu1 %vm839_vm3, %v1042_v29 }
 0x55c   : > { %v6884_v31 = vpop.f32.mrb[2].mxu1 }
 0x55d   : > { %v1030_v32 = vpop.f32.mrb[3].mxu1 }
 0x55e   : > { %6906 = vmatprep.mubr.msk.f32.mxu0 %vm839_vm3, %v1030_v32 }
 0x55f   : > { %6907 = vmatmul.mubr.msk.f32.vlgmr.msra.gmra.mrb[4].mxu0 %vm839_vm3, %v6884_v31 }
 0x564   : > { %v6891_v33 = vpop.f32.mrb[4].mxu1 }
 0x565   : > { %v1131_v34 = vmul.f32 0.35355338, %v6891_v33  ;;  %v1121_v37 = vpop.f32.mrb[5].mxu1 }
 0x566   : > { %v1130_v39 = vmul.f32 0.35355338, %v1121_v37 }
 0x567   : > { %v1133_v40 = vadd.f32 %v1131_v34, %v7792_v58 }
 0x568   : > { %v1132_v41 = vadd.f32 %v1130_v39, %v7797_v61 }
 0x569   : > { %v1137_v43 = vsel %vm927_vm5, %v1133_v40, -inf }
 0x56a   : > { %1138 = vmax.xlane.f32.xlu0 %v1137_v43  ;;  %v1134_v44 = vsel %vm927_vm5, %v1132_v41, -inf }
 0x56b   : > { %1135 = vmax.xlane.f32.xlu1 %v1134_v44 }
 0x580   : > { %7233 = vrot.lane.b32.xlu0 %v7769_v49, %s7558_s6 }
 0x584   : > { %1692 = vrot.lane.b32.xlu0 %v7761_v42, %s7559_s7 }
 0x5f7   : > { %v1139_v46 = vpop.xlane.xlu0 %1138 }
 0x5f8   : > { %v1141_v47 = vsub.f32 %v1133_v40, %v1139_v46  ;;  %v1136_v48 = vpop.xlane.xlu1 %1135 }
 0x5f9   : > { %v1140_v52 = vsub.f32 %v1132_v41, %v1136_v48 }
 0x5fa   : > { %v1144_v53 = vmul.f32 1.442695, %v1141_v47 }
 0x5fb   : > { %v1142_v54 = vmul.f32 1.442695, %v1140_v52  ;;  %v7234_v4 = vpop.permute.xlu0 %7233 }
 0x5fc   : > { %7458 = vpow2.f32 %v1144_v53  ;;  %v7236_v8 = vunpack.i.h.bf16 %v7234_v4  ;;  %v7235_v9 = vunpack.i.l.bf16 %v7234_v4 }
 0x5fd   : > { %7460 = vpow2.f32 %v1142_v54 }
 0x5fe   : > { %v7081_v12 = vpack.c.bf16 %v7236_v8, %v7235_v9 }
 0x5ff   : > { %v1693_v21 = vpop.permute.xlu0 %1692 }
 0x606   : > { %v7459_v56 = vpop.eup %7458 }
 0x607   : > { %v1149_v57 = vsel %vm927_vm5, %v7459_v56, 0.0  ;;  %v7461_v59 = vpop.eup %7460 }
 0x608   : > { %1150 = vadd.xlane.f32.xlu1 %v1149_v57  ;;  %v1146_v60 = vsel %vm927_vm5, %v7461_v59, 0.0 }
 0x60c   : > { %1147 = vadd.xlane.f32.xlu1 %v1146_v60 }
 0x61d   : > { %7228 = vrot.lane.b32.xlu1 %v7771_v50, %s7560_s24 }
 0x621   : > { %1405 = vrot.lane.b32.xlu1 %v7761_v42, %s7561_s25 }
 0x625   : > { %1407 = vrot.lane.b32.xlu1 %v7763_v45, %s7561_s25 }
 0x629   : > { %7238 = vrot.lane.b32.xlu1 %v7769_v49, %s7562_s26 }
 0x62d   : > { %1694 = vrot.lane.b32.xlu1 %v7763_v45, %s7559_s7 }
 0x695   : > { %v1151_v62 = vpop.xlane.xlu1 %1150 }
 0x696   : > { %7462 = vrcp.f32 %v1151_v62 }
 0x699   : > { %v1148_v63 = vpop.xlane.xlu1 %1147 }
 0x69a   : > { %7464 = vrcp.f32 %v1148_v63 }
 0x69d   : > { %v7229_v0 = vpop.permute.xlu1 %7228 }
 0x69e   : > { %v7231_v1 = vunpack.i.h.bf16 %v7229_v0  ;;  %v7230_v2 = vunpack.i.l.bf16 %v7229_v0 }
 0x6a0   : > { %v7077_v3 = vpack.c.bf16 %v7231_v1, %v7230_v2  ;;  %v7463_v6 = vpop.eup %7462  ;;  %v825_v1 = vld [vmem:[%s7677_s29 + $0x10] sm:$0xff] }
 0x6a1   : > { %v1155_v11 = vmul.f32 %v7463_v6, %v7459_v56  ;;  %v1406_v13 = vpop.permute.xlu1 %1405 }
 0x6a2   : > { %7078 = vmatprep.subr.bf16.mxu1 %v7077_v3 }
 0x6a3   : > { %7080 = vmatpush3.bf16.msra.mxu1 %v7077_v3 }
 0x6a4   : > { %v7465_v7 = vpop.eup %7464  ;;  %6899 = vmatprep.subr.mxu1 %v824_v5 }
 0x6a5   : > { %v1153_v10 = vmul.f32 %v7465_v7, %v7461_v59  ;;  %v1408_v14 = vpop.permute.xlu1 %1407 }
 0x6a7   : > { %6896 = vmatprep.mubr.msk.f32.mxu1 %vm927_vm5, %v1153_v10 }
 0x6a8   : > { %6897 = vmatmul.mubr.msk.f32.vlgmr.msra.gmra.mrb[6].mxu1 %vm927_vm5, %v1155_v11 }
 0x6a9   : > { %6900 = vmatpush3.msra.mxu1 %v824_v5  ;;  %v7239_v15 = vpop.permute.xlu1 %7238 }
 0x6aa   : > { %7083 = vmatprep.subr.msk.bf16.mxu1 %vm7779_vm4, %v7081_v12  ;;  %v7241_v16 = vunpack.i.h.bf16 %v7239_v15  ;;  %v7240_v17 = vunpack.i.l.bf16 %v7239_v15 }
 0x6ac   : > { %v7091_v20 = vpack.c.bf16 %v7241_v16, %v7240_v17 }
 0x6ad   : > { %v1695_v23 = vpop.permute.xlu1 %1694 }
 0x77b   : > { %v6898_v18 = vpop.f32.mrb[6].mxu1 }
 0x77c   : > { %v1234_v19 = vpop.f32.mrb[7].mxu1 }
 0x77d   : > { %6901 = vmatprep.mubr.msk.f32.mxu1 %vm839_vm3, %v1234_v19 }
 0x77e   : > { %6902 = vmatmul.mubr.msk.f32.vlgmr.msra.gmra.mrb[8].mxu1 %vm839_vm3, %v6898_v18 }
 0x77f   : > { %7086 = vmatpush3.bf16.xpose.msk.msra.mxu1 %vm7779_vm4, %v7081_v12  ;;  %6913 = vmatprep.mubr.msk.f32.mxu1 %vm839_vm3, %v1406_v13 }
 0x780   : > { %7093 = vmatprep.subr.msk.bf16.mxu1 %vm7779_vm4, %v7091_v20 }
 0x786   : > { %6914 = vmatmul.mubr.msk.f32.vlgmr.msra.gmra.mrb[10].mxu1 %vm839_vm3, %v1408_v14 }
 0x787   : > { %7096 = vmatpush3.bf16.xpose.msk.msra.mxu1 %vm7779_vm4, %v7091_v20  ;;  %6932 = vmatprep.mubr.msk.f32.mxu1 %vm839_vm3, %v1693_v21 }
 0x78e   : > { %6933 = vmatmul.mubr.msk.f32.vlgmr.msra.gmra.mrb[12].mxu1 %vm839_vm3, %v1695_v23 }
 0x851   : > { %v7861_v24 = vpop.f32.mrb[8].mxu1 }
 0x852   : > { %v7863_v25 = vpop.f32.mrb[9].mxu1 }
 0x859   : > { %v6915_v26 = vpop.f32.mrb[10].mxu1 }
 0x85a   : > { %v1497_v27 = vmul.f32 0.35355338, %v6915_v26  ;;  %v1487_v28 = vpop.f32.mrb[11].mxu1 }
 0x85b   : > { %v1496_v29 = vmul.f32 0.35355338, %v1487_v28 }
 0x85c   : > { %v1499_v30 = vadd.f32 %v1497_v27, %v7792_v58 }
 0x85d   : > { %v1498_v31 = vadd.f32 %v1496_v29, %v7797_v61 }
 0x85e   : > { %v1503_v32 = vsel %vm927_vm5, %v1499_v30, -inf }
 0x85f   : > { %1504 = vmax.xlane.f32.xlu1 %v1503_v32  ;;  %v1500_v33 = vsel %vm927_vm5, %v1498_v31, -inf }
 0x860   : > { %1501 = vmax.xlane.f32.xlu0 %v1500_v33 }
 0x861   : > { %v6934_v34 = vpop.f32.mrb[12].mxu1 }
 0x862   : > { %v1774_v37 = vpop.f32.mrb[13].mxu1  ;;  %v1784_v39 = vmul.f32 0.35355338, %v6934_v34 }
 0x863   : > { %v1783_v2 = vmul.f32 0.35355338, %v1774_v37 }
 0x864   : > { %v7876_v40 = vadd.f32 %v1784_v39, %v7792_v58 }
 0x865   : > { %v1785_v3 = vadd.f32 %v1783_v2, %v7797_v61 }
 0x866   : > { %v1790_v41 = vsel %vm927_vm5, %v7876_v40, -inf }
 0x867   : > { %v1787_v4 = vsel %vm927_vm5, %v1785_v3, -inf }
 0x870   : > { %7243 = vrot.lane.b32.xlu1 %v7771_v50, %s7563_s16 }
 0x874   : > { %1979 = vrot.lane.b32.xlu1 %v7761_v42, %s7555_s18 }
 0x878   : > { %1981 = vrot.lane.b32.xlu1 %v7763_v45, %s7555_s18  ;;  %s7566_s18 = smov 8  }
 0x89c   : > { %1791 = vmax.xlane.f32.xlu1 %v1790_v41 }
 0x8ad   : > { %7253 = vrot.lane.b32.xlu1 %v7771_v50, %s7564_s1 }
 0x8b1   : > { %2266 = vrot.lane.b32.xlu1 %v7761_v42, %s7560_s24 }
 0x8b5   : > { %2268 = vrot.lane.b32.xlu1 %v7763_v45, %s7560_s24  ;;  %s7567_s24 = smov 64  }
 0x8ec   : > { %v1505_v43 = vpop.xlane.xlu1 %1504 }
 0x8ed   : > { %v1507_v44 = vsub.f32 %v1499_v30, %v1505_v43  ;;  %v1502_v46 = vpop.xlane.xlu0 %1501 }
 0x8ee   : > { %v1506_v47 = vsub.f32 %v1498_v31, %v1502_v46 }
 0x8ef   : > { %v1510_v48 = vmul.f32 1.442695, %v1507_v44 }
 0x8f0   : > { %v1508_v52 = vmul.f32 1.442695, %v1506_v47  ;;  %v7244_v53 = vpop.permute.xlu1 %7243 }
 0x8f1   : > { %v7246_v54 = vunpack.i.h.bf16 %v7244_v53  ;;  %v7245_v56 = vunpack.i.l.bf16 %v7244_v53 }
 0x8f2   : > { %7466 = vpow2.f32 %v1508_v52 }
 0x8f3   : > { %v7087_v57 = vpack.c.bf16 %v7246_v54, %v7245_v56  ;;  %7468 = vpow2.f32 %v1510_v48 }
 0x8f4   : > { %v1980_v59 = vpop.permute.xlu1 %1979 }
 0x8f5   : > { %7088 = vmatprep.subr.bf16.mxu0 %v7087_v57  ;;  %6951 = vmatprep.mubr.msk.f32.mxu1 %vm839_vm3, %v1980_v59 }
 0x8f6   : > { %7090 = vmatpush3.bf16.msra.mxu0 %v7087_v57 }
 0x8f7   : > { %6923 = vmatprep.subr.mxu0 %v825_v1 }
 0x8f8   : > { %v1982_v6 = vpop.permute.xlu1 %1981 }
 0x8fc   : > { %v7467_v60 = vpop.eup %7466 }
 0x8fd   : > { %v1512_v62 = vsel %vm927_vm5, %v7467_v60, 0.0  ;;  %v7469_v63 = vpop.eup %7468 }
 0x8fe   : > { %1513 = vadd.xlane.f32.xlu0 %v1512_v62  ;;  %v1515_v0 = vsel %vm927_vm5, %v7469_v63, 0.0 }
 0x902   : > { %1516 = vadd.xlane.f32.xlu0 %v1515_v0 }
 0x918   : > { %7248 = vrot.lane.b32.xlu0 %v7769_v49, %s7565_s14 }
 0x929   : > { %v1792_v8 = vpop.xlane.xlu1 %1791 }
 0x92a   : > { %v1794_v23 = vsub.f32 %v7876_v40, %v1792_v8 }
 0x92c   : > { %v1797_v28 = vmul.f32 1.442695, %v1794_v23 }
 0x92d   : > { %v7254_v13 = vpop.permute.xlu1 %7253 }
 0x92e   : > { %v7256_v16 = vunpack.i.h.bf16 %v7254_v13  ;;  %v7255_v17 = vunpack.i.l.bf16 %v7254_v13 }
 0x930   : > { %v7097_v20 = vpack.c.bf16 %v7256_v16, %v7255_v17 }
 0x931   : > { %v2267_v21 = vpop.permute.xlu1 %2266 }
 0x935   : > { %v2269_v59 = vpop.permute.xlu1 %2268 }
 0x937   : > { %1788 = vmax.xlane.f32.xlu0 %v1787_v4 }
 0x98b   : > { %v1514_v5 = vpop.xlane.xlu0 %1513 }
 0x98c   : > { %7470 = vrcp.f32 %v1514_v5 }
 0x98f   : > { %v1517_v7 = vpop.xlane.xlu0 %1516 }
 0x990   : > { %7472 = vrcp.f32 %v1517_v7 }
 0x993   : > { %v7249_v9 = vpop.permute.xlu0 %7248 }
 0x994   : > { %v7251_v10 = vunpack.i.h.bf16 %v7249_v9  ;;  %v7250_v11 = vunpack.i.l.bf16 %v7249_v9 }
 0x996   : > { %v7471_v12 = vpop.eup %7470  ;;  %v7101_v14 = vpack.c.bf16 %v7251_v10, %v7250_v11 }
 0x997   : > { %v1519_v15 = vmul.f32 %v7471_v12, %v7467_v60 }
 0x998   : > { %7103 = vmatprep.subr.msk.bf16.mxu1 %vm7779_vm4, %v7101_v14 }
 0x999   : > { %6920 = vmatprep.mubr.msk.f32.mxu0 %vm927_vm5, %v1519_v15  ;;  %7106 = vmatpush3.bf16.xpose.msk.msra.mxu1 %vm7779_vm4, %v7101_v14 }
 0x99a   : > { %v7473_v18 = vpop.eup %7472 }
 0x99b   : > { %v1521_v19 = vmul.f32 %v7473_v18, %v7469_v63 }
 0x99d   : > { %6921 = vmatmul.mubr.msk.f32.vlgmr.msra.gmra.mrb[6].mxu0 %vm927_vm5, %v1521_v19 }
 0x99e   : > { %6924 = vmatpush3.msra.mxu0 %v825_v1  ;;  %v826_v1 = vld [vmem:[%s7677_s29 + $0x18] sm:$0xff] }
 0x99f   : > { %7098 = vmatprep.subr.bf16.mxu0 %v7097_v20 }
 0x9a0   : > { %6952 = vmatmul.mubr.msk.f32.vlgmr.msra.gmra.mrb[14].mxu1 %vm839_vm3, %v1982_v6 }
 0x9a1   : > { %6970 = vmatprep.mubr.msk.f32.mxu1 %vm839_vm3, %v2267_v21 }
 0x9c4   : > { %v1789_v26 = vpop.xlane.xlu0 %1788 }
 0x9c5   : > { %v1793_v27 = vsub.f32 %v1785_v3, %v1789_v26 }
 0x9c7   : > { %v1795_v29 = vmul.f32 1.442695, %v1793_v27 }
 0x9c9   : > { %7474 = vpow2.f32 %v1795_v29 }
 0x9ca   : > { %7476 = vpow2.f32 %v1797_v28 }
 0x9d3   : > { %v7475_v30 = vpop.eup %7474 }
 0x9d4   : > { %v1799_v31 = vsel %vm927_vm5, %v7475_v30, 0.0  ;;  %v7477_v32 = vpop.eup %7476 }
 0x9d5   : > { %1800 = vadd.xlane.f32.xlu0 %v1799_v31  ;;  %v1802_v33 = vsel %vm927_vm5, %v7477_v32, 0.0 }
 0x9d9   : > { %1803 = vadd.xlane.f32.xlu0 %v1802_v33 }
 0x9ef   : > { %7258 = vrot.lane.b32.xlu0 %v7769_v49, %s7566_s18 }
 0xa62   : > { %v1801_v34 = vpop.xlane.xlu0 %1800 }
 0xa63   : > { %7478 = vrcp.f32 %v1801_v34 }
 0xa66   : > { %v1804_v37 = vpop.xlane.xlu0 %1803 }
 0xa67   : > { %7480 = vrcp.f32 %v1804_v37 }
 0xa6a   : > { %v7259_v39 = vpop.permute.xlu0 %7258 }
 0xa6b   : > { %v7261_v40 = vunpack.i.h.bf16 %v7259_v39  ;;  %v7260_v41 = vunpack.i.l.bf16 %v7259_v39 }
 0xa6d   : > { %v7111_v43 = vpack.c.bf16 %v7261_v40, %v7260_v41  ;;  %v7479_v44 = vpop.eup %7478 }
 0xa6e   : > { %v1806_v48 = vmul.f32 %v7479_v44, %v7475_v30 }
 0xa6f   : > { %7113 = vmatprep.subr.msk.bf16.mxu1 %vm7779_vm4, %v7111_v43 }
 0xa70   : > { %v6922_v46 = vpop.f32.mrb[6].mxu0  ;;  %7116 = vmatpush3.bf16.xpose.msk.msra.mxu1 %vm7779_vm4, %v7111_v43 }
 0xa71   : > { %v1600_v47 = vpop.f32.mrb[7].mxu0  ;;  %7123 = vmatprep.subr.msk.bf16.mxu1 %vm7779_vm4, %v7775_v51  ;;  %v7481_v49 = vpop.eup %7480 }
 0xa72   : > { %6925 = vmatprep.mubr.msk.f32.mxu0 %vm839_vm3, %v1600_v47  ;;  %v1808_v56 = vmul.f32 %v7481_v49, %v7477_v32 }
 0xa73   : > { %6926 = vmatmul.mubr.msk.f32.vlgmr.msra.gmra.mrb[4].mxu0 %vm839_vm3, %v6922_v46  ;;  %v6953_v52 = vpop.f32.mrb[14].mxu1 }
 0xa74   : > { %7100 = vmatpush3.bf16.msra.mxu0 %v7097_v20  ;;  %v2071_v53 = vmul.f32 0.35355338, %v6953_v52  ;;  %6939 = vmatprep.mubr.msk.f32.mxu0 %vm927_vm5, %v1806_v48  ;;  %v2061_v54 = vpop.f32.mrb[15].mxu1 }
 0xa75   : > { %v2070_v57 = vmul.f32 0.35355338, %v2061_v54  ;;  %6942 = vmatprep.subr.mxu0 %v826_v1 }
 0xa76   : > { %v2073_v60 = vadd.f32 %v2071_v53, %v7792_v58  ;;  %v827_v53 = vld [vmem:[%s7677_s29 + $0x20] sm:$0xff] }
 0xa77   : > { %6940 = vmatmul.mubr.msk.f32.vlgmr.msra.gmra.mrb[8].mxu0 %vm927_vm5, %v1808_v56  ;;  %6971 = vmatmul.mubr.msk.f32.vlgmr.msra.gmra.mrb[16].mxu1 %vm839_vm3, %v2269_v59  ;;  %v2072_v62 = vadd.f32 %v2070_v57, %v7797_v61 }
 0xa78   : > { %7126 = vmatpush3.bf16.xpose.msk.msra.mxu1 %vm7779_vm4, %v7775_v51  ;;  %v2077_v63 = vsel %vm927_vm5, %v2073_v60, -inf  ;;  %6943 = vmatpush3.msra.mxu0 %v826_v1 }
 0xa79   : > { %2078 = vmax.xlane.f32.xlu1 %v2077_v63  ;;  %v2074_v0 = vsel %vm927_vm5, %v2072_v62, -inf }
 0xa7a   : > { %2075 = vmax.xlane.f32.xlu0 %v2074_v0 }
 0xa8a   : > { %7263 = vrot.lane.b32.xlu1 %v7771_v50, %s7567_s24 }
 0xa8e   : > { %2555 = vrot.lane.b32.xlu1 %v7763_v45, %s7563_s16 }
 0xb06   : > { %v2079_v2 = vpop.xlane.xlu1 %2078 }
 0xb07   : > { %v2081_v3 = vsub.f32 %v2073_v60, %v2079_v2  ;;  %v2076_v4 = vpop.xlane.xlu0 %2075 }
 0xb08   : > { %v2080_v51 = vsub.f32 %v2072_v62, %v2076_v4 }
 0xb09   : > { %v2084_v5 = vmul.f32 1.442695, %v2081_v3 }
 0xb0a   : > { %v2082_v6 = vmul.f32 1.442695, %v2080_v51  ;;  %v7264_v7 = vpop.permute.xlu1 %7263 }
 0xb0b   : > { %v7266_v8 = vunpack.i.h.bf16 %v7264_v7  ;;  %v7265_v9 = vunpack.i.l.bf16 %v7264_v7 }
 0xb0c   : > { %7482 = vpow2.f32 %v2082_v6 }
 0xb0d   : > { %v7107_v10 = vpack.c.bf16 %v7266_v8, %v7265_v9  ;;  %7484 = vpow2.f32 %v2084_v5 }
 0xb0e   : > { %v2556_v31 = vpop.permute.xlu1 %2555 }
 0xb0f   : > { %7108 = vmatprep.subr.bf16.mxu0 %v7107_v10 }
 0xb16   : > { %v7483_v11 = vpop.eup %7482 }
 0xb17   : > { %v2086_v12 = vsel %vm927_vm5, %v7483_v11, 0.0  ;;  %v7485_v13 = vpop.eup %7484 }
 0xb18   : > { %2087 = vadd.xlane.f32.xlu0 %v2086_v12  ;;  %v2089_v14 = vsel %vm927_vm5, %v7485_v13, 0.0 }
 0xb1c   : > { %2090 = vadd.xlane.f32.xlu0 %v2089_v14 }
 0xb32   : > { %2553 = vrot.lane.b32.xlu0 %v7761_v42, %s7563_s16  ;;  %s7568_s16 = smov 56  }
 0xb4a   : > { %v6941_v15 = vpop.f32.mrb[8].mxu0  ;;  %v6972_v16 = vpop.f32.mrb[16].mxu1 }
 0xb4b   : > { %v2358_v17 = vmul.f32 0.35355338, %v6972_v16  ;;  %v1887_v18 = vpop.f32.mrb[9].mxu0  ;;  %v2348_v19 = vpop.f32.mrb[17].mxu1 }
 0xb4c   : > { %v2357_v20 = vmul.f32 0.35355338, %v2348_v19  ;;  %6944 = vmatprep.mubr.msk.f32.mxu0 %vm839_vm3, %v1887_v18  ;;  %v828_v18 = vld [vmem:[%s7677_s29 + $0x28] sm:$0xff] }
 0xb4d   : > { %6945 = vmatmul.mubr.msk.f32.vlgmr.msra.gmra.mrb[4].mxu0 %vm839_vm3, %v6941_v15  ;;  %v2360_v21 = vadd.f32 %v2358_v17, %v7792_v58 }
 0xb4e   : > { %7110 = vmatpush3.bf16.msra.mxu0 %v7107_v10  ;;  %v2359_v23 = vadd.f32 %v2357_v20, %v7797_v61 }
 0xb4f   : > { %v2364_v26 = vsel %vm927_vm5, %v2360_v21, -inf  ;;  %6961 = vmatprep.subr.mxu0 %v827_v53 }
 0xb50   : > { %v2361_v27 = vsel %vm927_vm5, %v2359_v23, -inf }
 0xb51   : > { %2362 = vmax.xlane.f32.xlu1 %v2361_v27  ;;  %2365 = vmax.xlane.f32.xlu0 %v2364_v26 }
 0xba5   : > { %v2088_v28 = vpop.xlane.xlu0 %2087 }
 0xba6   : > { %7486 = vrcp.f32 %v2088_v28 }
 0xba9   : > { %v2091_v29 = vpop.xlane.xlu0 %2090 }
 0xbaa   : > { %7488 = vrcp.f32 %v2091_v29 }
 0xbad   : > { %v2554_v30 = vpop.permute.xlu0 %2553 }
 0xbae   : > { %6989 = vmatprep.mubr.msk.f32.mxu1 %vm839_vm3, %v2554_v30 }
 0xbaf   : > { %6990 = vmatmul.mubr.msk.f32.vlgmr.msra.gmra.mrb[18].mxu1 %vm839_vm3, %v2556_v31 }
 0xbb0   : > { %v7487_v32 = vpop.eup %7486 }
 0xbb1   : > { %v2093_v33 = vmul.f32 %v7487_v32, %v7483_v11 }
 0xbb3   : > { %6958 = vmatprep.mubr.msk.f32.mxu0 %vm927_vm5, %v2093_v33 }
 0xbb4   : > { %v7489_v34 = vpop.eup %7488 }
 0xbb5   : > { %v2095_v37 = vmul.f32 %v7489_v34, %v7485_v13 }
 0xbb7   : > { %6959 = vmatmul.mubr.msk.f32.vlgmr.msra.gmra.mrb[10].mxu0 %vm927_vm5, %v2095_v37 }
 0xbb8   : > { %6962 = vmatpush3.msra.mxu0 %v827_v53 }
 0xbde   : > { %v2363_v39 = vpop.xlane.xlu1 %2362  ;;  %v2366_v40 = vpop.xlane.xlu0 %2365 }
 0xbdf   : > { %v2367_v41 = vsub.f32 %v2359_v23, %v2363_v39  ;;  %v2368_v43 = vsub.f32 %v2360_v21, %v2366_v40 }
 0xbe1   : > { %v2369_v44 = vmul.f32 1.442695, %v2367_v41  ;;  %v2371_v46 = vmul.f32 1.442695, %v2368_v43 }
 0xbe3   : > { %7490 = vpow2.f32 %v2369_v44 }
 0xbe4   : > { %7492 = vpow2.f32 %v2371_v46 }
 0xbed   : > { %v7491_v47 = vpop.eup %7490 }
 0xbee   : > { %v7493_v49 = vpop.eup %7492  ;;  %v2373_v48 = vsel %vm927_vm5, %v7491_v47, 0.0 }
 0xbef   : > { %2374 = vadd.xlane.f32.xlu0 %v2373_v48  ;;  %v2376_v52 = vsel %vm927_vm5, %v7493_v49, 0.0 }
 0xbf0   : > { %2377 = vadd.xlane.f32.xlu1 %v2376_v52 }
 0xc01   : > { %7273 = vrot.lane.b32.xlu1 %v7771_v50, %s7557_s21 }
 0xc05   : > { %2836 = vrot.lane.b32.xlu1 %v7761_v42, %s7564_s1  ;;  %7268 = vrot.lane.b32.xlu0 %v7771_v50, %s7568_s16 }
 0xc09   : > { %2838 = vrot.lane.b32.xlu0 %v7763_v45, %s7564_s1 }
 0xc7c   : > { %v2375_v54 = vpop.xlane.xlu0 %2374 }
 0xc7d   : > { %v2378_v56 = vpop.xlane.xlu1 %2377  ;;  %7494 = vrcp.f32 %v2375_v54 }
 0xc7e   : > { %7496 = vrcp.f32 %v2378_v56 }
 0xc80   : > { %v7269_v57 = vpop.permute.xlu0 %7268 }
 0xc81   : > { %v7274_v59 = vpop.permute.xlu1 %7273  ;;  %v7271_v60 = vunpack.i.h.bf16 %v7269_v57  ;;  %v7270_v62 = vunpack.i.l.bf16 %v7269_v57 }
 0xc82   : > { %v7276_v63 = vunpack.i.h.bf16 %v7274_v59  ;;  %v7275_v0 = vunpack.i.l.bf16 %v7274_v59  ;;  %v6991_v1 = vpop.f32.mrb[18].mxu1 }
 0xc83   : > { %v7117_v2 = vpack.c.bf16 %v7271_v60, %v7270_v62  ;;  %v2641_v3 = vmul.f32 0.35355338, %v6991_v1  ;;  %v2631_v4 = vpop.f32.mrb[19].mxu1 }
 0xc84   : > { %v7131_v51 = vpack.c.bf16 %v7276_v63, %v7275_v0  ;;  %v2640_v5 = vmul.f32 0.35355338, %v2631_v4  ;;  %v2839_v15 = vpop.permute.xlu0 %2838 }
 0xc85   : > { %v2837_v6 = vpop.permute.xlu1 %2836  ;;  %7118 = vmatprep.subr.bf16.mxu0 %v7117_v2  ;;  %v2643_v7 = vadd.f32 %v2641_v3, %v7792_v58 }
 0xc86   : > { %7133 = vmatprep.subr.msk.bf16.mxu1 %vm7779_vm4, %v7131_v51  ;;  %7008 = vmatprep.mubr.msk.f32.mxu1 %vm839_vm3, %v2837_v6  ;;  %v2642_v8 = vadd.f32 %v2640_v5, %v7797_v61 }
 0xc87   : > { %7136 = vmatpush3.bf16.xpose.msk.msra.mxu1 %vm7779_vm4, %v7131_v51  ;;  %v2647_v9 = vsel %vm927_vm5, %v2643_v7, -inf  ;;  %v7495_v11 = vpop.eup %7494 }
 0xc88   : > { %2648 = vmax.xlane.f32.xlu0 %v2647_v9  ;;  %v2644_v10 = vsel %vm927_vm5, %v2642_v8, -inf  ;;  %v7497_v14 = vpop.eup %7496  ;;  %v2380_v16 = vmul.f32 %v7495_v11, %v7491_v47 }
 0xc89   : > { %2645 = vmax.xlane.f32.xlu1 %v2644_v10  ;;  %v2382_v17 = vmul.f32 %v7497_v14, %v7493_v49 }
 0xc8a   : > { %v6960_v12 = vpop.f32.mrb[10].mxu0 }
 0xc8b   : > { %v2174_v13 = vpop.f32.mrb[11].mxu0 }
 0xc8c   : > { %6963 = vmatprep.mubr.msk.f32.mxu0 %vm839_vm3, %v2174_v13  ;;  %v829_v13 = vld [vmem:[%s7677_s29 + $0x30] sm:$0xff] }
 0xc8d   : > { %6964 = vmatmul.mubr.msk.f32.vlgmr.msra.gmra.mrb[4].mxu0 %vm839_vm3, %v6960_v12 }
 0xc8e   : > { %7120 = vmatpush3.bf16.msra.mxu0 %v7117_v2  ;;  %7009 = vmatmul.mubr.msk.f32.vlgmr.msra.gmra.mrb[20].mxu1 %vm839_vm3, %v2839_v15 }
 0xc8f   : > { %6977 = vmatprep.mubr.msk.f32.mxu0 %vm927_vm5, %v2380_v16  ;;  %6980 = vmatprep.subr.mxu0 %v828_v18 }
 0xc91   : > { %6978 = vmatmul.mubr.msk.f32.vlgmr.msra.gmra.mrb[12].mxu0 %vm927_vm5, %v2382_v17 }
 0xc92   : > { %6981 = vmatpush3.msra.mxu0 %v828_v18 }
 0xd15   : > { %v2649_v19 = vpop.xlane.xlu0 %2648 }
 0xd16   : > { %v2651_v20 = vsub.f32 %v2643_v7, %v2649_v19  ;;  %v2646_v21 = vpop.xlane.xlu1 %2645 }
 0xd17   : > { %v2650_v23 = vsub.f32 %v2642_v8, %v2646_v21 }
 0xd18   : > { %v2654_v26 = vmul.f32 1.442695, %v2651_v20 }
 0xd19   : > { %v2652_v27 = vmul.f32 1.442695, %v2650_v23 }
 0xd1a   : > { %7498 = vpow2.f32 %v2654_v26 }
 0xd1b   : > { %7500 = vpow2.f32 %v2652_v27 }
 0xd24   : > { %v7499_v28 = vpop.eup %7498 }
 0xd25   : > { %v7501_v29 = vpop.eup %7500  ;;  %v2659_v30 = vsel %vm927_vm5, %v7499_v28, 0.0 }
 0xd26   : > { %2660 = vadd.xlane.f32.xlu1 %v2659_v30  ;;  %v2656_v31 = vsel %vm927_vm5, %v7501_v29, 0.0 }
 0xd27   : > { %2657 = vadd.xlane.f32.xlu0 %v2656_v31 }
 0xd37   : > { %7283 = vrot.lane.b32.xlu1 %v7771_v50, %s7561_s25  ;;  %s8440_s25 = scalar_lea.vmem %s8415_s8, %s7656_s15 }
 0xd3b   : > { %3123 = vrot.lane.b32.xlu1 %v7761_v42, %s7567_s24 }
 0xd3d   : > { %7278 = vrot.lane.b32.xlu0 %v7771_v50, %s7554_s20 }
 0xd41   : > { %3125 = vrot.lane.b32.xlu0 %v7763_v45, %s7567_s24 }
 0xd61   : > { %v7010_v32 = vpop.f32.mrb[20].mxu1 }
 0xd62   : > { %v2928_v33 = vmul.f32 0.35355338, %v7010_v32  ;;  %v2918_v34 = vpop.f32.mrb[21].mxu1 }
 0xd63   : > { %v2927_v37 = vmul.f32 0.35355338, %v2918_v34 }
 0xd64   : > { %v6979_v39 = vpop.f32.mrb[12].mxu0  ;;  %v2930_v40 = vadd.f32 %v2928_v33, %v7792_v58 }
 0xd65   : > { %v2461_v41 = vpop.f32.mrb[13].mxu0  ;;  %v2929_v43 = vadd.f32 %v2927_v37, %v7797_v61 }
 0xd66   : > { %v2934_v44 = vsel %vm927_vm5, %v2930_v40, -inf  ;;  %6982 = vmatprep.mubr.msk.f32.mxu0 %vm839_vm3, %v2461_v41 }
 0xd67   : > { %2935 = vmax.xlane.f32.xlu0 %v2934_v44  ;;  %v2931_v46 = vsel %vm927_vm5, %v2929_v43, -inf  ;;  %6983 = vmatmul.mubr.msk.f32.vlgmr.msra.gmra.mrb[4].mxu0 %vm839_vm3, %v6979_v39 }
 0xd68   : > { %2932 = vmax.xlane.f32.xlu1 %v2931_v46 }
 0xdb3   : > { %v2661_v47 = vpop.xlane.xlu1 %2660 }
 0xdb4   : > { %7502 = vrcp.f32 %v2661_v47  ;;  %v2658_v49 = vpop.xlane.xlu0 %2657 }
 0xdb5   : > { %7504 = vrcp.f32 %v2658_v49 }
 0xdb7   : > { %v7284_v48 = vpop.permute.xlu1 %7283 }
 0xdb8   : > { %v7286_v52 = vunpack.i.h.bf16 %v7284_v48  ;;  %v7285_v53 = vunpack.i.l.bf16 %v7284_v48  ;;  %v7279_v54 = vpop.permute.xlu0 %7278 }
 0xdb9   : > { %v7281_v56 = vunpack.i.h.bf16 %v7279_v54  ;;  %v7280_v57 = vunpack.i.l.bf16 %v7279_v54 }
 0xdba   : > { %v7141_v59 = vpack.c.bf16 %v7286_v52, %v7285_v53 }
 0xdbb   : > { %v7127_v60 = vpack.c.bf16 %v7281_v56, %v7280_v57  ;;  %v3124_v62 = vpop.permute.xlu1 %3123 }
 0xdbc   : > { %7143 = vmatprep.subr.msk.bf16.mxu1 %vm7779_vm4, %v7141_v59  ;;  %7027 = vmatprep.mubr.msk.f32.mxu1 %vm839_vm3, %v3124_v62  ;;  %v3126_v3 = vpop.permute.xlu0 %3125 }
 0xdbd   : > { %7128 = vmatprep.subr.bf16.mxu0 %v7127_v60  ;;  %7146 = vmatpush3.bf16.xpose.msk.msra.mxu1 %vm7779_vm4, %v7141_v59 }
 0xdbe   : > { %v7503_v63 = vpop.eup %7502  ;;  %7130 = vmatpush3.bf16.msra.mxu0 %v7127_v60 }
 0xdbf   : > { %v7505_v0 = vpop.eup %7504  ;;  %v2665_v2 = vmul.f32 %v7503_v63, %v7499_v28  ;;  %6999 = vmatprep.subr.mxu0 %v829_v13 }
 0xdc0   : > { %v2663_v1 = vmul.f32 %v7505_v0, %v7501_v29 }
 0xdc2   : > { %6996 = vmatprep.mubr.msk.f32.mxu0 %vm927_vm5, %v2663_v1  ;;  %v7538_v1 = vld [vmem:[%s8439_s27] sm:$0xff] }
 0xdc3   : > { %6997 = vmatmul.mubr.msk.f32.vlgmr.msra.gmra.mrb[14].mxu0 %vm927_vm5, %v2665_v2 }
 0xdc4   : > { %7028 = vmatmul.mubr.msk.f32.vlgmr.msra.gmra.mrb[22].mxu1 %vm839_vm3, %v3126_v3  ;;  %7000 = vmatpush3.msra.mxu0 %v829_v13 }
 0xdf4   : > { %v2936_v4 = vpop.xlane.xlu0 %2935 }
 0xdf5   : > { %v2938_v51 = vsub.f32 %v2930_v40, %v2936_v4  ;;  %v2933_v5 = vpop.xlane.xlu1 %2932  ;;  %v7539_v4 = vld [vmem:[%s8439_s27 + $0x8] sm:$0xff] }
 0xdf6   : > { %v2937_v6 = vsub.f32 %v2929_v43, %v2933_v5 }
 0xdf7   : > { %v2941_v7 = vmul.f32 1.442695, %v2938_v51 }
 0xdf8   : > { %v2939_v8 = vmul.f32 1.442695, %v2937_v6 }
 0xdf9   : > { %7506 = vpow2.f32 %v2941_v7 }
 0xdfa   : > { %7508 = vpow2.f32 %v2939_v8 }
 0xe03   : > { %v7507_v9 = vpop.eup %7506 }
 0xe04   : > { %v7509_v10 = vpop.eup %7508  ;;  %v2946_v11 = vsel %vm927_vm5, %v7507_v9, 0.0 }
 0xe05   : > { %2947 = vadd.xlane.f32.xlu1 %v2946_v11  ;;  %v2943_v12 = vsel %vm927_vm5, %v7509_v10, 0.0 }
 0xe06   : > { %2944 = vadd.xlane.f32.xlu0 %v2943_v12 }
 0xe16   : > { %7293 = vrot.lane.b32.xlu1 %v7771_v50, %s7559_s7 }
 0xe1a   : > { %3410 = vrot.lane.b32.xlu1 %v7761_v42, %s7568_s16 }
 0xe1c   : > { %7288 = vrot.lane.b32.xlu0 %v7771_v50, %s7556_s19 }
 0xe20   : > { %3412 = vrot.lane.b32.xlu0 %v7763_v45, %s7568_s16 }
 0xe92   : > { %v2948_v14 = vpop.xlane.xlu1 %2947 }
 0xe93   : > { %7510 = vrcp.f32 %v2948_v14  ;;  %v2945_v15 = vpop.xlane.xlu0 %2944 }
 0xe94   : > { %7512 = vrcp.f32 %v2945_v15 }
 0xe96   : > { %v7294_v16 = vpop.permute.xlu1 %7293  ;;  %v6998_v17 = vpop.f32.mrb[14].mxu0 }
 0xe97   : > { %v7296_v18 = vunpack.i.h.bf16 %v7294_v16  ;;  %v7295_v19 = vunpack.i.l.bf16 %v7294_v16  ;;  %v7289_v20 = vpop.permute.xlu0 %7288  ;;  %v2744_v21 = vpop.f32.mrb[15].mxu0 }
 0xe98   : > { %v7291_v23 = vunpack.i.h.bf16 %v7289_v20  ;;  %v7290_v26 = vunpack.i.l.bf16 %v7289_v20  ;;  %v7029_v27 = vpop.f32.mrb[22].mxu1  ;;  %7001 = vmatprep.mubr.msk.f32.mxu0 %vm839_vm3, %v2744_v21 }
 0xe99   : > { %v7151_v42 = vpack.c.bf16 %v7296_v18, %v7295_v19  ;;  %v3215_v28 = vmul.f32 0.35355338, %v7029_v27  ;;  %v3205_v29 = vpop.f32.mrb[23].mxu1  ;;  %7002 = vmatmul.mubr.msk.f32.vlgmr.msra.gmra.mrb[4].mxu0 %vm839_vm3, %v6998_v17 }
 0xe9a   : > { %v7137_v45 = vpack.c.bf16 %v7291_v23, %v7290_v26  ;;  %v3214_v30 = vmul.f32 0.35355338, %v3205_v29  ;;  %v3411_v31 = vpop.permute.xlu1 %3410 }
 0xe9b   : > { %7153 = vmatprep.subr.msk.bf16.mxu1 %vm7779_vm4, %v7151_v42  ;;  %7046 = vmatprep.mubr.msk.f32.mxu1 %vm839_vm3, %v3411_v31  ;;  %v3217_v32 = vadd.f32 %v3215_v28, %v7792_v58  ;;  %v3413_v58 = vpop.permute.xlu0 %3412  ;;  %v831_v28 = vld [vmem:[%s7677_s29 + $0x40] sm:$0xff] }
 0xe9c   : > { %7138 = vmatprep.subr.bf16.mxu0 %v7137_v45  ;;  %7156 = vmatpush3.bf16.xpose.msk.msra.mxu1 %vm7779_vm4, %v7151_v42  ;;  %v3216_v33 = vadd.f32 %v3214_v30, %v7797_v61 }
 0xe9d   : > { %v7511_v34 = vpop.eup %7510  ;;  %7140 = vmatpush3.bf16.msra.mxu0 %v7137_v45  ;;  %v3221_v37 = vsel %vm927_vm5, %v3217_v32, -inf }
 0xe9e   : > { %v7513_v39 = vpop.eup %7512  ;;  %3222 = vmax.xlane.f32.xlu0 %v3221_v37  ;;  %v3218_v40 = vsel %vm927_vm5, %v3216_v33, -inf  ;;  %v2952_v43 = vmul.f32 %v7511_v34, %v7507_v9  ;;  %7018 = vmatprep.subr.mxu0 %v830_v55 }
 0xe9f   : > { %3219 = vmax.xlane.f32.xlu1 %v3218_v40  ;;  %v2950_v41 = vmul.f32 %v7513_v39, %v7509_v10  ;;  %v832_v39 = vld [vmem:[%s7677_s29 + $0x48] sm:$0xff] }
 0xea1   : > { %7015 = vmatprep.mubr.msk.f32.mxu0 %vm927_vm5, %v2950_v41 }
 0xea2   : > { %7016 = vmatmul.mubr.msk.f32.vlgmr.msra.gmra.mrb[16].mxu0 %vm927_vm5, %v2952_v43 }
 0xea3   : > { %7047 = vmatmul.mubr.msk.f32.vlgmr.msra.gmra.mrb[24].mxu1 %vm839_vm3, %v3413_v58  ;;  %7019 = vmatpush3.msra.mxu0 %v830_v55 }
 0xea4   : > { %4347 = vmatprep.mubr.bf16.mxu1 %v7553_v22 }
 0xf2b   : > { %v3223_v61 = vpop.xlane.xlu0 %3222 }
 0xf2c   : > { %v3225_v44 = vsub.f32 %v3217_v32, %v3223_v61  ;;  %v3220_v46 = vpop.xlane.xlu1 %3219 }
 0xf2d   : > { %v3224_v47 = vsub.f32 %v3216_v33, %v3220_v46 }
 0xf2e   : > { %v3228_v49 = vmul.f32 1.442695, %v3225_v44  ;;  %v6343_v44 = vld [vmem:[%s8440_s25] ss:$0 sm:$0xff] }
 0xf2f   : > { %v3226_v48 = vmul.f32 1.442695, %v3224_v47 }
 0xf30   : > { %7514 = vpow2.f32 %v3228_v49 }
 0xf31   : > { %7516 = vpow2.f32 %v3226_v48 }
 0xf3a   : > { %v7515_v52 = vpop.eup %7514 }
 0xf3b   : > { %v7517_v53 = vpop.eup %7516  ;;  %v3233_v54 = vsel %vm927_vm5, %v7515_v52, 0.0 }
 0xf3c   : > { %3234 = vadd.xlane.f32.xlu1 %v3233_v54  ;;  %v3230_v56 = vsel %vm927_vm5, %v7517_v53, 0.0 }
 0xf3d   : > { %3231 = vadd.xlane.f32.xlu0 %v3230_v56  ;;  %v7541_v56 = vld [vmem:[#allocation2] sm:$0xff] }
 0xf53   : > { %7298 = vrot.lane.b32.xlu0 %v7771_v50, %s7558_s6 }
 0xf75   : > { %v7017_v57 = vpop.f32.mrb[16].mxu0 }
 0xf76   : > { %v3031_v59 = vpop.f32.mrb[17].mxu0  ;;  %v7048_v60 = vpop.f32.mrb[24].mxu1 }
 0xf77   : > { %7020 = vmatprep.mubr.msk.f32.mxu0 %vm839_vm3, %v3031_v59  ;;  %v3492_v62 = vpop.f32.mrb[25].mxu1  ;;  %v3502_v63 = vmul.f32 0.35355338, %v7048_v60 }
 0xf78   : > { %v3501_v0 = vmul.f32 0.35355338, %v3492_v62  ;;  %7021 = vmatmul.mubr.msk.f32.vlgmr.msra.gmra.mrb[4].mxu0 %vm839_vm3, %v7017_v57 }
 0xf79   : > { %v3504_v51 = vadd.f32 %v7539_v4, %v3502_v63 }
 0xf7a   : > { %v3503_v2 = vadd.f32 %v7538_v1, %v3501_v0 }
 0xf7b   : > { %v3508_v5 = vsel %vm927_vm5, %v3504_v51, -inf }
 0xf7c   : > { %v3505_v3 = vsel %vm927_vm5, %v3503_v2, -inf }
 0xf7d   : > { %3506 = vmax.xlane.f32.xlu1 %v3505_v3 }
 0xf81   : > { %3509 = vmax.xlane.f32.xlu1 %v3508_v5  ;;  %v3748_v5 = vld [vmem:[%s7690_s23] sm:$0xff] }
 0xfc9   : > { %v3235_v6 = vpop.xlane.xlu1 %3234 }
 0xfca   : > { %7518 = vrcp.f32 %v3235_v6  ;;  %v3232_v7 = vpop.xlane.xlu0 %3231  ;;  %v3756_v6 = vld [vmem:[%s7690_s23 + $0x40] sm:$0xff] }
 0xfcb   : > { %7520 = vrcp.f32 %v3232_v7  ;;  %v3749_v7 = vld [vmem:[%s7690_s23 + $0x8] sm:$0xff] }
 0xfce   : > { %v7299_v8 = vpop.permute.xlu0 %7298 }
 0xfcf   : > { %v7301_v9 = vunpack.i.h.bf16 %v7299_v8  ;;  %v7300_v10 = vunpack.i.l.bf16 %v7299_v8  ;;  %v6345_v8 = vcombine.high %v3748_v5, %v3756_v6 }
 0xfd1   : > { %v7147_v11 = vpack.c.bf16 %v7301_v9, %v7300_v10  ;;  %v3757_v9 = vld [vmem:[%s7690_s23 + $0x48] sm:$0xff]  ;;  %v6344_v10 = vcombine.low %v3748_v5, %v3756_v6  ;;  %4315 = vmatprep.subr.bf16.mxu1 %v6345_v8 }
 0xfd3   : > { %7148 = vmatprep.subr.bf16.mxu0 %v7147_v11  ;;  %4316 = vmatpush1.bf16.msra.mxu1 %v6344_v10  ;;  %v3766_v10 = vld [vmem:[%s7690_s23 + $0x90] sm:$0xff] }
 0xfd4   : > { %v7519_v12 = vpop.eup %7518  ;;  %7150 = vmatpush3.bf16.msra.mxu0 %v7147_v11  ;;  %v6346_v11 = vcombine.low %v3749_v7, %v3757_v9 }
 0xfd5   : > { %v7521_v13 = vpop.eup %7520  ;;  %v3239_v15 = vmul.f32 %v7519_v12, %v7515_v52  ;;  %7037 = vmatprep.subr.mxu0 %v831_v28  ;;  %v6347_v12 = vcombine.high %v3749_v7, %v3757_v9 }
 0xfd6   : > { %v3237_v14 = vmul.f32 %v7521_v13, %v7517_v53  ;;  %v7540_v53 = vld [vmem:[#allocation2 + $0x8] sm:$0xff]  ;;  %v3764_v13 = vld [vmem:[%s7690_s23 + $0x80] sm:$0xff] }
 0xfd8   : > { %7034 = vmatprep.mubr.msk.f32.mxu0 %vm927_vm5, %v3237_v14  ;;  %v3772_v14 = vld [vmem:[%s7690_s23 + $0xc0] sm:$0xff] }
 0xfd9   : > { %7035 = vmatmul.mubr.msk.f32.vlgmr.msra.gmra.mrb[18].mxu0 %vm927_vm5, %v3239_v15  ;;  %v3765_v15 = vld [vmem:[%s7690_s23 + $0x88] sm:$0xff] }
 0xfda   : > { %7038 = vmatpush3.msra.mxu0 %v831_v28 }
0x100a   : > { %v3507_v16 = vpop.xlane.xlu1 %3506 }
0x100b   : > { %v3511_v17 = vsub.f32 %v3503_v2, %v3507_v16  ;;  %v6361_v16 = vcombine.high %v3764_v13, %v3772_v14 }
0x100d   : > { %v3513_v20 = vmul.f32 1.442695, %v3511_v17  ;;  %v3773_v17 = vld [vmem:[%s7690_s23 + $0xc8] sm:$0xff]  ;;  %4317 = vmatprep.subr.bf16.mxu1 %v6361_v16 }
0x100e   : > { %v3510_v18 = vpop.xlane.xlu1 %3509 }
0x100f   : > { %v3512_v19 = vsub.f32 %v3504_v51, %v3510_v18  ;;  %v6360_v18 = vcombine.low %v3764_v13, %v3772_v14  ;;  %v3775_v13 = vld [vmem:[%s7690_s23 + $0xd8] sm:$0xff] }
0x1011   : > { %v3515_v21 = vmul.f32 1.442695, %v3512_v19  ;;  %v6362_v19 = vcombine.low %v3765_v15, %v3773_v17  ;;  %4318 = vmatpush1.bf16.msra.mxu1 %v6360_v18  ;;  %v3782_v18 = vld [vmem:[%s7690_s23 + $0x110] sm:$0xff] }
0x1013   : > { %7522 = vpow2.f32 %v3515_v21  ;;  %v3780_v21 = vld [vmem:[%s7690_s23 + $0x100] sm:$0xff] }
0x1014   : > { %7524 = vpow2.f32 %v3513_v20  ;;  %v6363_v20 = vcombine.high %v3765_v15, %v3773_v17 }
0x101d   : > { %v7523_v23 = vpop.eup %7522 }
0x101e   : > { %v3520_v26 = vsel %vm927_vm5, %v7523_v23, 0.0  ;;  %v7525_v27 = vpop.eup %7524 }
0x101f   : > { %3521 = vadd.xlane.f32.xlu1 %v3520_v26  ;;  %v3517_v42 = vsel %vm927_vm5, %v7525_v27, 0.0  ;;  %v3781_v26 = vld [vmem:[%s7690_s23 + $0x108] sm:$0xff] }
0x1023   : > { %3518 = vadd.xlane.f32.xlu1 %v3517_v42  ;;  %v3789_v42 = vld [vmem:[%s7690_s23 + $0x148] sm:$0xff] }
0x1034   : > { %7303 = vrot.lane.b32.xlu1 %v7771_v50, %s7562_s26 }
0x10ac   : > { %v3522_v29 = vpop.xlane.xlu1 %3521  ;;  %v7036_v45 = vpop.f32.mrb[18].mxu0 }
0x10ad   : > { %v3318_v30 = vpop.f32.mrb[19].mxu0  ;;  %7526 = vrcp.f32 %v3522_v29  ;;  %v6378_v29 = vcombine.low %v3781_v26, %v3789_v42 }
0x10ae   : > { %7039 = vmatprep.mubr.msk.f32.mxu0 %vm839_vm3, %v3318_v30  ;;  %v3796_v30 = vld [vmem:[%s7690_s23 + $0x180] sm:$0xff] }
0x10af   : > { %7040 = vmatmul.mubr.msk.f32.vlgmr.msra.gmra.mrb[4].mxu0 %vm839_vm3, %v7036_v45  ;;  %v6379_v45 = vcombine.high %v3781_v26, %v3789_v42  ;;  %v3798_v42 = vld [vmem:[%s7690_s23 + $0x190] sm:$0xff] }
0x10b0   : > { %v3519_v31 = vpop.xlane.xlu1 %3518 }
0x10b1   : > { %7528 = vrcp.f32 %v3519_v31  ;;  %v3804_v31 = vld [vmem:[%s7690_s23 + $0x1c0] sm:$0xff] }
0x10b4   : > { %v7304_v32 = vpop.permute.xlu1 %7303 }
0x10b5   : > { %v7306_v33 = vunpack.i.h.bf16 %v7304_v32  ;;  %v7305_v34 = vunpack.i.l.bf16 %v7304_v32  ;;  %v3797_v32 = vld [vmem:[%s7690_s23 + $0x188] sm:$0xff] }
0x10b7   : > { %v7157_v37 = vpack.c.bf16 %v7306_v33, %v7305_v34  ;;  %v7527_v40 = vpop.eup %7526  ;;  %v6393_v33 = vcombine.high %v3796_v30, %v3804_v31  ;;  %v3805_v34 = vld [vmem:[%s7690_s23 + $0x1c8] sm:$0xff] }
0x10b8   : > { %v3526_v43 = vmul.f32 %v7527_v40, %v7523_v23  ;;  %v3788_v23 = vld [vmem:[%s7690_s23 + $0x140] sm:$0xff]  ;;  %v6395_v40 = vcombine.high %v3797_v32, %v3805_v34 }
0x10b9   : > { %7158 = vmatprep.subr.bf16.mxu0 %v7157_v37  ;;  %v6376_v28 = vcombine.low %v3780_v21, %v3788_v23 }
0x10ba   : > { %7160 = vmatpush3.bf16.msra.mxu0 %v7157_v37  ;;  %v6392_v37 = vcombine.low %v3796_v30, %v3804_v31 }
0x10bb   : > { %v7529_v50 = vpop.eup %7528  ;;  %7056 = vmatprep.subr.mxu0 %v832_v39 }
0x10bc   : > { %v3524_v41 = vmul.f32 %v7529_v50, %v7525_v27  ;;  %v6377_v27 = vcombine.high %v3780_v21, %v3788_v23  ;;  %v3812_v50 = vld [vmem:[%s7690_s23 + $0x200] sm:$0xff] }
0x10be   : > { %7053 = vmatprep.mubr.msk.f32.mxu0 %vm927_vm5, %v3524_v41  ;;  %4319 = vmatprep.subr.bf16.mxu1 %v6377_v27  ;;  %v3820_v41 = vld [vmem:[%s7690_s23 + $0x240] sm:$0xff] }
0x10bf   : > { %7054 = vmatmul.mubr.msk.f32.vlgmr.msra.gmra.mrb[20].mxu0 %vm927_vm5, %v3526_v43  ;;  %4320 = vmatpush1.bf16.msra.mxu1 %v6376_v28  ;;  %v3813_v43 = vld [vmem:[%s7690_s23 + $0x208] sm:$0xff]  ;;  %v3806_v28 = vld [vmem:[%s7690_s23 + $0x1d0] sm:$0xff] }
0x10c0   : > { %7057 = vmatpush3.msra.mxu0 %v832_v39  ;;  %v6394_v39 = vcombine.low %v3797_v32, %v3805_v34  ;;  %4321 = vmatprep.subr.bf16.mxu1 %v6393_v33  ;;  %v6397_v32 = vcombine.high %v3798_v42, %v3806_v28  ;;  %v3814_v34 = vld [vmem:[%s7690_s23 + $0x210] sm:$0xff] }
0x10c1   : > { %4358 = vmatprep.subr.bf16.mxu0 %v6347_v12  ;;  %v3767_v12 = vld [vmem:[%s7690_s23 + $0x98] sm:$0xff] }
0x10c2   : > { %v6367_v17 = vcombine.high %v3767_v12, %v3775_v13  ;;  %v6366_v23 = vcombine.low %v3767_v12, %v3775_v13 }
0x10c3   : > { %4322 = vmatpush1.bf16.msra.mxu1 %v6392_v37  ;;  %v3822_v37 = vld [vmem:[%s7690_s23 + $0x250] sm:$0xff] }
0x1192   : > { %v7055_v58 = vpop.f32.mrb[20].mxu0 }
0x1193   : > { %v3605_v55 = vpop.f32.mrb[21].mxu0 }
0x1194   : > { %7058 = vmatprep.mubr.msk.f32.mxu0 %vm839_vm3, %v3605_v55  ;;  %v3821_v55 = vld [vmem:[%s7690_s23 + $0x248] sm:$0xff] }
0x1195   : > { %7059 = vmatmul.mubr.msk.f32.vlgmr.msra.gmra.mrb[4].mxu0 %vm839_vm3, %v7055_v58  ;;  %v6409_v58 = vcombine.high %v3812_v50, %v3820_v41 }
0x1196   : > { %4390 = vmatprep.mubr.bf16.mxu0 %v7553_v22  ;;  %4359 = vmatpush1.bf16.msra.mxu0 %v6346_v11  ;;  %v3774_v11 = vld [vmem:[%s7690_s23 + $0xd0] sm:$0xff] }
0x1197   : > { %4360 = vmatprep.subr.bf16.mxu0 %v6363_v20  ;;  %4323 = vmatprep.subr.bf16.mxu1 %v6409_v58  ;;  %v6365_v16 = vcombine.high %v3766_v10, %v3774_v11  ;;  %v3791_v20 = vld [vmem:[%s7690_s23 + $0x158] sm:$0xff]  ;;  %v6364_v21 = vcombine.low %v3766_v10, %v3774_v11  ;;  %v3809_v10 = vld [vmem:[%s7690_s23 + $0x1e8] sm:$0xff] }
0x119a   : > { %4361 = vmatpush1.bf16.msra.mxu0 %v6362_v19  ;;  %v3783_v19 = vld [vmem:[%s7690_s23 + $0x118] sm:$0xff] }
0x119b   : > { %4362 = vmatprep.subr.bf16.mxu0 %v6379_v45  ;;  %v6383_v27 = vcombine.high %v3783_v19, %v3791_v20  ;;  %v3807_v45 = vld [vmem:[%s7690_s23 + $0x1d8] sm:$0xff]  ;;  %v6382_v31 = vcombine.low %v3783_v19, %v3791_v20  ;;  %v3825_v19 = vld [vmem:[%s7690_s23 + $0x268] sm:$0xff] }
0x119e   : > { %4363 = vmatpush1.bf16.msra.mxu0 %v6378_v29  ;;  %v3799_v29 = vld [vmem:[%s7690_s23 + $0x198] sm:$0xff] }
0x119f   : > { %4364 = vmatprep.subr.bf16.mxu0 %v6395_v40  ;;  %v6399_v33 = vcombine.high %v3799_v29, %v3807_v45  ;;  %v3823_v40 = vld [vmem:[%s7690_s23 + $0x258] sm:$0xff] }
0x11a2   : > { %4365 = vmatpush1.bf16.msra.mxu0 %v6394_v39  ;;  %v3815_v39 = vld [vmem:[%s7690_s23 + $0x218] sm:$0xff] }
0x11a3   : > { %v6415_v58 = vcombine.high %v3815_v39, %v3823_v40 }
0x1268   : > { %v7060_v61 = vpop.f32.mrb[4].mxu0 }
0x1269   : > { %v7161_v46 = vadd.f32 %v7060_v61, %v7861_v24  ;;  %v3686_v47 = vpop.f32.mrb[5].mxu0  ;;  %v6408_v61 = vcombine.low %v3812_v50, %v3820_v41  ;;  %v6396_v50 = vcombine.low %v3798_v42, %v3806_v28  ;;  %v6398_v41 = vcombine.low %v3799_v29, %v3807_v45  ;;  %v3762_v42 = vld [vmem:[%s7690_s23 + $0x70] sm:$0xff]  ;;  %v3755_v28 = vld [vmem:[%s7690_s23 + $0x38] sm:$0xff] }
0x126a   : > { %v7162_v49 = vadd.f32 %v3686_v47, %v7863_v25  ;;  %v3750_v47 = vld [vmem:[%s7690_s23 + $0x10] sm:$0xff]  ;;  %v3763_v29 = vld [vmem:[%s7690_s23 + $0x78] sm:$0xff] }
0x126b   : > { %v3705_v48 = vadd.f32 %v7161_v46, %v6343_v44  ;;  %v6411_v46 = vcombine.high %v3813_v43, %v3821_v55  ;;  %4324 = vmatpush1.bf16.msra.mxu1 %v6408_v61  ;;  %v3760_v61 = vld [vmem:[%s7690_s23 + $0x60] sm:$0xff] }
0x126c   : > { %v3704_v52 = vadd.f32 %v7162_v49, %v6343_v44  ;;  %v6410_v44 = vcombine.low %v3813_v43, %v3821_v55  ;;  %v3758_v49 = vld [vmem:[%s7690_s23 + $0x50] sm:$0xff]  ;;  %v6413_v43 = vcombine.high %v3814_v34, %v3822_v37  ;;  %v3752_v55 = vld [vmem:[%s7690_s23 + $0x20] sm:$0xff] }
0x126d   : > { %v3707_v54 = vadd.f32 %v7540_v53, %v3705_v48  ;;  %4366 = vmatprep.subr.bf16.mxu0 %v6411_v46  ;;  %v3751_v48 = vld [vmem:[%s7690_s23 + $0x18] sm:$0xff]  ;;  %v3761_v46 = vld [vmem:[%s7690_s23 + $0x68] sm:$0xff] }
0x126e   : > { %v3706_v57 = vadd.f32 %v7541_v56, %v3704_v52  ;;  %4367 = vmatpush1.bf16.msra.mxu0 %v6410_v44  ;;  %v6349_v52 = vcombine.high %v3750_v47, %v3758_v49  ;;  %v3759_v53 = vld [vmem:[%s7690_s23 + $0x58] sm:$0xff]  ;;  %v3753_v44 = vld [vmem:[%s7690_s23 + $0x28] sm:$0xff] }
0x126f   : > { %v3711_v59 = vsel %vm776_vm2, %v3707_v54, 0.0  ;;  %v6350_v56 = vcombine.low %v3751_v48, %v3759_v53 }
0x1270   : > { %3712 = vadd.xlane.f32.xlu1 %v3711_v59  ;;  %v3708_v60 = vsel %vm776_vm2, %v3706_v57, 0.0  ;;  %4401 = vmatprep.subr.bf16.mxu1 %v6349_v52  ;;  %v6355_v52 = vcombine.high %v3753_v44, %v3761_v46 }
0x1271   : > { %3709 = vadd.xlane.f32.xlu0 %v3708_v60 }
0x12fd   : > { %v3713_v62 = vpop.xlane.xlu1 %3712 }
0x12fe   : > { %v3716_v24 = vmul.f32 0.0125, %v3713_v62  ;;  %v3710_v63 = vpop.xlane.xlu0 %3709 }
0x12ff   : > { %v3715_v25 = vmul.f32 0.0125, %v3710_v63 }
0x1300   : > { %v8058_v0 = vsub.f32 %v3707_v54, %v3716_v24  ;;  %v6348_v54 = vcombine.low %v3750_v47, %v3758_v49  ;;  %v6412_v47 = vcombine.low %v3814_v34, %v3822_v37  ;;  %v6414_v49 = vcombine.low %v3815_v39, %v3823_v40  ;;  %v3778_v34 = vld [vmem:[%s7690_s23 + $0xf0] sm:$0xff]  ;;  %v3771_v37 = vld [vmem:[%s7690_s23 + $0xb8] sm:$0xff] }
0x1301   : > { %v8060_v1 = vsub.f32 %v3706_v57, %v3715_v25  ;;  %v6351_v57 = vcombine.high %v3751_v48, %v3759_v53  ;;  %v6353_v48 = vcombine.high %v3752_v55, %v3760_v61  ;;  %v3768_v53 = vld [vmem:[%s7690_s23 + $0xa0] sm:$0xff]  ;;  %v3779_v39 = vld [vmem:[%s7690_s23 + $0xf8] sm:$0xff] }
0x1302   : > { %v3720_v4 = vmul.f32 %v8058_v0, %v8058_v0 }
0x1303   : > { %v3719_v2 = vmul.f32 %v8060_v1, %v8060_v1  ;;  %4444 = vmatprep.subr.bf16.mxu0 %v6351_v57  ;;  %v3777_v57 = vld [vmem:[%s7690_s23 + $0xe8] sm:$0xff] }
0x1304   : > { %v3724_v51 = vsel %vm776_vm2, %v3720_v4, 0.0 }
0x1305   : > { %v3721_v3 = vsel %vm776_vm2, %v3719_v2, 0.0  ;;  %v702_v2 = vld [vmem:[%s7705_s2] sm:$0xf] }
0x1306   : > { %3722 = vadd.xlane.f32.xlu0 %v3721_v3  ;;  %v3738_v4 = vrot.slane %v702_v2, %v7753_v36  ;;  %v3744_v6 = vrot.slane %v702_v2, %v7757_v38  ;;  %v3785_v2 = vld [vmem:[%s7690_s23 + $0x128] sm:$0xff] }
0x130a   : > { %3725 = vadd.xlane.f32.xlu0 %v3724_v51 }
0x1393   : > { %v3723_v59 = vpop.xlane.xlu0 %3722 }
0x1394   : > { %v3727_v60 = vmul.f32 0.0125, %v3723_v59  ;;  %v6352_v59 = vcombine.low %v3752_v55, %v3760_v61  ;;  %v3794_v55 = vld [vmem:[%s7690_s23 + $0x170] sm:$0xff]  ;;  %v3787_v61 = vld [vmem:[%s7690_s23 + $0x138] sm:$0xff] }
0x1396   : > { %v3729_v62 = vadd.f32 1e-05, %v3727_v60  ;;  %v6354_v60 = vcombine.low %v3753_v44, %v3761_v46  ;;  %v3795_v44 = vld [vmem:[%s7690_s23 + $0x178] sm:$0xff] }
0x1397   : > { %v3726_v24 = vpop.xlane.xlu0 %3725 }
0x1398   : > { %7530 = vrsqrt.f32 %v3729_v62  ;;  %v3728_v63 = vmul.f32 0.0125, %v3726_v24 }
0x139a   : > { %v3730_v25 = vadd.f32 1e-05, %v3728_v63  ;;  %v3784_v63 = vld [vmem:[%s7690_s23 + $0x120] sm:$0xff] }
0x139c   : > { %7532 = vrsqrt.f32 %v3730_v25  ;;  %v3792_v25 = vld [vmem:[%s7690_s23 + $0x160] sm:$0xff] }
0x139d   : > { %v6384_v11 = vcombine.low %v3784_v63, %v3792_v25 }
0x13a2   : > { %v7531_v3 = vpop.eup %7530 }
0x13a3   : > { %v3733_v51 = vmul.f32 %v7531_v3, %v8060_v1  ;;  %v3793_v3 = vld [vmem:[%s7690_s23 + $0x168] sm:$0xff] }
0x13a4   : > { %v6386_v12 = vcombine.low %v3785_v2, %v3793_v3 }
0x13a5   : > { %v3739_v7 = vmul.f32 %v3738_v4, %v3733_v51 }
0x13a6   : > { %v7533_v5 = vpop.eup %7532 }
0x13a7   : > { %v3734_v8 = vmul.f32 %v7533_v5, %v8058_v0  ;;  %v8101_v14 = vadd.f32 %v3744_v6, %v3739_v7  ;;  %v3790_v0 = vld [vmem:[%s7690_s23 + $0x150] sm:$0xff]  ;;  %v6385_v5 = vcombine.high %v3784_v63, %v3792_v25  ;;  %v3800_v7 = vld [vmem:[%s7690_s23 + $0x1a0] sm:$0xff]  ;;  %v3819_v25 = vld [vmem:[%s7690_s23 + $0x238] sm:$0xff] }
0x13a8   : > { %v6381_v26 = vcombine.high %v3782_v18, %v3790_v0  ;;  %v6380_v30 = vcombine.low %v3782_v18, %v3790_v0  ;;  %v3824_v18 = vld [vmem:[%s7690_s23 + $0x260] sm:$0xff]  ;;  %v3817_v0 = vld [vmem:[%s7690_s23 + $0x228] sm:$0xff]  ;;  %v3826_v63 = vld [vmem:[%s7690_s23 + $0x270] sm:$0xff] }
0x13a9   : > { %v3740_v9 = vmul.f32 %v3738_v4, %v3734_v8  ;;  %v3808_v8 = vld [vmem:[%s7690_s23 + $0x1e0] sm:$0xff] }
0x13aa   : > { %v6401_v13 = vcombine.high %v3800_v7, %v3808_v8  ;;  %v6400_v20 = vcombine.low %v3800_v7, %v3808_v8  ;;  %v7322_v7 = vld [vmem:[%s7695_s5 + $0x40] sm:$0xff]  }
0x13ab   : > { %v8103_v15 = vadd.f32 %v3744_v6, %v3740_v9  ;;  %v6387_v6 = vcombine.high %v3785_v2, %v3793_v3  ;;  %v3801_v9 = vld [vmem:[%s7690_s23 + $0x1a8] sm:$0xff]  ;;  %v3827_v2 = vld [vmem:[%s7690_s23 + $0x278] sm:$0xff]  ;;  %v7323_v8 = vld [vmem:[%s7695_s5 + $0xc0] sm:$0xff]  }
0x13ad   : > { %v8107_v1 = vpack.c.bf16 %v8103_v15, %v8101_v14 }
0x13af   : > { %6424 = vmatmul.mubr.msk.bf16.vlgmr.msra.gmra.mrb[28].mxu1 %vm776_vm2, %v8107_v1  ;;  %6425 = vmatmul.mubr.msk.bf16.vlgmr.msra.gmra.mrb[24].mxu0 %vm776_vm2, %v8107_v1 }
0x13b0   : > { %4402 = vmatpush1.bf16.msra.mxu1 %v6348_v54  ;;  %4445 = vmatpush1.bf16.msra.mxu0 %v6350_v56  ;;  %v3776_v54 = vld [vmem:[%s7690_s23 + $0xe0] sm:$0xff]  ;;  %v3769_v56 = vld [vmem:[%s7690_s23 + $0xa8] sm:$0xff] }
0x13b1   : > { %4403 = vmatprep.subr.bf16.mxu1 %v6365_v16  ;;  %4446 = vmatprep.subr.bf16.mxu0 %v6367_v17  ;;  %v6369_v62 = vcombine.high %v3768_v53, %v3776_v54  ;;  %v6371_v24 = vcombine.high %v3769_v56, %v3777_v57  ;;  %v6368_v4 = vcombine.low %v3768_v53, %v3776_v54  ;;  %v3816_v17 = vld [vmem:[%s7690_s23 + $0x220] sm:$0xff]  ;;  %v3810_v53 = vld [vmem:[%s7690_s23 + $0x1f0] sm:$0xff]  ;;  %v3803_v54 = vld [vmem:[%s7690_s23 + $0x1b8] sm:$0xff] }
0x13b2   : > { %4433 = vmatprep.mubr.bf16.mxu1 %v7553_v22  ;;  %4476 = vmatprep.mubr.bf16.mxu0 %v7553_v22  ;;  %v6370_v51 = vcombine.low %v3769_v56, %v3777_v57  ;;  %v6403_v16 = vcombine.high %v3801_v9, %v3809_v10  ;;  %v6416_v45 = vcombine.low %v3816_v17, %v3824_v18  ;;  %v3811_v56 = vld [vmem:[%s7690_s23 + $0x1f8] sm:$0xff] }
0x13b4   : > { %4404 = vmatpush1.bf16.msra.mxu1 %v6364_v21  ;;  %4447 = vmatpush1.bf16.msra.mxu0 %v6366_v23  ;;  %v6402_v21 = vcombine.low %v3801_v9, %v3809_v10  ;;  %v6417_v23 = vcombine.high %v3816_v17, %v3824_v18  ;;  %v7324_v9 = vld [vmem:[%s7695_s5] sm:$0xff]   ;;  %v7330_v17 = vld [vmem:[%s7695_s5 + $0x50] sm:$0xff]  }
0x13b5   : > { %4405 = vmatprep.subr.bf16.mxu1 %v6381_v26  ;;  %4448 = vmatprep.subr.bf16.mxu0 %v6383_v27  ;;  %v6419_v26 = vcombine.high %v3817_v0, %v3825_v19  ;;  %v3754_v27 = vld [vmem:[%s7690_s23 + $0x30] sm:$0xff]  ;;  %v7325_v10 = vld [vmem:[%s7695_s5 + $0x80] sm:$0xff]  }
0x13b6   : > { %v6356_v40 = vcombine.low %v3754_v27, %v3762_v42  ;;  %v7331_v18 = vld [vmem:[%s7695_s5 + $0xd0] sm:$0xff]  }
0x13b8   : > { %4406 = vmatpush1.bf16.msra.mxu1 %v6380_v30  ;;  %4449 = vmatpush1.bf16.msra.mxu0 %v6382_v31  ;;  %v6418_v30 = vcombine.low %v3817_v0, %v3825_v19  ;;  %v6357_v31 = vcombine.high %v3754_v27, %v3762_v42  ;;  %v7332_v0 = vld [vmem:[%s7695_s5 + $0x10] sm:$0xff]   ;;  %v7339_v27 = vld [vmem:[%s7695_s5 + $0xe0] sm:$0xff]  }
0x13b9   : > { %4407 = vmatprep.subr.bf16.mxu1 %v6397_v32  ;;  %4450 = vmatprep.subr.bf16.mxu0 %v6399_v33  ;;  %v6359_v32 = vcombine.high %v3755_v28, %v3763_v29  ;;  %v3770_v33 = vld [vmem:[%s7690_s23 + $0xb0] sm:$0xff]  ;;  %v7340_v42 = vld [vmem:[%s7695_s5 + $0x20] sm:$0xff]  }
0x13ba   : > { %v6372_v46 = vcombine.low %v3770_v33, %v3778_v34  ;;  %v7333_v19 = vld [vmem:[%s7695_s5 + $0x90] sm:$0xff]  }
0x13bc   : > { %4408 = vmatpush1.bf16.msra.mxu1 %v6396_v50  ;;  %4451 = vmatpush1.bf16.msra.mxu0 %v6398_v41  ;;  %v6358_v50 = vcombine.low %v3755_v28, %v3763_v29  ;;  %v6373_v41 = vcombine.high %v3770_v33, %v3778_v34  ;;  %v7341_v28 = vld [vmem:[%s7695_s5 + $0xa0] sm:$0xff]   ;;  %v7342_v29 = vld [vmem:[%s7695_s5 + $0x68] sm:$0xff]   ;;  %v7347_v33 = vld [vmem:[%s7695_s5 + $0xf0] sm:$0xff]  }
0x13bd   : > { %4409 = vmatprep.subr.bf16.mxu1 %v6413_v43  ;;  %4452 = vmatprep.subr.bf16.mxu0 %v6415_v58  ;;  %v6375_v43 = vcombine.high %v3771_v37, %v3779_v39  ;;  %v3786_v58 = vld [vmem:[%s7690_s23 + $0x130] sm:$0xff] }
0x13be   : > { %v6388_v57 = vcombine.low %v3786_v58, %v3794_v55  ;;  %v7348_v34 = vld [vmem:[%s7695_s5 + $0x30] sm:$0xff]  }
0x13c0   : > { %4410 = vmatpush1.bf16.msra.mxu1 %v6412_v47  ;;  %4453 = vmatpush1.bf16.msra.mxu0 %v6414_v49  ;;  %v6374_v47 = vcombine.low %v3771_v37, %v3779_v39  ;;  %v6389_v49 = vcombine.high %v3786_v58, %v3794_v55  ;;  %v7349_v37 = vld [vmem:[%s7695_s5 + $0xb0] sm:$0xff]   ;;  %v7350_v39 = vld [vmem:[%s7695_s5 + $0x78] sm:$0xff]   ;;  %v7355_v58 = vld [vmem:[%s7695_s5 + $0x1c0] sm:$0xff]   ;;  %v8218_v55 = vsub.s32 2, %v7750_v35 }
0x13c1   : > { %4487 = vmatprep.subr.bf16.mxu1 %v6353_v48  ;;  %4530 = vmatprep.subr.bf16.mxu0 %v6355_v52  ;;  %v6391_v48 = vcombine.high %v3787_v61, %v3795_v44  ;;  %v3802_v52 = vld [vmem:[%s7690_s23 + $0x1b0] sm:$0xff] }
0x13c2   : > { %v6404_v3 = vcombine.low %v3802_v52, %v3810_v53 }
0x13c3   : > { %6426 = vmatmul.mubr.msk.bf16.vlgmr.msra.gmra.mrb[32].mxu1 %vm776_vm2, %v8107_v1  ;;  %6427 = vmatmul.mubr.msk.bf16.vlgmr.msra.gmra.mrb[28].mxu0 %vm776_vm2, %v8107_v1 }
0x13c4   : > { %4488 = vmatpush1.bf16.msra.mxu1 %v6352_v59  ;;  %4531 = vmatpush1.bf16.msra.mxu0 %v6354_v60  ;;  %v6390_v59 = vcombine.low %v3787_v61, %v3795_v44  ;;  %v6405_v60 = vcombine.high %v3802_v52, %v3810_v53  ;;  %v8221_v61 = vld [vmem:[%s7684_s17] sm:$0xff]  ;;  %v8224_v44 = vsub.s32 3, %v7750_v35 }
0x13c5   : > { %4489 = vmatprep.subr.bf16.mxu1 %v6369_v62  ;;  %4532 = vmatprep.subr.bf16.mxu0 %v6371_v24  ;;  %v6407_v62 = vcombine.high %v3803_v54, %v3811_v56  ;;  %v3818_v24 = vld [vmem:[%s7690_s23 + $0x230] sm:$0xff] }
0x13c6   : > { %4519 = vmatprep.mubr.bf16.mxu1 %v7553_v22  ;;  %4562 = vmatprep.mubr.bf16.mxu0 %v7553_v22 }
0x13c8   : > { %4490 = vmatpush1.bf16.msra.mxu1 %v6368_v4  ;;  %4533 = vmatpush1.bf16.msra.mxu0 %v6370_v51  ;;  %v6406_v4 = vcombine.low %v3803_v54, %v3811_v56  ;;  %v6423_v51 = vcombine.high %v3819_v25, %v3827_v2 }
0x13c9   : > { %4491 = vmatprep.subr.bf16.mxu1 %v6385_v5  ;;  %4534 = vmatprep.subr.bf16.mxu0 %v6387_v6  ;;  %v6420_v5 = vcombine.low %v3818_v24, %v3826_v63  ;;  %v6422_v6 = vcombine.low %v3819_v25, %v3827_v2 }
0x13cc   : > { %4492 = vmatpush1.bf16.msra.mxu1 %v6384_v11  ;;  %4535 = vmatpush1.bf16.msra.mxu0 %v6386_v12  ;;  %v7326_v11 = vld [vmem:[%s7695_s5 + $0x48] sm:$0xff]  }
0x13cd   : > { %4493 = vmatprep.subr.bf16.mxu1 %v6401_v13  ;;  %4536 = vmatprep.subr.bf16.mxu0 %v6403_v16  ;;  %v7327_v12 = vld [vmem:[%s7695_s5 + $0xc8] sm:$0xff]  }
0x13ce   : > { %v7328_v13 = vld [vmem:[%s7695_s5 + $0x8] sm:$0xff]  }
0x13cf   : > { %v7329_v16 = vld [vmem:[%s7695_s5 + $0x88] sm:$0xff]  }
0x13d0   : > { %4494 = vmatpush1.bf16.msra.mxu1 %v6400_v20  ;;  %4537 = vmatpush1.bf16.msra.mxu0 %v6402_v21  ;;  %v7335_v20 = vld [vmem:[%s7695_s5 + $0xd8] sm:$0xff]  }
0x13d1   : > { %4495 = vmatprep.subr.bf16.mxu1 %v6417_v23  ;;  %4538 = vmatprep.subr.bf16.mxu0 %v6419_v26  ;;  %v7336_v21 = vld [vmem:[%s7695_s5 + $0x18] sm:$0xff]   ;;  %v7338_v26 = vld [vmem:[%s7695_s5 + $0x60] sm:$0xff]  }
0x13d2   : > { %v7337_v23 = vld [vmem:[%s7695_s5 + $0x98] sm:$0xff]  }
0x13d4   : > { %4496 = vmatpush1.bf16.msra.mxu1 %v6416_v45  ;;  %4539 = vmatpush1.bf16.msra.mxu0 %v6418_v30  ;;  %v7343_v45 = vld [vmem:[%s7695_s5 + $0xe8] sm:$0xff]  }
0x13d5   : > { %4573 = vmatprep.subr.bf16.mxu1 %v6357_v31  ;;  %4616 = vmatprep.subr.bf16.mxu0 %v6359_v32  ;;  %v7344_v30 = vld [vmem:[%s7695_s5 + $0x28] sm:$0xff]   ;;  %v7346_v32 = vld [vmem:[%s7695_s5 + $0x70] sm:$0xff]  }
0x13d6   : > { %v7345_v31 = vld [vmem:[%s7695_s5 + $0xa8] sm:$0xff]  }
0x13d7   : > { %6428 = vmatmul.mubr.msk.bf16.vlgmr.msra.gmra.mrb[36].mxu1 %vm776_vm2, %v8107_v1  ;;  %6429 = vmatmul.mubr.msk.bf16.vlgmr.msra.gmra.mrb[32].mxu0 %vm776_vm2, %v8107_v1 }
0x13d8   : > { %4574 = vmatpush1.bf16.msra.mxu1 %v6356_v40  ;;  %4617 = vmatpush1.bf16.msra.mxu0 %v6358_v50  ;;  %v7351_v40 = vld [vmem:[%s7695_s5 + $0xf8] sm:$0xff]  }
0x13d9   : > { %4575 = vmatprep.subr.bf16.mxu1 %v6373_v41  ;;  %4618 = vmatprep.subr.bf16.mxu0 %v6375_v43  ;;  %v7352_v50 = vld [vmem:[%s7695_s5 + $0x38] sm:$0xff]   ;;  %v7354_v43 = vld [vmem:[%s7695_s5 + $0x140] sm:$0xff]  }
0x13da   : > { %4605 = vmatprep.mubr.bf16.mxu1 %v7553_v22  ;;  %4648 = vmatprep.mubr.bf16.mxu0 %v7553_v22  ;;  %v6421_v22 = vcombine.high %v3818_v24, %v3826_v63  ;;  %v7353_v41 = vld [vmem:[%s7695_s5 + $0xb8] sm:$0xff]  }
0x13dc   : > { %4576 = vmatpush1.bf16.msra.mxu1 %v6372_v46  ;;  %4619 = vmatpush1.bf16.msra.mxu0 %v6374_v47  ;;  %v3835_v46 = vrot.slane %v8221_v61, %v7753_v36  ;;  %v3843_v47 = vrot.slane %v8221_v61, %v8218_v55 }
0x13dd   : > { %4577 = vmatprep.subr.bf16.mxu1 %v6389_v49  ;;  %4620 = vmatprep.subr.bf16.mxu0 %v6391_v48  ;;  %v3839_v49 = vrot.slane %v8221_v61, %v7757_v38  ;;  %v3847_v48 = vrot.slane %v8221_v61, %v8224_v44 }
0x13e0   : > { %4578 = vmatpush1.bf16.msra.mxu1 %v6388_v57  ;;  %4621 = vmatpush1.bf16.msra.mxu0 %v6390_v59 }
0x13e1   : > { %4579 = vmatprep.subr.bf16.mxu1 %v6405_v60  ;;  %4622 = vmatprep.subr.bf16.mxu0 %v6407_v62 }
0x13e4   : > { %4580 = vmatpush1.bf16.msra.mxu1 %v6404_v3  ;;  %4623 = vmatpush1.bf16.msra.mxu0 %v6406_v4 }
0x13e5   : > { %4581 = vmatprep.subr.bf16.mxu1 %v6421_v22  ;;  %4624 = vmatprep.subr.bf16.mxu0 %v6423_v51 }
0x13e8   : > { %4582 = vmatpush1.bf16.msra.mxu1 %v6420_v5  ;;  %4625 = vmatpush1.bf16.msra.mxu0 %v6422_v6 }
0x13e9   : > { %6681 = vmatprep.subr.bf16.mxu1 %v7322_v7  ;;  %6703 = vmatprep.subr.bf16.mxu0 %v7323_v8 }
0x13eb   : > { %6430 = vmatmul.mubr.msk.bf16.vlgmr.msra.gmra.mrb[40].mxu1 %vm776_vm2, %v8107_v1  ;;  %6431 = vmatmul.mubr.msk.bf16.vlgmr.msra.gmra.mrb[36].mxu0 %vm776_vm2, %v8107_v1  ;;  %v7334_v1 = vld [vmem:[%s7695_s5 + $0x58] sm:$0xff]  }
0x13ec   : > { %6682 = vmatpush3.bf16.msra.mxu1 %v7324_v9  ;;  %6704 = vmatpush3.bf16.msra.mxu0 %v7325_v10 }
0x13ed   : > { %6683 = vmatprep.subr.bf16.mxu1 %v7326_v11  ;;  %6705 = vmatprep.subr.bf16.mxu0 %v7327_v12 }
0x13f0   : > { %6684 = vmatpush3.bf16.msra.mxu1 %v7328_v13  ;;  %6706 = vmatpush3.bf16.msra.mxu0 %v7329_v16 }
0x13f1   : > { %6685 = vmatprep.subr.bf16.mxu1 %v7330_v17  ;;  %6707 = vmatprep.subr.bf16.mxu0 %v7331_v18 }
0x13f4   : > { %6686 = vmatpush3.bf16.msra.mxu1 %v7332_v0  ;;  %6708 = vmatpush3.bf16.msra.mxu0 %v7333_v19  ;;  %v7356_v0 = vld [vmem:[%s7695_s5 + $0x100] sm:$0xff]  }
0x13f5   : > { %6687 = vmatprep.subr.bf16.mxu1 %v7334_v1  ;;  %6709 = vmatprep.subr.bf16.mxu0 %v7335_v20  ;;  %v7357_v19 = vld [vmem:[%s7695_s5 + $0x180] sm:$0xff]   ;;  %v7358_v1 = vld [vmem:[%s7695_s5 + $0x148] sm:$0xff]  }
0x13f6   : > { %v7359_v20 = vld [vmem:[%s7695_s5 + $0x1c8] sm:$0xff]  }
0x13f8   : > { %6688 = vmatpush3.bf16.msra.mxu1 %v7336_v21  ;;  %6710 = vmatpush3.bf16.msra.mxu0 %v7337_v23  ;;  %v7360_v21 = vld [vmem:[%s7695_s5 + $0x108] sm:$0xff]  }
0x13f9   : > { %6689 = vmatprep.subr.bf16.mxu1 %v7338_v26  ;;  %6711 = vmatprep.subr.bf16.mxu0 %v7339_v27  ;;  %v7361_v23 = vld [vmem:[%s7695_s5 + $0x188] sm:$0xff]   ;;  %v7362_v26 = vld [vmem:[%s7695_s5 + $0x150] sm:$0xff]  }
0x13fa   : > { %v7363_v27 = vld [vmem:[%s7695_s5 + $0x1d0] sm:$0xff]  }
0x13fc   : > { %6690 = vmatpush3.bf16.msra.mxu1 %v7340_v42  ;;  %6712 = vmatpush3.bf16.msra.mxu0 %v7341_v28  ;;  %v3850_v42 = vsub.s32 4, %v7750_v35  ;;  %v3858_v28 = vsub.s32 6, %v7750_v35 }
0x13fd   : > { %6691 = vmatprep.subr.bf16.mxu1 %v7342_v29  ;;  %6713 = vmatprep.subr.bf16.mxu0 %v7343_v45  ;;  %v3854_v29 = vsub.s32 5, %v7750_v35  ;;  %v3862_v45 = vsub.s32 7, %v7750_v35 }
0x1400   : > { %6692 = vmatpush3.bf16.msra.mxu1 %v7344_v30  ;;  %6714 = vmatpush3.bf16.msra.mxu0 %v7345_v31  ;;  %v7364_v30 = vld [vmem:[%s7695_s5 + $0x110] sm:$0xff]  }
0x1401   : > { %6693 = vmatprep.subr.bf16.mxu1 %v7346_v32  ;;  %6715 = vmatprep.subr.bf16.mxu0 %v7347_v33  ;;  %v7365_v31 = vld [vmem:[%s7695_s5 + $0x190] sm:$0xff]   ;;  %v3851_v32 = vrot.slane %v8221_v61, %v3850_v42  ;;  %v3859_v33 = vrot.slane %v8221_v61, %v3858_v28 }
0x1404   : > { %6694 = vmatpush3.bf16.msra.mxu1 %v7348_v34  ;;  %6716 = vmatpush3.bf16.msra.mxu0 %v7349_v37  ;;  %v7366_v34 = vld [vmem:[%s7695_s5 + $0x158] sm:$0xff]  }
0x1405   : > { %6695 = vmatprep.subr.bf16.mxu1 %v7350_v39  ;;  %6717 = vmatprep.subr.bf16.mxu0 %v7351_v40  ;;  %v7367_v37 = vld [vmem:[%s7695_s5 + $0x1d8] sm:$0xff]   ;;  %v3855_v39 = vrot.slane %v8221_v61, %v3854_v29  ;;  %v3863_v40 = vrot.slane %v8221_v61, %v3862_v45 }
0x1408   : > { %6696 = vmatpush3.bf16.msra.mxu1 %v7352_v50  ;;  %6718 = vmatpush3.bf16.msra.mxu0 %v7353_v41 }
0x1409   : > { %6725 = vmatprep.subr.bf16.mxu1 %v7354_v43  ;;  %6747 = vmatprep.subr.bf16.mxu0 %v7355_v58  ;;  %v7368_v43 = vld [vmem:[%s7695_s5 + $0x118] sm:$0xff]  }
0x140a   : > { %v7369_v58 = vld [vmem:[%s7695_s5 + $0x198] sm:$0xff]  }
0x1482   : > { %v4349_v52 = vpop.f32.mrb[28].mxu1  ;;  %v4392_v53 = vpop.f32.mrb[24].mxu0 }
0x1483   : > { %v4350_v54 = vadd.f32 %v4349_v52, %v3835_v46  ;;  %v4393_v56 = vadd.f32 %v4392_v53, %v3843_v47  ;;  %v4351_v57 = vpop.f32.mrb[29].mxu1  ;;  %v4394_v59 = vpop.f32.mrb[25].mxu0  ;;  %v7370_v52 = vld [vmem:[%s7695_s5 + $0x160] sm:$0xff]  }
0x1484   : > { %v4352_v60 = vadd.f32 %v4351_v57, %v3839_v49  ;;  %v4395_v62 = vadd.f32 %v4394_v59, %v3847_v48  ;;  %v4353_v24 = vpop.f32.mrb[30].mxu1  ;;  %v4396_v63 = vpop.f32.mrb[26].mxu0  ;;  %v7371_v53 = vld [vmem:[%s7695_s5 + $0x1e0] sm:$0xff]  }
0x1485   : > { %v4354_v25 = vadd.f32 %v4353_v24, %v3835_v46  ;;  %v4397_v2 = vadd.f32 %v4396_v63, %v3843_v47  ;;  %v4355_v3 = vpop.f32.mrb[31].mxu1  ;;  %v4398_v4 = vpop.f32.mrb[27].mxu0  ;;  %v4659_v5 = vmax.f32 %v4350_v54, 0.0  ;;  %v4661_v6 = vmax.f32 %v4393_v56, 0.0 }
0x1486   : > { %v4356_v22 = vadd.f32 %v4355_v3, %v3839_v49  ;;  %v4399_v51 = vadd.f32 %v4398_v4, %v3847_v48  ;;  %v4660_v9 = vmax.f32 %v4352_v60, 0.0  ;;  %v4662_v10 = vmax.f32 %v4395_v62, 0.0  ;;  %v7373_v3 = vld [vmem:[%s7695_s5 + $0x1a0] sm:$0xff]  }
0x1487   : > { %v4675_v7 = vmax.f32 %v4354_v25, 0.0  ;;  %v4677_v8 = vmax.f32 %v4397_v2, 0.0  ;;  %v7372_v2 = vld [vmem:[%s7695_s5 + $0x120] sm:$0xff]  }
0x1488   : > { %v4676_v11 = vmax.f32 %v4356_v22, 0.0  ;;  %v4678_v12 = vmax.f32 %v4399_v51, 0.0 }
0x1489   : > { %v4691_v13 = vpack.c.bf16 %v4675_v7, %v4659_v5  ;;  %v4693_v16 = vpack.c.bf16 %v4677_v8, %v4661_v6  ;;  %v7374_v6 = vld [vmem:[%s7695_s5 + $0x168] sm:$0xff]  }
0x148a   : > { %v4692_v17 = vpack.c.bf16 %v4676_v11, %v4660_v9  ;;  %v4694_v18 = vpack.c.bf16 %v4678_v12, %v4662_v10  ;;  %v7375_v7 = vld [vmem:[%s7695_s5 + $0x1e8] sm:$0xff]  }
0x148c   : > { %5770 = vmatprep.mubr.bf16.mxu1 %v4692_v17  ;;  %5811 = vmatprep.mubr.bf16.mxu0 %v4694_v18  ;;  %v7376_v18 = vld [vmem:[%s7695_s5 + $0x128] sm:$0xff]  }
0x148d   : > { %5771 = vmatmul.mubr.bf16.vlgmr.msra.gmra.mrb[44].mxu1 %v4691_v13  ;;  %5812 = vmatmul.mubr.bf16.vlgmr.msra.gmra.mrb[40].mxu0 %v4693_v16 }
0x148e   : > { %6726 = vmatpush3.bf16.msra.mxu1 %v7356_v0  ;;  %6748 = vmatpush3.bf16.msra.mxu0 %v7357_v19  ;;  %v7377_v0 = vld [vmem:[%s7695_s5 + $0x1a8] sm:$0xff]   ;;  %v7378_v19 = vld [vmem:[%s7695_s5 + $0x170] sm:$0xff]  }
0x148f   : > { %6727 = vmatprep.subr.bf16.mxu1 %v7358_v1  ;;  %6749 = vmatprep.subr.bf16.mxu0 %v7359_v20  ;;  %v7379_v1 = vld [vmem:[%s7695_s5 + $0x1f0] sm:$0xff]  }
0x1490   : > { %v7380_v20 = vld [vmem:[%s7695_s5 + $0x130] sm:$0xff]  }
0x1492   : > { %6728 = vmatpush3.bf16.msra.mxu1 %v7360_v21  ;;  %6750 = vmatpush3.bf16.msra.mxu0 %v7361_v23  ;;  %v7381_v21 = vld [vmem:[%s7695_s5 + $0x1b0] sm:$0xff]   ;;  %v7382_v23 = vld [vmem:[%s7695_s5 + $0x178] sm:$0xff]  }
0x1493   : > { %6729 = vmatprep.subr.bf16.mxu1 %v7362_v26  ;;  %6751 = vmatprep.subr.bf16.mxu0 %v7363_v27  ;;  %v7383_v26 = vld [vmem:[%s7695_s5 + $0x1f8] sm:$0xff]   ;;  %v8279_v27 = vld [vmem:[%s7684_s17 + $0x8] sm:$0xff] }
0x1496   : > { %v4435_v50 = vpop.f32.mrb[32].mxu1  ;;  %v4478_v41 = vpop.f32.mrb[28].mxu0  ;;  %6730 = vmatpush3.bf16.msra.mxu1 %v7364_v30  ;;  %6752 = vmatpush3.bf16.msra.mxu0 %v7365_v31  ;;  %v7384_v30 = vld [vmem:[%s7695_s5 + $0x138] sm:$0xff]  }
0x1497   : > { %v4436_v46 = vadd.f32 %v4435_v50, %v3851_v32  ;;  %v4479_v47 = vadd.f32 %v4478_v41, %v3859_v33  ;;  %v4437_v49 = vpop.f32.mrb[33].mxu1  ;;  %v4480_v48 = vpop.f32.mrb[29].mxu0  ;;  %6731 = vmatprep.subr.bf16.mxu1 %v7366_v34  ;;  %6753 = vmatprep.subr.bf16.mxu0 %v7367_v37  ;;  %v7385_v31 = vld [vmem:[%s7695_s5 + $0x1b8] sm:$0xff]   ;;  %v7386_v34 = vld [vmem:[%s7695_s5 + $0x240] sm:$0xff]  }
0x1498   : > { %v4438_v54 = vadd.f32 %v4437_v49, %v3855_v39  ;;  %v4481_v56 = vadd.f32 %v4480_v48, %v3863_v40  ;;  %v4439_v57 = vpop.f32.mrb[34].mxu1  ;;  %v4482_v61 = vpop.f32.mrb[30].mxu0  ;;  %v7387_v37 = vld [vmem:[%s7695_s5 + $0x2c0] sm:$0xff]   ;;  %v7390_v48 = vld [vmem:[%s7695_s5 + $0x248] sm:$0xff]  }
0x1499   : > { %v4440_v59 = vadd.f32 %v4439_v57, %v3851_v32  ;;  %v4483_v60 = vadd.f32 %v4482_v61, %v3859_v33  ;;  %v4441_v62 = vpop.f32.mrb[35].mxu1  ;;  %v4484_v24 = vpop.f32.mrb[31].mxu0  ;;  %v4663_v4 = vmax.f32 %v4436_v46, 0.0  ;;  %v4665_v22 = vmax.f32 %v4479_v47, 0.0 }
0x149a   : > { %v4442_v63 = vadd.f32 %v4441_v62, %v3855_v39  ;;  %v4485_v25 = vadd.f32 %v4484_v24, %v3863_v40  ;;  %6732 = vmatpush3.bf16.msra.mxu1 %v7368_v43  ;;  %6754 = vmatpush3.bf16.msra.mxu0 %v7369_v58  ;;  %v4664_v8 = vmax.f32 %v4438_v54, 0.0  ;;  %v4666_v9 = vmax.f32 %v4481_v56, 0.0  ;;  %v7388_v43 = vld [vmem:[%s7695_s5 + $0x200] sm:$0xff]  }
0x149b   : > { %v4679_v51 = vmax.f32 %v4440_v59, 0.0  ;;  %v4681_v5 = vmax.f32 %v4483_v60, 0.0  ;;  %6733 = vmatprep.subr.bf16.mxu1 %v7370_v52  ;;  %6755 = vmatprep.subr.bf16.mxu0 %v7371_v53  ;;  %v3867_v32 = vrot.slane %v8279_v27, %v7753_v36  ;;  %v3875_v33 = vrot.slane %v8279_v27, %v8218_v55  ;;  %v7389_v58 = vld [vmem:[%s7695_s5 + $0x280] sm:$0xff]   ;;  %v7391_v52 = vld [vmem:[%s7695_s5 + $0x2c8] sm:$0xff]  }
0x149c   : > { %v4680_v10 = vmax.f32 %v4442_v63, 0.0  ;;  %v4682_v11 = vmax.f32 %v4485_v25, 0.0  ;;  %v3871_v39 = vrot.slane %v8279_v27, %v7757_v38  ;;  %v3879_v40 = vrot.slane %v8279_v27, %v8224_v44  ;;  %v7392_v63 = vld [vmem:[%s7695_s5 + $0x208] sm:$0xff]  }
0x149d   : > { %v4695_v12 = vpack.c.bf16 %v4679_v51, %v4663_v4  ;;  %v4697_v13 = vpack.c.bf16 %v4681_v5, %v4665_v22  ;;  %v7393_v25 = vld [vmem:[%s7695_s5 + $0x288] sm:$0xff]   ;;  %v7394_v51 = vld [vmem:[%s7695_s5 + $0x250] sm:$0xff]  }
0x149e   : > { %v4696_v16 = vpack.c.bf16 %v4680_v10, %v4664_v8  ;;  %v4698_v17 = vpack.c.bf16 %v4682_v11, %v4666_v9  ;;  %6734 = vmatpush3.bf16.msra.mxu1 %v7372_v2  ;;  %6756 = vmatpush3.bf16.msra.mxu0 %v7373_v3  ;;  %v7395_v5 = vld [vmem:[%s7695_s5 + $0x2d0] sm:$0xff]  }
0x149f   : > { %6735 = vmatprep.subr.bf16.mxu1 %v7374_v6  ;;  %6757 = vmatprep.subr.bf16.mxu0 %v7375_v7 }
0x14a0   : > { %5852 = vmatprep.mubr.bf16.mxu1 %v4696_v16  ;;  %5893 = vmatprep.mubr.bf16.mxu0 %v4698_v17  ;;  %v7396_v16 = vld [vmem:[%s7695_s5 + $0x210] sm:$0xff]  }
0x14a1   : > { %v7397_v17 = vld [vmem:[%s7695_s5 + $0x290] sm:$0xff]  }
0x14a2   : > { %6736 = vmatpush3.bf16.msra.mxu1 %v7376_v18  ;;  %6758 = vmatpush3.bf16.msra.mxu0 %v7377_v0  ;;  %v7398_v18 = vld [vmem:[%s7695_s5 + $0x258] sm:$0xff]  }
0x14a3   : > { %6737 = vmatprep.subr.bf16.mxu1 %v7378_v19  ;;  %6759 = vmatprep.subr.bf16.mxu0 %v7379_v1  ;;  %v7399_v0 = vld [vmem:[%s7695_s5 + $0x2d8] sm:$0xff]  }
0x14a4   : > { %v7400_v19 = vld [vmem:[%s7695_s5 + $0x218] sm:$0xff]  }
0x14a5   : > { %v7401_v1 = vld [vmem:[%s7695_s5 + $0x298] sm:$0xff]  }
0x14a6   : > { %6738 = vmatpush3.bf16.msra.mxu1 %v7380_v20  ;;  %6760 = vmatpush3.bf16.msra.mxu0 %v7381_v21  ;;  %v7402_v20 = vld [vmem:[%s7695_s5 + $0x260] sm:$0xff]  }
0x14a7   : > { %6739 = vmatprep.subr.bf16.mxu1 %v7382_v23  ;;  %6761 = vmatprep.subr.bf16.mxu0 %v7383_v26  ;;  %v7403_v21 = vld [vmem:[%s7695_s5 + $0x2e0] sm:$0xff]  }
0x14a8   : > { %v7404_v23 = vld [vmem:[%s7695_s5 + $0x220] sm:$0xff]  }
0x14a9   : > { %v7405_v26 = vld [vmem:[%s7695_s5 + $0x2a0] sm:$0xff]  }
0x14aa   : > { %v4521_v50 = vpop.f32.mrb[36].mxu1  ;;  %v4564_v41 = vpop.f32.mrb[32].mxu0  ;;  %6740 = vmatpush3.bf16.msra.mxu1 %v7384_v30  ;;  %6762 = vmatpush3.bf16.msra.mxu0 %v7385_v31  ;;  %v3883_v30 = vrot.slane %v8279_v27, %v3850_v42  ;;  %v3891_v31 = vrot.slane %v8279_v27, %v3858_v28  ;;  %v7408_v42 = vld [vmem:[%s7695_s5 + $0x228] sm:$0xff]  }
0x14ab   : > { %v4522_v36 = vadd.f32 %v4521_v50, %v3867_v32  ;;  %v4565_v46 = vadd.f32 %v4564_v41, %v3875_v33  ;;  %v4523_v47 = vpop.f32.mrb[37].mxu1  ;;  %v4566_v49 = vpop.f32.mrb[33].mxu0  ;;  %6769 = vmatprep.subr.bf16.mxu1 %v7386_v34  ;;  %6791 = vmatprep.subr.bf16.mxu0 %v7387_v37  ;;  %v3887_v34 = vrot.slane %v8279_v27, %v3854_v29  ;;  %v7409_v50 = vld [vmem:[%s7695_s5 + $0x2a8] sm:$0xff]   ;;  %v7411_v29 = vld [vmem:[%s7695_s5 + $0x2f0] sm:$0xff]  }
0x14ac   : > { %v4524_v38 = vadd.f32 %v4523_v47, %v3871_v39  ;;  %v4567_v53 = vadd.f32 %v4566_v49, %v3879_v40  ;;  %v4525_v54 = vpop.f32.mrb[38].mxu1  ;;  %v4568_v56 = vpop.f32.mrb[34].mxu0  ;;  %v3895_v37 = vrot.slane %v8279_v27, %v3862_v45 }
0x14ad   : > { %v4526_v57 = vadd.f32 %v4525_v54, %v3867_v32  ;;  %v4569_v61 = vadd.f32 %v4568_v56, %v3875_v33  ;;  %v4527_v59 = vpop.f32.mrb[39].mxu1  ;;  %v4570_v60 = vpop.f32.mrb[35].mxu0  ;;  %5853 = vmatmul.mubr.bf16.vlgmr.msra.gmra.mrb[48].mxu1 %v4695_v12  ;;  %5894 = vmatmul.mubr.bf16.vlgmr.msra.gmra.mrb[44].mxu0 %v4697_v13  ;;  %v4667_v2 = vmax.f32 %v4522_v36, 0.0  ;;  %v4669_v3 = vmax.f32 %v4565_v46, 0.0  ;;  %v7406_v32 = vld [vmem:[%s7695_s5 + $0x268] sm:$0xff]   ;;  %v7410_v36 = vld [vmem:[%s7695_s5 + $0x270] sm:$0xff]  }
0x14ae   : > { %v4528_v62 = vadd.f32 %v4527_v59, %v3871_v39  ;;  %v4571_v24 = vadd.f32 %v4570_v60, %v3879_v40  ;;  %6770 = vmatpush3.bf16.msra.mxu1 %v7388_v43  ;;  %6792 = vmatpush3.bf16.msra.mxu0 %v7389_v58  ;;  %v4668_v6 = vmax.f32 %v4524_v38, 0.0  ;;  %v4670_v7 = vmax.f32 %v4567_v53, 0.0  ;;  %v7407_v33 = vld [vmem:[%s7695_s5 + $0x2e8] sm:$0xff]   ;;  %v7412_v54 = vld [vmem:[%s7695_s5 + $0x230] sm:$0xff]  }
0x14af   : > { %v4683_v4 = vmax.f32 %v4526_v57, 0.0  ;;  %v4685_v22 = vmax.f32 %v4569_v61, 0.0  ;;  %6771 = vmatprep.subr.bf16.mxu1 %v7390_v48  ;;  %6793 = vmatprep.subr.bf16.mxu0 %v7391_v52  ;;  %v7413_v56 = vld [vmem:[%s7695_s5 + $0x2b0] sm:$0xff]  }
0x14b0   : > { %v4684_v8 = vmax.f32 %v4528_v62, 0.0  ;;  %v4686_v9 = vmax.f32 %v4571_v24, 0.0  ;;  %v7414_v62 = vld [vmem:[%s7695_s5 + $0x278] sm:$0xff]  }
0x14b1   : > { %v8301_v10 = vpack.c.bf16 %v4683_v4, %v4667_v2  ;;  %v8303_v11 = vpack.c.bf16 %v4685_v22, %v4669_v3  ;;  %v7415_v24 = vld [vmem:[%s7695_s5 + $0x2f8] sm:$0xff]  }
0x14b2   : > { %v4700_v12 = vpack.c.bf16 %v4684_v8, %v4668_v6  ;;  %v4702_v13 = vpack.c.bf16 %v4686_v9, %v4670_v7  ;;  %6772 = vmatpush3.bf16.msra.mxu1 %v7392_v63  ;;  %6794 = vmatpush3.bf16.msra.mxu0 %v7393_v25  ;;  %v7416_v6 = vld [vmem:[%s7695_s5 + $0x238] sm:$0xff]   ;;  %v7418_v8 = vld [vmem:[%s7695_s5 + $0x340] sm:$0xff]  }
0x14b3   : > { %6773 = vmatprep.subr.bf16.mxu1 %v7394_v51  ;;  %6795 = vmatprep.subr.bf16.mxu0 %v7395_v5  ;;  %v7417_v7 = vld [vmem:[%s7695_s5 + $0x2b8] sm:$0xff]   ;;  %v7419_v9 = vld [vmem:[%s7695_s5 + $0x3c0] sm:$0xff]  }
0x14b4   : > { %5934 = vmatprep.mubr.bf16.mxu1 %v4700_v12  ;;  %5975 = vmatprep.mubr.bf16.mxu0 %v4702_v13  ;;  %v7420_v12 = vld [vmem:[%s7695_s5 + $0x300] sm:$0xff]  }
0x14b5   : > { %v7421_v13 = vld [vmem:[%s7695_s5 + $0x380] sm:$0xff]  }
0x14b6   : > { %6774 = vmatpush3.bf16.msra.mxu1 %v7396_v16  ;;  %6796 = vmatpush3.bf16.msra.mxu0 %v7397_v17  ;;  %v7422_v16 = vld [vmem:[%s7695_s5 + $0x348] sm:$0xff]  }
0x14b7   : > { %6775 = vmatprep.subr.bf16.mxu1 %v7398_v18  ;;  %6797 = vmatprep.subr.bf16.mxu0 %v7399_v0  ;;  %v7423_v17 = vld [vmem:[%s7695_s5 + $0x3c8] sm:$0xff]  }
0x14b8   : > { %v7424_v18 = vld [vmem:[%s7695_s5 + $0x308] sm:$0xff]  }
0x14b9   : > { %v7425_v0 = vld [vmem:[%s7695_s5 + $0x388] sm:$0xff]  }
0x14ba   : > { %6776 = vmatpush3.bf16.msra.mxu1 %v7400_v19  ;;  %6798 = vmatpush3.bf16.msra.mxu0 %v7401_v1  ;;  %v7426_v19 = vld [vmem:[%s7695_s5 + $0x350] sm:$0xff]  }
0x14bb   : > { %6777 = vmatprep.subr.bf16.mxu1 %v7402_v20  ;;  %6799 = vmatprep.subr.bf16.mxu0 %v7403_v21  ;;  %v7427_v1 = vld [vmem:[%s7695_s5 + $0x3d0] sm:$0xff]   ;;  %v7430_v20 = vld [vmem:[%s7695_s5 + $0x358] sm:$0xff]  }
0x14bc   : > { %v7431_v21 = vld [vmem:[%s7695_s5 + $0x3d8] sm:$0xff]  }
0x14be   : > { %v4607_v39 = vpop.f32.mrb[40].mxu1  ;;  %v4650_v40 = vpop.f32.mrb[36].mxu0  ;;  %6778 = vmatpush3.bf16.msra.mxu1 %v7404_v23  ;;  %6800 = vmatpush3.bf16.msra.mxu0 %v7405_v26  ;;  %v7432_v23 = vld [vmem:[%s7695_s5 + $0x318] sm:$0xff]  }
0x14bf   : > { %v4608_v41 = vadd.f32 %v4607_v39, %v3883_v30  ;;  %v4651_v28 = vadd.f32 %v4650_v40, %v3891_v31  ;;  %v4609_v43 = vpop.f32.mrb[41].mxu1  ;;  %v4652_v58 = vpop.f32.mrb[37].mxu0  ;;  %6779 = vmatprep.subr.bf16.mxu1 %v7406_v32  ;;  %6801 = vmatprep.subr.bf16.mxu0 %v7407_v33  ;;  %v7433_v26 = vld [vmem:[%s7695_s5 + $0x398] sm:$0xff]   ;;  %v7436_v32 = vld [vmem:[%s7695_s5 + $0x320] sm:$0xff]   ;;  %v7440_v39 = vld [vmem:[%s7695_s5 + $0x328] sm:$0xff]  }
0x14c0   : > { %v4610_v46 = vadd.f32 %v4609_v43, %v3887_v34  ;;  %v4653_v35 = vadd.f32 %v4652_v58, %v3895_v37  ;;  %v4611_v47 = vpop.f32.mrb[42].mxu1  ;;  %v4654_v45 = vpop.f32.mrb[38].mxu0  ;;  %v7437_v33 = vld [vmem:[%s7695_s5 + $0x3a0] sm:$0xff]   ;;  %v7441_v40 = vld [vmem:[%s7695_s5 + $0x3a8] sm:$0xff]   ;;  %v7446_v43 = vld [vmem:[%s7695_s5 + $0x378] sm:$0xff]  }
0x14c1   : > { %v4612_v27 = vadd.f32 %v4611_v47, %v3883_v30  ;;  %v4655_v49 = vadd.f32 %v4654_v45, %v3891_v31  ;;  %v4613_v48 = vpop.f32.mrb[43].mxu1  ;;  %v4656_v52 = vpop.f32.mrb[39].mxu0  ;;  %v4671_v57 = vmax.f32 %v4608_v41, 0.0  ;;  %v4673_v61 = vmax.f32 %v4651_v28, 0.0  ;;  %v7434_v30 = vld [vmem:[%s7695_s5 + $0x360] sm:$0xff]   ;;  %v7444_v41 = vld [vmem:[%s7695_s5 + $0x330] sm:$0xff]  }
0x14c2   : > { %v4614_v38 = vadd.f32 %v4613_v48, %v3887_v34  ;;  %v4657_v53 = vadd.f32 %v4656_v52, %v3895_v37  ;;  %6780 = vmatpush3.bf16.msra.mxu1 %v7408_v42  ;;  %6802 = vmatpush3.bf16.msra.mxu0 %v7409_v50  ;;  %v4672_v63 = vmax.f32 %v4610_v46, 0.0  ;;  %v4674_v25 = vmax.f32 %v4653_v35, 0.0  ;;  %v7435_v31 = vld [vmem:[%s7695_s5 + $0x3e0] sm:$0xff]   ;;  %v7438_v34 = vld [vmem:[%s7695_s5 + $0x368] sm:$0xff]   ;;  %v7442_v42 = vld [vmem:[%s7695_s5 + $0x370] sm:$0xff]  }
0x14c3   : > { %v4687_v59 = vmax.f32 %v4612_v27, 0.0  ;;  %v4689_v60 = vmax.f32 %v4655_v49, 0.0  ;;  %6781 = vmatprep.subr.bf16.mxu1 %v7410_v36  ;;  %6803 = vmatprep.subr.bf16.mxu0 %v7411_v29  ;;  %v7439_v37 = vld [vmem:[%s7695_s5 + $0x3e8] sm:$0xff]   ;;  %v7443_v50 = vld [vmem:[%s7695_s5 + $0x3f0] sm:$0xff]   ;;  %v7447_v58 = vld [vmem:[%s7695_s5 + $0x3f8] sm:$0xff]  }
0x14c4   : > { %v4688_v2 = vmax.f32 %v4614_v38, 0.0  ;;  %v4690_v3 = vmax.f32 %v4657_v53, 0.0  ;;  %v7445_v28 = vld [vmem:[%s7695_s5 + $0x3b0] sm:$0xff]   ;;  %v7448_v36 = vld [vmem:[%s7695_s5 + $0x338] sm:$0xff]   ;;  %v6432_v47 = vld [vmem:[%s587_s28] ss:$0 sm:$0xff] }
0x14c5   : > { %v8337_v4 = vpack.c.bf16 %v4687_v59, %v4671_v57  ;;  %v8339_v22 = vpack.c.bf16 %v4689_v60, %v4673_v61  ;;  %v7449_v29 = vld [vmem:[%s7695_s5 + $0x3b8] sm:$0xff]   ;;  %s8441_s28 = sld [smem:[#allocation9_spill]] (!%p6561_p5) }
0x14c6   : > { %v4704_v51 = vpack.c.bf16 %v4688_v2, %v4672_v63  ;;  %v4706_v5 = vpack.c.bf16 %v4690_v3, %v4674_v25  ;;  %6782 = vmatpush3.bf16.msra.mxu1 %v7412_v54  ;;  %6804 = vmatpush3.bf16.msra.mxu0 %v7413_v56 }
0x14c7   : > { %6783 = vmatprep.subr.bf16.mxu1 %v7414_v62  ;;  %6805 = vmatprep.subr.bf16.mxu0 %v7415_v24 }
0x14ca   : > { %6784 = vmatpush3.bf16.msra.mxu1 %v7416_v6  ;;  %6806 = vmatpush3.bf16.msra.mxu0 %v7417_v7 }
0x14cb   : > { %6813 = vmatprep.subr.bf16.mxu1 %v7418_v8  ;;  %6835 = vmatprep.subr.bf16.mxu0 %v7419_v9 }
0x14cd   : > { %5935 = vmatmul.mubr.bf16.vlgmr.msra.gmra.mrb[52].mxu1 %v8301_v10  ;;  %5976 = vmatmul.mubr.bf16.vlgmr.msra.gmra.mrb[48].mxu0 %v8303_v11  ;;  %v7428_v10 = vld [vmem:[%s7695_s5 + $0x310] sm:$0xff]  }
0x14ce   : > { %6814 = vmatpush3.bf16.msra.mxu1 %v7420_v12  ;;  %6016 = vmatprep.mubr.bf16.mxu1 %v4704_v51  ;;  %v7429_v11 = vld [vmem:[%s7695_s5 + $0x390] sm:$0xff]  }
0x14cf   : > { %6836 = vmatpush3.bf16.msra.mxu0 %v7421_v13  ;;  %6057 = vmatprep.mubr.bf16.mxu0 %v4706_v5 }
0x14d0   : > { %6815 = vmatprep.subr.bf16.mxu1 %v7422_v16  ;;  %6837 = vmatprep.subr.bf16.mxu0 %v7423_v17 }
0x14d2   : > { %6816 = vmatpush3.bf16.msra.mxu1 %v7424_v18 }
0x14d3   : > { %6838 = vmatpush3.bf16.msra.mxu0 %v7425_v0  ;;  %6817 = vmatprep.subr.bf16.mxu1 %v7426_v19 }
0x14d4   : > { %6839 = vmatprep.subr.bf16.mxu0 %v7427_v1 }
0x14d6   : > { %6818 = vmatpush3.bf16.msra.mxu1 %v7428_v10 }
0x14d7   : > { %6840 = vmatpush3.bf16.msra.mxu0 %v7429_v11  ;;  %6819 = vmatprep.subr.bf16.mxu1 %v7430_v20 }
0x14d8   : > { %6841 = vmatprep.subr.bf16.mxu0 %v7431_v21 }
0x14da   : > { %6820 = vmatpush3.bf16.msra.mxu1 %v7432_v23 }
0x14db   : > { %6842 = vmatpush3.bf16.msra.mxu0 %v7433_v26  ;;  %6821 = vmatprep.subr.bf16.mxu1 %v7434_v30 }
0x14dc   : > { %6843 = vmatprep.subr.bf16.mxu0 %v7435_v31 }
0x14de   : > { %6822 = vmatpush3.bf16.msra.mxu1 %v7436_v32 }
0x14df   : > { %6844 = vmatpush3.bf16.msra.mxu0 %v7437_v33  ;;  %6823 = vmatprep.subr.bf16.mxu1 %v7438_v34 }
0x14e0   : > { %6845 = vmatprep.subr.bf16.mxu0 %v7439_v37 }
0x14e2   : > { %6824 = vmatpush3.bf16.msra.mxu1 %v7440_v39 }
0x14e3   : > { %6846 = vmatpush3.bf16.msra.mxu0 %v7441_v40  ;;  %6825 = vmatprep.subr.bf16.mxu1 %v7442_v42 }
0x14e4   : > { %6847 = vmatprep.subr.bf16.mxu0 %v7443_v50 }
0x14e6   : > { %6826 = vmatpush3.bf16.msra.mxu1 %v7444_v41 }
0x14e7   : > { %6848 = vmatpush3.bf16.msra.mxu0 %v7445_v28  ;;  %6827 = vmatprep.subr.bf16.mxu1 %v7446_v43 }
0x14e8   : > { %6849 = vmatprep.subr.bf16.mxu0 %v7447_v58 }
0x14ea   : > { %6828 = vmatpush3.bf16.msra.mxu1 %v7448_v36 }
0x14eb   : > { %6850 = vmatpush3.bf16.msra.mxu0 %v7449_v29 }
0x14ed   : > { %6017 = vmatmul.mubr.bf16.vlgmr.msra.gmra.mrb[56].mxu1 %v8337_v4 }
0x14ee   : > { %6058 = vmatmul.mubr.bf16.vlgmr.msra.gmra.mrb[52].mxu0 %v8339_v22 }
0x1560   : > { %v6697_v46 = vpop.f32.mrb[44].mxu1  ;;  %v6719_v35 = vpop.f32.mrb[40].mxu0 }
0x1561   : > { %v6698_v45 = vpop.f32.mrb[45].mxu1  ;;  %v6720_v27 = vpop.f32.mrb[41].mxu0 }
0x1562   : > { %v6699_v49 = vadd.f32 %v6698_v45, %v6697_v46  ;;  %v6721_v48 = vadd.f32 %v6720_v27, %v6719_v35  ;;  %v6700_v52 = vpop.f32.mrb[46].mxu1  ;;  %v6722_v38 = vpop.f32.mrb[42].mxu0 }
0x1563   : > { %v6701_v53 = vpop.f32.mrb[47].mxu1  ;;  %v6723_v54 = vpop.f32.mrb[43].mxu0 }
0x1564   : > { %v5773_v56 = vadd.f32 %v6699_v49, %v6432_v47  ;;  %v6702_v57 = vadd.f32 %v6701_v53, %v6700_v52  ;;  %v6724_v61 = vadd.f32 %v6723_v54, %v6722_v38 }
0x1566   : > { %v5814_v59 = vadd.f32 %v6721_v48, %v5773_v56  ;;  %v5776_v60 = vadd.f32 %v6702_v57, %v6432_v47 }
0x1568   : > { %v5817_v62 = vadd.f32 %v6724_v61, %v5776_v60 }
0x1580   : > { %v6741_v24 = vpop.f32.mrb[48].mxu1  ;;  %v6763_v63 = vpop.f32.mrb[44].mxu0 }
0x1581   : > { %v6742_v25 = vpop.f32.mrb[49].mxu1  ;;  %v6764_v2 = vpop.f32.mrb[45].mxu0 }
0x1582   : > { %v6743_v3 = vadd.f32 %v6742_v25, %v6741_v24  ;;  %v6765_v4 = vadd.f32 %v6764_v2, %v6763_v63  ;;  %v6744_v22 = vpop.f32.mrb[50].mxu1  ;;  %v6766_v51 = vpop.f32.mrb[46].mxu0 }
0x1583   : > { %v6745_v5 = vpop.f32.mrb[51].mxu1  ;;  %v6767_v6 = vpop.f32.mrb[47].mxu0 }
0x1584   : > { %v5855_v7 = vadd.f32 %v6743_v3, %v5814_v59  ;;  %v6746_v8 = vadd.f32 %v6745_v5, %v6744_v22  ;;  %v6768_v9 = vadd.f32 %v6767_v6, %v6766_v51  ;;  %v7542_v22 = vld [vmem:[%s7705_s2] sm:$0xf] }
0x1585   : > { %v6097_v51 = vrot.slane %v7542_v22, %v8218_v55  ;;  %v6103_v6 = vrot.slane %v7542_v22, %v8224_v44 }
0x1586   : > { %v5896_v12 = vadd.f32 %v6765_v4, %v5855_v7  ;;  %v5858_v13 = vadd.f32 %v6746_v8, %v5817_v62 }
0x1588   : > { %v5899_v16 = vadd.f32 %v6768_v9, %v5858_v13 }
0x15a0   : > { %v6785_v17 = vpop.f32.mrb[52].mxu1  ;;  %v6807_v18 = vpop.f32.mrb[48].mxu0 }
0x15a1   : > { %v6786_v0 = vpop.f32.mrb[53].mxu1  ;;  %v6808_v19 = vpop.f32.mrb[49].mxu0 }
0x15a2   : > { %v6787_v1 = vadd.f32 %v6786_v0, %v6785_v17  ;;  %v6809_v10 = vadd.f32 %v6808_v19, %v6807_v18  ;;  %v6788_v11 = vpop.f32.mrb[54].mxu1  ;;  %v6810_v20 = vpop.f32.mrb[50].mxu0 }
0x15a3   : > { %v6789_v21 = vpop.f32.mrb[55].mxu1  ;;  %v6811_v23 = vpop.f32.mrb[51].mxu0 }
0x15a4   : > { %v5937_v26 = vadd.f32 %v6787_v1, %v5896_v12  ;;  %v6790_v30 = vadd.f32 %v6789_v21, %v6788_v11  ;;  %v6812_v31 = vadd.f32 %v6811_v23, %v6810_v20 }
0x15a6   : > { %v5978_v32 = vadd.f32 %v6809_v10, %v5937_v26  ;;  %v5940_v33 = vadd.f32 %v6790_v30, %v5899_v16 }
0x15a8   : > { %v5981_v34 = vadd.f32 %v6812_v31, %v5940_v33 }
0x15c0   : > { %v6829_v37 = vpop.f32.mrb[56].mxu1 }
0x15c1   : > { %v6851_v39 = vpop.f32.mrb[52].mxu0  ;;  %v6830_v40 = vpop.f32.mrb[57].mxu1 }
0x15c2   : > { %v6831_v42 = vadd.f32 %v6830_v40, %v6829_v37  ;;  %v6852_v50 = vpop.f32.mrb[53].mxu0  ;;  %v6832_v41 = vpop.f32.mrb[58].mxu1 }
0x15c3   : > { %v6853_v28 = vadd.f32 %v6852_v50, %v6851_v39  ;;  %v6854_v43 = vpop.f32.mrb[54].mxu0  ;;  %v6833_v58 = vpop.f32.mrb[59].mxu1 }
0x15c4   : > { %v6019_v36 = vadd.f32 %v6831_v42, %v5978_v32  ;;  %v6834_v29 = vadd.f32 %v6833_v58, %v6832_v41  ;;  %v6855_v46 = vpop.f32.mrb[55].mxu0 }
0x15c5   : > { %v6856_v35 = vadd.f32 %v6855_v46, %v6854_v43 }
0x15c6   : > { %v6060_v47 = vadd.f32 %v6853_v28, %v6019_v36  ;;  %v6022_v45 = vadd.f32 %v6834_v29, %v5981_v34 }
0x15c8   : > { %v6063_v27 = vadd.f32 %v6856_v35, %v6022_v45  ;;  %v6066_v49 = vadd.f32 %v6060_v47, %v8101_v14 }
0x15ca   : > { %v6068_v48 = vsel %vm776_vm2, %v6066_v49, 0.0  ;;  %v6067_v52 = vadd.f32 %v6063_v27, %v8103_v15 }
0x15cb   : > { %6069 = vadd.xlane.f32.xlu0 %v6068_v48 }
0x15cc   : > { %v6071_v38 = vsel %vm776_vm2, %v6067_v52, 0.0 }
0x15cf   : > { %6072 = vadd.xlane.f32.xlu0 %v6071_v38 }
0x1658   : > { %v6070_v53 = vpop.xlane.xlu0 %6069 }
0x1659   : > { %v6074_v54 = vmul.f32 0.0125, %v6070_v53 }
0x165b   : > { %v6076_v56 = vsub.f32 %v6066_v49, %v6074_v54 }
0x165c   : > { %v6073_v57 = vpop.xlane.xlu0 %6072 }
0x165d   : > { %v6075_v61 = vmul.f32 0.0125, %v6073_v57  ;;  %v6078_v59 = vmul.f32 %v6076_v56, %v6076_v56 }
0x165f   : > { %v6077_v60 = vsub.f32 %v6067_v52, %v6075_v61  ;;  %v6080_v62 = vsel %vm776_vm2, %v6078_v59, 0.0 }
0x1660   : > { %6081 = vadd.xlane.f32.xlu0 %v6080_v62 }
0x1661   : > { %v6079_v14 = vmul.f32 %v6077_v60, %v6077_v60 }
0x1663   : > { %v6083_v24 = vsel %vm776_vm2, %v6079_v14, 0.0 }
0x1664   : > { %6084 = vadd.xlane.f32.xlu1 %v6083_v24 }
0x16ed   : > { %v6082_v15 = vpop.xlane.xlu0 %6081 }
0x16ee   : > { %v6086_v63 = vmul.f32 0.0125, %v6082_v15 }
0x16f0   : > { %v6088_v25 = vadd.f32 1e-05, %v6086_v63 }
0x16f1   : > { %v6085_v2 = vpop.xlane.xlu1 %6084 }
0x16f2   : > { %7534 = vrsqrt.f32 %v6088_v25  ;;  %v6087_v3 = vmul.f32 0.0125, %v6085_v2 }
0x16f4   : > { %v6089_v4 = vadd.f32 1e-05, %v6087_v3 }
0x16f6   : > { %7536 = vrsqrt.f32 %v6089_v4 }
0x16fc   : > { %v7535_v5 = vpop.eup %7534 }
0x16fd   : > { %v6092_v7 = vmul.f32 %v7535_v5, %v6076_v56 }
0x16ff   : > { %v6098_v8 = vmul.f32 %v6097_v51, %v6092_v7 }
0x1700   : > { %v7537_v9 = vpop.eup %7536 }
0x1701   : > { %v6104_v12 = vadd.f32 %v6103_v6, %v6098_v8  ;;  %v6093_v13 = vmul.f32 %v7537_v9, %v6077_v60  ;;  %6111 = sbr.rel (%p6561_p5) target bundleno = 5896 (0x1708), region = 84 }
0x1703   : > { %6106 = vst.msk [vmem:[#allocation2] sm:$0xff] %vm776_vm2, %v6104_v12  ;;  %v6099_v16 = vmul.f32 %v6097_v51, %v6093_v13  ;;  %6112 = vst.msk [vmem:[%s8441_s28] sm:$0xff] (!%p6561_p5), %vm776_vm2, %v6104_v12 }
0x1705   : > { %v6105_v17 = vadd.f32 %v6103_v6, %v6099_v16 }
0x1707   : > { %6107 = vst.msk [vmem:[#allocation2 + $0x8] sm:$0xff] %vm776_vm2, %v6105_v17  ;;  %6113 = vst.msk [vmem:[%s8441_s28 + $0x8] sm:$0xff] (!%p6561_p5), %vm776_vm2, %v6105_v17 }
0x1708 PF: > { %s8442_s1 = sld [smem:[#allocation3_spill]] }
0x170e   : > { %s24_s29 = sadd.s32 1, %s8442_s1  }
0x170f   : > { %p21_p6 = scmp.ge.s32.totalorder %s24_s29, 10  }
0x1711   :  { %23 = sbr.rel (!%p21_p6) target bundleno = 7 (0x7), region = 134 }

// kernel: forward.3
= control target key start
LH: loop header
LB: loop body
LE: loop exit
PB: predicated region body
PF: predicated region fallthrough
CT: control target
= control target key end

     0   :  { %s12184_s24 = smov 0   ;;  %s13361_s0 = inlined_call_operand.vmem [shape: f32[12,3], index: 0, kind: input, shape index: {}]   ;;  %s13362_s1 = inlined_call_operand.vmem [shape: f32[3,80], index: 1, kind: input, shape index: {}]   ;;  %s13363_s2 = inlined_call_operand.vmem [shape: f32[12,80], index: 2, kind: input, shape index: {}]   ;;  %s13364_s3 = inlined_call_operand.vmem [shape: f32[16,80], index: 3, kind: input, shape index: {}]   ;;  %s13365_s4 = inlined_call_operand.vmem [shape: f32[12,12], index: 4, kind: input, shape index: {}]   ;;  %s13366_s5 = inlined_call_operand.vmem [shape: f32[12,16], index: 5, kind: input, shape index: {}]   ;;  %s13367_s6 = inlined_call_operand.vmem [shape: bf16[8,80,240], index: 6, kind: input, shape index: {}]   ;;  %s13368_s7 = inlined_call_operand.vmem [shape: f32[8,1,240], index: 7, kind: input, shape index: {}]   ;;  %s13369_s8 = inlined_call_operand.vmem [shape: f32[8,80,80], index: 8, kind: input, shape index: {}]   ;;  %s13370_s9 = inlined_call_operand.vmem [shape: f32[8,1,80], index: 9, kind: input, shape index: {}]   ;;  %s13371_s10 = inlined_call_operand.vmem [shape: bf16[8,80,80], index: 10, kind: input, shape index: {}]   ;;  %s13372_s11 = inlined_call_operand.vmem [shape: f32[8,1,80], index: 11, kind: input, shape index: {}]   ;;  %s13373_s12 = inlined_call_operand.vmem [shape: bf16[8,80,160], index: 12, kind: input, shape index: {}]   ;;  %s13374_s13 = inlined_call_operand.vmem [shape: f32[8,1,160], index: 13, kind: input, shape index: {}]   ;;  %s13375_s14 = inlined_call_operand.vmem [shape: f32[8,80,80], index: 14, kind: input, shape index: {}]   ;;  %s13376_s15 = inlined_call_operand.vmem [shape: f32[8,1,80], index: 15, kind: input, shape index: {}]   ;;  %s13377_s16 = inlined_call_operand.vmem [shape: bf16[8,80,2048], index: 16, kind: input, shape index: {}]   ;;  %s13378_s17 = inlined_call_operand.vmem [shape: f32[8,1,2048], index: 17, kind: input, shape index: {}]   ;;  %s13379_s18 = inlined_call_operand.vmem [shape: bf16[8,2048,80], index: 18, kind: input, shape index: {}]   ;;  %s13380_s19 = inlined_call_operand.vmem [shape: f32[8,1,80], index: 19, kind: input, shape index: {}]   ;;  %s13381_s20 = inlined_call_operand.vmem [shape: f32[8,6,80], index: 20, kind: input, shape index: {}]   ;;  %s13382_s21 = inlined_call_operand.vmem [shape: f32[80,1], index: 21, kind: input, shape index: {}]   ;;  %s13383_s22 = inlined_call_operand.<no memory space> [shape: f32[1,1], index: 22, kind: input, shape index: {}]   ;;  %s13384_s23 = inlined_call_operand.vmem [shape: f32[12,1], index: 23, kind: output, shape index: {}]  }
   0x1   :  { %13406 = sst [smem:[#allocation7_spill]] %s13361_s0  ;;  %v28_v0 = vstv %s13383_s22 }
   0x2   :  { %13407 = sst [smem:[#allocation8_spill]] %s13362_s1  ;;  %29 = vst [vmem:[#allocation3] sm:$0x1] %v28_v0 }
   0x3   :  { %13408 = sst [smem:[#allocation9_spill]] %s13363_s2 }
   0x4   :  { %13409 = sst [smem:[#allocation10_spill]] %s13364_s3 }
   0x5   :  { %13410 = sst [smem:[#allocation11_spill]] %s13365_s4 }
   0x6   :  { %13411 = sst [smem:[#allocation12_spill]] %s13366_s5 }
   0x7   :  { %13412 = sst [smem:[#allocation13_spill]] %s13367_s6 }
   0x8   :  { %13413 = sst [smem:[#allocation14_spill]] %s13368_s7 }
   0x9   :  { %13414 = sst [smem:[#allocation15_spill]] %s13369_s8 }
   0xa   :  { %13415 = sst [smem:[#allocation16_spill]] %s13370_s9 }
   0xb   :  { %13416 = sst [smem:[#allocation17_spill]] %s13371_s10 }
   0xc   :  { %13417 = sst [smem:[#allocation18_spill]] %s13372_s11 }
   0xd   :  { %13418 = sst [smem:[#allocation19_spill]] %s13373_s12 }
   0xe   :  { %13419 = sst [smem:[#allocation20_spill]] %s13374_s13 }
   0xf   :  { %13420 = sst [smem:[#allocation21_spill]] %s13375_s14 }
  0x10   :  { %13421 = sst [smem:[#allocation22_spill]] %s13382_s21 }
  0x11   :  { %13422 = sst [smem:[#allocation23_spill]] %s13384_s23 }
  0x12 LB: > { %13423 = sst [smem:[#allocation4_spill]] %s12040_s24  ;;  %s12190_s25 = sadd.s32 4294967295, %s12040_s24   ;;  %s12040_s24 = sphi %s12184_s24, %s35_s24  }
  0x13   : > { %13424 = sst [smem:[#allocation5_spill]] %s12190_s25  ;;  %p9912_p0 = scmp.ge.s32.totalorder %s12040_s24, 1 }
  0x14   : > { %p762_p1 = scmp.lt.s32.totalorder %s12040_s24, 9 }
  0x16   : > { %p763_p2 = pnand %p9912_p0, %p762_p1 }
  0x18   : > { %766 = sbr.rel (%p763_p2) target bundleno = 10155 (0x27ab), region = 112 }
  0x1f   : > { %p879_p3 = scmp.lt.s32.totalorder %s12190_s25, 7  ;;  %s13425_s6 = sld [smem:[#allocation14_spill]] }
  0x20   : > { %s13428_s4 = sld [smem:[#allocation13_spill]]  ;;  %s13429_s8 = sld [smem:[#allocation15_spill]] }
  0x21   : > { %s12196_s22 = scalar_select %p879_p3, %s12190_s25, 7 }
  0x22   : > { %s13431_s12 = sld [smem:[#allocation19_spill]]  ;;  %s13432_s13 = sld [smem:[#allocation20_spill]] }
  0x23   : > { %s11469_s5 = smul.u32 80, %s12196_s22  ;;  %s9914_s1 = sshll.u32 %s12196_s22, 1 }
  0x24   : > { %s11470_s25 = smul.u32 40, %s12196_s22  ;;  %s13433_s10 = sld [smem:[#allocation17_spill]] }
  0x25   : > { %s12203_s27 = scalar_lea.vmem %s13425_s6, %s9914_s1  ;;  %s13434_s14 = sld [smem:[#allocation21_spill]] }
  0x26   : > { %13426 = sst [smem:[#allocation6_spill]] %s12203_s27  ;;  %s12212_s30 = scalar_lea.vmem %s13428_s4, %s11469_s5 }
  0x27   : > { %s12217_s21 = scalar_lea.vmem %s13429_s8, %s11469_s5  ;;  %s11471_s7 = smul.u32 640, %s12196_s22 }
  0x28   : > { %s12227_s28 = scalar_lea.vmem %s13431_s12, %s11469_s5  ;;  %s12232_s4 = scalar_lea.vmem %s13432_s13, %s9914_s1 }
  0x29   : > { %s9921_s12 = sshll.u32 %s12196_s22, 4  ;;  %s10353_s11 = sshll.u32 %s12196_s22, 10 }
  0x2a   : > { %s12237_s24 = scalar_lea.vmem %s13433_s10, %s11470_s25  ;;  %s12254_s0 = scalar_lea.vmem %s13377_s16, %s11471_s7 }
  0x2b   : > { %s12242_s26 = scalar_lea.vmem %s13434_s14, %s11469_s5  ;;  %s12259_s23 = scalar_lea.vmem %s13378_s17, %s9921_s12 }
  0x2c   : > { %s12264_s5 = scalar_lea.vmem %s13379_s18, %s10353_s11  ;;  %s9924_s10 = sshll.u32 %s12196_s22, 3 }
  0x2d   : > { %s12274_s7 = scalar_lea.vmem %s13381_s20, %s9924_s10  ;;  %s13435_s3 = sld [smem:[#allocation5_spill]] }
  0x33   : > { %p9925_p4 = scmp.ne.s32.totalorder %s13435_s3, 0 }
  0x34   : > { %s13436_s29 = sld [smem:[#allocation8_spill]] (!%p9925_p4)  ;;  %vm959_vm0 = vcmask (!%p9925_p4), 1042432   ;;  %s13437_s8 = sld [smem:[#allocation7_spill]] (!%p9925_p4)  ;;  %vm952_vm1 = vcmask (!%p9925_p4), 23552   ;;  %vm1040_vm2 = vcmask (!%p9925_p4), 650240   ;;  %vm1038_vm3 = vcmask (!%p9925_p4), 654336  }
  0x35   : > { %946 = sbr.rel (%p9925_p4) target bundleno = 277 (0x115), region = 116  ;;  %s13438_s14 = sld [smem:[#allocation9_spill]] (!%p9925_p4) }
  0x3a   : > { %v949_v1 = vld [vmem:[%s13436_s29] sm:$0x7] (!%p9925_p4)  ;;  %v948_v3 = vld [vmem:[%s13437_s8 + $0x8] sm:$0xf] (!%p9925_p4) }
  0x3b   : > { %v947_v2 = vld [vmem:[%s13437_s8] sm:$0xff] (!%p9925_p4)  ;;  %10771 = vmatprep.subr.msk.mxu0 (!%p9925_p4), %vm959_vm0, %v949_v1  ;;  %v951_v4 = vld [vmem:[%s13438_s14 + $0x8] sm:$0xf] (!%p9925_p4) }
  0x3c   : > { %10773 = vmatprep.mubr.msk.f32.mxu0 %vm952_vm1, %v947_v2  ;;  %10772 = vmatpush3.msk.msra.mxu0 %vm959_vm0, %v949_v1  ;;  %v950_v5 = vld [vmem:[%s13438_s14] sm:$0xff] }
  0x3d   : > { %10774 = vmatmul.mubr.msk.f32.vlgmr.msra.gmra.mrb[0].mxu0 %vm952_vm1, %v948_v3 }
 0x110   : > { %v10775_v6 = vpop.f32.mrb[0].mxu0 }
 0x111   : > { %v1035_v7 = vadd.f32 %v10775_v6, %v951_v4  ;;  %v1029_v8 = vpop.f32.mrb[1].mxu0 }
 0x112   : > { %v1030_v9 = vadd.f32 %v1029_v8, %v950_v5 }
 0x113   : > { %1041 = vst.msk [vmem:[#allocation2 + $0x8] sm:$0xf] %vm1040_vm2, %v1035_v7 }
 0x114   : > { %1039 = vst.msk [vmem:[#allocation2] sm:$0xff] %vm1038_vm3, %v1030_v9 }
 0x115 PF: > { %v11684_v10 = vld [vmem:[%s12212_s30 + $0x4] ss:$8 sps:$4 sm:$0xff]   ;;  %v11686_v11 = vld [vmem:[%s12212_s30] ss:$8 sps:$4 sm:$0xff]   ;;  %v12042_v12 = vmov 0   ;;  %s13439_s12 = sld [smem:[#allocation6_spill]]  ;;  %v1060_v24 = vlaneseq }
 0x116   : > { %1156 = vmatprep.mubr.bf16.mxu0 %v12042_v12  ;;  %1124 = vmatprep.subr.bf16.mxu0 %v11684_v10  ;;  %v11687_v13 = vld [vmem:[%s12212_s30 + $0x14] ss:$8 sps:$4 sm:$0xff]   ;;  %v11689_v14 = vld [vmem:[%s12212_s30 + $0x10] ss:$8 sps:$4 sm:$0xff]   ;;  %v11690_v15 = vld [vmem:[%s12212_s30 + $0x24] ss:$8 sps:$4 sm:$0xff]  }
 0x117   : > { %1125 = vmatpush1.bf16.msra.mxu0 %v11686_v11  ;;  %v11692_v16 = vld [vmem:[%s12212_s30 + $0x20] ss:$8 sps:$4 sm:$0xff]   ;;  %v11693_v17 = vld [vmem:[%s12212_s30 + $0x34] ss:$8 sps:$4 sm:$0xff]   ;;  %v11695_v18 = vld [vmem:[%s12212_s30 + $0x30] ss:$8 sps:$4 sm:$0xff]  }
 0x118   : > { %1126 = vmatprep.subr.bf16.mxu0 %v11687_v13  ;;  %v11696_v19 = vld [vmem:[%s12212_s30 + $0x44] ss:$8 sps:$4 sm:$0xff]   ;;  %vm1120_vm4 = vcmask 654336   ;;  %v11698_v20 = vld [vmem:[%s12212_s30 + $0x40] ss:$8 sps:$4 sm:$0xff]   ;;  %v12304_v25 = vshrl.u32 %v1060_v24, 7 }
 0x119   : > { %vm1185_vm5 = vcmask 64512   ;;  %s12043_s30 = smov 48   ;;  %s13442_s11 = sld [smem:[#allocation11_spill]]  ;;  %vm1277_vm7 = vcmask 93184   ;;  %vm1273_vm8 = vcmask 97280   ;;  %vm1310_vm9 = vcmask 1043456  }
 0x11a   : > { %v1043_v22 = vld [vmem:[#allocation2 + $0x8] sm:$0xf]  ;;  %v12307_v26 = vsub.s32 0, %v12304_v25  ;;  %v12311_v28 = vsub.s32 1, %v12304_v25  ;;  %vm12333_vm6 = vmpackc.low %vm1185_vm5, %vm1185_vm5  ;;  %s12044_s6 = smov 96   ;;  %s12045_s10 = smov 40  }
 0x11b   : > { %1127 = vmatpush1.bf16.msra.mxu0 %v11689_v14  ;;  %v1042_v21 = vld [vmem:[#allocation2] sm:$0xff]  ;;  %s12046_s13 = smov 120   ;;  %vm12047_vm10 = vmmov 1   ;;  %s12048_s2 = smov 32   ;;  %vm4069_vm12 = vcmask 650240   ;;  %vm12060_vm13 = vmmov 0  }
 0x11c   : > { %1128 = vmatprep.subr.bf16.mxu0 %v11690_v15  ;;  %v1047_v23 = vpack.c.bf16 %v1043_v22, %v1042_v21  ;;  %v1058_v27 = vld [vmem:[%s13439_s12] sm:$0x3]  ;;  %vm12363_vm11 = vmpackc.low %vm1310_vm9, %vm12047_vm10  ;;  %s12049_s3 = smov 104   ;;  %s13404_s12 = smov 88   ;;  %vm4424_vm14 = vcmask 125952   ;;  %vm4420_vm15 = vcmask 130048  }
 0x11d   : > { %v1063_v29 = vrot.slane %v1058_v27, %v12307_v26  ;;  %v1067_v31 = vrot.slane %v1058_v27, %v12311_v28  ;;  %v1167_v21 = vld [vmem:[%s12217_s21] sm:$0xff]  ;;  %s12051_s1 = smov 112   ;;  %s12052_s29 = smov 24  }
 0x11e   : > { %s13396_s25 = smov 80   ;;  %s13402_s9 = smov 72  }
 0x11f   : > { %1129 = vmatpush1.bf16.msra.mxu0 %v11692_v16  ;;  %v12346_v48 = vld [vmem:[%s13442_s11 + $0x8] sm:$0xf]  ;;  %v12351_v51 = vld [vmem:[%s13442_s11] sm:$0xff]  ;;  %s13394_s27 = smov 16  }
 0x120   : > { %1130 = vmatprep.subr.bf16.mxu0 %v11693_v17 }
 0x123   : > { %1131 = vmatpush1.bf16.msra.mxu0 %v11695_v18 }
 0x124   : > { %1132 = vmatprep.subr.bf16.mxu0 %v11696_v19 }
 0x127   : > { %1133 = vmatpush1.bf16.msra.mxu0 %v11698_v20 }
 0x128   : > { %10809 = vmatprep.subr.mxu0 %v1167_v21 }
 0x12a   : > { %9939 = vmatmul.mubr.msk.bf16.vlgmr.msra.gmra.mrb[0].mxu0 %vm1120_vm4, %v1047_v23 }
 0x12b   : > { %10810 = vmatpush3.msra.mxu0 %v1167_v21 }
 0x1fd   : > { %v1158_v30 = vpop.f32.mrb[0].mxu0 }
 0x1fe   : > { %v12315_v32 = vadd.f32 %v1158_v30, %v1063_v29  ;;  %v1160_v33 = vpop.f32.mrb[1].mxu0 }
 0x1ff   : > { %v1162_v34 = vpop.f32.mrb[2].mxu0  ;;  %v1161_v37 = vadd.f32 %v1160_v33, %v1067_v31 }
 0x200   : > { %v12317_v35 = vadd.f32 %v1162_v34, %v1063_v29  ;;  %v1164_v36 = vpop.f32.mrb[3].mxu0  ;;  %10780 = vmatprep.mubr.msk.f32.mxu1 %vm1185_vm5, %v12315_v32 }
 0x201   : > { %v1165_v38 = vadd.f32 %v1164_v36, %v1067_v31 }
 0x202   : > { %v12323_v39 = vpack.i.bf16 %v12317_v35, %v12315_v32 }
 0x203   : > { %v12325_v40 = vpack.i.bf16 %v1165_v38, %v1161_v37  ;;  %v12329_v41 = vpack.c.bf16 %v1165_v38, %v1161_v37 }
 0x204   : > { %11500 = vrot.lane.b32.xlu0 %v12323_v39, %s12043_s30 }
 0x276   : > { %v11501_v42 = vpop.permute.xlu0 %11500 }
 0x277   : > { %v11503_v43 = vunpack.i.h.bf16 %v11501_v42  ;;  %v11502_v44 = vunpack.i.l.bf16 %v11501_v42 }
 0x279   : > { %v11193_v46 = vpack.c.bf16 %v11503_v43, %v11502_v44 }
 0x27b   : > { %11195 = vmatprep.subr.msk.bf16.mxu1 %vm12333_vm6, %v11193_v46 }
 0x27c   : > { %11198 = vmatpush3.bf16.xpose.msk.msra.mxu1 %vm12333_vm6, %v11193_v46 }
 0x283   : > { %10781 = vmatmul.mubr.msk.f32.vlgmr.msra.gmra.mrb[0].mxu1 %vm1185_vm5, %v12317_v35 }
 0x356   : > { %v10782_v47 = vpop.f32.mrb[0].mxu1 }
 0x357   : > { %v1270_v49 = vmul.f32 0.35355338, %v10782_v47  ;;  %v1260_v50 = vpop.f32.mrb[1].mxu1 }
 0x358   : > { %v1269_v52 = vmul.f32 0.35355338, %v1260_v50 }
 0x359   : > { %v1272_v53 = vadd.f32 %v1270_v49, %v12346_v48 }
 0x35a   : > { %v1271_v54 = vadd.f32 %v1269_v52, %v12351_v51 }
 0x35b   : > { %v1278_v55 = vsel %vm1277_vm7, %v1272_v53, -inf }
 0x35c   : > { %1279 = vmax.xlane.f32.xlu1 %v1278_v55  ;;  %v1274_v56 = vsel %vm1273_vm8, %v1271_v54, -inf }
 0x35d   : > { %1275 = vmax.xlane.f32.xlu0 %v1274_v56 }
 0x36d   : > { %11505 = vrot.lane.b32.xlu1 %v12325_v40, %s12044_s6 }
 0x371   : > { %11510 = vrot.lane.b32.xlu1 %v12323_v39, %s12045_s10 }
 0x373   : > { %1390 = vrot.lane.b32.xlu0 %v12317_v35, %s12046_s13 }
 0x3e9   : > { %v1280_v57 = vpop.xlane.xlu1 %1279 }
 0x3ea   : > { %v1282_v58 = vsub.f32 %v1272_v53, %v1280_v57  ;;  %v1276_v59 = vpop.xlane.xlu0 %1275 }
 0x3eb   : > { %v1281_v60 = vsub.f32 %v1271_v54, %v1276_v59 }
 0x3ec   : > { %v1285_v61 = vmul.f32 1.442695, %v1282_v58 }
 0x3ed   : > { %v1283_v62 = vmul.f32 1.442695, %v1281_v60  ;;  %v11506_v63 = vpop.permute.xlu1 %11505  ;;  %v1168_v60 = vld [vmem:[%s12217_s21 + $0x8] sm:$0xff] }
 0x3ee   : > { %11847 = vpow2.f32 %v1285_v61  ;;  %v11508_v0 = vunpack.i.h.bf16 %v11506_v63  ;;  %v11507_v1 = vunpack.i.l.bf16 %v11506_v63  ;;  %v1391_v20 = vpop.permute.xlu0 %1390 }
 0x3ef   : > { %11849 = vpow2.f32 %v1283_v62 }
 0x3f0   : > { %v11199_v3 = vpack.c.bf16 %v11508_v0, %v11507_v1 }
 0x3f1   : > { %v11511_v4 = vpop.permute.xlu1 %11510 }
 0x3f2   : > { %v11513_v5 = vunpack.i.h.bf16 %v11511_v4  ;;  %v11512_v6 = vunpack.i.l.bf16 %v11511_v4  ;;  %11201 = vmatprep.subr.msk.bf16.mxu1 %vm12363_vm11, %v11199_v3 }
 0x3f3   : > { %11204 = vmatpush3.bf16.msk.msra.mxu1 %vm12363_vm11, %v11199_v3 }
 0x3f4   : > { %v11205_v7 = vpack.c.bf16 %v11513_v5, %v11512_v6 }
 0x3f6   : > { %11207 = vmatprep.subr.msk.bf16.mxu1 %vm12333_vm6, %v11205_v7 }
 0x3f8   : > { %v11848_v8 = vpop.eup %11847 }
 0x3f9   : > { %v1290_v9 = vsel %vm1277_vm7, %v11848_v8, 0.0  ;;  %v11850_v10 = vpop.eup %11849 }
 0x3fa   : > { %1291 = vadd.xlane.f32.xlu1 %v1290_v9  ;;  %v1287_v11 = vsel %vm1273_vm8, %v11850_v10, 0.0 }
 0x3fe   : > { %1288 = vadd.xlane.f32.xlu1 %v1287_v11 }
 0x40f   : > { %1388 = vrot.lane.b32.xlu1 %v12315_v32, %s12046_s13 }
 0x487   : > { %v1292_v13 = vpop.xlane.xlu1 %1291 }
 0x488   : > { %11851 = vrcp.f32 %v1292_v13 }
 0x48b   : > { %v1289_v14 = vpop.xlane.xlu1 %1288 }
 0x48c   : > { %11853 = vrcp.f32 %v1289_v14 }
 0x48f   : > { %v1389_v19 = vpop.permute.xlu1 %1388 }
 0x492   : > { %v11852_v15 = vpop.eup %11851 }
 0x493   : > { %v1296_v18 = vmul.f32 %v11852_v15, %v11848_v8 }
 0x496   : > { %v11854_v16 = vpop.eup %11853 }
 0x497   : > { %v1294_v17 = vmul.f32 %v11854_v16, %v11850_v10 }
 0x499   : > { %10787 = vmatprep.mubr.msk.f32.mxu1 %vm1273_vm8, %v1294_v17 }
 0x49a   : > { %10788 = vmatmul.mubr.msk.f32.vlgmr.msra.gmra.mrb[2].mxu1 %vm1273_vm8, %v1296_v18 }
 0x49b   : > { %11210 = vmatpush3.bf16.xpose.msk.msra.mxu1 %vm12333_vm6, %v11205_v7  ;;  %10794 = vmatprep.mubr.msk.f32.mxu1 %vm1185_vm5, %v1389_v19 }
 0x4a2   : > { %10795 = vmatmul.mubr.msk.f32.vlgmr.msra.gmra.mrb[4].mxu1 %vm1185_vm5, %v1391_v20 }
 0x56d   : > { %v10789_v22 = vpop.f32.mrb[2].mxu1 }
 0x56e   : > { %v1379_v23 = vpop.f32.mrb[3].mxu1 }
 0x56f   : > { %10811 = vmatprep.mubr.msk.f32.mxu0 %vm1185_vm5, %v1379_v23 }
 0x570   : > { %10812 = vmatmul.mubr.msk.f32.vlgmr.msra.gmra.mrb[4].mxu0 %vm1185_vm5, %v10789_v22 }
 0x575   : > { %v10796_v24 = vpop.f32.mrb[4].mxu1 }
 0x576   : > { %v1480_v27 = vmul.f32 0.35355338, %v10796_v24  ;;  %v1470_v29 = vpop.f32.mrb[5].mxu1 }
 0x577   : > { %v1479_v30 = vmul.f32 0.35355338, %v1470_v29 }
 0x578   : > { %v1482_v31 = vadd.f32 %v1480_v27, %v12346_v48 }
 0x579   : > { %v1481_v33 = vadd.f32 %v1479_v30, %v12351_v51 }
 0x57a   : > { %v1486_v34 = vsel %vm1277_vm7, %v1482_v31, -inf }
 0x57b   : > { %1487 = vmax.xlane.f32.xlu0 %v1486_v34  ;;  %v1483_v36 = vsel %vm1273_vm8, %v1481_v33, -inf }
 0x57c   : > { %1484 = vmax.xlane.f32.xlu1 %v1483_v36 }
 0x591   : > { %11520 = vrot.lane.b32.xlu0 %v12323_v39, %s12048_s2 }
 0x595   : > { %2043 = vrot.lane.b32.xlu0 %v12315_v32, %s12049_s3 }
 0x608   : > { %v1488_v37 = vpop.xlane.xlu0 %1487 }
 0x609   : > { %v1490_v38 = vsub.f32 %v1482_v31, %v1488_v37  ;;  %v1485_v42 = vpop.xlane.xlu1 %1484 }
 0x60a   : > { %v1489_v43 = vsub.f32 %v1481_v33, %v1485_v42 }
 0x60b   : > { %v1493_v44 = vmul.f32 1.442695, %v1490_v38 }
 0x60c   : > { %v1491_v46 = vmul.f32 1.442695, %v1489_v43  ;;  %v11521_v59 = vpop.permute.xlu0 %11520 }
 0x60d   : > { %11855 = vpow2.f32 %v1493_v44  ;;  %v11523_v63 = vunpack.i.h.bf16 %v11521_v59  ;;  %v11522_v0 = vunpack.i.l.bf16 %v11521_v59 }
 0x60e   : > { %11857 = vpow2.f32 %v1491_v46 }
 0x60f   : > { %v11217_v4 = vpack.c.bf16 %v11523_v63, %v11522_v0 }
 0x610   : > { %v2044_v14 = vpop.permute.xlu0 %2043 }
 0x617   : > { %v11856_v47 = vpop.eup %11855 }
 0x618   : > { %v1498_v49 = vsel %vm1277_vm7, %v11856_v47, 0.0  ;;  %v11858_v50 = vpop.eup %11857 }
 0x619   : > { %1499 = vadd.xlane.f32.xlu1 %v1498_v49  ;;  %v1495_v52 = vsel %vm1273_vm8, %v11858_v50, 0.0 }
 0x61d   : > { %1496 = vadd.xlane.f32.xlu1 %v1495_v52 }
 0x62e   : > { %11515 = vrot.lane.b32.xlu1 %v12325_v40, %s13404_s12 }
 0x632   : > { %1755 = vrot.lane.b32.xlu1 %v12315_v32, %s12051_s1 }
 0x636   : > { %1757 = vrot.lane.b32.xlu1 %v12317_v35, %s12051_s1 }
 0x63a   : > { %11525 = vrot.lane.b32.xlu1 %v12323_v39, %s12052_s29 }
 0x63e   : > { %2045 = vrot.lane.b32.xlu1 %v12317_v35, %s12049_s3 }
 0x6a6   : > { %v1500_v53 = vpop.xlane.xlu1 %1499 }
 0x6a7   : > { %11859 = vrcp.f32 %v1500_v53 }
 0x6aa   : > { %v1497_v54 = vpop.xlane.xlu1 %1496 }
 0x6ab   : > { %11861 = vrcp.f32 %v1497_v54 }
 0x6ae   : > { %v11516_v55 = vpop.permute.xlu1 %11515 }
 0x6af   : > { %v11518_v56 = vunpack.i.h.bf16 %v11516_v55  ;;  %v11517_v57 = vunpack.i.l.bf16 %v11516_v55 }
 0x6b1   : > { %v11211_v58 = vpack.c.bf16 %v11518_v56, %v11517_v57  ;;  %v11860_v61 = vpop.eup %11859  ;;  %v1169_v57 = vld [vmem:[%s12217_s21 + $0x10] sm:$0xff] }
 0x6b2   : > { %v1504_v3 = vmul.f32 %v11860_v61, %v11856_v47  ;;  %v1756_v5 = vpop.permute.xlu1 %1755 }
 0x6b3   : > { %11213 = vmatprep.subr.msk.bf16.mxu1 %vm12363_vm11, %v11211_v58 }
 0x6b4   : > { %11216 = vmatpush3.bf16.msk.msra.mxu1 %vm12363_vm11, %v11211_v58 }
 0x6b5   : > { %v11862_v62 = vpop.eup %11861  ;;  %10804 = vmatprep.subr.mxu1 %v1168_v60 }
 0x6b6   : > { %v1502_v1 = vmul.f32 %v11862_v62, %v11858_v50  ;;  %v1758_v6 = vpop.permute.xlu1 %1757 }
 0x6b8   : > { %10801 = vmatprep.mubr.msk.f32.mxu1 %vm1273_vm8, %v1502_v1 }
 0x6b9   : > { %10802 = vmatmul.mubr.msk.f32.vlgmr.msra.gmra.mrb[6].mxu1 %vm1273_vm8, %v1504_v3 }
 0x6ba   : > { %10805 = vmatpush3.msra.mxu1 %v1168_v60  ;;  %v11526_v7 = vpop.permute.xlu1 %11525 }
 0x6bb   : > { %11219 = vmatprep.subr.msk.bf16.mxu1 %vm12333_vm6, %v11217_v4  ;;  %v11528_v8 = vunpack.i.h.bf16 %v11526_v7  ;;  %v11527_v9 = vunpack.i.l.bf16 %v11526_v7 }
 0x6bd   : > { %v11229_v13 = vpack.c.bf16 %v11528_v8, %v11527_v9 }
 0x6be   : > { %v2046_v15 = vpop.permute.xlu1 %2045 }
 0x78c   : > { %v10803_v10 = vpop.f32.mrb[6].mxu1 }
 0x78d   : > { %v1584_v11 = vpop.f32.mrb[7].mxu1 }
 0x78e   : > { %10806 = vmatprep.mubr.msk.f32.mxu1 %vm1185_vm5, %v1584_v11 }
 0x78f   : > { %10807 = vmatmul.mubr.msk.f32.vlgmr.msra.gmra.mrb[8].mxu1 %vm1185_vm5, %v10803_v10 }
 0x790   : > { %11222 = vmatpush3.bf16.xpose.msk.msra.mxu1 %vm12333_vm6, %v11217_v4  ;;  %10818 = vmatprep.mubr.msk.f32.mxu1 %vm1185_vm5, %v1756_v5 }
 0x791   : > { %11231 = vmatprep.subr.msk.bf16.mxu1 %vm12333_vm6, %v11229_v13 }
 0x797   : > { %10819 = vmatmul.mubr.msk.f32.vlgmr.msra.gmra.mrb[10].mxu1 %vm1185_vm5, %v1758_v6 }
 0x798   : > { %11234 = vmatpush3.bf16.xpose.msk.msra.mxu1 %vm12333_vm6, %v11229_v13  ;;  %10837 = vmatprep.mubr.msk.f32.mxu1 %vm1185_vm5, %v2044_v14 }
 0x79f   : > { %10838 = vmatmul.mubr.msk.f32.vlgmr.msra.gmra.mrb[12].mxu1 %vm1185_vm5, %v2046_v15 }
 0x862   : > { %v12427_v16 = vpop.f32.mrb[8].mxu1 }
 0x863   : > { %v12429_v17 = vpop.f32.mrb[9].mxu1 }
 0x86a   : > { %v10820_v18 = vpop.f32.mrb[10].mxu1 }
 0x86b   : > { %v1847_v19 = vmul.f32 0.35355338, %v10820_v18  ;;  %v1837_v20 = vpop.f32.mrb[11].mxu1 }
 0x86c   : > { %v1846_v21 = vmul.f32 0.35355338, %v1837_v20 }
 0x86d   : > { %v1849_v22 = vadd.f32 %v1847_v19, %v12346_v48 }
 0x86e   : > { %v1848_v23 = vadd.f32 %v1846_v21, %v12351_v51 }
 0x86f   : > { %v1853_v24 = vsel %vm1277_vm7, %v1849_v22, -inf }
 0x870   : > { %1854 = vmax.xlane.f32.xlu1 %v1853_v24  ;;  %v1850_v27 = vsel %vm1273_vm8, %v1848_v23, -inf }
 0x871   : > { %1851 = vmax.xlane.f32.xlu0 %v1850_v27 }
 0x872   : > { %v10839_v29 = vpop.f32.mrb[12].mxu1 }
 0x873   : > { %v2125_v30 = vpop.f32.mrb[13].mxu1  ;;  %v2135_v31 = vmul.f32 0.35355338, %v10839_v29 }
 0x874   : > { %v2134_v58 = vmul.f32 0.35355338, %v2125_v30 }
 0x875   : > { %v12442_v33 = vadd.f32 %v2135_v31, %v12346_v48 }
 0x876   : > { %v2136_v59 = vadd.f32 %v2134_v58, %v12351_v51  ;;  %v1170_v58 = vld [vmem:[%s12217_s21 + $0x18] sm:$0xff] }
 0x877   : > { %v2141_v34 = vsel %vm1277_vm7, %v12442_v33, -inf }
 0x878   : > { %v2138_v60 = vsel %vm1273_vm8, %v2136_v59, -inf }
 0x881   : > { %11530 = vrot.lane.b32.xlu1 %v12325_v40, %s13396_s25 }
 0x885   : > { %2331 = vrot.lane.b32.xlu1 %v12315_v32, %s12044_s6 }
 0x889   : > { %2333 = vrot.lane.b32.xlu1 %v12317_v35, %s12044_s6 }
 0x8ad   : > { %2142 = vmax.xlane.f32.xlu1 %v2141_v34 }
 0x8be   : > { %11540 = vrot.lane.b32.xlu1 %v12325_v40, %s13402_s9 }
 0x8c2   : > { %2619 = vrot.lane.b32.xlu1 %v12315_v32, %s13404_s12 }
 0x8c6   : > { %2621 = vrot.lane.b32.xlu1 %v12317_v35, %s13404_s12  ;;  %s13445_s12 = sld [smem:[#allocation16_spill]] }
 0x8fd   : > { %v1855_v36 = vpop.xlane.xlu1 %1854 }
 0x8fe   : > { %v1857_v37 = vsub.f32 %v1849_v22, %v1855_v36  ;;  %v1852_v38 = vpop.xlane.xlu0 %1851 }
 0x8ff   : > { %v1856_v42 = vsub.f32 %v1848_v23, %v1852_v38 }
 0x900   : > { %v1860_v43 = vmul.f32 1.442695, %v1857_v37 }
 0x901   : > { %v1858_v44 = vmul.f32 1.442695, %v1856_v42  ;;  %v11531_v46 = vpop.permute.xlu1 %11530 }
 0x902   : > { %v11533_v47 = vunpack.i.h.bf16 %v11531_v46  ;;  %v11532_v49 = vunpack.i.l.bf16 %v11531_v46 }
 0x903   : > { %11863 = vpow2.f32 %v1858_v44 }
 0x904   : > { %v11223_v50 = vpack.c.bf16 %v11533_v47, %v11532_v49  ;;  %11865 = vpow2.f32 %v1860_v43 }
 0x905   : > { %v2332_v52 = vpop.permute.xlu1 %2331 }
 0x906   : > { %11225 = vmatprep.subr.msk.bf16.mxu0 %vm12363_vm11, %v11223_v50  ;;  %10856 = vmatprep.mubr.msk.f32.mxu1 %vm1185_vm5, %v2332_v52 }
 0x907   : > { %11228 = vmatpush3.bf16.msk.msra.mxu0 %vm12363_vm11, %v11223_v50 }
 0x908   : > { %10828 = vmatprep.subr.mxu0 %v1169_v57 }
 0x909   : > { %v2334_v62 = vpop.permute.xlu1 %2333 }
 0x90d   : > { %v11864_v53 = vpop.eup %11863 }
 0x90e   : > { %v1862_v54 = vsel %vm1273_vm8, %v11864_v53, 0.0  ;;  %v11866_v55 = vpop.eup %11865 }
 0x90f   : > { %1863 = vadd.xlane.f32.xlu0 %v1862_v54  ;;  %v1865_v56 = vsel %vm1277_vm7, %v11866_v55, 0.0 }
 0x913   : > { %1866 = vadd.xlane.f32.xlu0 %v1865_v56 }
 0x929   : > { %11535 = vrot.lane.b32.xlu0 %v12323_v39, %s13394_s27  ;;  %s13395_s27 = smov 8  }
 0x93a   : > { %v2143_v0 = vpop.xlane.xlu1 %2142 }
 0x93b   : > { %v2145_v18 = vsub.f32 %v12442_v33, %v2143_v0 }
 0x93d   : > { %v2148_v21 = vmul.f32 1.442695, %v2145_v18 }
 0x93e   : > { %v11541_v6 = vpop.permute.xlu1 %11540 }
 0x93f   : > { %v11543_v9 = vunpack.i.h.bf16 %v11541_v6  ;;  %v11542_v10 = vunpack.i.l.bf16 %v11541_v6 }
 0x941   : > { %v11235_v14 = vpack.c.bf16 %v11543_v9, %v11542_v10 }
 0x942   : > { %v2620_v15 = vpop.permute.xlu1 %2619 }
 0x948   : > { %2139 = vmax.xlane.f32.xlu0 %v2138_v60 }
 0x99c   : > { %v1864_v61 = vpop.xlane.xlu0 %1863 }
 0x99d   : > { %11867 = vrcp.f32 %v1864_v61 }
 0x9a0   : > { %v1867_v63 = vpop.xlane.xlu0 %1866 }
 0x9a1   : > { %11869 = vrcp.f32 %v1867_v63 }
 0x9a4   : > { %v11536_v1 = vpop.permute.xlu0 %11535 }
 0x9a5   : > { %v11538_v3 = vunpack.i.h.bf16 %v11536_v1  ;;  %v11537_v4 = vunpack.i.l.bf16 %v11536_v1 }
 0x9a7   : > { %v11868_v5 = vpop.eup %11867  ;;  %v11241_v7 = vpack.c.bf16 %v11538_v3, %v11537_v4 }
 0x9a8   : > { %v1869_v8 = vmul.f32 %v11868_v5, %v11864_v53  ;;  %v2622_v53 = vpop.permute.xlu1 %2621 }
 0x9a9   : > { %11243 = vmatprep.subr.msk.bf16.mxu1 %vm12333_vm6, %v11241_v7 }
 0x9aa   : > { %10825 = vmatprep.mubr.msk.f32.mxu0 %vm1273_vm8, %v1869_v8  ;;  %11246 = vmatpush3.bf16.xpose.msk.msra.mxu1 %vm12333_vm6, %v11241_v7 }
 0x9ab   : > { %v11870_v11 = vpop.eup %11869 }
 0x9ac   : > { %v1871_v13 = vmul.f32 %v11870_v11, %v11866_v55 }
 0x9ae   : > { %10826 = vmatmul.mubr.msk.f32.vlgmr.msra.gmra.mrb[6].mxu0 %vm1273_vm8, %v1871_v13 }
 0x9af   : > { %10829 = vmatpush3.msra.mxu0 %v1169_v57 }
 0x9b0   : > { %11237 = vmatprep.subr.msk.bf16.mxu0 %vm12363_vm11, %v11235_v14 }
 0x9b1   : > { %10857 = vmatmul.mubr.msk.f32.vlgmr.msra.gmra.mrb[14].mxu1 %vm1185_vm5, %v2334_v62 }
 0x9b2   : > { %10875 = vmatprep.mubr.msk.f32.mxu1 %vm1185_vm5, %v2620_v15 }
 0x9d5   : > { %v2140_v19 = vpop.xlane.xlu0 %2139 }
 0x9d6   : > { %v2144_v20 = vsub.f32 %v2136_v59, %v2140_v19 }
 0x9d8   : > { %v2146_v22 = vmul.f32 1.442695, %v2144_v20 }
 0x9da   : > { %11871 = vpow2.f32 %v2146_v22 }
 0x9db   : > { %11873 = vpow2.f32 %v2148_v21 }
 0x9e4   : > { %v11872_v23 = vpop.eup %11871 }
 0x9e5   : > { %v2150_v24 = vsel %vm1273_vm8, %v11872_v23, 0.0  ;;  %v11874_v27 = vpop.eup %11873 }
 0x9e6   : > { %2151 = vadd.xlane.f32.xlu0 %v2150_v24  ;;  %v2153_v29 = vsel %vm1277_vm7, %v11874_v27, 0.0 }
 0x9ea   : > { %2154 = vadd.xlane.f32.xlu0 %v2153_v29 }
 0xa00   : > { %11545 = vrot.lane.b32.xlu0 %v12323_v39, %s13395_s27  ;;  %s13400_s27 = smov 64  }
 0xa73   : > { %v2152_v30 = vpop.xlane.xlu0 %2151 }
 0xa74   : > { %11875 = vrcp.f32 %v2152_v30 }
 0xa77   : > { %v2155_v31 = vpop.xlane.xlu0 %2154 }
 0xa78   : > { %11877 = vrcp.f32 %v2155_v31 }
 0xa7b   : > { %v11546_v33 = vpop.permute.xlu0 %11545 }
 0xa7c   : > { %v11548_v34 = vunpack.i.h.bf16 %v11546_v33  ;;  %v11547_v36 = vunpack.i.l.bf16 %v11546_v33 }
 0xa7e   : > { %v11253_v37 = vpack.c.bf16 %v11548_v34, %v11547_v36  ;;  %v11876_v38 = vpop.eup %11875 }
 0xa7f   : > { %v2157_v44 = vmul.f32 %v11876_v38, %v11872_v23 }
 0xa80   : > { %11255 = vmatprep.subr.msk.bf16.mxu1 %vm12333_vm6, %v11253_v37 }
 0xa81   : > { %v10827_v42 = vpop.f32.mrb[6].mxu0  ;;  %11258 = vmatpush3.bf16.xpose.msk.msra.mxu1 %vm12333_vm6, %v11253_v37 }
 0xa82   : > { %v1951_v43 = vpop.f32.mrb[7].mxu0  ;;  %11267 = vmatprep.subr.msk.bf16.mxu1 %vm12333_vm6, %v12329_v41  ;;  %v11878_v39 = vpop.eup %11877 }
 0xa83   : > { %10830 = vmatprep.mubr.msk.f32.mxu0 %vm1185_vm5, %v1951_v43  ;;  %v2159_v52 = vmul.f32 %v11878_v39, %v11874_v27 }
 0xa84   : > { %10831 = vmatmul.mubr.msk.f32.vlgmr.msra.gmra.mrb[4].mxu0 %vm1185_vm5, %v10827_v42  ;;  %v10858_v46 = vpop.f32.mrb[14].mxu1 }
 0xa85   : > { %11240 = vmatpush3.bf16.msk.msra.mxu0 %vm12363_vm11, %v11235_v14  ;;  %v2423_v47 = vmul.f32 0.35355338, %v10858_v46  ;;  %10844 = vmatprep.mubr.msk.f32.mxu0 %vm1273_vm8, %v2157_v44  ;;  %v2413_v49 = vpop.f32.mrb[15].mxu1 }
 0xa86   : > { %v2422_v50 = vmul.f32 0.35355338, %v2413_v49  ;;  %10847 = vmatprep.subr.mxu0 %v1170_v58  ;;  %v1171_v49 = vld [vmem:[%s12217_s21 + $0x20] sm:$0xff] }
 0xa87   : > { %v2425_v54 = vadd.f32 %v2423_v47, %v12346_v48 }
 0xa88   : > { %10845 = vmatmul.mubr.msk.f32.vlgmr.msra.gmra.mrb[8].mxu0 %vm1273_vm8, %v2159_v52  ;;  %10876 = vmatmul.mubr.msk.f32.vlgmr.msra.gmra.mrb[16].mxu1 %vm1185_vm5, %v2622_v53  ;;  %v2424_v55 = vadd.f32 %v2422_v50, %v12351_v51 }
 0xa89   : > { %11270 = vmatpush3.bf16.xpose.msk.msra.mxu1 %vm12333_vm6, %v12329_v41  ;;  %v2429_v56 = vsel %vm1277_vm7, %v2425_v54, -inf  ;;  %10848 = vmatpush3.msra.mxu0 %v1170_v58 }
 0xa8a   : > { %2430 = vmax.xlane.f32.xlu1 %v2429_v56  ;;  %v2426_v57 = vsel %vm1273_vm8, %v2424_v55, -inf }
 0xa8b   : > { %2427 = vmax.xlane.f32.xlu0 %v2426_v57 }
 0xa9b   : > { %11550 = vrot.lane.b32.xlu1 %v12325_v40, %s13400_s27 }
 0xa9f   : > { %2909 = vrot.lane.b32.xlu1 %v12317_v35, %s13396_s25 }
 0xb17   : > { %v2431_v59 = vpop.xlane.xlu1 %2430 }
 0xb18   : > { %v2433_v60 = vsub.f32 %v2425_v54, %v2431_v59  ;;  %v2428_v61 = vpop.xlane.xlu0 %2427 }
 0xb19   : > { %v2432_v41 = vsub.f32 %v2424_v55, %v2428_v61 }
 0xb1a   : > { %v2436_v62 = vmul.f32 1.442695, %v2433_v60 }
 0xb1b   : > { %v2434_v63 = vmul.f32 1.442695, %v2432_v41  ;;  %v11551_v0 = vpop.permute.xlu1 %11550 }
 0xb1c   : > { %v11553_v1 = vunpack.i.h.bf16 %v11551_v0  ;;  %v11552_v3 = vunpack.i.l.bf16 %v11551_v0 }
 0xb1d   : > { %11879 = vpow2.f32 %v2434_v63 }
 0xb1e   : > { %v11247_v4 = vpack.c.bf16 %v11553_v1, %v11552_v3  ;;  %11881 = vpow2.f32 %v2436_v62 }
 0xb1f   : > { %v2910_v27 = vpop.permute.xlu1 %2909 }
 0xb20   : > { %11249 = vmatprep.subr.msk.bf16.mxu0 %vm12363_vm11, %v11247_v4 }
 0xb27   : > { %v11880_v5 = vpop.eup %11879 }
 0xb28   : > { %v2438_v6 = vsel %vm1273_vm8, %v11880_v5, 0.0  ;;  %v11882_v7 = vpop.eup %11881 }
 0xb29   : > { %2439 = vadd.xlane.f32.xlu0 %v2438_v6  ;;  %v2441_v8 = vsel %vm1277_vm7, %v11882_v7, 0.0 }
 0xb2d   : > { %2442 = vadd.xlane.f32.xlu0 %v2441_v8 }
 0xb43   : > { %2907 = vrot.lane.b32.xlu0 %v12315_v32, %s13396_s25  ;;  %s13398_s25 = smov 56  }
 0xb5b   : > { %v10846_v9 = vpop.f32.mrb[8].mxu0  ;;  %v10877_v10 = vpop.f32.mrb[16].mxu1 }
 0xb5c   : > { %v2711_v11 = vmul.f32 0.35355338, %v10877_v10  ;;  %v2239_v13 = vpop.f32.mrb[9].mxu0  ;;  %v2701_v14 = vpop.f32.mrb[17].mxu1 }
 0xb5d   : > { %v2710_v15 = vmul.f32 0.35355338, %v2701_v14  ;;  %10849 = vmatprep.mubr.msk.f32.mxu0 %vm1185_vm5, %v2239_v13  ;;  %v1172_v14 = vld [vmem:[%s12217_s21 + $0x28] sm:$0xff] }
 0xb5e   : > { %10850 = vmatmul.mubr.msk.f32.vlgmr.msra.gmra.mrb[4].mxu0 %vm1185_vm5, %v10846_v9  ;;  %v2713_v18 = vadd.f32 %v2711_v11, %v12346_v48 }
 0xb5f   : > { %11252 = vmatpush3.bf16.msk.msra.mxu0 %vm12363_vm11, %v11247_v4  ;;  %v2712_v19 = vadd.f32 %v2710_v15, %v12351_v51 }
 0xb60   : > { %v2717_v20 = vsel %vm1277_vm7, %v2713_v18, -inf  ;;  %10866 = vmatprep.subr.mxu0 %v1171_v49 }
 0xb61   : > { %v2714_v21 = vsel %vm1273_vm8, %v2712_v19, -inf }
 0xb62   : > { %2715 = vmax.xlane.f32.xlu1 %v2714_v21  ;;  %2718 = vmax.xlane.f32.xlu0 %v2717_v20 }
 0xbb6   : > { %v2440_v22 = vpop.xlane.xlu0 %2439 }
 0xbb7   : > { %11883 = vrcp.f32 %v2440_v22 }
 0xbba   : > { %v2443_v23 = vpop.xlane.xlu0 %2442 }
 0xbbb   : > { %11885 = vrcp.f32 %v2443_v23 }
 0xbbe   : > { %v2908_v24 = vpop.permute.xlu0 %2907 }
 0xbbf   : > { %10894 = vmatprep.mubr.msk.f32.mxu1 %vm1185_vm5, %v2908_v24 }
 0xbc0   : > { %10895 = vmatmul.mubr.msk.f32.vlgmr.msra.gmra.mrb[18].mxu1 %vm1185_vm5, %v2910_v27 }
 0xbc1   : > { %v11884_v29 = vpop.eup %11883 }
 0xbc2   : > { %v2445_v30 = vmul.f32 %v11884_v29, %v11880_v5 }
 0xbc4   : > { %10863 = vmatprep.mubr.msk.f32.mxu0 %vm1273_vm8, %v2445_v30 }
 0xbc5   : > { %v11886_v31 = vpop.eup %11885 }
 0xbc6   : > { %v2447_v33 = vmul.f32 %v11886_v31, %v11882_v7 }
 0xbc8   : > { %10864 = vmatmul.mubr.msk.f32.vlgmr.msra.gmra.mrb[10].mxu0 %vm1273_vm8, %v2447_v33 }
 0xbc9   : > { %10867 = vmatpush3.msra.mxu0 %v1171_v49 }
 0xbef   : > { %v2716_v34 = vpop.xlane.xlu1 %2715  ;;  %v2719_v36 = vpop.xlane.xlu0 %2718 }
 0xbf0   : > { %v2720_v37 = vsub.f32 %v2712_v19, %v2716_v34  ;;  %v2721_v38 = vsub.f32 %v2713_v18, %v2719_v36 }
 0xbf2   : > { %v2722_v42 = vmul.f32 1.442695, %v2720_v37  ;;  %v2724_v43 = vmul.f32 1.442695, %v2721_v38 }
 0xbf4   : > { %11887 = vpow2.f32 %v2722_v42 }
 0xbf5   : > { %11889 = vpow2.f32 %v2724_v43 }
 0xbfe   : > { %v11888_v39 = vpop.eup %11887 }
 0xbff   : > { %v11890_v44 = vpop.eup %11889  ;;  %v2726_v46 = vsel %vm1273_vm8, %v11888_v39, 0.0 }
 0xc00   : > { %2727 = vadd.xlane.f32.xlu0 %v2726_v46  ;;  %v2729_v47 = vsel %vm1277_vm7, %v11890_v44, 0.0 }
 0xc01   : > { %2730 = vadd.xlane.f32.xlu1 %v2729_v47 }
 0xc12   : > { %11560 = vrot.lane.b32.xlu1 %v12325_v40, %s12046_s13 }
 0xc16   : > { %3191 = vrot.lane.b32.xlu1 %v12315_v32, %s13402_s9  ;;  %11555 = vrot.lane.b32.xlu0 %v12325_v40, %s13398_s25 }
 0xc1a   : > { %3193 = vrot.lane.b32.xlu0 %v12317_v35, %s13402_s9 }
 0xc8d   : > { %v2728_v50 = vpop.xlane.xlu0 %2727 }
 0xc8e   : > { %v2731_v52 = vpop.xlane.xlu1 %2730  ;;  %11891 = vrcp.f32 %v2728_v50 }
 0xc8f   : > { %11893 = vrcp.f32 %v2731_v52 }
 0xc91   : > { %v11556_v53 = vpop.permute.xlu0 %11555 }
 0xc92   : > { %v11561_v54 = vpop.permute.xlu1 %11560  ;;  %v11558_v55 = vunpack.i.h.bf16 %v11556_v53  ;;  %v11557_v56 = vunpack.i.l.bf16 %v11556_v53 }
 0xc93   : > { %v11563_v57 = vunpack.i.h.bf16 %v11561_v54  ;;  %v11562_v58 = vunpack.i.l.bf16 %v11561_v54  ;;  %v10896_v59 = vpop.f32.mrb[18].mxu1 }
 0xc94   : > { %v11259_v60 = vpack.c.bf16 %v11558_v55, %v11557_v56  ;;  %v2995_v61 = vmul.f32 0.35355338, %v10896_v59  ;;  %v2985_v41 = vpop.f32.mrb[19].mxu1 }
 0xc95   : > { %v11277_v62 = vpack.c.bf16 %v11563_v57, %v11562_v58  ;;  %v2994_v63 = vmul.f32 0.35355338, %v2985_v41  ;;  %v3194_v10 = vpop.permute.xlu0 %3193 }
 0xc96   : > { %v3192_v0 = vpop.permute.xlu1 %3191  ;;  %11261 = vmatprep.subr.msk.bf16.mxu0 %vm12363_vm11, %v11259_v60  ;;  %v2997_v1 = vadd.f32 %v2995_v61, %v12346_v48 }
 0xc97   : > { %11279 = vmatprep.subr.msk.bf16.mxu1 %vm12333_vm6, %v11277_v62  ;;  %10913 = vmatprep.mubr.msk.f32.mxu1 %vm1185_vm5, %v3192_v0  ;;  %v2996_v3 = vadd.f32 %v2994_v63, %v12351_v51 }
 0xc98   : > { %11282 = vmatpush3.bf16.xpose.msk.msra.mxu1 %vm12333_vm6, %v11277_v62  ;;  %v3001_v4 = vsel %vm1277_vm7, %v2997_v1, -inf  ;;  %v11892_v6 = vpop.eup %11891 }
 0xc99   : > { %3002 = vmax.xlane.f32.xlu0 %v3001_v4  ;;  %v2998_v5 = vsel %vm1273_vm8, %v2996_v3, -inf  ;;  %v11894_v9 = vpop.eup %11893  ;;  %v2733_v11 = vmul.f32 %v11892_v6, %v11888_v39 }
 0xc9a   : > { %2999 = vmax.xlane.f32.xlu1 %v2998_v5  ;;  %v2735_v13 = vmul.f32 %v11894_v9, %v11890_v44  ;;  %v1173_v9 = vld [vmem:[%s12217_s21 + $0x30] sm:$0xff] }
 0xc9b   : > { %v10865_v7 = vpop.f32.mrb[10].mxu0 }
 0xc9c   : > { %v2527_v8 = vpop.f32.mrb[11].mxu0 }
 0xc9d   : > { %10868 = vmatprep.mubr.msk.f32.mxu0 %vm1185_vm5, %v2527_v8 }
 0xc9e   : > { %10869 = vmatmul.mubr.msk.f32.vlgmr.msra.gmra.mrb[4].mxu0 %vm1185_vm5, %v10865_v7 }
 0xc9f   : > { %11264 = vmatpush3.bf16.msk.msra.mxu0 %vm12363_vm11, %v11259_v60  ;;  %10914 = vmatmul.mubr.msk.f32.vlgmr.msra.gmra.mrb[20].mxu1 %vm1185_vm5, %v3194_v10 }
 0xca0   : > { %10882 = vmatprep.mubr.msk.f32.mxu0 %vm1273_vm8, %v2733_v11  ;;  %10885 = vmatprep.subr.mxu0 %v1172_v14 }
 0xca2   : > { %10883 = vmatmul.mubr.msk.f32.vlgmr.msra.gmra.mrb[12].mxu0 %vm1273_vm8, %v2735_v13 }
 0xca3   : > { %10886 = vmatpush3.msra.mxu0 %v1172_v14 }
 0xd26   : > { %v3003_v15 = vpop.xlane.xlu0 %3002 }
 0xd27   : > { %v3005_v18 = vsub.f32 %v2997_v1, %v3003_v15  ;;  %v3000_v19 = vpop.xlane.xlu1 %2999 }
 0xd28   : > { %v3004_v20 = vsub.f32 %v2996_v3, %v3000_v19 }
 0xd29   : > { %v3008_v21 = vmul.f32 1.442695, %v3005_v18 }
 0xd2a   : > { %v3006_v22 = vmul.f32 1.442695, %v3004_v20 }
 0xd2b   : > { %11895 = vpow2.f32 %v3008_v21 }
 0xd2c   : > { %11897 = vpow2.f32 %v3006_v22 }
 0xd35   : > { %v11896_v23 = vpop.eup %11895 }
 0xd36   : > { %v11898_v24 = vpop.eup %11897  ;;  %v3013_v27 = vsel %vm1277_vm7, %v11896_v23, 0.0 }
 0xd37   : > { %3014 = vadd.xlane.f32.xlu1 %v3013_v27  ;;  %v3010_v29 = vsel %vm1273_vm8, %v11898_v24, 0.0 }
 0xd38   : > { %3011 = vadd.xlane.f32.xlu0 %v3010_v29 }
 0xd48   : > { %11570 = vrot.lane.b32.xlu1 %v12325_v40, %s12051_s1 }
 0xd4c   : > { %3479 = vrot.lane.b32.xlu1 %v12315_v32, %s13400_s27 }
 0xd4e   : > { %11565 = vrot.lane.b32.xlu0 %v12325_v40, %s12043_s30 }
 0xd52   : > { %3481 = vrot.lane.b32.xlu0 %v12317_v35, %s13400_s27  ;;  %s13447_s27 = sld [smem:[#allocation10_spill]] }
 0xd72   : > { %v10915_v30 = vpop.f32.mrb[20].mxu1 }
 0xd73   : > { %v3283_v31 = vmul.f32 0.35355338, %v10915_v30  ;;  %v3273_v33 = vpop.f32.mrb[21].mxu1 }
 0xd74   : > { %v3282_v34 = vmul.f32 0.35355338, %v3273_v33 }
 0xd75   : > { %v10884_v36 = vpop.f32.mrb[12].mxu0  ;;  %v3285_v37 = vadd.f32 %v3283_v31, %v12346_v48 }
 0xd76   : > { %v2815_v38 = vpop.f32.mrb[13].mxu0  ;;  %v3284_v42 = vadd.f32 %v3282_v34, %v12351_v51 }
 0xd77   : > { %v3289_v43 = vsel %vm1277_vm7, %v3285_v37, -inf  ;;  %10887 = vmatprep.mubr.msk.f32.mxu0 %vm1185_vm5, %v2815_v38 }
 0xd78   : > { %3290 = vmax.xlane.f32.xlu0 %v3289_v43  ;;  %v3286_v39 = vsel %vm1273_vm8, %v3284_v42, -inf  ;;  %10888 = vmatmul.mubr.msk.f32.vlgmr.msra.gmra.mrb[4].mxu0 %vm1185_vm5, %v10884_v36 }
 0xd79   : > { %3287 = vmax.xlane.f32.xlu1 %v3286_v39 }
 0xdc4   : > { %v3015_v44 = vpop.xlane.xlu1 %3014 }
 0xdc5   : > { %11899 = vrcp.f32 %v3015_v44  ;;  %v3012_v46 = vpop.xlane.xlu0 %3011 }
 0xdc6   : > { %11901 = vrcp.f32 %v3012_v46 }
 0xdc8   : > { %v11571_v47 = vpop.permute.xlu1 %11570 }
 0xdc9   : > { %v11573_v49 = vunpack.i.h.bf16 %v11571_v47  ;;  %v11572_v50 = vunpack.i.l.bf16 %v11571_v47  ;;  %v11566_v52 = vpop.permute.xlu0 %11565 }
 0xdca   : > { %v11568_v53 = vunpack.i.h.bf16 %v11566_v52  ;;  %v11567_v54 = vunpack.i.l.bf16 %v11566_v52 }
 0xdcb   : > { %v11289_v55 = vpack.c.bf16 %v11573_v49, %v11572_v50 }
 0xdcc   : > { %v11271_v56 = vpack.c.bf16 %v11568_v53, %v11567_v54  ;;  %v3480_v57 = vpop.permute.xlu1 %3479 }
 0xdcd   : > { %11291 = vmatprep.subr.msk.bf16.mxu1 %vm12333_vm6, %v11289_v55  ;;  %10932 = vmatprep.mubr.msk.f32.mxu1 %vm1185_vm5, %v3480_v57  ;;  %v3482_v41 = vpop.permute.xlu0 %3481 }
 0xdce   : > { %11273 = vmatprep.subr.msk.bf16.mxu0 %vm12363_vm11, %v11271_v56  ;;  %11294 = vmatpush3.bf16.xpose.msk.msra.mxu1 %vm12333_vm6, %v11289_v55 }
 0xdcf   : > { %v11900_v58 = vpop.eup %11899  ;;  %11276 = vmatpush3.bf16.msk.msra.mxu0 %vm12363_vm11, %v11271_v56 }
 0xdd0   : > { %v11902_v59 = vpop.eup %11901  ;;  %v3019_v61 = vmul.f32 %v11900_v58, %v11896_v23  ;;  %10904 = vmatprep.subr.mxu0 %v1173_v9 }
 0xdd1   : > { %v3017_v60 = vmul.f32 %v11902_v59, %v11898_v24 }
 0xdd3   : > { %10901 = vmatprep.mubr.msk.f32.mxu0 %vm1273_vm8, %v3017_v60 }
 0xdd4   : > { %10902 = vmatmul.mubr.msk.f32.vlgmr.msra.gmra.mrb[14].mxu0 %vm1273_vm8, %v3019_v61 }
 0xdd5   : > { %10933 = vmatmul.mubr.msk.f32.vlgmr.msra.gmra.mrb[22].mxu1 %vm1185_vm5, %v3482_v41  ;;  %10905 = vmatpush3.msra.mxu0 %v1173_v9  ;;  %v12019_v41 = vld [vmem:[%s13442_s11] sm:$0xff] }
 0xe05   : > { %v3291_v62 = vpop.xlane.xlu0 %3290 }
 0xe06   : > { %v3293_v63 = vsub.f32 %v3285_v37, %v3291_v62  ;;  %v3288_v0 = vpop.xlane.xlu1 %3287 }
 0xe07   : > { %v3292_v1 = vsub.f32 %v3284_v42, %v3288_v0  ;;  %v12020_v0 = vld [vmem:[%s13442_s11 + $0x8] sm:$0xf] }
 0xe08   : > { %v3296_v3 = vmul.f32 1.442695, %v3293_v63 }
 0xe09   : > { %v3294_v4 = vmul.f32 1.442695, %v3292_v1 }
 0xe0a   : > { %11903 = vpow2.f32 %v3296_v3 }
 0xe0b   : > { %11905 = vpow2.f32 %v3294_v4 }
 0xe14   : > { %v11904_v5 = vpop.eup %11903 }
 0xe15   : > { %v11906_v6 = vpop.eup %11905  ;;  %v3301_v7 = vsel %vm1277_vm7, %v11904_v5, 0.0 }
 0xe16   : > { %3302 = vadd.xlane.f32.xlu1 %v3301_v7  ;;  %v3298_v8 = vsel %vm1273_vm8, %v11906_v6, 0.0 }
 0xe17   : > { %3299 = vadd.xlane.f32.xlu0 %v3298_v8 }
 0xe27   : > { %11580 = vrot.lane.b32.xlu1 %v12325_v40, %s12049_s3 }
 0xe2b   : > { %3767 = vrot.lane.b32.xlu1 %v12315_v32, %s13398_s25 }
 0xe2d   : > { %11575 = vrot.lane.b32.xlu0 %v12325_v40, %s12045_s10 }
 0xe31   : > { %3769 = vrot.lane.b32.xlu0 %v12317_v35, %s13398_s25  ;;  %s13446_s25 = scalar_lea.vmem %s13445_s12, %s12196_s22  ;;  %s13459_s12 = scalar_lea.vmem %s13380_s19, %s12196_s22 }
 0xe32   : > { %v10030_v2 = vld [vmem:[%s13446_s25] ss:$0 sm:$0xff]  ;;  %s13450_s25 = sld [smem:[#allocation12_spill]] }
 0xea3   : > { %v3303_v10 = vpop.xlane.xlu1 %3302 }
 0xea4   : > { %11907 = vrcp.f32 %v3303_v10  ;;  %v3300_v11 = vpop.xlane.xlu0 %3299 }
 0xea5   : > { %11909 = vrcp.f32 %v3300_v11 }
 0xea7   : > { %v11581_v13 = vpop.permute.xlu1 %11580  ;;  %v10903_v14 = vpop.f32.mrb[14].mxu0 }
 0xea8   : > { %v11583_v15 = vunpack.i.h.bf16 %v11581_v13  ;;  %v11582_v18 = vunpack.i.l.bf16 %v11581_v13  ;;  %v11576_v19 = vpop.permute.xlu0 %11575  ;;  %v3099_v20 = vpop.f32.mrb[15].mxu0 }
 0xea9   : > { %v11578_v21 = vunpack.i.h.bf16 %v11576_v19  ;;  %v11577_v22 = vunpack.i.l.bf16 %v11576_v19  ;;  %v10934_v23 = vpop.f32.mrb[22].mxu1  ;;  %10906 = vmatprep.mubr.msk.f32.mxu0 %vm1185_vm5, %v3099_v20 }
 0xeaa   : > { %v11301_v32 = vpack.c.bf16 %v11583_v15, %v11582_v18  ;;  %v3571_v24 = vmul.f32 0.35355338, %v10934_v23  ;;  %v3561_v27 = vpop.f32.mrb[23].mxu1  ;;  %10907 = vmatmul.mubr.msk.f32.vlgmr.msra.gmra.mrb[4].mxu0 %vm1185_vm5, %v10903_v14 }
 0xeab   : > { %v11283_v35 = vpack.c.bf16 %v11578_v21, %v11577_v22  ;;  %v3570_v29 = vmul.f32 0.35355338, %v3561_v27  ;;  %v3768_v30 = vpop.permute.xlu1 %3767 }
 0xeac   : > { %11303 = vmatprep.subr.msk.bf16.mxu1 %vm12333_vm6, %v11301_v32  ;;  %10951 = vmatprep.mubr.msk.f32.mxu1 %vm1185_vm5, %v3768_v30  ;;  %v3573_v31 = vadd.f32 %v3571_v24, %v12346_v48  ;;  %v3770_v43 = vpop.permute.xlu0 %3769 }
 0xead   : > { %11285 = vmatprep.subr.msk.bf16.mxu0 %vm12363_vm11, %v11283_v35  ;;  %11306 = vmatpush3.bf16.xpose.msk.msra.mxu1 %vm12333_vm6, %v11301_v32  ;;  %v3572_v33 = vadd.f32 %v3570_v29, %v12351_v51  ;;  %v1174_v51 = vld [vmem:[%s12217_s21 + $0x38] sm:$0xff] }
 0xeae   : > { %v11908_v34 = vpop.eup %11907  ;;  %11288 = vmatpush3.bf16.msk.msra.mxu0 %vm12363_vm11, %v11283_v35  ;;  %v3577_v36 = vsel %vm1277_vm7, %v3573_v31, -inf  ;;  %v1175_v35 = vld [vmem:[%s12217_s21 + $0x40] sm:$0xff] }
 0xeaf   : > { %v11910_v37 = vpop.eup %11909  ;;  %3578 = vmax.xlane.f32.xlu0 %v3577_v36  ;;  %v3574_v38 = vsel %vm1273_vm8, %v3572_v33, -inf  ;;  %v3307_v42 = vmul.f32 %v11908_v34, %v11904_v5  ;;  %10923 = vmatprep.subr.mxu0 %v1174_v51 }
 0xeb0   : > { %3575 = vmax.xlane.f32.xlu1 %v3574_v38  ;;  %v3305_v48 = vmul.f32 %v11910_v37, %v11906_v6 }
 0xeb2   : > { %10920 = vmatprep.mubr.msk.f32.mxu0 %vm1273_vm8, %v3305_v48  ;;  %v1176_v48 = vld [vmem:[%s12217_s21 + $0x48] sm:$0xff] }
 0xeb3   : > { %10921 = vmatmul.mubr.msk.f32.vlgmr.msra.gmra.mrb[16].mxu0 %vm1273_vm8, %v3307_v42 }
 0xeb4   : > { %10952 = vmatmul.mubr.msk.f32.vlgmr.msra.gmra.mrb[24].mxu1 %vm1185_vm5, %v3770_v43  ;;  %10924 = vmatpush3.msra.mxu0 %v1174_v51 }
 0xf3c   : > { %v3579_v39 = vpop.xlane.xlu0 %3578 }
 0xf3d   : > { %v3581_v44 = vsub.f32 %v3573_v31, %v3579_v39  ;;  %v3576_v46 = vpop.xlane.xlu1 %3575 }
 0xf3e   : > { %v3580_v47 = vsub.f32 %v3572_v33, %v3576_v46 }
 0xf3f   : > { %v3584_v49 = vmul.f32 1.442695, %v3581_v44 }
 0xf40   : > { %v3582_v50 = vmul.f32 1.442695, %v3580_v47 }
 0xf41   : > { %11911 = vpow2.f32 %v3584_v49 }
 0xf42   : > { %11913 = vpow2.f32 %v3582_v50 }
 0xf4b   : > { %v11912_v52 = vpop.eup %11911 }
 0xf4c   : > { %v11914_v53 = vpop.eup %11913  ;;  %v3589_v54 = vsel %vm1277_vm7, %v11912_v52, 0.0 }
 0xf4d   : > { %3590 = vadd.xlane.f32.xlu1 %v3589_v54  ;;  %v3586_v55 = vsel %vm1273_vm8, %v11914_v53, 0.0  ;;  %v12021_v54 = vld [vmem:[#allocation2 + $0x8] sm:$0xf] }
 0xf4e   : > { %3587 = vadd.xlane.f32.xlu0 %v3586_v55 }
 0xf64   : > { %11585 = vrot.lane.b32.xlu0 %v12325_v40, %s12048_s2 }
 0xf86   : > { %v10922_v56 = vpop.f32.mrb[16].mxu0 }
 0xf87   : > { %v3387_v57 = vpop.f32.mrb[17].mxu0  ;;  %v10953_v58 = vpop.f32.mrb[24].mxu1 }
 0xf88   : > { %10925 = vmatprep.mubr.msk.f32.mxu0 %vm1185_vm5, %v3387_v57  ;;  %v3849_v59 = vpop.f32.mrb[25].mxu1  ;;  %v3859_v60 = vmul.f32 0.35355338, %v10953_v58 }
 0xf89   : > { %v3858_v61 = vmul.f32 0.35355338, %v3849_v59  ;;  %10926 = vmatmul.mubr.msk.f32.vlgmr.msra.gmra.mrb[4].mxu0 %vm1185_vm5, %v10922_v56  ;;  %v12022_v56 = vld [vmem:[#allocation2] sm:$0xff] }
 0xf8a   : > { %v3861_v1 = vadd.f32 %v12020_v0, %v3859_v60  ;;  %v11701_v60 = vld [vmem:[%s12227_s28 + $0x4] ss:$8 sps:$4 sm:$0xff]  }
 0xf8b   : > { %v3860_v62 = vadd.f32 %v12019_v41, %v3858_v61  ;;  %v11704_v61 = vld [vmem:[%s12227_s28 + $0x14] ss:$8 sps:$4 sm:$0xff]   ;;  %v11707_v41 = vld [vmem:[%s12227_s28 + $0x24] ss:$8 sps:$4 sm:$0xff]  }
 0xf8c   : > { %v3865_v3 = vsel %vm1277_vm7, %v3861_v1, -inf }
 0xf8d   : > { %v3862_v63 = vsel %vm1273_vm8, %v3860_v62, -inf }
 0xf8e   : > { %3863 = vmax.xlane.f32.xlu1 %v3862_v63 }
 0xf92   : > { %3866 = vmax.xlane.f32.xlu1 %v3865_v3 }
 0xfda   : > { %v3591_v4 = vpop.xlane.xlu1 %3590 }
 0xfdb   : > { %11915 = vrcp.f32 %v3591_v4  ;;  %v3588_v5 = vpop.xlane.xlu0 %3587 }
 0xfdc   : > { %11917 = vrcp.f32 %v3588_v5 }
 0xfdf   : > { %v11586_v6 = vpop.permute.xlu0 %11585 }
 0xfe0   : > { %v11588_v7 = vunpack.i.h.bf16 %v11586_v6  ;;  %v11587_v8 = vunpack.i.l.bf16 %v11586_v6 }
 0xfe2   : > { %v11295_v9 = vpack.c.bf16 %v11588_v7, %v11587_v8 }
 0xfe4   : > { %11297 = vmatprep.subr.msk.bf16.mxu0 %vm12363_vm11, %v11295_v9 }
 0xfe5   : > { %v11916_v10 = vpop.eup %11915  ;;  %11300 = vmatpush3.bf16.msk.msra.mxu0 %vm12363_vm11, %v11295_v9 }
 0xfe6   : > { %v11918_v11 = vpop.eup %11917  ;;  %v3595_v14 = vmul.f32 %v11916_v10, %v11912_v52  ;;  %10942 = vmatprep.subr.mxu0 %v1175_v35  ;;  %v11710_v10 = vld [vmem:[%s12227_s28 + $0x34] ss:$8 sps:$4 sm:$0xff]  }
 0xfe7   : > { %v3593_v13 = vmul.f32 %v11918_v11, %v11914_v53  ;;  %v11708_v11 = vld [vmem:[%s12227_s28 + $0x30] ss:$8 sps:$4 sm:$0xff]  }
 0xfe9   : > { %10939 = vmatprep.mubr.msk.f32.mxu0 %vm1273_vm8, %v3593_v13  ;;  %v11713_v13 = vld [vmem:[%s12227_s28 + $0x44] ss:$8 sps:$4 sm:$0xff]  }
 0xfea   : > { %10940 = vmatmul.mubr.msk.f32.vlgmr.msra.gmra.mrb[18].mxu0 %vm1273_vm8, %v3595_v14  ;;  %v11711_v14 = vld [vmem:[%s12227_s28 + $0x40] ss:$8 sps:$4 sm:$0xff]  }
 0xfeb   : > { %10943 = vmatpush3.msra.mxu0 %v1175_v35 }
0x101b   : > { %v3864_v15 = vpop.xlane.xlu1 %3863 }
0x101c   : > { %v3868_v18 = vsub.f32 %v3860_v62, %v3864_v15  ;;  %v11705_v62 = vld [vmem:[%s12227_s28 + $0x20] ss:$8 sps:$4 sm:$0xff]  }
0x101d   : > { %v11714_v15 = vld [vmem:[%s12237_s24] sm:$0xff]  }
0x101e   : > { %v3870_v21 = vmul.f32 1.442695, %v3868_v18  ;;  %v12059_v18 = vmov 0.0  }
0x101f   : > { %v3867_v19 = vpop.xlane.xlu1 %3866  ;;  %10966 = vmatprep.subr.bf16.mxu1 %v12059_v18  ;;  %10976 = vmatprep.mubr.msk.bf16.mxu1 %vm12060_vm13, %v12059_v18 }
0x1020   : > { %v3869_v20 = vsub.f32 %v3861_v1, %v3867_v19  ;;  %v1044_v19 = vld [vmem:[%s13447_s27] sm:$0xff]  ;;  %10967 = vmatpush3.bf16.msra.mxu1 %v11714_v15 }
0x1021   : > { %10968 = vmatprep.subr.bf16.mxu1 %v12059_v18  ;;  %v12737_v15 = vld [vmem:[%s13450_s25] sm:$0xff] }
0x1022   : > { %v3872_v22 = vmul.f32 1.442695, %v3869_v20  ;;  %v1045_v20 = vld [vmem:[%s13447_s27 + $0x8] sm:$0xff] }
0x1024   : > { %11919 = vpow2.f32 %v3872_v22  ;;  %v11715_v22 = vld [vmem:[%s12237_s24 + $0x8] sm:$0xff]  }
0x1025   : > { %11921 = vpow2.f32 %v3870_v21  ;;  %v4198_v21 = vpack.c.bf16 %v1045_v20, %v1044_v19  ;;  %10969 = vmatpush3.bf16.msra.mxu1 %v11715_v22 }
0x1026   : > { %10970 = vmatprep.subr.bf16.mxu1 %v12059_v18 }
0x102e   : > { %v11920_v23 = vpop.eup %11919 }
0x102f   : > { %v3877_v32 = vsel %vm1277_vm7, %v11920_v23, 0.0  ;;  %v11922_v24 = vpop.eup %11921 }
0x1030   : > { %3878 = vadd.xlane.f32.xlu1 %v3877_v32  ;;  %v3874_v27 = vsel %vm1273_vm8, %v11922_v24, 0.0  ;;  %v11717_v32 = vld [vmem:[%s12237_s24 + $0x18] sm:$0xff]  }
0x1034   : > { %3875 = vadd.xlane.f32.xlu1 %v3874_v27 }
0x1045   : > { %11590 = vrot.lane.b32.xlu1 %v12325_v40, %s12052_s29 }
0x10bd   : > { %v3879_v29 = vpop.xlane.xlu1 %3878  ;;  %v10941_v30 = vpop.f32.mrb[18].mxu0 }
0x10be   : > { %v3675_v31 = vpop.f32.mrb[19].mxu0  ;;  %11923 = vrcp.f32 %v3879_v29 }
0x10bf   : > { %10944 = vmatprep.mubr.msk.f32.mxu0 %vm1185_vm5, %v3675_v31 }
0x10c0   : > { %10945 = vmatmul.mubr.msk.f32.vlgmr.msra.gmra.mrb[4].mxu0 %vm1185_vm5, %v10941_v30 }
0x10c1   : > { %v3876_v33 = vpop.xlane.xlu1 %3875 }
0x10c2   : > { %11925 = vrcp.f32 %v3876_v33 }
0x10c5   : > { %v11591_v34 = vpop.permute.xlu1 %11590 }
0x10c6   : > { %v11593_v36 = vunpack.i.h.bf16 %v11591_v34  ;;  %v11592_v37 = vunpack.i.l.bf16 %v11591_v34  ;;  %v1046_v34 = vld [vmem:[%s12274_s7] sm:$0x3f] }
0x10c8   : > { %v11307_v38 = vpack.c.bf16 %v11593_v36, %v11592_v37  ;;  %v11924_v40 = vpop.eup %11923  ;;  %v4097_v37 = vrot.slane %v1046_v34, %v12307_v26 }
0x10c9   : > { %v3883_v51 = vmul.f32 %v11924_v40, %v11920_v23  ;;  %v11716_v23 = vld [vmem:[%s12237_s24 + $0x10] sm:$0xff]  }
0x10ca   : > { %11309 = vmatprep.subr.msk.bf16.mxu0 %vm12363_vm11, %v11307_v38  ;;  %10971 = vmatpush3.bf16.msra.mxu1 %v11716_v23 }
0x10cb   : > { %11312 = vmatpush3.bf16.msk.msra.mxu0 %vm12363_vm11, %v11307_v38  ;;  %10972 = vmatprep.subr.bf16.mxu1 %v12059_v18 }
0x10cc   : > { %v11926_v42 = vpop.eup %11925  ;;  %10961 = vmatprep.subr.mxu0 %v1176_v48 }
0x10cd   : > { %v3881_v43 = vmul.f32 %v11926_v42, %v11922_v24  ;;  %v11718_v24 = vld [vmem:[%s12237_s24 + $0x20] sm:$0xff]   ;;  %s13448_s24 = sld [smem:[#allocation18_spill]] }
0x10ce   : > { %10973 = vmatpush3.bf16.msra.mxu1 %v11717_v32 }
0x10cf   : > { %10958 = vmatprep.mubr.msk.f32.mxu0 %vm1273_vm8, %v3881_v43  ;;  %10974 = vmatprep.subr.bf16.mxu1 %v12059_v18  ;;  %v4103_v43 = vrot.slane %v1046_v34, %v12311_v28 }
0x10d0   : > { %10959 = vmatmul.mubr.msk.f32.vlgmr.msra.gmra.mrb[20].mxu0 %vm1273_vm8, %v3883_v51 }
0x10d1   : > { %10962 = vmatpush3.msra.mxu0 %v1176_v48 }
0x10d2   : > { %4274 = vmatprep.subr.bf16.mxu0 %v11701_v60  ;;  %10975 = vmatpush3.bf16.msra.mxu1 %v11718_v24 }
0x10d3   : > { %s13449_s9 = scalar_lea.vmem %s13448_s24, %s12196_s22  ;;  %s13456_s24 = smov 64  }
0x11a3   : > { %v10960_v39 = vpop.f32.mrb[20].mxu0 }
0x11a4   : > { %v3963_v44 = vpop.f32.mrb[21].mxu0 }
0x11a5   : > { %10963 = vmatprep.mubr.msk.f32.mxu0 %vm1185_vm5, %v3963_v44 }
0x11a6   : > { %10964 = vmatmul.mubr.msk.f32.vlgmr.msra.gmra.mrb[4].mxu0 %vm1185_vm5, %v10960_v39 }
0x11a7   : > { %4306 = vmatprep.mubr.bf16.mxu0 %v12042_v12 }
0x1279   : > { %v10965_v46 = vpop.f32.mrb[4].mxu0 }
0x127a   : > { %v11433_v47 = vadd.f32 %v10965_v46, %v12427_v16  ;;  %v4044_v49 = vpop.f32.mrb[5].mxu0  ;;  %v11699_v16 = vld [vmem:[%s12227_s28] ss:$8 sps:$4 sm:$0xff]  }
0x127b   : > { %v11434_v50 = vadd.f32 %v4044_v49, %v12429_v17  ;;  %4275 = vmatpush1.bf16.msra.mxu0 %v11699_v16  ;;  %v11702_v17 = vld [vmem:[%s12227_s28 + $0x10] ss:$8 sps:$4 sm:$0xff]  }
0x127c   : > { %v4063_v52 = vadd.f32 %v11433_v47, %v10030_v2  ;;  %4276 = vmatprep.subr.bf16.mxu0 %v11704_v61 }
0x127d   : > { %v4062_v53 = vadd.f32 %v11434_v50, %v10030_v2  ;;  %v4209_v2 = vld [vmem:[%s12232_s4] sm:$0x3] }
0x127e   : > { %v4065_v55 = vadd.f32 %v12021_v54, %v4063_v52  ;;  %v4214_v47 = vrot.slane %v4209_v2, %v12307_v26  ;;  %v4218_v52 = vrot.slane %v4209_v2, %v12311_v28 }
0x127f   : > { %v4064_v57 = vadd.f32 %v12022_v56, %v4062_v53  ;;  %4277 = vmatpush1.bf16.msra.mxu0 %v11702_v17 }
0x1280   : > { %v4070_v58 = vsel %vm4069_vm12, %v4065_v55, 0.0  ;;  %4278 = vmatprep.subr.bf16.mxu0 %v11707_v41 }
0x1281   : > { %4071 = vadd.xlane.f32.xlu1 %v4070_v58  ;;  %v4066_v59 = vsel %vm1120_vm4, %v4064_v57, 0.0 }
0x1282   : > { %4067 = vadd.xlane.f32.xlu0 %v4066_v59 }
0x1283   : > { %4279 = vmatpush1.bf16.msra.mxu0 %v11705_v62 }
0x1284   : > { %4280 = vmatprep.subr.bf16.mxu0 %v11710_v10 }
0x1287   : > { %4281 = vmatpush1.bf16.msra.mxu0 %v11708_v11  ;;  %v12732_v11 = vld [vmem:[%s13450_s25 + $0x8] sm:$0xf] }
0x1288   : > { %4282 = vmatprep.subr.bf16.mxu0 %v11713_v13 }
0x128b   : > { %4283 = vmatpush1.bf16.msra.mxu0 %v11711_v14 }
0x128e   : > { %10048 = vmatmul.mubr.msk.bf16.vlgmr.msra.gmra.mrb[24].mxu0 %vm1120_vm4, %v4198_v21 }
0x130e   : > { %v4072_v63 = vpop.xlane.xlu1 %4071 }
0x130f   : > { %v4075_v0 = vmul.f32 0.0125, %v4072_v63  ;;  %v4068_v1 = vpop.xlane.xlu0 %4067 }
0x1310   : > { %v4074_v3 = vmul.f32 0.0125, %v4068_v1 }
0x1311   : > { %v4077_v4 = vsub.f32 %v4065_v55, %v4075_v0  ;;  %v10031_v0 = vld [vmem:[%s13449_s9] ss:$0 sm:$0xff]  ;;  %s13457_s9 = smov 56  }
0x1312   : > { %v4076_v5 = vsub.f32 %v4064_v57, %v4074_v3 }
0x1313   : > { %v4079_v8 = vmul.f32 %v4077_v4, %v4077_v4 }
0x1314   : > { %v4078_v6 = vmul.f32 %v4076_v5, %v4076_v5 }
0x1315   : > { %v4083_v9 = vsel %vm4069_vm12, %v4079_v8, 0.0 }
0x1316   : > { %v4080_v7 = vsel %vm1120_vm4, %v4078_v6, 0.0 }
0x1317   : > { %4081 = vadd.xlane.f32.xlu0 %v4080_v7 }
0x131b   : > { %4084 = vadd.xlane.f32.xlu0 %v4083_v9 }
0x1361   : > { %v4308_v49 = vpop.f32.mrb[24].mxu0 }
0x1362   : > { %v4309_v50 = vadd.f32 %v4308_v49, %v4214_v47  ;;  %v4310_v53 = vpop.f32.mrb[25].mxu0 }
0x1363   : > { %v4312_v54 = vpop.f32.mrb[26].mxu0  ;;  %v4311_v57 = vadd.f32 %v4310_v53, %v4218_v52 }
0x1364   : > { %v4313_v55 = vadd.f32 %v4312_v54, %v4214_v47  ;;  %v4314_v56 = vpop.f32.mrb[27].mxu0 }
0x1365   : > { %v4315_v58 = vadd.f32 %v4314_v56, %v4218_v52 }
0x1366   : > { %v11313_v59 = vpack.c.bf16 %v4313_v55, %v4309_v50  ;;  %v12694_v16 = vpack.i.bf16 %v4313_v55, %v4309_v50 }
0x1367   : > { %v12702_v60 = vpack.c.bf16 %v4315_v58, %v4311_v57  ;;  %v12704_v61 = vpack.i.bf16 %v4315_v58, %v4311_v57 }
0x1368   : > { %11315 = vmatprep.subr.msk.bf16.mxu1 %vm12333_vm6, %v11313_v59  ;;  %11595 = vrot.lane.b32.xlu0 %v12694_v16, %s12046_s13 }
0x13a4   : > { %v4082_v27 = vpop.xlane.xlu0 %4081 }
0x13a5   : > { %v4086_v35 = vmul.f32 0.0125, %v4082_v27 }
0x13a7   : > { %v4088_v29 = vadd.f32 1e-05, %v4086_v35 }
0x13a8   : > { %v4085_v30 = vpop.xlane.xlu0 %4084 }
0x13a9   : > { %11927 = vrsqrt.f32 %v4088_v29  ;;  %v4087_v31 = vmul.f32 0.0125, %v4085_v30 }
0x13ab   : > { %v4089_v33 = vadd.f32 1e-05, %v4087_v31 }
0x13ad   : > { %11929 = vrsqrt.f32 %v4089_v33 }
0x13b3   : > { %v11928_v36 = vpop.eup %11927 }
0x13b4   : > { %v4092_v38 = vmul.f32 %v11928_v36, %v4076_v5 }
0x13b6   : > { %v4098_v40 = vmul.f32 %v4097_v37, %v4092_v38 }
0x13b7   : > { %v11930_v48 = vpop.eup %11929 }
0x13b8   : > { %v4093_v42 = vmul.f32 %v11930_v48, %v4077_v4  ;;  %v12684_v39 = vadd.f32 %v4103_v43, %v4098_v40 }
0x13ba   : > { %v4099_v51 = vmul.f32 %v4097_v37, %v4093_v42 }
0x13bc   : > { %v12686_v44 = vadd.f32 %v4103_v43, %v4099_v51 }
0x13be   : > { %v4106_v46 = vpack.c.bf16 %v12686_v44, %v12684_v39 }
0x13c0   : > { %10977 = vmatmul.mubr.msk.bf16.vlgmr.msra.gmra.mrb[28].mxu1 %vm1120_vm4, %v4106_v46 }
0x13c1   : > { %11318 = vmatpush3.bf16.xpose.msk.msra.mxu1 %vm12333_vm6, %v11313_v59 }
0x13da   : > { %v11596_v17 = vpop.permute.xlu0 %11595 }
0x13db   : > { %v11598_v41 = vunpack.i.h.bf16 %v11596_v17  ;;  %v11597_v62 = vunpack.i.l.bf16 %v11596_v17 }
0x13dd   : > { %v11323_v63 = vpack.c.bf16 %v11598_v41, %v11597_v62 }
0x13df   : > { %11325 = vmatprep.subr.msk.bf16.mxu0 %vm12333_vm6, %v11323_v63 }
0x13e0   : > { %11328 = vmatpush3.bf16.xpose.msk.msra.mxu0 %vm12333_vm6, %v11323_v63 }
0x1493   : > { %v4191_v1 = vpop.f32.mrb[28].mxu1 }
0x1494   : > { %v12715_v3 = vadd.f32 %v10031_v0, %v4191_v1  ;;  %v10978_v4 = vpop.f32.mrb[29].mxu1 }
0x1495   : > { %v4194_v5 = vpop.f32.mrb[30].mxu1 }
0x1496   : > { %v12717_v6 = vadd.f32 %v10031_v0, %v4194_v5  ;;  %4531 = vrot.lane.b32.xlu1 %v12715_v3, %s12046_s13  ;;  %v10979_v7 = vpop.f32.mrb[31].mxu1  ;;  %10984 = vmatprep.mubr.msk.f32.mxu1 %vm1185_vm5, %v12715_v3 }
0x1498   : > { %4533 = vrot.lane.b32.xlu0 %v12717_v6, %s12046_s13  ;;  %10985 = vmatmul.mubr.msk.f32.vlgmr.msra.gmra.mrb[26].mxu1 %vm1185_vm5, %v12717_v6 }
0x1508   : > { %v4532_v8 = vpop.permute.xlu1 %4531 }
0x1509   : > { %10998 = vmatprep.mubr.msk.f32.mxu0 %vm1185_vm5, %v4532_v8 }
0x150a   : > { %v4534_v9 = vpop.permute.xlu0 %4533 }
0x150b   : > { %10999 = vmatmul.mubr.msk.f32.vlgmr.msra.gmra.mrb[22].mxu0 %vm1185_vm5, %v4534_v9 }
0x156b   : > { %v10986_v10 = vpop.f32.mrb[26].mxu1 }
0x156c   : > { %v4417_v13 = vmul.f32 0.35355338, %v10986_v10  ;;  %v4407_v14 = vpop.f32.mrb[27].mxu1 }
0x156d   : > { %v4416_v18 = vmul.f32 0.35355338, %v4407_v14 }
0x156e   : > { %v4419_v19 = vadd.f32 %v4417_v13, %v12732_v11 }
0x156f   : > { %v4418_v20 = vadd.f32 %v4416_v18, %v12737_v15 }
0x1570   : > { %v4425_v21 = vsel %vm4424_vm14, %v4419_v19, -inf }
0x1571   : > { %4426 = vmax.xlane.f32.xlu1 %v4425_v21  ;;  %v4421_v22 = vsel %vm4420_vm15, %v4418_v20, -inf }
0x1572   : > { %4422 = vmax.xlane.f32.xlu0 %v4421_v22 }
0x1582   : > { %11600 = vrot.lane.b32.xlu1 %v12694_v16, %s12043_s30  ;;  %s13451_s30 = smov 88  }
0x15de   : > { %v11000_v23 = vpop.f32.mrb[22].mxu0 }
0x15df   : > { %v4613_v32 = vpop.f32.mrb[23].mxu0  ;;  %v4623_v24 = vmul.f32 0.35355338, %v11000_v23 }
0x15e0   : > { %v4622_v27 = vmul.f32 0.35355338, %v4613_v32 }
0x15e1   : > { %v4625_v30 = vadd.f32 %v4623_v24, %v12732_v11 }
0x15e2   : > { %v4624_v35 = vadd.f32 %v4622_v27, %v12737_v15 }
0x15e3   : > { %v4629_v31 = vsel %vm4424_vm14, %v4625_v30, -inf }
0x15e4   : > { %v4626_v29 = vsel %vm4420_vm15, %v4624_v35, -inf }
0x15e5   : > { %4627 = vmax.xlane.f32.xlu0 %v4626_v29 }
0x15e9   : > { %4630 = vmax.xlane.f32.xlu0 %v4629_v31 }
0x15fe   : > { %v4427_v33 = vpop.xlane.xlu1 %4426 }
0x15ff   : > { %v4429_v34 = vsub.f32 %v4419_v19, %v4427_v33  ;;  %v4423_v36 = vpop.xlane.xlu0 %4422 }
0x1600   : > { %v4428_v37 = vsub.f32 %v4418_v20, %v4423_v36  ;;  %v4318_v36 = vld [vmem:[%s12242_s26 + $0x8] sm:$0xff] }
0x1601   : > { %v4432_v38 = vmul.f32 1.442695, %v4429_v34  ;;  %11008 = vmatprep.subr.mxu0 %v4318_v36 }
0x1602   : > { %v4430_v48 = vmul.f32 1.442695, %v4428_v37  ;;  %v11601_v40 = vpop.permute.xlu1 %11600  ;;  %11009 = vmatpush3.msra.mxu0 %v4318_v36  ;;  %v4317_v37 = vld [vmem:[%s12242_s26] sm:$0xff] }
0x1603   : > { %11931 = vpow2.f32 %v4432_v38  ;;  %v11603_v42 = vunpack.i.h.bf16 %v11601_v40  ;;  %v11602_v43 = vunpack.i.l.bf16 %v11601_v40  ;;  %11013 = vmatprep.subr.mxu0 %v4317_v37 }
0x1604   : > { %11933 = vpow2.f32 %v4430_v48 }
0x1605   : > { %v11319_v51 = vpack.c.bf16 %v11603_v42, %v11602_v43 }
0x1607   : > { %11320 = vmatprep.subr.bf16.mxu1 %v11319_v51 }
0x1608   : > { %11322 = vmatpush3.bf16.msra.mxu1 %v11319_v51 }
0x160d   : > { %v11932_v46 = vpop.eup %11931 }
0x160e   : > { %v11934_v2 = vpop.eup %11933  ;;  %v4437_v47 = vsel %vm4424_vm14, %v11932_v46, 0.0 }
0x160f   : > { %4438 = vadd.xlane.f32.xlu0 %v4437_v47  ;;  %v4434_v49 = vsel %vm4420_vm15, %v11934_v2, 0.0 }
0x1610   : > { %4435 = vadd.xlane.f32.xlu1 %v4434_v49 }
0x1621   : > { %11610 = vrot.lane.b32.xlu1 %v12694_v16, %s12051_s1 }
0x1672   : > { %v4628_v50 = vpop.xlane.xlu0 %4627 }
0x1673   : > { %v4632_v52 = vsub.f32 %v4624_v35, %v4628_v50 }
0x1675   : > { %v4634_v53 = vmul.f32 1.442695, %v4632_v52 }
0x1676   : > { %v4631_v54 = vpop.xlane.xlu0 %4630 }
0x1677   : > { %11935 = vpow2.f32 %v4634_v53  ;;  %v4633_v55 = vsub.f32 %v4625_v30, %v4631_v54 }
0x1679   : > { %v4636_v56 = vmul.f32 1.442695, %v4633_v55 }
0x167b   : > { %11937 = vpow2.f32 %v4636_v56 }
0x1681   : > { %v11936_v57 = vpop.eup %11935 }
0x1682   : > { %v4638_v58 = vsel %vm4420_vm15, %v11936_v57, 0.0 }
0x1683   : > { %4639 = vadd.xlane.f32.xlu1 %v4638_v58 }
0x1685   : > { %v11938_v59 = vpop.eup %11937 }
0x1686   : > { %v4641_v17 = vsel %vm4424_vm14, %v11938_v59, 0.0 }
0x1687   : > { %4642 = vadd.xlane.f32.xlu0 %v4641_v17 }
0x1694   : > { %4897 = vrot.lane.b32.xlu1 %v12715_v3, %s12051_s1 }
0x1698   : > { %11615 = vrot.lane.b32.xlu1 %v12694_v16, %s12049_s3 }
0x169c   : > { %5186 = vrot.lane.b32.xlu1 %v12717_v6, %s12049_s3  ;;  %v4439_v41 = vpop.xlane.xlu0 %4438 }
0x169d   : > { %11939 = vrcp.f32 %v4439_v41  ;;  %v4436_v62 = vpop.xlane.xlu1 %4435  ;;  %11605 = vrot.lane.b32.xlu0 %v12694_v16, %s12045_s10  ;;  %s13453_s10 = smov 80  }
0x169e   : > { %11941 = vrcp.f32 %v4436_v62 }
0x16a1   : > { %4899 = vrot.lane.b32.xlu0 %v12717_v6, %s12051_s1  ;;  %v11611_v5 = vpop.permute.xlu1 %11610 }
0x16a2   : > { %v11613_v10 = vunpack.i.h.bf16 %v11611_v5  ;;  %v11612_v13 = vunpack.i.l.bf16 %v11611_v5 }
0x16a4   : > { %v11333_v23 = vpack.c.bf16 %v11613_v10, %v11612_v13 }
0x16a5   : > { %5184 = vrot.lane.b32.xlu0 %v12715_v3, %s12049_s3 }
0x16a7   : > { %v11940_v63 = vpop.eup %11939 }
0x16a8   : > { %v11942_v0 = vpop.eup %11941  ;;  %v4443_v4 = vmul.f32 %v11940_v63, %v11932_v46 }
0x16a9   : > { %v4441_v1 = vmul.f32 %v11942_v0, %v11934_v2 }
0x16ab   : > { %10991 = vmatprep.mubr.msk.f32.mxu1 %vm4420_vm15, %v4441_v1 }
0x16ac   : > { %10992 = vmatmul.mubr.msk.f32.vlgmr.msra.gmra.mrb[32].mxu1 %vm4420_vm15, %v4443_v4 }
0x1710   : > { %v4640_v7 = vpop.xlane.xlu1 %4639 }
0x1711   : > { %11943 = vrcp.f32 %v4640_v7 }
0x1714   : > { %v4643_v8 = vpop.xlane.xlu0 %4642  ;;  %v4898_v14 = vpop.permute.xlu1 %4897 }
0x1715   : > { %11945 = vrcp.f32 %v4643_v8 }
0x1718   : > { %v11606_v9 = vpop.permute.xlu0 %11605  ;;  %v11616_v24 = vpop.permute.xlu1 %11615 }
0x1719   : > { %v11608_v18 = vunpack.i.h.bf16 %v11606_v9  ;;  %v11607_v19 = vunpack.i.l.bf16 %v11606_v9  ;;  %v11618_v35 = vunpack.i.h.bf16 %v11616_v24  ;;  %v11617_v29 = vunpack.i.l.bf16 %v11616_v24 }
0x171b   : > { %v11944_v20 = vpop.eup %11943  ;;  %v11329_v21 = vpack.c.bf16 %v11608_v18, %v11607_v19  ;;  %v11343_v30 = vpack.c.bf16 %v11618_v35, %v11617_v29 }
0x171c   : > { %v4645_v22 = vmul.f32 %v11944_v20, %v11936_v57  ;;  %v4900_v31 = vpop.permute.xlu0 %4899  ;;  %v5187_v34 = vpop.permute.xlu1 %5186 }
0x171d   : > { %11330 = vmatprep.subr.bf16.mxu1 %v11329_v21 }
0x171e   : > { %11332 = vmatpush3.bf16.msra.mxu1 %v11329_v21  ;;  %11005 = vmatprep.mubr.msk.f32.mxu1 %vm4420_vm15, %v4645_v22 }
0x171f   : > { %v11946_v32 = vpop.eup %11945  ;;  %11335 = vmatprep.subr.msk.bf16.mxu1 %vm12333_vm6, %v11333_v23 }
0x1720   : > { %v4647_v27 = vmul.f32 %v11946_v32, %v11938_v59  ;;  %v5185_v33 = vpop.permute.xlu0 %5184 }
0x1722   : > { %11006 = vmatmul.mubr.msk.f32.vlgmr.msra.gmra.mrb[34].mxu1 %vm4420_vm15, %v4647_v27 }
0x1723   : > { %11022 = vmatprep.mubr.msk.f32.mxu1 %vm1185_vm5, %v4898_v14  ;;  %v4319_v14 = vld [vmem:[%s12242_s26 + $0x10] sm:$0xff] }
0x1727   : > { %11338 = vmatpush3.bf16.xpose.msk.msra.mxu1 %vm12333_vm6, %v11333_v23 }
0x1728   : > { %11345 = vmatprep.subr.msk.bf16.mxu1 %vm12333_vm6, %v11343_v30 }
0x172e   : > { %11023 = vmatmul.mubr.msk.f32.vlgmr.msra.gmra.mrb[36].mxu1 %vm1185_vm5, %v4900_v31 }
0x172f   : > { %11348 = vmatpush3.bf16.xpose.msk.msra.mxu1 %vm12333_vm6, %v11343_v30  ;;  %11041 = vmatprep.mubr.msk.f32.mxu1 %vm1185_vm5, %v5185_v33 }
0x1736   : > { %11042 = vmatmul.mubr.msk.f32.vlgmr.msra.gmra.mrb[38].mxu1 %vm1185_vm5, %v5187_v34 }
0x177f   : > { %v10993_v38 = vpop.f32.mrb[32].mxu1 }
0x1780   : > { %v4522_v48 = vpop.f32.mrb[33].mxu1 }
0x17f5   : > { %v11007_v40 = vpop.f32.mrb[34].mxu1 }
0x17f6   : > { %v4726_v42 = vpop.f32.mrb[35].mxu1 }
0x17f7   : > { %11010 = vmatprep.mubr.msk.f32.mxu0 %vm1185_vm5, %v4726_v42 }
0x17f8   : > { %11011 = vmatmul.mubr.msk.f32.vlgmr.msra.gmra.mrb[28].mxu0 %vm1185_vm5, %v11007_v40 }
0x17f9   : > { %11015 = vmatprep.mubr.msk.f32.mxu0 %vm1185_vm5, %v4522_v48  ;;  %11014 = vmatpush3.msra.mxu0 %v4317_v37 }
0x1800   : > { %11016 = vmatmul.mubr.msk.f32.vlgmr.msra.gmra.mrb[28].mxu0 %vm1185_vm5, %v10993_v38 }
0x1801   : > { %v11024_v43 = vpop.f32.mrb[36].mxu1 }
0x1802   : > { %v4989_v51 = vmul.f32 0.35355338, %v11024_v43  ;;  %v4979_v46 = vpop.f32.mrb[37].mxu1 }
0x1803   : > { %v4988_v2 = vmul.f32 0.35355338, %v4979_v46 }
0x1804   : > { %v4991_v47 = vadd.f32 %v4989_v51, %v12732_v11 }
0x1805   : > { %v4990_v49 = vadd.f32 %v4988_v2, %v12737_v15 }
0x1806   : > { %v4995_v50 = vsel %vm4424_vm14, %v4991_v47, -inf }
0x1807   : > { %4996 = vmax.xlane.f32.xlu1 %v4995_v50  ;;  %v4992_v52 = vsel %vm4420_vm15, %v4990_v49, -inf }
0x1808   : > { %4993 = vmax.xlane.f32.xlu0 %v4992_v52 }
0x1809   : > { %v11043_v53 = vpop.f32.mrb[38].mxu1 }
0x180a   : > { %v5266_v54 = vpop.f32.mrb[39].mxu1  ;;  %v5276_v55 = vmul.f32 0.35355338, %v11043_v53 }
0x180b   : > { %v5275_v18 = vmul.f32 0.35355338, %v5266_v54 }
0x180c   : > { %v12800_v56 = vadd.f32 %v5276_v55, %v12732_v11 }
0x180d   : > { %v5277_v19 = vadd.f32 %v5275_v18, %v12737_v15  ;;  %v4320_v18 = vld [vmem:[%s12242_s26 + $0x18] sm:$0xff] }
0x180e   : > { %v5282_v57 = vsel %vm4424_vm14, %v12800_v56, -inf }
0x180f   : > { %v5279_v20 = vsel %vm4420_vm15, %v5277_v19, -inf }
0x1818   : > { %11620 = vrot.lane.b32.xlu1 %v12694_v16, %s12048_s2  ;;  %s13454_s2 = smov 8  }
0x181c   : > { %5471 = vrot.lane.b32.xlu1 %v12715_v3, %s12044_s6 }
0x1820   : > { %5473 = vrot.lane.b32.xlu1 %v12717_v6, %s12044_s6 }
0x1844   : > { %5283 = vmax.xlane.f32.xlu1 %v5282_v57 }
0x1855   : > { %11630 = vrot.lane.b32.xlu1 %v12694_v16, %s12052_s29  ;;  %s13455_s29 = smov 72  }
0x1859   : > { %5758 = vrot.lane.b32.xlu1 %v12715_v3, %s13451_s30 }
0x185d   : > { %5760 = vrot.lane.b32.xlu1 %v12717_v6, %s13451_s30 }
0x1894   : > { %v4997_v58 = vpop.xlane.xlu1 %4996 }
0x1895   : > { %v4999_v59 = vsub.f32 %v4991_v47, %v4997_v58  ;;  %v4994_v17 = vpop.xlane.xlu0 %4993 }
0x1896   : > { %v4998_v41 = vsub.f32 %v4990_v49, %v4994_v17 }
0x1897   : > { %v5002_v62 = vmul.f32 1.442695, %v4999_v59 }
0x1898   : > { %v5000_v63 = vmul.f32 1.442695, %v4998_v41  ;;  %v11621_v0 = vpop.permute.xlu1 %11620 }
0x1899   : > { %v11623_v1 = vunpack.i.h.bf16 %v11621_v0  ;;  %v11622_v4 = vunpack.i.l.bf16 %v11621_v0 }
0x189a   : > { %11947 = vpow2.f32 %v5000_v63 }
0x189b   : > { %v11339_v5 = vpack.c.bf16 %v11623_v1, %v11622_v4  ;;  %11949 = vpow2.f32 %v5002_v62 }
0x189c   : > { %v5472_v7 = vpop.permute.xlu1 %5471 }
0x189d   : > { %11340 = vmatprep.subr.bf16.mxu0 %v11339_v5  ;;  %11060 = vmatprep.mubr.msk.f32.mxu1 %vm1185_vm5, %v5472_v7 }
0x189e   : > { %11342 = vmatpush3.bf16.msra.mxu0 %v11339_v5 }
0x189f   : > { %11032 = vmatprep.subr.mxu0 %v4319_v14 }
0x18a0   : > { %v5474_v22 = vpop.permute.xlu1 %5473 }
0x18a4   : > { %v11948_v8 = vpop.eup %11947 }
0x18a5   : > { %v5004_v9 = vsel %vm4420_vm15, %v11948_v8, 0.0  ;;  %v11950_v10 = vpop.eup %11949 }
0x18a6   : > { %5005 = vadd.xlane.f32.xlu0 %v5004_v9  ;;  %v5007_v13 = vsel %vm4424_vm14, %v11950_v10, 0.0 }
0x18aa   : > { %5008 = vadd.xlane.f32.xlu0 %v5007_v13 }
0x18c0   : > { %11625 = vrot.lane.b32.xlu0 %v12694_v16, %s12044_s6  ;;  %s13452_s6 = smov 16  }
0x18d1   : > { %v5284_v32 = vpop.xlane.xlu1 %5283 }
0x18d2   : > { %v5286_v42 = vsub.f32 %v12800_v56, %v5284_v32 }
0x18d4   : > { %v5289_v46 = vmul.f32 1.442695, %v5286_v42 }
0x18d5   : > { %v11631_v30 = vpop.permute.xlu1 %11630 }
0x18d6   : > { %v11633_v34 = vunpack.i.h.bf16 %v11631_v30  ;;  %v11632_v36 = vunpack.i.l.bf16 %v11631_v30 }
0x18d8   : > { %v11349_v48 = vpack.c.bf16 %v11633_v34, %v11632_v36 }
0x18d9   : > { %v5759_v40 = vpop.permute.xlu1 %5758 }
0x18df   : > { %5280 = vmax.xlane.f32.xlu0 %v5279_v20 }
0x1933   : > { %v5006_v21 = vpop.xlane.xlu0 %5005 }
0x1934   : > { %11951 = vrcp.f32 %v5006_v21 }
0x1937   : > { %v5009_v23 = vpop.xlane.xlu0 %5008 }
0x1938   : > { %11953 = vrcp.f32 %v5009_v23 }
0x193b   : > { %v11626_v24 = vpop.permute.xlu0 %11625 }
0x193c   : > { %v11628_v27 = vunpack.i.h.bf16 %v11626_v24  ;;  %v11627_v35 = vunpack.i.l.bf16 %v11626_v24 }
0x193e   : > { %v11952_v29 = vpop.eup %11951  ;;  %v11353_v31 = vpack.c.bf16 %v11628_v27, %v11627_v35 }
0x193f   : > { %v5011_v33 = vmul.f32 %v11952_v29, %v11948_v8  ;;  %v5761_v8 = vpop.permute.xlu1 %5760 }
0x1940   : > { %11355 = vmatprep.subr.msk.bf16.mxu1 %vm12333_vm6, %v11353_v31 }
0x1941   : > { %11029 = vmatprep.mubr.msk.f32.mxu0 %vm4420_vm15, %v5011_v33  ;;  %11358 = vmatpush3.bf16.xpose.msk.msra.mxu1 %vm12333_vm6, %v11353_v31 }
0x1942   : > { %v11954_v37 = vpop.eup %11953 }
0x1943   : > { %v5013_v38 = vmul.f32 %v11954_v37, %v11950_v10 }
0x1945   : > { %11030 = vmatmul.mubr.msk.f32.vlgmr.msra.gmra.mrb[30].mxu0 %vm4420_vm15, %v5013_v38 }
0x1946   : > { %11033 = vmatpush3.msra.mxu0 %v4319_v14 }
0x1947   : > { %11350 = vmatprep.subr.bf16.mxu0 %v11349_v48 }
0x1948   : > { %11061 = vmatmul.mubr.msk.f32.vlgmr.msra.gmra.mrb[40].mxu1 %vm1185_vm5, %v5474_v22 }
0x1949   : > { %11079 = vmatprep.mubr.msk.f32.mxu1 %vm1185_vm5, %v5759_v40 }
0x196c   : > { %v5281_v43 = vpop.xlane.xlu0 %5280 }
0x196d   : > { %v5285_v51 = vsub.f32 %v5277_v19, %v5281_v43 }
0x196f   : > { %v5287_v2 = vmul.f32 1.442695, %v5285_v51 }
0x1971   : > { %11955 = vpow2.f32 %v5287_v2 }
0x1972   : > { %11957 = vpow2.f32 %v5289_v46 }
0x197b   : > { %v11956_v47 = vpop.eup %11955 }
0x197c   : > { %v5291_v49 = vsel %vm4420_vm15, %v11956_v47, 0.0  ;;  %v11958_v50 = vpop.eup %11957 }
0x197d   : > { %5292 = vadd.xlane.f32.xlu0 %v5291_v49  ;;  %v5294_v52 = vsel %vm4424_vm14, %v11958_v50, 0.0  ;;  %v4321_v49 = vld [vmem:[%s12242_s26 + $0x20] sm:$0xff] }
0x1981   : > { %5295 = vadd.xlane.f32.xlu0 %v5294_v52 }
0x1997   : > { %11635 = vrot.lane.b32.xlu0 %v12694_v16, %s13451_s30 }
0x1a0a   : > { %v5293_v53 = vpop.xlane.xlu0 %5292 }
0x1a0b   : > { %11959 = vrcp.f32 %v5293_v53 }
0x1a0e   : > { %v5296_v54 = vpop.xlane.xlu0 %5295 }
0x1a0f   : > { %11961 = vrcp.f32 %v5296_v54 }
0x1a12   : > { %v11636_v55 = vpop.permute.xlu0 %11635 }
0x1a13   : > { %v11638_v56 = vunpack.i.h.bf16 %v11636_v55  ;;  %v11637_v57 = vunpack.i.l.bf16 %v11636_v55 }
0x1a15   : > { %v11363_v58 = vpack.c.bf16 %v11638_v56, %v11637_v57  ;;  %v11960_v59 = vpop.eup %11959 }
0x1a16   : > { %v5298_v63 = vmul.f32 %v11960_v59, %v11956_v47 }
0x1a17   : > { %11365 = vmatprep.subr.msk.bf16.mxu1 %vm12333_vm6, %v11363_v58 }
0x1a18   : > { %v11031_v17 = vpop.f32.mrb[30].mxu0  ;;  %11368 = vmatpush3.bf16.xpose.msk.msra.mxu1 %vm12333_vm6, %v11363_v58 }
0x1a19   : > { %v5092_v41 = vpop.f32.mrb[31].mxu0  ;;  %v11962_v62 = vpop.eup %11961 }
0x1a1a   : > { %11034 = vmatprep.mubr.msk.f32.mxu0 %vm1185_vm5, %v5092_v41  ;;  %v5300_v5 = vmul.f32 %v11962_v62, %v11958_v50 }
0x1a1b   : > { %11035 = vmatmul.mubr.msk.f32.vlgmr.msra.gmra.mrb[28].mxu0 %vm1185_vm5, %v11031_v17  ;;  %v11062_v0 = vpop.f32.mrb[40].mxu1 }
0x1a1c   : > { %11352 = vmatpush3.bf16.msra.mxu0 %v11349_v48  ;;  %v5563_v1 = vmul.f32 0.35355338, %v11062_v0  ;;  %11048 = vmatprep.mubr.msk.f32.mxu0 %vm4420_vm15, %v5298_v63  ;;  %v5553_v4 = vpop.f32.mrb[41].mxu1 }
0x1a1d   : > { %v5562_v7 = vmul.f32 0.35355338, %v5553_v4  ;;  %11051 = vmatprep.subr.mxu0 %v4320_v18 }
0x1a1e   : > { %v5565_v9 = vadd.f32 %v5563_v1, %v12732_v11 }
0x1a1f   : > { %v5564_v10 = vadd.f32 %v5562_v7, %v12737_v15  ;;  %11049 = vmatmul.mubr.msk.f32.vlgmr.msra.gmra.mrb[32].mxu0 %vm4420_vm15, %v5300_v5  ;;  %11080 = vmatmul.mubr.msk.f32.vlgmr.msra.gmra.mrb[42].mxu1 %vm1185_vm5, %v5761_v8 }
0x1a20   : > { %v5569_v13 = vsel %vm4424_vm14, %v5565_v9, -inf  ;;  %11052 = vmatpush3.msra.mxu0 %v4320_v18 }
0x1a21   : > { %5570 = vmax.xlane.f32.xlu1 %v5569_v13  ;;  %v5566_v14 = vsel %vm4420_vm15, %v5564_v10, -inf }
0x1a22   : > { %5567 = vmax.xlane.f32.xlu0 %v5566_v14 }
0x1a32   : > { %11640 = vrot.lane.b32.xlu1 %v12694_v16, %s13452_s6 }
0x1a36   : > { %6045 = vrot.lane.b32.xlu1 %v12715_v3, %s13453_s10 }
0x1a3a   : > { %6047 = vrot.lane.b32.xlu1 %v12717_v6, %s13453_s10 }
0x1aae   : > { %v5571_v19 = vpop.xlane.xlu1 %5570 }
0x1aaf   : > { %v5573_v20 = vsub.f32 %v5565_v9, %v5571_v19  ;;  %v5568_v21 = vpop.xlane.xlu0 %5567 }
0x1ab0   : > { %v5572_v22 = vsub.f32 %v5564_v10, %v5568_v21 }
0x1ab1   : > { %v5576_v23 = vmul.f32 1.442695, %v5573_v20 }
0x1ab2   : > { %v5574_v32 = vmul.f32 1.442695, %v5572_v22  ;;  %v11641_v24 = vpop.permute.xlu1 %11640 }
0x1ab3   : > { %v11643_v27 = vunpack.i.h.bf16 %v11641_v24  ;;  %v11642_v35 = vunpack.i.l.bf16 %v11641_v24 }
0x1ab4   : > { %11963 = vpow2.f32 %v5574_v32 }
0x1ab5   : > { %v11359_v29 = vpack.c.bf16 %v11643_v27, %v11642_v35  ;;  %11965 = vpow2.f32 %v5576_v23 }
0x1ab6   : > { %v6046_v30 = vpop.permute.xlu1 %6045 }
0x1ab7   : > { %11360 = vmatprep.subr.bf16.mxu0 %v11359_v29  ;;  %11098 = vmatprep.mubr.msk.f32.mxu1 %vm1185_vm5, %v6046_v30 }
0x1aba   : > { %v6048_v41 = vpop.permute.xlu1 %6047 }
0x1abe   : > { %v11964_v31 = vpop.eup %11963 }
0x1abf   : > { %v5578_v33 = vsel %vm4420_vm15, %v11964_v31, 0.0  ;;  %v11966_v34 = vpop.eup %11965 }
0x1ac0   : > { %5579 = vadd.xlane.f32.xlu0 %v5578_v33  ;;  %v5581_v36 = vsel %vm4424_vm14, %v11966_v34, 0.0 }
0x1ac4   : > { %5582 = vadd.xlane.f32.xlu0 %v5581_v36 }
0x1ada   : > { %11645 = vrot.lane.b32.xlu0 %v12694_v16, %s13453_s10 }
0x1af2   : > { %v11050_v37 = vpop.f32.mrb[32].mxu0  ;;  %v11081_v38 = vpop.f32.mrb[42].mxu1 }
0x1af3   : > { %v5850_v48 = vmul.f32 0.35355338, %v11081_v38  ;;  %v5379_v40 = vpop.f32.mrb[33].mxu0  ;;  %v5840_v42 = vpop.f32.mrb[43].mxu1 }
0x1af4   : > { %v5849_v43 = vmul.f32 0.35355338, %v5840_v42  ;;  %11053 = vmatprep.mubr.msk.f32.mxu0 %vm1185_vm5, %v5379_v40 }
0x1af5   : > { %v5852_v51 = vadd.f32 %v5850_v48, %v12732_v11  ;;  %11054 = vmatmul.mubr.msk.f32.vlgmr.msra.gmra.mrb[28].mxu0 %vm1185_vm5, %v11050_v37 }
0x1af6   : > { %v5851_v46 = vadd.f32 %v5849_v43, %v12737_v15  ;;  %11362 = vmatpush3.bf16.msra.mxu0 %v11359_v29 }
0x1af7   : > { %v5856_v2 = vsel %vm4424_vm14, %v5852_v51, -inf  ;;  %11070 = vmatprep.subr.mxu0 %v4321_v49 }
0x1af8   : > { %5857 = vmax.xlane.f32.xlu1 %v5856_v2  ;;  %v5853_v47 = vsel %vm4420_vm15, %v5851_v46, -inf }
0x1af9   : > { %5854 = vmax.xlane.f32.xlu0 %v5853_v47 }
0x1b09   : > { %11650 = vrot.lane.b32.xlu1 %v12694_v16, %s13454_s2 }
0x1b0d   : > { %6326 = vrot.lane.b32.xlu1 %v12715_v3, %s13455_s29 }
0x1b11   : > { %6328 = vrot.lane.b32.xlu1 %v12717_v6, %s13455_s29 }
0x1b4d   : > { %v5580_v50 = vpop.xlane.xlu0 %5579 }
0x1b4e   : > { %11967 = vrcp.f32 %v5580_v50 }
0x1b51   : > { %v5583_v52 = vpop.xlane.xlu0 %5582 }
0x1b52   : > { %11969 = vrcp.f32 %v5583_v52 }
0x1b55   : > { %v11646_v53 = vpop.permute.xlu0 %11645 }
0x1b56   : > { %v11648_v54 = vunpack.i.h.bf16 %v11646_v53  ;;  %v11647_v55 = vunpack.i.l.bf16 %v11646_v53 }
0x1b58   : > { %v11968_v56 = vpop.eup %11967  ;;  %v11373_v57 = vpack.c.bf16 %v11648_v54, %v11647_v55 }
0x1b59   : > { %v5585_v58 = vmul.f32 %v11968_v56, %v11964_v31 }
0x1b5a   : > { %11375 = vmatprep.subr.msk.bf16.mxu1 %vm12333_vm6, %v11373_v57 }
0x1b5b   : > { %11067 = vmatprep.mubr.msk.f32.mxu0 %vm4420_vm15, %v5585_v58  ;;  %11378 = vmatpush3.bf16.xpose.msk.msra.mxu1 %vm12333_vm6, %v11373_v57 }
0x1b5c   : > { %v11970_v59 = vpop.eup %11969 }
0x1b5d   : > { %v5587_v17 = vmul.f32 %v11970_v59, %v11966_v34  ;;  %v4322_v34 = vld [vmem:[%s12242_s26 + $0x28] sm:$0xff] }
0x1b5f   : > { %11068 = vmatmul.mubr.msk.f32.vlgmr.msra.gmra.mrb[34].mxu0 %vm4420_vm15, %v5587_v17 }
0x1b60   : > { %11071 = vmatpush3.msra.mxu0 %v4321_v49 }
0x1b62   : > { %11099 = vmatmul.mubr.msk.f32.vlgmr.msra.gmra.mrb[44].mxu1 %vm1185_vm5, %v6048_v41 }
0x1b85   : > { %v5858_v62 = vpop.xlane.xlu1 %5857 }
0x1b86   : > { %v5860_v63 = vsub.f32 %v5852_v51, %v5858_v62  ;;  %v5855_v0 = vpop.xlane.xlu0 %5854 }
0x1b87   : > { %v5859_v1 = vsub.f32 %v5851_v46, %v5855_v0 }
0x1b88   : > { %v5863_v4 = vmul.f32 1.442695, %v5860_v63 }
0x1b89   : > { %v5861_v5 = vmul.f32 1.442695, %v5859_v1  ;;  %v11651_v7 = vpop.permute.xlu1 %11650 }
0x1b8a   : > { %v11653_v8 = vunpack.i.h.bf16 %v11651_v7  ;;  %v11652_v9 = vunpack.i.l.bf16 %v11651_v7 }
0x1b8b   : > { %11971 = vpow2.f32 %v5861_v5 }
0x1b8c   : > { %v11369_v10 = vpack.c.bf16 %v11653_v8, %v11652_v9  ;;  %11973 = vpow2.f32 %v5863_v4 }
0x1b8d   : > { %v6327_v13 = vpop.permute.xlu1 %6326 }
0x1b8e   : > { %11370 = vmatprep.subr.bf16.mxu0 %v11369_v10  ;;  %11117 = vmatprep.mubr.msk.f32.mxu1 %vm1185_vm5, %v6327_v13 }
0x1b91   : > { %v6329_v42 = vpop.permute.xlu1 %6328 }
0x1b95   : > { %v11972_v14 = vpop.eup %11971 }
0x1b96   : > { %v5865_v18 = vsel %vm4420_vm15, %v11972_v14, 0.0  ;;  %v11974_v19 = vpop.eup %11973 }
0x1b97   : > { %5866 = vadd.xlane.f32.xlu0 %v5865_v18  ;;  %v5868_v20 = vsel %vm4424_vm14, %v11974_v19, 0.0 }
0x1b9b   : > { %5869 = vadd.xlane.f32.xlu0 %v5868_v20 }
0x1bb1   : > { %11655 = vrot.lane.b32.xlu0 %v12694_v16, %s13455_s29 }
0x1c24   : > { %v5867_v21 = vpop.xlane.xlu0 %5866 }
0x1c25   : > { %11975 = vrcp.f32 %v5867_v21 }
0x1c28   : > { %v5870_v22 = vpop.xlane.xlu0 %5869 }
0x1c29   : > { %11977 = vrcp.f32 %v5870_v22 }
0x1c2c   : > { %v11656_v23 = vpop.permute.xlu0 %11655 }
0x1c2d   : > { %v11658_v32 = vunpack.i.h.bf16 %v11656_v23  ;;  %v11657_v24 = vunpack.i.l.bf16 %v11656_v23 }
0x1c2f   : > { %v11383_v27 = vpack.c.bf16 %v11658_v32, %v11657_v24  ;;  %v11976_v35 = vpop.eup %11975 }
0x1c30   : > { %v5872_v33 = vmul.f32 %v11976_v35, %v11972_v14 }
0x1c31   : > { %11385 = vmatprep.subr.msk.bf16.mxu1 %vm12333_vm6, %v11383_v27 }
0x1c32   : > { %v11069_v29 = vpop.f32.mrb[34].mxu0  ;;  %11388 = vmatpush3.bf16.xpose.msk.msra.mxu1 %vm12333_vm6, %v11383_v27 }
0x1c33   : > { %v5666_v30 = vpop.f32.mrb[35].mxu0  ;;  %v11978_v31 = vpop.eup %11977 }
0x1c34   : > { %11072 = vmatprep.mubr.msk.f32.mxu0 %vm1185_vm5, %v5666_v30  ;;  %v5874_v48 = vmul.f32 %v11978_v31, %v11974_v19 }
0x1c35   : > { %11073 = vmatmul.mubr.msk.f32.vlgmr.msra.gmra.mrb[28].mxu0 %vm1185_vm5, %v11069_v29  ;;  %v11100_v36 = vpop.f32.mrb[44].mxu1 }
0x1c36   : > { %11372 = vmatpush3.bf16.msra.mxu0 %v11369_v10  ;;  %v6137_v37 = vmul.f32 0.35355338, %v11100_v36  ;;  %11086 = vmatprep.mubr.msk.f32.mxu0 %vm4420_vm15, %v5872_v33  ;;  %v6127_v38 = vpop.f32.mrb[45].mxu1 }
0x1c37   : > { %v6136_v40 = vmul.f32 0.35355338, %v6127_v38  ;;  %11089 = vmatprep.subr.mxu0 %v4322_v34 }
0x1c38   : > { %v6139_v43 = vadd.f32 %v6137_v37, %v12732_v11  ;;  %v4323_v37 = vld [vmem:[%s12242_s26 + $0x30] sm:$0xff] }
0x1c39   : > { %v6138_v51 = vadd.f32 %v6136_v40, %v12737_v15  ;;  %11087 = vmatmul.mubr.msk.f32.vlgmr.msra.gmra.mrb[36].mxu0 %vm4420_vm15, %v5874_v48  ;;  %11118 = vmatmul.mubr.msk.f32.vlgmr.msra.gmra.mrb[46].mxu1 %vm1185_vm5, %v6329_v42 }
0x1c3a   : > { %11090 = vmatpush3.msra.mxu0 %v4322_v34  ;;  %v6143_v46 = vsel %vm4424_vm14, %v6139_v43, -inf }
0x1c3b   : > { %11380 = vmatprep.subr.bf16.mxu0 %v12702_v60  ;;  %6144 = vmax.xlane.f32.xlu1 %v6143_v46  ;;  %v6140_v2 = vsel %vm4420_vm15, %v6138_v51, -inf }
0x1c3c   : > { %6141 = vmax.xlane.f32.xlu0 %v6140_v2 }
0x1c4c   : > { %11660 = vrot.lane.b32.xlu1 %v12694_v16, %s13456_s24 }
0x1c50   : > { %6617 = vrot.lane.b32.xlu1 %v12717_v6, %s13456_s24 }
0x1cc8   : > { %v6145_v47 = vpop.xlane.xlu1 %6144 }
0x1cc9   : > { %v6147_v49 = vsub.f32 %v6139_v43, %v6145_v47  ;;  %v6142_v50 = vpop.xlane.xlu0 %6141 }
0x1cca   : > { %v6146_v52 = vsub.f32 %v6138_v51, %v6142_v50 }
0x1ccb   : > { %v6150_v53 = vmul.f32 1.442695, %v6147_v49 }
0x1ccc   : > { %v6148_v54 = vmul.f32 1.442695, %v6146_v52  ;;  %v11661_v55 = vpop.permute.xlu1 %11660 }
0x1ccd   : > { %v11663_v56 = vunpack.i.h.bf16 %v11661_v55  ;;  %v11662_v57 = vunpack.i.l.bf16 %v11661_v55 }
0x1cce   : > { %11979 = vpow2.f32 %v6148_v54 }
0x1ccf   : > { %v11393_v58 = vpack.c.bf16 %v11663_v56, %v11662_v57  ;;  %11981 = vpow2.f32 %v6150_v53 }
0x1cd0   : > { %v6618_v20 = vpop.permute.xlu1 %6617 }
0x1cd1   : > { %11395 = vmatprep.subr.msk.bf16.mxu1 %vm12333_vm6, %v11393_v58 }
0x1cd2   : > { %11398 = vmatpush3.bf16.xpose.msk.msra.mxu1 %vm12333_vm6, %v11393_v58 }
0x1cd8   : > { %v11980_v59 = vpop.eup %11979 }
0x1cd9   : > { %v6152_v17 = vsel %vm4420_vm15, %v11980_v59, 0.0  ;;  %v11982_v41 = vpop.eup %11981 }
0x1cda   : > { %6153 = vadd.xlane.f32.xlu0 %v6152_v17  ;;  %v6155_v62 = vsel %vm4424_vm14, %v11982_v41, 0.0 }
0x1cde   : > { %6156 = vadd.xlane.f32.xlu0 %v6155_v62  ;;  %v4324_v62 = vld [vmem:[%s12242_s26 + $0x38] sm:$0xff] }
0x1cf4   : > { %6615 = vrot.lane.b32.xlu0 %v12715_v3, %s13456_s24 }
0x1d0c   : > { %v11088_v63 = vpop.f32.mrb[36].mxu0  ;;  %v11119_v0 = vpop.f32.mrb[46].mxu1 }
0x1d0d   : > { %v6418_v1 = vmul.f32 0.35355338, %v11119_v0  ;;  %v5953_v4 = vpop.f32.mrb[37].mxu0  ;;  %v6408_v5 = vpop.f32.mrb[47].mxu1 }
0x1d0e   : > { %v6417_v7 = vmul.f32 0.35355338, %v6408_v5  ;;  %11091 = vmatprep.mubr.msk.f32.mxu0 %vm1185_vm5, %v5953_v4 }
0x1d0f   : > { %v6420_v8 = vadd.f32 %v6418_v1, %v12732_v11  ;;  %11092 = vmatmul.mubr.msk.f32.vlgmr.msra.gmra.mrb[28].mxu0 %vm1185_vm5, %v11088_v63 }
0x1d10   : > { %v6419_v9 = vadd.f32 %v6417_v7, %v12737_v15  ;;  %11382 = vmatpush3.bf16.msra.mxu0 %v12702_v60 }
0x1d11   : > { %v6424_v10 = vsel %vm4424_vm14, %v6420_v8, -inf  ;;  %11108 = vmatprep.subr.mxu0 %v4323_v37 }
0x1d12   : > { %v6421_v13 = vsel %vm4420_vm15, %v6419_v9, -inf }
0x1d13   : > { %6422 = vmax.xlane.f32.xlu1 %v6421_v13  ;;  %6425 = vmax.xlane.f32.xlu0 %v6424_v10 }
0x1d67   : > { %v6154_v14 = vpop.xlane.xlu0 %6153 }
0x1d68   : > { %11983 = vrcp.f32 %v6154_v14 }
0x1d6b   : > { %v6157_v18 = vpop.xlane.xlu0 %6156 }
0x1d6c   : > { %11985 = vrcp.f32 %v6157_v18 }
0x1d6f   : > { %v6616_v19 = vpop.permute.xlu0 %6615 }
0x1d70   : > { %11136 = vmatprep.mubr.msk.f32.mxu1 %vm1185_vm5, %v6616_v19 }
0x1d71   : > { %11137 = vmatmul.mubr.msk.f32.vlgmr.msra.gmra.mrb[48].mxu1 %vm1185_vm5, %v6618_v20 }
0x1d72   : > { %v11984_v21 = vpop.eup %11983 }
0x1d73   : > { %v6159_v22 = vmul.f32 %v11984_v21, %v11980_v59 }
0x1d75   : > { %11105 = vmatprep.mubr.msk.f32.mxu0 %vm4420_vm15, %v6159_v22 }
0x1d76   : > { %v11986_v60 = vpop.eup %11985 }
0x1d77   : > { %v6161_v23 = vmul.f32 %v11986_v60, %v11982_v41 }
0x1d79   : > { %11106 = vmatmul.mubr.msk.f32.vlgmr.msra.gmra.mrb[38].mxu0 %vm4420_vm15, %v6161_v23  ;;  %v12023_v23 = vld [vmem:[%s13450_s25 + $0x8] sm:$0xf] }
0x1d7a   : > { %11109 = vmatpush3.msra.mxu0 %v4323_v37 }
0x1da0   : > { %v6423_v32 = vpop.xlane.xlu1 %6422  ;;  %v6426_v24 = vpop.xlane.xlu0 %6425 }
0x1da1   : > { %v6427_v27 = vsub.f32 %v6419_v9, %v6423_v32  ;;  %v6428_v35 = vsub.f32 %v6420_v8, %v6426_v24 }
0x1da3   : > { %v6429_v29 = vmul.f32 1.442695, %v6427_v27  ;;  %v6431_v30 = vmul.f32 1.442695, %v6428_v35 }
0x1da5   : > { %11987 = vpow2.f32 %v6429_v29 }
0x1da6   : > { %11989 = vpow2.f32 %v6431_v30 }
0x1daf   : > { %v11988_v31 = vpop.eup %11987 }
0x1db0   : > { %v11990_v33 = vpop.eup %11989  ;;  %v6433_v34 = vsel %vm4420_vm15, %v11988_v31, 0.0 }
0x1db1   : > { %6434 = vadd.xlane.f32.xlu0 %v6433_v34  ;;  %v6436_v36 = vsel %vm4424_vm14, %v11990_v33, 0.0 }
0x1db2   : > { %6437 = vadd.xlane.f32.xlu1 %v6436_v36 }
0x1dc3   : > { %11670 = vrot.lane.b32.xlu1 %v12694_v16, %s13457_s9 }
0x1dc7   : > { %6902 = vrot.lane.b32.xlu1 %v12715_v3, %s13457_s9  ;;  %11665 = vrot.lane.b32.xlu0 %v12704_v61, %s12046_s13 }
0x1dcb   : > { %6904 = vrot.lane.b32.xlu0 %v12717_v6, %s13457_s9 }
0x1e3e   : > { %v6435_v38 = vpop.xlane.xlu0 %6434 }
0x1e3f   : > { %v6438_v48 = vpop.xlane.xlu1 %6437  ;;  %11991 = vrcp.f32 %v6435_v38 }
0x1e40   : > { %11993 = vrcp.f32 %v6438_v48 }
0x1e42   : > { %v11666_v40 = vpop.permute.xlu0 %11665 }
0x1e43   : > { %v11671_v42 = vpop.permute.xlu1 %11670  ;;  %v11668_v43 = vunpack.i.h.bf16 %v11666_v40  ;;  %v11667_v51 = vunpack.i.l.bf16 %v11666_v40 }
0x1e44   : > { %v11673_v16 = vunpack.i.h.bf16 %v11671_v42  ;;  %v11672_v46 = vunpack.i.l.bf16 %v11671_v42  ;;  %v11138_v2 = vpop.f32.mrb[48].mxu1 }
0x1e45   : > { %v11389_v47 = vpack.c.bf16 %v11668_v43, %v11667_v51  ;;  %v6707_v3 = vmul.f32 0.35355338, %v11138_v2  ;;  %v6697_v49 = vpop.f32.mrb[49].mxu1 }
0x1e46   : > { %v11403_v50 = vpack.c.bf16 %v11673_v16, %v11672_v46  ;;  %v6706_v52 = vmul.f32 0.35355338, %v6697_v49  ;;  %v6905_v17 = vpop.permute.xlu0 %6904  ;;  %v4325_v49 = vld [vmem:[%s12242_s26 + $0x40] sm:$0xff] }
0x1e47   : > { %v6709_v53 = vadd.f32 %v6707_v3, %v12732_v11  ;;  %v6903_v54 = vpop.permute.xlu1 %6902  ;;  %11390 = vmatprep.subr.bf16.mxu0 %v11389_v47 }
0x1e48   : > { %v6708_v6 = vadd.f32 %v6706_v52, %v12737_v15  ;;  %11405 = vmatprep.subr.msk.bf16.mxu1 %vm12333_vm6, %v11403_v50  ;;  %11155 = vmatprep.mubr.msk.f32.mxu1 %vm1185_vm5, %v6903_v54 }
0x1e49   : > { %11408 = vmatpush3.bf16.xpose.msk.msra.mxu1 %vm12333_vm6, %v11403_v50  ;;  %v6713_v55 = vsel %vm4424_vm14, %v6709_v53, -inf  ;;  %v11992_v11 = vpop.eup %11991 }
0x1e4a   : > { %6714 = vmax.xlane.f32.xlu0 %v6713_v55  ;;  %v6710_v56 = vsel %vm4420_vm15, %v6708_v6, -inf  ;;  %v11994_v59 = vpop.eup %11993  ;;  %v6440_v41 = vmul.f32 %v11992_v11, %v11988_v31 }
0x1e4b   : > { %6711 = vmax.xlane.f32.xlu1 %v6710_v56  ;;  %v6442_v45 = vmul.f32 %v11994_v59, %v11990_v33 }
0x1e4c   : > { %v11107_v57 = vpop.f32.mrb[38].mxu0 }
0x1e4d   : > { %v6234_v58 = vpop.f32.mrb[39].mxu0 }
0x1e4e   : > { %11110 = vmatprep.mubr.msk.f32.mxu0 %vm1185_vm5, %v6234_v58 }
0x1e4f   : > { %11111 = vmatmul.mubr.msk.f32.vlgmr.msra.gmra.mrb[28].mxu0 %vm1185_vm5, %v11107_v57  ;;  %v4326_v57 = vld [vmem:[%s12242_s26 + $0x48] sm:$0xff] }
0x1e50   : > { %11392 = vmatpush3.bf16.msra.mxu0 %v11389_v47  ;;  %11156 = vmatmul.mubr.msk.f32.vlgmr.msra.gmra.mrb[50].mxu1 %vm1185_vm5, %v6905_v17 }
0x1e51   : > { %11124 = vmatprep.mubr.msk.f32.mxu0 %vm4420_vm15, %v6440_v41  ;;  %7838 = vmatprep.mubr.bf16.mxu1 %v12042_v12 }
0x1e52   : > { %11127 = vmatprep.subr.mxu0 %v4324_v62 }
0x1e53   : > { %11125 = vmatmul.mubr.msk.f32.vlgmr.msra.gmra.mrb[40].mxu0 %vm4420_vm15, %v6442_v45 }
0x1e54   : > { %11128 = vmatpush3.msra.mxu0 %v4324_v62 }
0x1ed7   : > { %v6715_v63 = vpop.xlane.xlu0 %6714 }
0x1ed8   : > { %v6717_v0 = vsub.f32 %v6709_v53, %v6715_v63  ;;  %v6712_v1 = vpop.xlane.xlu1 %6711 }
0x1ed9   : > { %v6716_v4 = vsub.f32 %v6708_v6, %v6712_v1 }
0x1eda   : > { %v6720_v5 = vmul.f32 1.442695, %v6717_v0 }
0x1edb   : > { %v6718_v7 = vmul.f32 1.442695, %v6716_v4 }
0x1edc   : > { %11995 = vpow2.f32 %v6720_v5 }
0x1edd   : > { %11997 = vpow2.f32 %v6718_v7 }
0x1ee6   : > { %v11996_v8 = vpop.eup %11995 }
0x1ee7   : > { %v11998_v9 = vpop.eup %11997  ;;  %v6725_v10 = vsel %vm4424_vm14, %v11996_v8, 0.0 }
0x1ee8   : > { %6726 = vadd.xlane.f32.xlu1 %v6725_v10  ;;  %v6722_v13 = vsel %vm4420_vm15, %v11998_v9, 0.0 }
0x1ee9   : > { %6723 = vadd.xlane.f32.xlu0 %v6722_v13 }
0x1eff   : > { %11675 = vrot.lane.b32.xlu0 %v12704_v61, %s12051_s1  ;;  %s13458_s1 = scalar_lea.vmem %s13376_s15, %s12196_s22  ;;  %s13460_s22 = sld [smem:[#allocation5_spill]] }
0x1f00   : > { %v10129_v62 = vld [vmem:[%s13458_s1] ss:$0 sm:$0xff] }
0x1f05   : > { %p10347_p5 = scmp.ne.s32.totalorder %s13460_s22, 7 }
0x1f06   : > { %s13461_s28 = sld [smem:[#allocation22_spill]] (!%p10347_p5)  ;;  %vm9723_vm0 = vcmask (!%p10347_p5), 3072   ;;  %vm9721_vm2 = vcmask (!%p10347_p5), 7168   ;;  %s13462_s30 = sld [smem:[#allocation23_spill]] (!%p10347_p5) }
0x1f23   : > { %v11157_v14 = vpop.f32.mrb[50].mxu1 }
0x1f24   : > { %v6984_v18 = vpop.f32.mrb[51].mxu1  ;;  %v6994_v19 = vmul.f32 0.35355338, %v11157_v14 }
0x1f25   : > { %v6993_v20 = vmul.f32 0.35355338, %v6984_v18 }
0x1f26   : > { %v11126_v21 = vpop.f32.mrb[40].mxu0  ;;  %v6996_v32 = vadd.f32 %v12023_v23, %v6994_v19  ;;  %v7247_v23 = vld [vmem:[%s12254_s0 + $0x40] sm:$0xff] }
0x1f27   : > { %v6995_v22 = vadd.f32 %v6993_v20, %v12737_v15  ;;  %v6523_v60 = vpop.f32.mrb[41].mxu0 }
0x1f28   : > { %11129 = vmatprep.mubr.msk.f32.mxu0 %vm1185_vm5, %v6523_v60  ;;  %v7000_v27 = vsel %vm4424_vm14, %v6996_v32, -inf  ;;  %v7239_v60 = vld [vmem:[%s12254_s0] sm:$0xff] }
0x1f29   : > { %v6997_v24 = vsel %vm4420_vm15, %v6995_v22, -inf  ;;  %11130 = vmatmul.mubr.msk.f32.vlgmr.msra.gmra.mrb[28].mxu0 %vm1185_vm5, %v11126_v21 }
0x1f2a   : > { %6998 = vmax.xlane.f32.xlu1 %v6997_v24  ;;  %v10131_v24 = vcombine.high %v7239_v60, %v7247_v23 }
0x1f2c   : > { %7806 = vmatprep.subr.bf16.mxu1 %v10131_v24 }
0x1f2e   : > { %7001 = vmax.xlane.f32.xlu1 %v7000_v27  ;;  %v7248_v27 = vld [vmem:[%s12254_s0 + $0x48] sm:$0xff] }
0x1f75   : > { %v6727_v35 = vpop.xlane.xlu1 %6726 }
0x1f76   : > { %11999 = vrcp.f32 %v6727_v35  ;;  %v6724_v29 = vpop.xlane.xlu0 %6723  ;;  %v10130_v35 = vcombine.low %v7239_v60, %v7247_v23  ;;  %v13022_v60 = vsub.s32 3, %v12304_v25 }
0x1f77   : > { %12001 = vrcp.f32 %v6724_v29 }
0x1f78   : > { %7807 = vmatpush1.bf16.msra.mxu1 %v10130_v35 }
0x1f7a   : > { %v11676_v15 = vpop.permute.xlu0 %11675 }
0x1f7b   : > { %v11678_v30 = vunpack.i.h.bf16 %v11676_v15  ;;  %v11677_v31 = vunpack.i.l.bf16 %v11676_v15 }
0x1f7d   : > { %v11399_v33 = vpack.c.bf16 %v11678_v30, %v11677_v31  ;;  %v7255_v30 = vld [vmem:[%s12254_s0 + $0x80] sm:$0xff] }
0x1f7e   : > { %v7263_v31 = vld [vmem:[%s12254_s0 + $0xc0] sm:$0xff] }
0x1f7f   : > { %11400 = vmatprep.subr.bf16.mxu0 %v11399_v33 }
0x1f80   : > { %v12000_v34 = vpop.eup %11999  ;;  %11402 = vmatpush3.bf16.msra.mxu0 %v11399_v33  ;;  %v7256_v33 = vld [vmem:[%s12254_s0 + $0x88] sm:$0xff] }
0x1f81   : > { %v12002_v36 = vpop.eup %12001  ;;  %v6731_v38 = vmul.f32 %v12000_v34, %v11996_v8  ;;  %11146 = vmatprep.subr.mxu0 %v4325_v49  ;;  %v10147_v34 = vcombine.high %v7255_v30, %v7263_v31 }
0x1f82   : > { %v6729_v37 = vmul.f32 %v12002_v36, %v11998_v9  ;;  %v7264_v36 = vld [vmem:[%s12254_s0 + $0xc8] sm:$0xff] }
0x1f83   : > { %7808 = vmatprep.subr.bf16.mxu1 %v10147_v34 }
0x1f84   : > { %11143 = vmatprep.mubr.msk.f32.mxu0 %vm4420_vm15, %v6729_v37  ;;  %v10146_v37 = vcombine.low %v7255_v30, %v7263_v31  ;;  %v7265_v30 = vld [vmem:[%s12254_s0 + $0xd0] sm:$0xff]  ;;  %v7258_v31 = vld [vmem:[%s12254_s0 + $0x98] sm:$0xff] }
0x1f85   : > { %11144 = vmatmul.mubr.msk.f32.vlgmr.msra.gmra.mrb[42].mxu0 %vm4420_vm15, %v6731_v38  ;;  %v10148_v38 = vcombine.low %v7256_v33, %v7264_v36 }
0x1f86   : > { %11147 = vmatpush3.msra.mxu0 %v4325_v49  ;;  %7809 = vmatpush1.bf16.msra.mxu1 %v10146_v37  ;;  %v7295_v49 = vld [vmem:[%s12254_s0 + $0x1c0] sm:$0xff] }
0x1fb7   : > { %v6999_v48 = vpop.xlane.xlu1 %6998 }
0x1fb8   : > { %v7003_v40 = vsub.f32 %v6995_v22, %v6999_v48  ;;  %v10149_v48 = vcombine.high %v7256_v33, %v7264_v36  ;;  %v7266_v33 = vld [vmem:[%s12254_s0 + $0xd8] sm:$0xff] }
0x1fba   : > { %v7005_v51 = vmul.f32 1.442695, %v7003_v40  ;;  %v7271_v40 = vld [vmem:[%s12254_s0 + $0x100] sm:$0xff] }
0x1fbb   : > { %v7002_v42 = vpop.xlane.xlu1 %7001 }
0x1fbc   : > { %v7004_v43 = vsub.f32 %v6996_v32, %v7002_v42  ;;  %v7240_v32 = vld [vmem:[%s12254_s0 + $0x8] sm:$0xff]  ;;  %v7279_v42 = vld [vmem:[%s12254_s0 + $0x140] sm:$0xff] }
0x1fbd   : > { %v10132_v29 = vcombine.low %v7240_v32, %v7248_v27  ;;  %v10133_v15 = vcombine.high %v7240_v32, %v7248_v27 }
0x1fbe   : > { %v7007_v16 = vmul.f32 1.442695, %v7004_v43  ;;  %v7272_v43 = vld [vmem:[%s12254_s0 + $0x108] sm:$0xff] }
0x1fc0   : > { %12003 = vpow2.f32 %v7007_v16  ;;  %v7280_v16 = vld [vmem:[%s12254_s0 + $0x148] sm:$0xff] }
0x1fc1   : > { %12005 = vpow2.f32 %v7005_v51  ;;  %v10163_v51 = vcombine.high %v7271_v40, %v7279_v42 }
0x1fc3   : > { %7810 = vmatprep.subr.bf16.mxu1 %v10163_v51  ;;  %v10152_v51 = vcombine.low %v7258_v31, %v7266_v33 }
0x1fca   : > { %v12004_v46 = vpop.eup %12003 }
0x1fcb   : > { %v7012_v2 = vsel %vm4424_vm14, %v12004_v46, 0.0  ;;  %v12006_v47 = vpop.eup %12005 }
0x1fcc   : > { %7013 = vadd.xlane.f32.xlu1 %v7012_v2  ;;  %v7009_v3 = vsel %vm4420_vm15, %v12006_v47, 0.0  ;;  %v10164_v2 = vcombine.low %v7272_v43, %v7280_v16 }
0x1fd0   : > { %7010 = vadd.xlane.f32.xlu1 %v7009_v3  ;;  %v7287_v3 = vld [vmem:[%s12254_s0 + $0x180] sm:$0xff] }
0x1fe1   : > { %11680 = vrot.lane.b32.xlu1 %v12704_v61, %s12049_s3 }
0x2058   : > { %v11145_v50 = vpop.f32.mrb[42].mxu0 }
0x2059   : > { %v7014_v52 = vpop.xlane.xlu1 %7013  ;;  %v6810_v53 = vpop.f32.mrb[43].mxu0 }
0x205a   : > { %11148 = vmatprep.mubr.msk.f32.mxu0 %vm1185_vm5, %v6810_v53  ;;  %12007 = vrcp.f32 %v7014_v52  ;;  %v10179_v52 = vcombine.high %v7287_v3, %v7295_v49  ;;  %v7296_v53 = vld [vmem:[%s12254_s0 + $0x1c8] sm:$0xff] }
0x205b   : > { %11149 = vmatmul.mubr.msk.f32.vlgmr.msra.gmra.mrb[28].mxu0 %vm1185_vm5, %v11145_v50  ;;  %v7288_v50 = vld [vmem:[%s12254_s0 + $0x188] sm:$0xff] }
0x205d   : > { %v7011_v54 = vpop.xlane.xlu1 %7010 }
0x205e   : > { %12009 = vrcp.f32 %v7011_v54  ;;  %v10178_v54 = vcombine.low %v7287_v3, %v7295_v49  ;;  %v7290_v3 = vld [vmem:[%s12254_s0 + $0x198] sm:$0xff] }
0x205f   : > { %v7298_v49 = vld [vmem:[%s12254_s0 + $0x1d8] sm:$0xff] }
0x2061   : > { %v11681_v6 = vpop.permute.xlu1 %11680 }
0x2062   : > { %v11683_v55 = vunpack.i.h.bf16 %v11681_v6  ;;  %v11682_v56 = vunpack.i.l.bf16 %v11681_v6  ;;  %v10180_v6 = vcombine.low %v7288_v50, %v7296_v53 }
0x2064   : > { %v11409_v11 = vpack.c.bf16 %v11683_v55, %v11682_v56  ;;  %v12008_v58 = vpop.eup %12007  ;;  %v10181_v55 = vcombine.high %v7288_v50, %v7296_v53  ;;  %v7303_v56 = vld [vmem:[%s12254_s0 + $0x200] sm:$0xff] }
0x2065   : > { %v7018_v17 = vmul.f32 %v12008_v58, %v12004_v46  ;;  %v10162_v46 = vcombine.low %v7271_v40, %v7279_v42  ;;  %v7274_v40 = vld [vmem:[%s12254_s0 + $0x118] sm:$0xff] }
0x2066   : > { %11410 = vmatprep.subr.bf16.mxu0 %v11409_v11  ;;  %v7282_v42 = vld [vmem:[%s12254_s0 + $0x158] sm:$0xff] }
0x2067   : > { %11412 = vmatpush3.bf16.msra.mxu0 %v11409_v11  ;;  %7811 = vmatpush1.bf16.msra.mxu1 %v10162_v46  ;;  %v7311_v11 = vld [vmem:[%s12254_s0 + $0x240] sm:$0xff]  ;;  %v10169_v46 = vcombine.high %v7274_v40, %v7282_v42 }
0x2068   : > { %v12010_v61 = vpop.eup %12009  ;;  %11165 = vmatprep.subr.mxu0 %v4326_v57  ;;  %7812 = vmatprep.subr.bf16.mxu1 %v10179_v52  ;;  %v10195_v58 = vcombine.high %v7303_v56, %v7311_v11  ;;  %v10168_v52 = vcombine.low %v7274_v40, %v7282_v42  ;;  %v7315_v40 = vld [vmem:[%s12254_s0 + $0x260] sm:$0xff]  ;;  %v7308_v42 = vld [vmem:[%s12254_s0 + $0x228] sm:$0xff] }
0x2069   : > { %v7016_v59 = vmul.f32 %v12010_v61, %v12006_v47  ;;  %v10165_v47 = vcombine.high %v7272_v43, %v7280_v16  ;;  %v7312_v61 = vld [vmem:[%s12254_s0 + $0x248] sm:$0xff] }
0x206b   : > { %11162 = vmatprep.mubr.msk.f32.mxu0 %vm4420_vm15, %v7016_v59  ;;  %7813 = vmatpush1.bf16.msra.mxu1 %v10178_v54  ;;  %v10194_v59 = vcombine.low %v7303_v56, %v7311_v11  ;;  %v10185_v54 = vcombine.high %v7290_v3, %v7298_v49  ;;  %v7306_v56 = vld [vmem:[%s12254_s0 + $0x218] sm:$0xff] }
0x206c   : > { %11163 = vmatmul.mubr.msk.f32.vlgmr.msra.gmra.mrb[44].mxu0 %vm4420_vm15, %v7018_v17  ;;  %7814 = vmatprep.subr.bf16.mxu1 %v10195_v58  ;;  %v7314_v11 = vld [vmem:[%s12254_s0 + $0x258] sm:$0xff]  ;;  %v10184_v58 = vcombine.low %v7290_v3, %v7298_v49  ;;  %v7253_v3 = vld [vmem:[%s12254_s0 + $0x70] sm:$0xff] }
0x206d   : > { %11166 = vmatpush3.msra.mxu0 %v4326_v57  ;;  %v7304_v57 = vld [vmem:[%s12254_s0 + $0x208] sm:$0xff]  ;;  %v7246_v49 = vld [vmem:[%s12254_s0 + $0x38] sm:$0xff] }
0x206e   : > { %7849 = vmatprep.subr.bf16.mxu0 %v10133_v15  ;;  %v10196_v17 = vcombine.low %v7304_v57, %v7312_v61  ;;  %v7257_v15 = vld [vmem:[%s12254_s0 + $0x90] sm:$0xff] }
0x206f   : > { %7815 = vmatpush1.bf16.msra.mxu1 %v10194_v59  ;;  %v10151_v37 = vcombine.high %v7257_v15, %v7265_v30  ;;  %v10150_v43 = vcombine.low %v7257_v15, %v7265_v30  ;;  %v10201_v59 = vcombine.high %v7306_v56, %v7314_v11  ;;  %v7299_v15 = vld [vmem:[%s12254_s0 + $0x1e0] sm:$0xff]  ;;  %v7292_v30 = vld [vmem:[%s12254_s0 + $0x1a8] sm:$0xff] }
0x213f   : > { %v11164_v41 = vpop.f32.mrb[44].mxu0 }
0x2140   : > { %v7097_v45 = vpop.f32.mrb[45].mxu0 }
0x2141   : > { %11167 = vmatprep.mubr.msk.f32.mxu0 %vm1185_vm5, %v7097_v45  ;;  %v7241_v45 = vld [vmem:[%s12254_s0 + $0x10] sm:$0xff] }
0x2142   : > { %11168 = vmatmul.mubr.msk.f32.vlgmr.msra.gmra.mrb[28].mxu0 %vm1185_vm5, %v11164_v41  ;;  %v10197_v41 = vcombine.high %v7304_v57, %v7312_v61 }
0x2143   : > { %7881 = vmatprep.mubr.bf16.mxu0 %v12042_v12  ;;  %7850 = vmatpush1.bf16.msra.mxu0 %v10132_v29 }
0x2144   : > { %7851 = vmatprep.subr.bf16.mxu0 %v10149_v48  ;;  %v7273_v48 = vld [vmem:[%s12254_s0 + $0x110] sm:$0xff] }
0x2147   : > { %7852 = vmatpush1.bf16.msra.mxu0 %v10148_v38  ;;  %v10153_v38 = vcombine.high %v7258_v31, %v7266_v33  ;;  %v7300_v31 = vld [vmem:[%s12254_s0 + $0x1e8] sm:$0xff] }
0x2148   : > { %7853 = vmatprep.subr.bf16.mxu0 %v10165_v47  ;;  %v7297_v47 = vld [vmem:[%s12254_s0 + $0x1d0] sm:$0xff] }
0x214b   : > { %7854 = vmatpush1.bf16.msra.mxu0 %v10164_v2  ;;  %v7289_v2 = vld [vmem:[%s12254_s0 + $0x190] sm:$0xff] }
0x214c   : > { %7855 = vmatprep.subr.bf16.mxu0 %v10181_v55  ;;  %v10183_v53 = vcombine.high %v7289_v2, %v7297_v47  ;;  %v7313_v55 = vld [vmem:[%s12254_s0 + $0x250] sm:$0xff]  ;;  %v10182_v57 = vcombine.low %v7289_v2, %v7297_v47 }
0x214d   : > { %v7245_v47 = vld [vmem:[%s12254_s0 + $0x30] sm:$0xff] }
0x214f   : > { %7856 = vmatpush1.bf16.msra.mxu0 %v10180_v6  ;;  %v7305_v6 = vld [vmem:[%s12254_s0 + $0x210] sm:$0xff] }
0x2150   : > { %7857 = vmatprep.subr.bf16.mxu0 %v10197_v41  ;;  %v10199_v61 = vcombine.high %v7305_v6, %v7313_v55  ;;  %v7251_v41 = vld [vmem:[%s12254_s0 + $0x60] sm:$0xff] }
0x2153   : > { %7858 = vmatpush1.bf16.msra.mxu0 %v10196_v17  ;;  %v7243_v17 = vld [vmem:[%s12254_s0 + $0x20] sm:$0xff] }
0x2215   : > { %v11169_v63 = vpop.f32.mrb[28].mxu0 }
0x2216   : > { %v7197_v0 = vadd.f32 %v11169_v63, %v10129_v62  ;;  %v7178_v1 = vpop.f32.mrb[29].mxu0  ;;  %v7242_v63 = vld [vmem:[%s12254_s0 + $0x18] sm:$0xff] }
0x2217   : > { %v7196_v4 = vadd.f32 %v10129_v62, %v7178_v1  ;;  %v7249_v62 = vld [vmem:[%s12254_s0 + $0x50] sm:$0xff]  ;;  %v7250_v1 = vld [vmem:[%s12254_s0 + $0x58] sm:$0xff] }
0x2218   : > { %v7199_v5 = vadd.f32 %v7197_v0, %v12686_v44  ;;  %v10135_v0 = vcombine.high %v7241_v45, %v7249_v62 }
0x2219   : > { %v7198_v7 = vadd.f32 %v7196_v4, %v12684_v39  ;;  %v10134_v4 = vcombine.low %v7241_v45, %v7249_v62  ;;  %v7244_v45 = vld [vmem:[%s12254_s0 + $0x28] sm:$0xff] }
0x221a   : > { %v7203_v8 = vsel %vm4069_vm12, %v7199_v5, 0.0  ;;  %7892 = vmatprep.subr.bf16.mxu1 %v10135_v0  ;;  %v7252_v62 = vld [vmem:[%s12254_s0 + $0x68] sm:$0xff]  ;;  %v10200_v0 = vcombine.low %v7306_v56, %v7314_v11  ;;  %v7269_v56 = vld [vmem:[%s12254_s0 + $0xf0] sm:$0xff]  ;;  %v7262_v11 = vld [vmem:[%s12254_s0 + $0xb8] sm:$0xff] }
0x221b   : > { %7204 = vadd.xlane.f32.xlu1 %v7203_v8  ;;  %v7200_v9 = vsel %vm1120_vm4, %v7198_v7, 0.0 }
0x221c   : > { %7201 = vadd.xlane.f32.xlu0 %v7200_v9 }
0x22a8   : > { %v7205_v10 = vpop.xlane.xlu1 %7204 }
0x22a9   : > { %v7207_v13 = vmul.f32 0.0125, %v7205_v10  ;;  %v7202_v14 = vpop.xlane.xlu0 %7201 }
0x22aa   : > { %v7206_v18 = vmul.f32 0.0125, %v7202_v14 }
0x22ab   : > { %v12982_v19 = vsub.f32 %v7199_v5, %v7207_v13  ;;  %v10136_v5 = vcombine.low %v7242_v63, %v7250_v1 }
0x22ac   : > { %v12984_v20 = vsub.f32 %v7198_v7, %v7206_v18  ;;  %v10137_v7 = vcombine.high %v7242_v63, %v7250_v1  ;;  %v10198_v63 = vcombine.low %v7305_v6, %v7313_v55  ;;  %v10139_v1 = vcombine.high %v7243_v17, %v7251_v41  ;;  %v7261_v55 = vld [vmem:[%s12254_s0 + $0xb0] sm:$0xff] }
0x22ad   : > { %v7211_v21 = vmul.f32 %v12982_v19, %v12982_v19 }
0x22ae   : > { %v7210_v39 = vmul.f32 %v12984_v20, %v12984_v20  ;;  %7935 = vmatprep.subr.bf16.mxu0 %v10137_v7  ;;  %v7267_v7 = vld [vmem:[%s12254_s0 + $0xe0] sm:$0xff] }
0x22af   : > { %v7215_v22 = vsel %vm4069_vm12, %v7211_v21, 0.0  ;;  %v12024_v21 = vld [vmem:[%s12274_s7] sm:$0x3f] }
0x22b0   : > { %v7212_v44 = vsel %vm1120_vm4, %v7210_v39, 0.0  ;;  %v13017_v39 = vsub.s32 2, %v12304_v25  ;;  %v7235_v24 = vrot.slane %v12024_v21, %v13022_v60 }
0x22b1   : > { %7213 = vadd.xlane.f32.xlu0 %v7212_v44 }
0x22b5   : > { %7216 = vadd.xlane.f32.xlu0 %v7215_v22  ;;  %v7229_v22 = vrot.slane %v12024_v21, %v13017_v39  ;;  %v7283_v21 = vld [vmem:[%s12254_s0 + $0x160] sm:$0xff] }
0x233e   : > { %v7214_v8 = vpop.xlane.xlu0 %7213 }
0x233f   : > { %v7218_v9 = vmul.f32 0.0125, %v7214_v8  ;;  %v7260_v8 = vld [vmem:[%s12254_s0 + $0xa8] sm:$0xff] }
0x2341   : > { %v7220_v10 = vadd.f32 1e-05, %v7218_v9  ;;  %v7268_v9 = vld [vmem:[%s12254_s0 + $0xe8] sm:$0xff] }
0x2342   : > { %v7217_v13 = vpop.xlane.xlu0 %7216 }
0x2343   : > { %12011 = vrsqrt.f32 %v7220_v10  ;;  %v7219_v14 = vmul.f32 0.0125, %v7217_v13  ;;  %v10138_v10 = vcombine.low %v7243_v17, %v7251_v41  ;;  %v10140_v13 = vcombine.low %v7244_v45, %v7252_v62  ;;  %v7277_v41 = vld [vmem:[%s12254_s0 + $0x130] sm:$0xff] }
0x2345   : > { %v7221_v18 = vadd.f32 1e-05, %v7219_v14 }
0x2347   : > { %12013 = vrsqrt.f32 %v7221_v18  ;;  %v10157_v18 = vcombine.high %v7260_v8, %v7268_v9 }
0x234d   : > { %v12012_v44 = vpop.eup %12011 }
0x234e   : > { %v7224_v23 = vmul.f32 %v12012_v44, %v12984_v20  ;;  %v7275_v44 = vld [vmem:[%s12254_s0 + $0x120] sm:$0xff] }
0x234f   : > { %v10170_v33 = vcombine.low %v7275_v44, %v7283_v21 }
0x2350   : > { %v7230_v27 = vmul.f32 %v7229_v22, %v7224_v23  ;;  %v7284_v23 = vld [vmem:[%s12254_s0 + $0x168] sm:$0xff] }
0x2351   : > { %v12014_v32 = vpop.eup %12013 }
0x2352   : > { %v7225_v35 = vmul.f32 %v12014_v32, %v12982_v19  ;;  %v13031_v34 = vadd.f32 %v7235_v24, %v7230_v27  ;;  %v7281_v19 = vld [vmem:[%s12254_s0 + $0x150] sm:$0xff]  ;;  %v10171_v27 = vcombine.high %v7275_v44, %v7283_v21 }
0x2353   : > { %v10167_v16 = vcombine.high %v7273_v48, %v7281_v19  ;;  %v10166_v50 = vcombine.low %v7273_v48, %v7281_v19  ;;  %v10189_v48 = vcombine.high %v7292_v30, %v7300_v31  ;;  %v7307_v19 = vld [vmem:[%s12254_s0 + $0x220] sm:$0xff]  ;;  %v7309_v21 = vld [vmem:[%s12254_s0 + $0x230] sm:$0xff] }
0x2354   : > { %v7231_v29 = vmul.f32 %v7229_v22, %v7225_v35  ;;  %v7276_v22 = vld [vmem:[%s12254_s0 + $0x128] sm:$0xff] }
0x2355   : > { %v10173_v35 = vcombine.high %v7276_v22, %v7284_v23 }
0x2356   : > { %v13033_v36 = vadd.f32 %v7235_v24, %v7231_v29  ;;  %v10156_v24 = vcombine.low %v7260_v8, %v7268_v9  ;;  %v7291_v29 = vld [vmem:[%s12254_s0 + $0x1a0] sm:$0xff]  ;;  %v7301_v8 = vld [vmem:[%s12254_s0 + $0x1f0] sm:$0xff]  ;;  %v7294_v9 = vld [vmem:[%s12254_s0 + $0x1b8] sm:$0xff] }
0x2358   : > { %v13037_v20 = vpack.c.bf16 %v13033_v36, %v13031_v34 }
0x235a   : > { %10210 = vmatmul.mubr.msk.bf16.vlgmr.msra.gmra.mrb[52].mxu1 %vm1120_vm4, %v13037_v20  ;;  %10211 = vmatmul.mubr.msk.bf16.vlgmr.msra.gmra.mrb[48].mxu0 %vm1120_vm4, %v13037_v20 }
0x235b   : > { %7893 = vmatpush1.bf16.msra.mxu1 %v10134_v4  ;;  %7936 = vmatpush1.bf16.msra.mxu0 %v10136_v5  ;;  %v10141_v4 = vcombine.high %v7244_v45, %v7252_v62  ;;  %v7259_v5 = vld [vmem:[%s12254_s0 + $0xa0] sm:$0xff]  ;;  %v7285_v45 = vld [vmem:[%s12254_s0 + $0x170] sm:$0xff]  ;;  %v7278_v62 = vld [vmem:[%s12254_s0 + $0x138] sm:$0xff] }
0x235c   : > { %7894 = vmatprep.subr.bf16.mxu1 %v10151_v37  ;;  %7937 = vmatprep.subr.bf16.mxu0 %v10153_v38  ;;  %v10155_v14 = vcombine.high %v7259_v5, %v7267_v7  ;;  %v10154_v32 = vcombine.low %v7259_v5, %v7267_v7  ;;  %v10172_v37 = vcombine.low %v7276_v22, %v7284_v23  ;;  %v7293_v7 = vld [vmem:[%s12254_s0 + $0x1b0] sm:$0xff]  ;;  %v7310_v23 = vld [vmem:[%s12254_s0 + $0x238] sm:$0xff] }
0x235d   : > { %7924 = vmatprep.mubr.bf16.mxu1 %v12042_v12  ;;  %7967 = vmatprep.mubr.bf16.mxu0 %v12042_v12  ;;  %v10187_v38 = vcombine.high %v7291_v29, %v7299_v15  ;;  %v7317_v22 = vld [vmem:[%s12254_s0 + $0x270] sm:$0xff] }
0x235f   : > { %7895 = vmatpush1.bf16.msra.mxu1 %v10150_v43  ;;  %7938 = vmatpush1.bf16.msra.mxu0 %v10152_v51  ;;  %v7316_v43 = vld [vmem:[%s12254_s0 + $0x268] sm:$0xff]  ;;  %v10186_v51 = vcombine.low %v7291_v29, %v7299_v15  ;;  %v10206_v29 = vcombine.low %v7309_v21, %v7317_v22 }
0x2360   : > { %7896 = vmatprep.subr.bf16.mxu1 %v10167_v16  ;;  %7939 = vmatprep.subr.bf16.mxu0 %v10169_v46  ;;  %v10188_v16 = vcombine.low %v7292_v30, %v7300_v31  ;;  %v10203_v46 = vcombine.high %v7307_v19, %v7315_v40  ;;  %v10205_v2 = vcombine.high %v7308_v42, %v7316_v43  ;;  %v11719_v30 = vld [vmem:[%s12264_s5 + $0x40] sm:$0xff]  }
0x2361   : > { %v11720_v31 = vld [vmem:[%s12264_s5 + $0xc0] sm:$0xff]  }
0x2363   : > { %7897 = vmatpush1.bf16.msra.mxu1 %v10166_v50  ;;  %7940 = vmatpush1.bf16.msra.mxu0 %v10168_v52  ;;  %v7254_v50 = vld [vmem:[%s12254_s0 + $0x78] sm:$0xff]  ;;  %v10202_v52 = vcombine.low %v7307_v19, %v7315_v40  ;;  %v11725_v19 = vld [vmem:[%s12264_s5 + $0x8] sm:$0xff]  }
0x2364   : > { %7898 = vmatprep.subr.bf16.mxu1 %v10183_v53  ;;  %7941 = vmatprep.subr.bf16.mxu0 %v10185_v54  ;;  %v10204_v53 = vcombine.low %v7308_v42, %v7316_v43  ;;  %v10143_v54 = vcombine.high %v7245_v47, %v7253_v3  ;;  %v10145_v6 = vcombine.high %v7246_v49, %v7254_v50  ;;  %v11726_v40 = vld [vmem:[%s12264_s5 + $0x88] sm:$0xff]   ;;  %v11727_v42 = vld [vmem:[%s12264_s5 + $0x50] sm:$0xff]  }
0x2365   : > { %v11728_v43 = vld [vmem:[%s12264_s5 + $0xd0] sm:$0xff]  }
0x2367   : > { %7899 = vmatpush1.bf16.msra.mxu1 %v10182_v57  ;;  %7942 = vmatpush1.bf16.msra.mxu0 %v10184_v58  ;;  %v7270_v57 = vld [vmem:[%s12254_s0 + $0xf8] sm:$0xff]  ;;  %v10142_v58 = vcombine.low %v7245_v47, %v7253_v3  ;;  %v11735_v3 = vld [vmem:[%s12264_s5 + $0x60] sm:$0xff]  }
0x2368   : > { %7900 = vmatprep.subr.bf16.mxu1 %v10199_v61  ;;  %7943 = vmatprep.subr.bf16.mxu0 %v10201_v59  ;;  %v10144_v61 = vcombine.low %v7246_v49, %v7254_v50  ;;  %v10159_v59 = vcombine.high %v7261_v55, %v7269_v56  ;;  %v10161_v17 = vcombine.high %v7262_v11, %v7270_v57  ;;  %v11734_v47 = vld [vmem:[%s12264_s5 + $0x98] sm:$0xff]   ;;  %v11736_v49 = vld [vmem:[%s12264_s5 + $0xe0] sm:$0xff]  }
0x2369   : > { %v11737_v50 = vld [vmem:[%s12264_s5 + $0x20] sm:$0xff]  }
0x236b   : > { %7901 = vmatpush1.bf16.msra.mxu1 %v10198_v63  ;;  %7944 = vmatpush1.bf16.msra.mxu0 %v10200_v0  ;;  %v7286_v63 = vld [vmem:[%s12254_s0 + $0x178] sm:$0xff]  ;;  %v10158_v0 = vcombine.low %v7261_v55, %v7269_v56  ;;  %v11742_v55 = vld [vmem:[%s12264_s5 + $0xa8] sm:$0xff]   ;;  %v11743_v56 = vld [vmem:[%s12264_s5 + $0x70] sm:$0xff]  }
0x236c   : > { %7978 = vmatprep.subr.bf16.mxu1 %v10139_v1  ;;  %8021 = vmatprep.subr.bf16.mxu0 %v10141_v4  ;;  %v10160_v1 = vcombine.low %v7262_v11, %v7270_v57  ;;  %v10175_v4 = vcombine.high %v7277_v41, %v7285_v45  ;;  %v10177_v5 = vcombine.high %v7278_v62, %v7286_v63  ;;  %v11744_v11 = vld [vmem:[%s12264_s5 + $0xf0] sm:$0xff]  }
0x236d   : > { %v11745_v57 = vld [vmem:[%s12264_s5 + $0x30] sm:$0xff]  }
0x236e   : > { %10212 = vmatmul.mubr.msk.bf16.vlgmr.msra.gmra.mrb[56].mxu1 %vm1120_vm4, %v13037_v20  ;;  %10213 = vmatmul.mubr.msk.bf16.vlgmr.msra.gmra.mrb[52].mxu0 %vm1120_vm4, %v13037_v20 }
0x236f   : > { %7979 = vmatpush1.bf16.msra.mxu1 %v10138_v10  ;;  %8022 = vmatpush1.bf16.msra.mxu0 %v10140_v13  ;;  %v7302_v10 = vld [vmem:[%s12254_s0 + $0x1f8] sm:$0xff]  ;;  %v10174_v13 = vcombine.low %v7277_v41, %v7285_v45  ;;  %v11751_v45 = vld [vmem:[%s12264_s5 + $0x140] sm:$0xff]  }
0x2370   : > { %7980 = vmatprep.subr.bf16.mxu1 %v10155_v14  ;;  %8023 = vmatprep.subr.bf16.mxu0 %v10157_v18  ;;  %v10176_v14 = vcombine.low %v7278_v62, %v7286_v63  ;;  %v10191_v18 = vcombine.high %v7293_v7, %v7301_v8  ;;  %v10193_v44 = vcombine.high %v7294_v9, %v7302_v10  ;;  %v11750_v41 = vld [vmem:[%s12264_s5 + $0xb8] sm:$0xff]   ;;  %v11752_v62 = vld [vmem:[%s12264_s5 + $0x1c0] sm:$0xff]  }
0x2371   : > { %8010 = vmatprep.mubr.bf16.mxu1 %v12042_v12  ;;  %8053 = vmatprep.mubr.bf16.mxu0 %v12042_v12  ;;  %v13148_v63 = vld [vmem:[%s12259_s23] sm:$0xff] }
0x2373   : > { %7981 = vmatpush1.bf16.msra.mxu1 %v10154_v32  ;;  %8024 = vmatpush1.bf16.msra.mxu0 %v10156_v24  ;;  %v7318_v32 = vld [vmem:[%s12254_s0 + $0x278] sm:$0xff]  ;;  %v10190_v24 = vcombine.low %v7293_v7, %v7301_v8 }
0x2374   : > { %7982 = vmatprep.subr.bf16.mxu1 %v10171_v27  ;;  %8025 = vmatprep.subr.bf16.mxu0 %v10173_v35  ;;  %v10192_v27 = vcombine.low %v7294_v9, %v7302_v10  ;;  %v10209_v35 = vcombine.high %v7310_v23, %v7318_v32  ;;  %v10208_v15 = vcombine.low %v7310_v23, %v7318_v32 }
0x2377   : > { %7983 = vmatpush1.bf16.msra.mxu1 %v10170_v33  ;;  %8026 = vmatpush1.bf16.msra.mxu0 %v10172_v37  ;;  %v11721_v33 = vld [vmem:[%s12264_s5] sm:$0xff]  }
0x2378   : > { %7984 = vmatprep.subr.bf16.mxu1 %v10187_v38  ;;  %8027 = vmatprep.subr.bf16.mxu0 %v10189_v48  ;;  %v11722_v37 = vld [vmem:[%s12264_s5 + $0x80] sm:$0xff]   ;;  %v11723_v38 = vld [vmem:[%s12264_s5 + $0x48] sm:$0xff]  }
0x2379   : > { %v11724_v48 = vld [vmem:[%s12264_s5 + $0xc8] sm:$0xff]  }
0x237b   : > { %7985 = vmatpush1.bf16.msra.mxu1 %v10186_v51  ;;  %8028 = vmatpush1.bf16.msra.mxu0 %v10188_v16  ;;  %v11729_v51 = vld [vmem:[%s12264_s5 + $0x10] sm:$0xff]  }
0x237c   : > { %7986 = vmatprep.subr.bf16.mxu1 %v10203_v46  ;;  %8029 = vmatprep.subr.bf16.mxu0 %v10205_v2  ;;  %v11730_v16 = vld [vmem:[%s12264_s5 + $0x90] sm:$0xff]   ;;  %v11732_v46 = vld [vmem:[%s12264_s5 + $0xd8] sm:$0xff]  }
0x237d   : > { %v11733_v2 = vld [vmem:[%s12264_s5 + $0x18] sm:$0xff]  }
0x237f   : > { %7987 = vmatpush1.bf16.msra.mxu1 %v10202_v52  ;;  %8030 = vmatpush1.bf16.msra.mxu0 %v10204_v53  ;;  %v11738_v52 = vld [vmem:[%s12264_s5 + $0xa0] sm:$0xff]   ;;  %v11739_v53 = vld [vmem:[%s12264_s5 + $0x68] sm:$0xff]  }
0x2380   : > { %8064 = vmatprep.subr.bf16.mxu1 %v10143_v54  ;;  %8107 = vmatprep.subr.bf16.mxu0 %v10145_v6  ;;  %v11740_v54 = vld [vmem:[%s12264_s5 + $0xe8] sm:$0xff]  }
0x2381   : > { %v11741_v6 = vld [vmem:[%s12264_s5 + $0x28] sm:$0xff]  }
0x2382   : > { %10214 = vmatmul.mubr.msk.bf16.vlgmr.msra.gmra.mrb[60].mxu1 %vm1120_vm4, %v13037_v20  ;;  %10215 = vmatmul.mubr.msk.bf16.vlgmr.msra.gmra.mrb[56].mxu0 %vm1120_vm4, %v13037_v20 }
0x2383   : > { %8065 = vmatpush1.bf16.msra.mxu1 %v10142_v58  ;;  %8108 = vmatpush1.bf16.msra.mxu0 %v10144_v61  ;;  %v11746_v58 = vld [vmem:[%s12264_s5 + $0xb0] sm:$0xff]   ;;  %v11747_v61 = vld [vmem:[%s12264_s5 + $0x78] sm:$0xff]  }
0x2384   : > { %8066 = vmatprep.subr.bf16.mxu1 %v10159_v59  ;;  %8109 = vmatprep.subr.bf16.mxu0 %v10161_v17  ;;  %v11748_v59 = vld [vmem:[%s12264_s5 + $0xf8] sm:$0xff]  }
0x2385   : > { %8096 = vmatprep.mubr.bf16.mxu1 %v12042_v12  ;;  %8139 = vmatprep.mubr.bf16.mxu0 %v12042_v12  ;;  %v10207_v12 = vcombine.high %v7309_v21, %v7317_v22  ;;  %v11749_v17 = vld [vmem:[%s12264_s5 + $0x38] sm:$0xff]  }
0x2387   : > { %8067 = vmatpush1.bf16.msra.mxu1 %v10158_v0  ;;  %8110 = vmatpush1.bf16.msra.mxu0 %v10160_v1  ;;  %v7326_v0 = vrot.slane %v13148_v63, %v12307_v26  ;;  %v7334_v1 = vrot.slane %v13148_v63, %v13017_v39 }
0x2388   : > { %8068 = vmatprep.subr.bf16.mxu1 %v10175_v4  ;;  %8111 = vmatprep.subr.bf16.mxu0 %v10177_v5  ;;  %v7330_v4 = vrot.slane %v13148_v63, %v12311_v28  ;;  %v7338_v5 = vrot.slane %v13148_v63, %v13022_v60 }
0x238b   : > { %8069 = vmatpush1.bf16.msra.mxu1 %v10174_v13  ;;  %8112 = vmatpush1.bf16.msra.mxu0 %v10176_v14 }
0x238c   : > { %8070 = vmatprep.subr.bf16.mxu1 %v10191_v18  ;;  %8113 = vmatprep.subr.bf16.mxu0 %v10193_v44 }
0x238f   : > { %8071 = vmatpush1.bf16.msra.mxu1 %v10190_v24  ;;  %8114 = vmatpush1.bf16.msra.mxu0 %v10192_v27 }
0x2390   : > { %8072 = vmatprep.subr.bf16.mxu1 %v10207_v12  ;;  %8115 = vmatprep.subr.bf16.mxu0 %v10209_v35 }
0x2393   : > { %8073 = vmatpush1.bf16.msra.mxu1 %v10206_v29  ;;  %8116 = vmatpush1.bf16.msra.mxu0 %v10208_v15 }
0x2394   : > { %10583 = vmatprep.subr.bf16.mxu1 %v11719_v30  ;;  %10605 = vmatprep.subr.bf16.mxu0 %v11720_v31 }
0x2396   : > { %10216 = vmatmul.mubr.msk.bf16.vlgmr.msra.gmra.mrb[64].mxu1 %vm1120_vm4, %v13037_v20  ;;  %10217 = vmatmul.mubr.msk.bf16.vlgmr.msra.gmra.mrb[60].mxu0 %vm1120_vm4, %v13037_v20  ;;  %v11731_v20 = vld [vmem:[%s12264_s5 + $0x58] sm:$0xff]  }
0x2397   : > { %10584 = vmatpush3.bf16.msra.mxu1 %v11721_v33  ;;  %10606 = vmatpush3.bf16.msra.mxu0 %v11722_v37 }
0x2398   : > { %10585 = vmatprep.subr.bf16.mxu1 %v11723_v38  ;;  %10607 = vmatprep.subr.bf16.mxu0 %v11724_v48 }
0x239b   : > { %10586 = vmatpush3.bf16.msra.mxu1 %v11725_v19  ;;  %10608 = vmatpush3.bf16.msra.mxu0 %v11726_v40 }
0x239c   : > { %10587 = vmatprep.subr.bf16.mxu1 %v11727_v42  ;;  %10609 = vmatprep.subr.bf16.mxu0 %v11728_v43 }
0x239f   : > { %10588 = vmatpush3.bf16.msra.mxu1 %v11729_v51  ;;  %10610 = vmatpush3.bf16.msra.mxu0 %v11730_v16  ;;  %v11753_v51 = vld [vmem:[%s12264_s5 + $0x100] sm:$0xff]  }
0x23a0   : > { %10589 = vmatprep.subr.bf16.mxu1 %v11731_v20  ;;  %10611 = vmatprep.subr.bf16.mxu0 %v11732_v46  ;;  %v11754_v16 = vld [vmem:[%s12264_s5 + $0x180] sm:$0xff]   ;;  %v11755_v20 = vld [vmem:[%s12264_s5 + $0x148] sm:$0xff]  }
0x23a1   : > { %v11756_v46 = vld [vmem:[%s12264_s5 + $0x1c8] sm:$0xff]  }
0x23a3   : > { %10590 = vmatpush3.bf16.msra.mxu1 %v11733_v2  ;;  %10612 = vmatpush3.bf16.msra.mxu0 %v11734_v47  ;;  %v11757_v2 = vld [vmem:[%s12264_s5 + $0x108] sm:$0xff]  }
0x23a4   : > { %10591 = vmatprep.subr.bf16.mxu1 %v11735_v3  ;;  %10613 = vmatprep.subr.bf16.mxu0 %v11736_v49  ;;  %v11758_v47 = vld [vmem:[%s12264_s5 + $0x188] sm:$0xff]   ;;  %v11759_v3 = vld [vmem:[%s12264_s5 + $0x150] sm:$0xff]  }
0x23a5   : > { %v11760_v49 = vld [vmem:[%s12264_s5 + $0x1d0] sm:$0xff]  }
0x23a7   : > { %10592 = vmatpush3.bf16.msra.mxu1 %v11737_v50  ;;  %10614 = vmatpush3.bf16.msra.mxu0 %v11738_v52  ;;  %v13167_v50 = vsub.s32 4, %v12304_v25  ;;  %v7349_v52 = vsub.s32 6, %v12304_v25 }
0x23a8   : > { %10593 = vmatprep.subr.bf16.mxu1 %v11739_v53  ;;  %10615 = vmatprep.subr.bf16.mxu0 %v11740_v54  ;;  %v13171_v53 = vsub.s32 5, %v12304_v25  ;;  %v7353_v54 = vsub.s32 7, %v12304_v25 }
0x23ab   : > { %10594 = vmatpush3.bf16.msra.mxu1 %v11741_v6  ;;  %10616 = vmatpush3.bf16.msra.mxu0 %v11742_v55  ;;  %v11761_v6 = vld [vmem:[%s12264_s5 + $0x110] sm:$0xff]  }
0x23ac   : > { %10595 = vmatprep.subr.bf16.mxu1 %v11743_v56  ;;  %10617 = vmatprep.subr.bf16.mxu0 %v11744_v11  ;;  %v11762_v55 = vld [vmem:[%s12264_s5 + $0x190] sm:$0xff]   ;;  %v7342_v56 = vrot.slane %v13148_v63, %v13167_v50  ;;  %v7350_v11 = vrot.slane %v13148_v63, %v7349_v52 }
0x23af   : > { %10596 = vmatpush3.bf16.msra.mxu1 %v11745_v57  ;;  %10618 = vmatpush3.bf16.msra.mxu0 %v11746_v58  ;;  %v11763_v57 = vld [vmem:[%s12264_s5 + $0x158] sm:$0xff]  }
0x23b0   : > { %10597 = vmatprep.subr.bf16.mxu1 %v11747_v61  ;;  %10619 = vmatprep.subr.bf16.mxu0 %v11748_v59  ;;  %v11764_v58 = vld [vmem:[%s12264_s5 + $0x1d8] sm:$0xff]   ;;  %v7346_v61 = vrot.slane %v13148_v63, %v13171_v53  ;;  %v7354_v59 = vrot.slane %v13148_v63, %v7353_v54 }
0x23b3   : > { %10598 = vmatpush3.bf16.msra.mxu1 %v11749_v17  ;;  %10620 = vmatpush3.bf16.msra.mxu0 %v11750_v41 }
0x23b4   : > { %10627 = vmatprep.subr.bf16.mxu1 %v11751_v45  ;;  %10649 = vmatprep.subr.bf16.mxu0 %v11752_v62  ;;  %v11765_v45 = vld [vmem:[%s12264_s5 + $0x118] sm:$0xff]  }
0x23b5   : > { %v11766_v62 = vld [vmem:[%s12264_s5 + $0x198] sm:$0xff]  }
0x242d   : > { %v7840_v7 = vpop.f32.mrb[52].mxu1  ;;  %v7883_v8 = vpop.f32.mrb[48].mxu0 }
0x242e   : > { %v7841_v9 = vadd.f32 %v7840_v7, %v7326_v0  ;;  %v7884_v10 = vadd.f32 %v7883_v8, %v7334_v1  ;;  %v7842_v13 = vpop.f32.mrb[53].mxu1  ;;  %v7885_v14 = vpop.f32.mrb[49].mxu0  ;;  %v11767_v7 = vld [vmem:[%s12264_s5 + $0x160] sm:$0xff]  }
0x242f   : > { %v7843_v18 = vadd.f32 %v7842_v13, %v7330_v4  ;;  %v7886_v44 = vadd.f32 %v7885_v14, %v7338_v5  ;;  %v7844_v21 = vpop.f32.mrb[54].mxu1  ;;  %v7887_v22 = vpop.f32.mrb[50].mxu0  ;;  %v11768_v8 = vld [vmem:[%s12264_s5 + $0x1e0] sm:$0xff]  }
0x2430   : > { %v7845_v23 = vadd.f32 %v7844_v21, %v7326_v0  ;;  %v7888_v32 = vadd.f32 %v7887_v22, %v7334_v1  ;;  %v7846_v24 = vpop.f32.mrb[55].mxu1  ;;  %v7889_v27 = vpop.f32.mrb[51].mxu0  ;;  %v8150_v29 = vmax.f32 %v7841_v9, 0.0  ;;  %v8152_v15 = vmax.f32 %v7884_v10, 0.0 }
0x2431   : > { %v7847_v12 = vadd.f32 %v7846_v24, %v7330_v4  ;;  %v7890_v35 = vadd.f32 %v7889_v27, %v7338_v5  ;;  %v8151_v33 = vmax.f32 %v7843_v18, 0.0  ;;  %v8153_v37 = vmax.f32 %v7886_v44, 0.0  ;;  %v11770_v24 = vld [vmem:[%s12264_s5 + $0x1a0] sm:$0xff]  }
0x2432   : > { %v8166_v30 = vmax.f32 %v7845_v23, 0.0  ;;  %v8168_v31 = vmax.f32 %v7888_v32, 0.0  ;;  %v11769_v32 = vld [vmem:[%s12264_s5 + $0x120] sm:$0xff]  }
0x2433   : > { %v8167_v38 = vmax.f32 %v7847_v12, 0.0  ;;  %v8169_v48 = vmax.f32 %v7890_v35, 0.0 }
0x2434   : > { %v8182_v19 = vpack.c.bf16 %v8166_v30, %v8150_v29  ;;  %v8184_v40 = vpack.c.bf16 %v8168_v31, %v8152_v15  ;;  %v11771_v15 = vld [vmem:[%s12264_s5 + $0x168] sm:$0xff]  }
0x2435   : > { %v8183_v42 = vpack.c.bf16 %v8167_v38, %v8151_v33  ;;  %v8185_v43 = vpack.c.bf16 %v8169_v48, %v8153_v37  ;;  %v11772_v30 = vld [vmem:[%s12264_s5 + $0x1e8] sm:$0xff]  }
0x2437   : > { %9261 = vmatprep.mubr.bf16.mxu1 %v8183_v42  ;;  %9302 = vmatprep.mubr.bf16.mxu0 %v8185_v43  ;;  %v11773_v43 = vld [vmem:[%s12264_s5 + $0x128] sm:$0xff]  }
0x2438   : > { %9262 = vmatmul.mubr.bf16.vlgmr.msra.gmra.mrb[68].mxu1 %v8182_v19  ;;  %9303 = vmatmul.mubr.bf16.vlgmr.msra.gmra.mrb[64].mxu0 %v8184_v40 }
0x2439   : > { %10628 = vmatpush3.bf16.msra.mxu1 %v11753_v51  ;;  %10650 = vmatpush3.bf16.msra.mxu0 %v11754_v16  ;;  %v11774_v51 = vld [vmem:[%s12264_s5 + $0x1a8] sm:$0xff]   ;;  %v11775_v16 = vld [vmem:[%s12264_s5 + $0x170] sm:$0xff]  }
0x243a   : > { %10629 = vmatprep.subr.bf16.mxu1 %v11755_v20  ;;  %10651 = vmatprep.subr.bf16.mxu0 %v11756_v46  ;;  %v11776_v20 = vld [vmem:[%s12264_s5 + $0x1f0] sm:$0xff]  }
0x243b   : > { %v11777_v46 = vld [vmem:[%s12264_s5 + $0x130] sm:$0xff]  }
0x243d   : > { %10630 = vmatpush3.bf16.msra.mxu1 %v11757_v2  ;;  %10652 = vmatpush3.bf16.msra.mxu0 %v11758_v47  ;;  %v11778_v2 = vld [vmem:[%s12264_s5 + $0x1b0] sm:$0xff]   ;;  %v11779_v47 = vld [vmem:[%s12264_s5 + $0x178] sm:$0xff]  }
0x243e   : > { %10631 = vmatprep.subr.bf16.mxu1 %v11759_v3  ;;  %10653 = vmatprep.subr.bf16.mxu0 %v11760_v49  ;;  %v11780_v3 = vld [vmem:[%s12264_s5 + $0x1f8] sm:$0xff]   ;;  %v13205_v49 = vld [vmem:[%s12259_s23 + $0x8] sm:$0xff] }
0x2441   : > { %v7926_v17 = vpop.f32.mrb[56].mxu1  ;;  %v7969_v41 = vpop.f32.mrb[52].mxu0  ;;  %10632 = vmatpush3.bf16.msra.mxu1 %v11761_v6  ;;  %10654 = vmatpush3.bf16.msra.mxu0 %v11762_v55  ;;  %v11781_v6 = vld [vmem:[%s12264_s5 + $0x138] sm:$0xff]  }
0x2442   : > { %v7927_v0 = vadd.f32 %v7926_v17, %v7342_v56  ;;  %v7970_v1 = vadd.f32 %v7969_v41, %v7350_v11  ;;  %v7928_v4 = vpop.f32.mrb[57].mxu1  ;;  %v7971_v5 = vpop.f32.mrb[53].mxu0  ;;  %10633 = vmatprep.subr.bf16.mxu1 %v11763_v57  ;;  %10655 = vmatprep.subr.bf16.mxu0 %v11764_v58  ;;  %v11782_v55 = vld [vmem:[%s12264_s5 + $0x1b8] sm:$0xff]   ;;  %v11783_v57 = vld [vmem:[%s12264_s5 + $0x240] sm:$0xff]  }
0x2443   : > { %v7929_v9 = vadd.f32 %v7928_v4, %v7346_v61  ;;  %v7972_v10 = vadd.f32 %v7971_v5, %v7354_v59  ;;  %v7930_v13 = vpop.f32.mrb[58].mxu1  ;;  %v7973_v63 = vpop.f32.mrb[54].mxu0  ;;  %v11784_v58 = vld [vmem:[%s12264_s5 + $0x2c0] sm:$0xff]   ;;  %v11787_v4 = vld [vmem:[%s12264_s5 + $0x248] sm:$0xff]  }
0x2444   : > { %v7931_v14 = vadd.f32 %v7930_v13, %v7342_v56  ;;  %v7974_v18 = vadd.f32 %v7973_v63, %v7350_v11  ;;  %v7932_v44 = vpop.f32.mrb[59].mxu1  ;;  %v7975_v21 = vpop.f32.mrb[55].mxu0  ;;  %v8154_v27 = vmax.f32 %v7927_v0, 0.0  ;;  %v8156_v12 = vmax.f32 %v7970_v1, 0.0  ;;  %v11788_v5 = vld [vmem:[%s12264_s5 + $0x2c8] sm:$0xff]  }
0x2445   : > { %v7933_v22 = vadd.f32 %v7932_v44, %v7346_v61  ;;  %v7976_v23 = vadd.f32 %v7975_v21, %v7354_v59  ;;  %10634 = vmatpush3.bf16.msra.mxu1 %v11765_v45  ;;  %10656 = vmatpush3.bf16.msra.mxu0 %v11766_v62  ;;  %v8155_v31 = vmax.f32 %v7929_v9, 0.0  ;;  %v8157_v33 = vmax.f32 %v7972_v10, 0.0  ;;  %v11785_v45 = vld [vmem:[%s12264_s5 + $0x200] sm:$0xff]   ;;  %v11789_v44 = vld [vmem:[%s12264_s5 + $0x208] sm:$0xff]  }
0x2446   : > { %v8170_v35 = vmax.f32 %v7931_v14, 0.0  ;;  %v8172_v29 = vmax.f32 %v7974_v18, 0.0  ;;  %10635 = vmatprep.subr.bf16.mxu1 %v11767_v7  ;;  %10657 = vmatprep.subr.bf16.mxu0 %v11768_v8  ;;  %v7358_v56 = vrot.slane %v13205_v49, %v12307_v26  ;;  %v7366_v11 = vrot.slane %v13205_v49, %v13017_v39  ;;  %v11786_v62 = vld [vmem:[%s12264_s5 + $0x280] sm:$0xff]   ;;  %v11790_v21 = vld [vmem:[%s12264_s5 + $0x288] sm:$0xff]  }
0x2447   : > { %v8171_v37 = vmax.f32 %v7933_v22, 0.0  ;;  %v8173_v38 = vmax.f32 %v7976_v23, 0.0  ;;  %v7362_v61 = vrot.slane %v13205_v49, %v12311_v28  ;;  %v7370_v59 = vrot.slane %v13205_v49, %v13022_v60 }
0x2448   : > { %v8186_v48 = vpack.c.bf16 %v8170_v35, %v8154_v27  ;;  %v8188_v19 = vpack.c.bf16 %v8172_v29, %v8156_v12  ;;  %v11791_v27 = vld [vmem:[%s12264_s5 + $0x250] sm:$0xff]  }
0x2449   : > { %v8187_v40 = vpack.c.bf16 %v8171_v37, %v8155_v31  ;;  %v8189_v42 = vpack.c.bf16 %v8173_v38, %v8157_v33  ;;  %10636 = vmatpush3.bf16.msra.mxu1 %v11769_v32  ;;  %10658 = vmatpush3.bf16.msra.mxu0 %v11770_v24  ;;  %v11792_v12 = vld [vmem:[%s12264_s5 + $0x2d0] sm:$0xff]  }
0x244a   : > { %10637 = vmatprep.subr.bf16.mxu1 %v11771_v15  ;;  %10659 = vmatprep.subr.bf16.mxu0 %v11772_v30 }
0x244b   : > { %9343 = vmatprep.mubr.bf16.mxu1 %v8187_v40  ;;  %9384 = vmatprep.mubr.bf16.mxu0 %v8189_v42  ;;  %v11795_v40 = vld [vmem:[%s12264_s5 + $0x258] sm:$0xff]  }
0x244c   : > { %v11796_v42 = vld [vmem:[%s12264_s5 + $0x2d8] sm:$0xff]  }
0x244d   : > { %10638 = vmatpush3.bf16.msra.mxu1 %v11773_v43  ;;  %10660 = vmatpush3.bf16.msra.mxu0 %v11774_v51  ;;  %v11797_v43 = vld [vmem:[%s12264_s5 + $0x218] sm:$0xff]  }
0x244e   : > { %10639 = vmatprep.subr.bf16.mxu1 %v11775_v16  ;;  %10661 = vmatprep.subr.bf16.mxu0 %v11776_v20  ;;  %v11798_v51 = vld [vmem:[%s12264_s5 + $0x298] sm:$0xff]   ;;  %v11799_v16 = vld [vmem:[%s12264_s5 + $0x260] sm:$0xff]  }
0x244f   : > { %v11800_v20 = vld [vmem:[%s12264_s5 + $0x2e0] sm:$0xff]  }
0x2451   : > { %10640 = vmatpush3.bf16.msra.mxu1 %v11777_v46  ;;  %10662 = vmatpush3.bf16.msra.mxu0 %v11778_v2  ;;  %v11801_v46 = vld [vmem:[%s12264_s5 + $0x220] sm:$0xff]  }
0x2452   : > { %10641 = vmatprep.subr.bf16.mxu1 %v11779_v47  ;;  %10663 = vmatprep.subr.bf16.mxu0 %v11780_v3  ;;  %v11802_v2 = vld [vmem:[%s12264_s5 + $0x2a0] sm:$0xff]   ;;  %v7374_v47 = vrot.slane %v13205_v49, %v13167_v50  ;;  %v7382_v3 = vrot.slane %v13205_v49, %v7349_v52 }
0x2455   : > { %v8012_v17 = vpop.f32.mrb[60].mxu1  ;;  %v8055_v41 = vpop.f32.mrb[56].mxu0  ;;  %10642 = vmatpush3.bf16.msra.mxu1 %v11781_v6  ;;  %10664 = vmatpush3.bf16.msra.mxu0 %v11782_v55  ;;  %v11803_v6 = vld [vmem:[%s12264_s5 + $0x268] sm:$0xff]  }
0x2456   : > { %v8013_v26 = vadd.f32 %v8012_v17, %v7358_v56  ;;  %v8056_v0 = vadd.f32 %v8055_v41, %v7366_v11  ;;  %v8014_v1 = vpop.f32.mrb[61].mxu1  ;;  %v8057_v39 = vpop.f32.mrb[57].mxu0  ;;  %10671 = vmatprep.subr.bf16.mxu1 %v11783_v57  ;;  %10693 = vmatprep.subr.bf16.mxu0 %v11784_v58  ;;  %v11804_v55 = vld [vmem:[%s12264_s5 + $0x2e8] sm:$0xff]  }
0x2457   : > { %v8015_v28 = vadd.f32 %v8014_v1, %v7362_v61  ;;  %v8058_v7 = vadd.f32 %v8057_v39, %v7370_v59  ;;  %v8016_v8 = vpop.f32.mrb[62].mxu1  ;;  %v8059_v60 = vpop.f32.mrb[58].mxu0 }
0x2458   : > { %v8017_v9 = vadd.f32 %v8016_v8, %v7358_v56  ;;  %v8060_v10 = vadd.f32 %v8059_v60, %v7366_v11  ;;  %v8018_v13 = vpop.f32.mrb[63].mxu1  ;;  %v8061_v63 = vpop.f32.mrb[59].mxu0  ;;  %9344 = vmatmul.mubr.bf16.vlgmr.msra.gmra.mrb[72].mxu1 %v8186_v48  ;;  %9385 = vmatmul.mubr.bf16.vlgmr.msra.gmra.mrb[68].mxu0 %v8188_v19  ;;  %v8158_v22 = vmax.f32 %v8013_v26, 0.0  ;;  %v8160_v23 = vmax.f32 %v8056_v0, 0.0  ;;  %v11793_v48 = vld [vmem:[%s12264_s5 + $0x210] sm:$0xff]  }
0x2459   : > { %v8019_v14 = vadd.f32 %v8018_v13, %v7362_v61  ;;  %v8062_v18 = vadd.f32 %v8061_v63, %v7370_v59  ;;  %10672 = vmatpush3.bf16.msra.mxu1 %v11785_v45  ;;  %10694 = vmatpush3.bf16.msra.mxu0 %v11786_v62  ;;  %v8159_v35 = vmax.f32 %v8015_v28, 0.0  ;;  %v8161_v29 = vmax.f32 %v8058_v7, 0.0  ;;  %v11794_v19 = vld [vmem:[%s12264_s5 + $0x290] sm:$0xff]   ;;  %v11805_v61 = vld [vmem:[%s12264_s5 + $0x228] sm:$0xff]  }
0x245a   : > { %v8174_v32 = vmax.f32 %v8017_v9, 0.0  ;;  %v8176_v24 = vmax.f32 %v8060_v10, 0.0  ;;  %10673 = vmatprep.subr.bf16.mxu1 %v11787_v4  ;;  %10695 = vmatprep.subr.bf16.mxu0 %v11788_v5  ;;  %v7378_v56 = vrot.slane %v13205_v49, %v13171_v53  ;;  %v7386_v11 = vrot.slane %v13205_v49, %v7353_v54  ;;  %v11806_v59 = vld [vmem:[%s12264_s5 + $0x2a8] sm:$0xff]   ;;  %v11807_v62 = vld [vmem:[%s12264_s5 + $0x270] sm:$0xff]  }
0x245b   : > { %v8175_v15 = vmax.f32 %v8019_v14, 0.0  ;;  %v8177_v30 = vmax.f32 %v8062_v18, 0.0  ;;  %v11808_v26 = vld [vmem:[%s12264_s5 + $0x2f0] sm:$0xff]   ;;  %v11811_v14 = vld [vmem:[%s12264_s5 + $0x278] sm:$0xff]  }
0x245c   : > { %v13227_v31 = vpack.c.bf16 %v8174_v32, %v8158_v22  ;;  %v13229_v33 = vpack.c.bf16 %v8176_v24, %v8160_v23  ;;  %v11809_v8 = vld [vmem:[%s12264_s5 + $0x230] sm:$0xff]   ;;  %v11812_v18 = vld [vmem:[%s12264_s5 + $0x2f8] sm:$0xff]  }
0x245d   : > { %v8191_v37 = vpack.c.bf16 %v8175_v15, %v8159_v35  ;;  %v8193_v38 = vpack.c.bf16 %v8177_v30, %v8161_v29  ;;  %10674 = vmatpush3.bf16.msra.mxu1 %v11789_v44  ;;  %10696 = vmatpush3.bf16.msra.mxu0 %v11790_v21  ;;  %v11810_v60 = vld [vmem:[%s12264_s5 + $0x2b0] sm:$0xff]   ;;  %v11813_v35 = vld [vmem:[%s12264_s5 + $0x238] sm:$0xff]   ;;  %v11815_v15 = vld [vmem:[%s12264_s5 + $0x340] sm:$0xff]  }
0x245e   : > { %10675 = vmatprep.subr.bf16.mxu1 %v11791_v27  ;;  %10697 = vmatprep.subr.bf16.mxu0 %v11792_v12  ;;  %v11814_v29 = vld [vmem:[%s12264_s5 + $0x2b8] sm:$0xff]   ;;  %v11816_v30 = vld [vmem:[%s12264_s5 + $0x3c0] sm:$0xff]  }
0x245f   : > { %9425 = vmatprep.mubr.bf16.mxu1 %v8191_v37  ;;  %9466 = vmatprep.mubr.bf16.mxu0 %v8193_v38  ;;  %v11817_v37 = vld [vmem:[%s12264_s5 + $0x300] sm:$0xff]  }
0x2460   : > { %v11818_v38 = vld [vmem:[%s12264_s5 + $0x380] sm:$0xff]  }
0x2461   : > { %10676 = vmatpush3.bf16.msra.mxu1 %v11793_v48  ;;  %10698 = vmatpush3.bf16.msra.mxu0 %v11794_v19  ;;  %v11819_v48 = vld [vmem:[%s12264_s5 + $0x348] sm:$0xff]  }
0x2462   : > { %10677 = vmatprep.subr.bf16.mxu1 %v11795_v40  ;;  %10699 = vmatprep.subr.bf16.mxu0 %v11796_v42  ;;  %v11820_v19 = vld [vmem:[%s12264_s5 + $0x3c8] sm:$0xff]  }
0x2463   : > { %v11821_v40 = vld [vmem:[%s12264_s5 + $0x308] sm:$0xff]  }
0x2464   : > { %v11822_v42 = vld [vmem:[%s12264_s5 + $0x388] sm:$0xff]  }
0x2465   : > { %10678 = vmatpush3.bf16.msra.mxu1 %v11797_v43  ;;  %10700 = vmatpush3.bf16.msra.mxu0 %v11798_v51  ;;  %v11823_v43 = vld [vmem:[%s12264_s5 + $0x350] sm:$0xff]  }
0x2466   : > { %10679 = vmatprep.subr.bf16.mxu1 %v11799_v16  ;;  %10701 = vmatprep.subr.bf16.mxu0 %v11800_v20  ;;  %v11824_v51 = vld [vmem:[%s12264_s5 + $0x3d0] sm:$0xff]   ;;  %v11827_v16 = vld [vmem:[%s12264_s5 + $0x358] sm:$0xff]  }
0x2467   : > { %v11828_v20 = vld [vmem:[%s12264_s5 + $0x3d8] sm:$0xff]  }
0x2469   : > { %v8098_v57 = vpop.f32.mrb[64].mxu1  ;;  %v8141_v58 = vpop.f32.mrb[60].mxu0  ;;  %10680 = vmatpush3.bf16.msra.mxu1 %v11801_v46  ;;  %10702 = vmatpush3.bf16.msra.mxu0 %v11802_v2  ;;  %v11829_v46 = vld [vmem:[%s12264_s5 + $0x318] sm:$0xff]  }
0x246a   : > { %v8099_v17 = vadd.f32 %v8098_v57, %v7374_v47  ;;  %v8142_v41 = vadd.f32 %v8141_v58, %v7382_v3  ;;  %v8100_v52 = vpop.f32.mrb[65].mxu1  ;;  %v8143_v45 = vpop.f32.mrb[61].mxu0  ;;  %10681 = vmatprep.subr.bf16.mxu1 %v11803_v6  ;;  %10703 = vmatprep.subr.bf16.mxu0 %v11804_v55  ;;  %v11830_v2 = vld [vmem:[%s12264_s5 + $0x398] sm:$0xff]   ;;  %v11833_v6 = vld [vmem:[%s12264_s5 + $0x320] sm:$0xff]   ;;  %v11837_v57 = vld [vmem:[%s12264_s5 + $0x328] sm:$0xff]  }
0x246b   : > { %v8101_v0 = vadd.f32 %v8100_v52, %v7378_v56  ;;  %v8144_v25 = vadd.f32 %v8143_v45, %v7386_v11  ;;  %v8102_v1 = vpop.f32.mrb[66].mxu1  ;;  %v8145_v54 = vpop.f32.mrb[62].mxu0  ;;  %v11834_v55 = vld [vmem:[%s12264_s5 + $0x3a0] sm:$0xff]   ;;  %v11838_v58 = vld [vmem:[%s12264_s5 + $0x3a8] sm:$0xff]   ;;  %v11843_v52 = vld [vmem:[%s12264_s5 + $0x378] sm:$0xff]  }
0x246c   : > { %v8103_v49 = vadd.f32 %v8102_v1, %v7374_v47  ;;  %v8146_v39 = vadd.f32 %v8145_v54, %v7382_v3  ;;  %v8104_v4 = vpop.f32.mrb[67].mxu1  ;;  %v8147_v5 = vpop.f32.mrb[63].mxu0  ;;  %v8162_v9 = vmax.f32 %v8099_v17, 0.0  ;;  %v8164_v10 = vmax.f32 %v8142_v41, 0.0  ;;  %v11831_v47 = vld [vmem:[%s12264_s5 + $0x360] sm:$0xff]   ;;  %v11841_v17 = vld [vmem:[%s12264_s5 + $0x330] sm:$0xff]  }
0x246d   : > { %v8105_v28 = vadd.f32 %v8104_v4, %v7378_v56  ;;  %v8148_v7 = vadd.f32 %v8147_v5, %v7386_v11  ;;  %10682 = vmatpush3.bf16.msra.mxu1 %v11805_v61  ;;  %10704 = vmatpush3.bf16.msra.mxu0 %v11806_v59  ;;  %v8163_v44 = vmax.f32 %v8101_v0, 0.0  ;;  %v8165_v21 = vmax.f32 %v8144_v25, 0.0  ;;  %v11832_v3 = vld [vmem:[%s12264_s5 + $0x3e0] sm:$0xff]   ;;  %v11835_v56 = vld [vmem:[%s12264_s5 + $0x368] sm:$0xff]   ;;  %v11839_v61 = vld [vmem:[%s12264_s5 + $0x370] sm:$0xff]  }
0x246e   : > { %v8178_v13 = vmax.f32 %v8103_v49, 0.0  ;;  %v8180_v63 = vmax.f32 %v8146_v39, 0.0  ;;  %10683 = vmatprep.subr.bf16.mxu1 %v11807_v62  ;;  %10705 = vmatprep.subr.bf16.mxu0 %v11808_v26  ;;  %v11836_v11 = vld [vmem:[%s12264_s5 + $0x3e8] sm:$0xff]   ;;  %v11840_v59 = vld [vmem:[%s12264_s5 + $0x3f0] sm:$0xff]   ;;  %v11844_v45 = vld [vmem:[%s12264_s5 + $0x3f8] sm:$0xff]  }
0x246f   : > { %v8179_v22 = vmax.f32 %v8105_v28, 0.0  ;;  %v8181_v23 = vmax.f32 %v8148_v7, 0.0  ;;  %v11842_v41 = vld [vmem:[%s12264_s5 + $0x3b0] sm:$0xff]   ;;  %v11845_v62 = vld [vmem:[%s12264_s5 + $0x338] sm:$0xff]   ;;  %v10218_v1 = vld [vmem:[%s13459_s12] ss:$0 sm:$0xff] }
0x2470   : > { %v13261_v32 = vpack.c.bf16 %v8178_v13, %v8162_v9  ;;  %v13263_v24 = vpack.c.bf16 %v8180_v63, %v8164_v10  ;;  %v11846_v26 = vld [vmem:[%s12264_s5 + $0x3b8] sm:$0xff]  }
0x2471   : > { %v8195_v27 = vpack.c.bf16 %v8179_v22, %v8163_v44  ;;  %v8197_v12 = vpack.c.bf16 %v8181_v23, %v8165_v21  ;;  %10684 = vmatpush3.bf16.msra.mxu1 %v11809_v8  ;;  %10706 = vmatpush3.bf16.msra.mxu0 %v11810_v60 }
0x2472   : > { %10685 = vmatprep.subr.bf16.mxu1 %v11811_v14  ;;  %10707 = vmatprep.subr.bf16.mxu0 %v11812_v18 }
0x2475   : > { %10686 = vmatpush3.bf16.msra.mxu1 %v11813_v35  ;;  %10708 = vmatpush3.bf16.msra.mxu0 %v11814_v29 }
0x2476   : > { %10715 = vmatprep.subr.bf16.mxu1 %v11815_v15  ;;  %10737 = vmatprep.subr.bf16.mxu0 %v11816_v30 }
0x2478   : > { %9426 = vmatmul.mubr.bf16.vlgmr.msra.gmra.mrb[76].mxu1 %v13227_v31  ;;  %9467 = vmatmul.mubr.bf16.vlgmr.msra.gmra.mrb[72].mxu0 %v13229_v33  ;;  %v11825_v31 = vld [vmem:[%s12264_s5 + $0x310] sm:$0xff]  }
0x2479   : > { %10716 = vmatpush3.bf16.msra.mxu1 %v11817_v37  ;;  %9507 = vmatprep.mubr.bf16.mxu1 %v8195_v27  ;;  %v11826_v33 = vld [vmem:[%s12264_s5 + $0x390] sm:$0xff]  }
0x247a   : > { %10738 = vmatpush3.bf16.msra.mxu0 %v11818_v38  ;;  %9548 = vmatprep.mubr.bf16.mxu0 %v8197_v12 }
0x247b   : > { %10717 = vmatprep.subr.bf16.mxu1 %v11819_v48  ;;  %10739 = vmatprep.subr.bf16.mxu0 %v11820_v19 }
0x247d   : > { %10718 = vmatpush3.bf16.msra.mxu1 %v11821_v40 }
0x247e   : > { %10740 = vmatpush3.bf16.msra.mxu0 %v11822_v42  ;;  %10719 = vmatprep.subr.bf16.mxu1 %v11823_v43 }
0x247f   : > { %10741 = vmatprep.subr.bf16.mxu0 %v11824_v51 }
0x2481   : > { %10720 = vmatpush3.bf16.msra.mxu1 %v11825_v31 }
0x2482   : > { %10742 = vmatpush3.bf16.msra.mxu0 %v11826_v33  ;;  %10721 = vmatprep.subr.bf16.mxu1 %v11827_v16 }
0x2483   : > { %10743 = vmatprep.subr.bf16.mxu0 %v11828_v20 }
0x2485   : > { %10722 = vmatpush3.bf16.msra.mxu1 %v11829_v46 }
0x2486   : > { %10744 = vmatpush3.bf16.msra.mxu0 %v11830_v2  ;;  %10723 = vmatprep.subr.bf16.mxu1 %v11831_v47 }
0x2487   : > { %10745 = vmatprep.subr.bf16.mxu0 %v11832_v3 }
0x2489   : > { %10724 = vmatpush3.bf16.msra.mxu1 %v11833_v6 }
0x248a   : > { %10746 = vmatpush3.bf16.msra.mxu0 %v11834_v55  ;;  %10725 = vmatprep.subr.bf16.mxu1 %v11835_v56 }
0x248b   : > { %10747 = vmatprep.subr.bf16.mxu0 %v11836_v11 }
0x248d   : > { %10726 = vmatpush3.bf16.msra.mxu1 %v11837_v57 }
0x248e   : > { %10748 = vmatpush3.bf16.msra.mxu0 %v11838_v58  ;;  %10727 = vmatprep.subr.bf16.mxu1 %v11839_v61 }
0x248f   : > { %10749 = vmatprep.subr.bf16.mxu0 %v11840_v59 }
0x2491   : > { %10728 = vmatpush3.bf16.msra.mxu1 %v11841_v17 }
0x2492   : > { %10750 = vmatpush3.bf16.msra.mxu0 %v11842_v41  ;;  %10729 = vmatprep.subr.bf16.mxu1 %v11843_v52 }
0x2493   : > { %10751 = vmatprep.subr.bf16.mxu0 %v11844_v45 }
0x2495   : > { %10730 = vmatpush3.bf16.msra.mxu1 %v11845_v62 }
0x2496   : > { %10752 = vmatpush3.bf16.msra.mxu0 %v11846_v26 }
0x2498   : > { %9508 = vmatmul.mubr.bf16.vlgmr.msra.gmra.mrb[80].mxu1 %v13261_v32 }
0x2499   : > { %9549 = vmatmul.mubr.bf16.vlgmr.msra.gmra.mrb[76].mxu0 %v13263_v24 }
0x250b   : > { %v10599_v0 = vpop.f32.mrb[68].mxu1  ;;  %v10621_v25 = vpop.f32.mrb[64].mxu0 }
0x250c   : > { %v10600_v54 = vpop.f32.mrb[69].mxu1  ;;  %v10622_v49 = vpop.f32.mrb[65].mxu0 }
0x250d   : > { %v10601_v39 = vadd.f32 %v10600_v54, %v10599_v0  ;;  %v10623_v4 = vadd.f32 %v10622_v49, %v10621_v25  ;;  %v10602_v5 = vpop.f32.mrb[70].mxu1  ;;  %v10624_v28 = vpop.f32.mrb[66].mxu0 }
0x250e   : > { %v10603_v7 = vpop.f32.mrb[71].mxu1  ;;  %v10625_v8 = vpop.f32.mrb[67].mxu0 }
0x250f   : > { %v9264_v60 = vadd.f32 %v10601_v39, %v10218_v1  ;;  %v10604_v9 = vadd.f32 %v10603_v7, %v10602_v5  ;;  %v10626_v10 = vadd.f32 %v10625_v8, %v10624_v28 }
0x2511   : > { %v9305_v13 = vadd.f32 %v10623_v4, %v9264_v60  ;;  %v9267_v63 = vadd.f32 %v10604_v9, %v10218_v1 }
0x2513   : > { %v9308_v14 = vadd.f32 %v10626_v10, %v9267_v63 }
0x252b   : > { %v10643_v18 = vpop.f32.mrb[72].mxu1  ;;  %v10665_v44 = vpop.f32.mrb[68].mxu0 }
0x252c   : > { %v10644_v21 = vpop.f32.mrb[73].mxu1  ;;  %v10666_v22 = vpop.f32.mrb[69].mxu0 }
0x252d   : > { %v10645_v23 = vadd.f32 %v10644_v21, %v10643_v18  ;;  %v10667_v32 = vadd.f32 %v10666_v22, %v10665_v44  ;;  %v10646_v24 = vpop.f32.mrb[74].mxu1  ;;  %v10668_v27 = vpop.f32.mrb[70].mxu0 }
0x252e   : > { %v10647_v12 = vpop.f32.mrb[75].mxu1  ;;  %v10669_v35 = vpop.f32.mrb[71].mxu0 }
0x252f   : > { %v9346_v29 = vadd.f32 %v10645_v23, %v9305_v13  ;;  %v10648_v15 = vadd.f32 %v10647_v12, %v10646_v24  ;;  %v10670_v30 = vadd.f32 %v10669_v35, %v10668_v27  ;;  %v12025_v24 = vld [vmem:[%s12274_s7] sm:$0x3f] }
0x2530   : > { %v9588_v27 = vrot.slane %v12025_v24, %v13167_v50  ;;  %v9594_v35 = vrot.slane %v12025_v24, %v13171_v53  ;;  %v9603_v50 = vld [vmem:[%s13461_s28] sm:$0xff] (!%p10347_p5)  ;;  %v9604_v53 = vld [vmem:[%s13461_s28 + $0x8] sm:$0xff] (!%p10347_p5) }
0x2531   : > { %v9387_v37 = vadd.f32 %v10667_v32, %v9346_v29  ;;  %v9349_v38 = vadd.f32 %v10648_v15, %v9308_v14 }
0x2533   : > { %v9390_v48 = vadd.f32 %v10670_v30, %v9349_v38 }
0x254b   : > { %v10687_v19 = vpop.f32.mrb[76].mxu1  ;;  %v10709_v40 = vpop.f32.mrb[72].mxu0 }
0x254c   : > { %v10688_v42 = vpop.f32.mrb[77].mxu1  ;;  %v10710_v43 = vpop.f32.mrb[73].mxu0 }
0x254d   : > { %v10689_v51 = vadd.f32 %v10688_v42, %v10687_v19  ;;  %v10711_v31 = vadd.f32 %v10710_v43, %v10709_v40  ;;  %v10690_v33 = vpop.f32.mrb[78].mxu1  ;;  %v10712_v16 = vpop.f32.mrb[74].mxu0  ;;  %v9605_v40 = vld [vmem:[%s13461_s28 + $0x10] sm:$0xff] (!%p10347_p5)  ;;  %v11413_v42 = vpack.c.bf16 (!%p10347_p5), %v9604_v53, %v9603_v50  ;;  %v9606_v43 = vld [vmem:[%s13461_s28 + $0x18] sm:$0xff] (!%p10347_p5) }
0x254e   : > { %v10691_v20 = vpop.f32.mrb[79].mxu1  ;;  %v10713_v46 = vpop.f32.mrb[75].mxu0 }
0x254f   : > { %v9428_v2 = vadd.f32 %v10689_v51, %v9387_v37  ;;  %v10692_v47 = vadd.f32 %v10691_v20, %v10690_v33  ;;  %v10714_v3 = vadd.f32 %v10713_v46, %v10712_v16  ;;  %v11417_v51 = vpack.c.bf16 (!%p10347_p5), %v9606_v43, %v9605_v40  ;;  %v9608_v33 = vld [vmem:[%s13461_s28 + $0x28] sm:$0xff] (!%p10347_p5)  ;;  %11414 = vmatprep.subr.bf16.mxu0 (!%p10347_p5), %v11413_v42  ;;  %v9609_v20 = vld [vmem:[%s13461_s28 + $0x30] sm:$0xff] (!%p10347_p5)  ;;  %v9610_v46 = vld [vmem:[%s13461_s28 + $0x38] sm:$0xff] (!%p10347_p5) }
0x2550   : > { %11416 = vmatpush3.bf16.msra.mxu0 (!%p10347_p5), %v11413_v42 }
0x2551   : > { %v9469_v6 = vadd.f32 %v10711_v31, %v9428_v2  ;;  %v9431_v55 = vadd.f32 %v10692_v47, %v9390_v48  ;;  %v9607_v31 = vld [vmem:[%s13461_s28 + $0x20] sm:$0xff] (!%p10347_p5)  ;;  %11418 = vmatprep.subr.bf16.mxu0 (!%p10347_p5), %v11417_v51  ;;  %v11425_v2 = vpack.c.bf16 (!%p10347_p5), %v9610_v46, %v9609_v20 }
0x2552   : > { %v11421_v16 = vpack.c.bf16 (!%p10347_p5), %v9608_v33, %v9607_v31  ;;  %v9611_v47 = vld [vmem:[%s13461_s28 + $0x40] sm:$0xff] (!%p10347_p5) }
0x2553   : > { %v9472_v56 = vadd.f32 %v10714_v3, %v9431_v55  ;;  %v9612_v3 = vld [vmem:[%s13461_s28 + $0x48] sm:$0xff] (!%p10347_p5)  ;;  %v10348_v55 = vld [vmem:[#allocation3] ss:$0 sm:$0xff] (!%p10347_p5) }
0x2554   : > { %11420 = vmatpush3.bf16.msra.mxu0 (!%p10347_p5), %v11417_v51 }
0x2555   : > { %11422 = vmatprep.subr.bf16.mxu0 (!%p10347_p5), %v11421_v16 }
0x2558   : > { %11424 = vmatpush3.bf16.msra.mxu0 (!%p10347_p5), %v11421_v16 }
0x2559   : > { %11426 = vmatprep.subr.bf16.mxu0 (!%p10347_p5), %v11425_v2 }
0x255c   : > { %11428 = vmatpush3.bf16.msra.mxu0 (!%p10347_p5), %v11425_v2 }
0x256b   : > { %v10731_v11 = vpop.f32.mrb[80].mxu1 }
0x256c   : > { %v10753_v57 = vpop.f32.mrb[76].mxu0  ;;  %v10732_v58 = vpop.f32.mrb[81].mxu1 }
0x256d   : > { %v10733_v61 = vadd.f32 %v10732_v58, %v10731_v11  ;;  %v10754_v59 = vpop.f32.mrb[77].mxu0  ;;  %v10734_v17 = vpop.f32.mrb[82].mxu1 }
0x256e   : > { %v10755_v41 = vadd.f32 %v10754_v59, %v10753_v57  ;;  %v10756_v52 = vpop.f32.mrb[78].mxu0  ;;  %v10735_v45 = vpop.f32.mrb[83].mxu1 }
0x256f   : > { %v9510_v62 = vadd.f32 %v10733_v61, %v9469_v6  ;;  %v10736_v26 = vadd.f32 %v10735_v45, %v10734_v17  ;;  %v10757_v0 = vpop.f32.mrb[79].mxu0  ;;  %v11429_v6 = vpack.c.bf16 (!%p10347_p5), %v9612_v3, %v9611_v47 }
0x2570   : > { %v10758_v25 = vadd.f32 %v10757_v0, %v10756_v52 }
0x2571   : > { %v9551_v1 = vadd.f32 %v10755_v41, %v9510_v62  ;;  %v9513_v54 = vadd.f32 %v10736_v26, %v9472_v56  ;;  %11430 = vmatprep.subr.bf16.mxu0 (!%p10347_p5), %v11429_v6 }
0x2572   : > { %11432 = vmatpush3.bf16.msra.mxu0 (!%p10347_p5), %v11429_v6 }
0x2573   : > { %v9554_v49 = vadd.f32 %v10758_v25, %v9513_v54  ;;  %v9557_v39 = vadd.f32 %v9551_v1, %v13031_v34 }
0x2575   : > { %v9559_v4 = vsel %vm1120_vm4, %v9557_v39, 0.0  ;;  %v9558_v5 = vadd.f32 %v9554_v49, %v13033_v36 }
0x2576   : > { %9560 = vadd.xlane.f32.xlu0 %v9559_v4 }
0x2577   : > { %v9562_v28 = vsel %vm4069_vm12, %v9558_v5, 0.0 }
0x257a   : > { %9563 = vadd.xlane.f32.xlu0 %v9562_v28 }
0x2603   : > { %v9561_v7 = vpop.xlane.xlu0 %9560 }
0x2604   : > { %v9565_v8 = vmul.f32 0.0125, %v9561_v7 }
0x2606   : > { %v9567_v60 = vsub.f32 %v9557_v39, %v9565_v8 }
0x2607   : > { %v9564_v9 = vpop.xlane.xlu0 %9563 }
0x2608   : > { %v9566_v10 = vmul.f32 0.0125, %v9564_v9  ;;  %v9569_v13 = vmul.f32 %v9567_v60, %v9567_v60 }
0x260a   : > { %v9568_v63 = vsub.f32 %v9558_v5, %v9566_v10  ;;  %v9571_v14 = vsel %vm1120_vm4, %v9569_v13, 0.0 }
0x260b   : > { %9572 = vadd.xlane.f32.xlu0 %v9571_v14 }
0x260c   : > { %v9570_v34 = vmul.f32 %v9568_v63, %v9568_v63 }
0x260e   : > { %v9574_v18 = vsel %vm4069_vm12, %v9570_v34, 0.0 }
0x260f   : > { %9575 = vadd.xlane.f32.xlu1 %v9574_v18 }
0x2698   : > { %v9573_v36 = vpop.xlane.xlu0 %9572 }
0x2699   : > { %v9577_v44 = vmul.f32 0.0125, %v9573_v36 }
0x269b   : > { %v9579_v21 = vadd.f32 1e-05, %v9577_v44 }
0x269c   : > { %v9576_v22 = vpop.xlane.xlu1 %9575 }
0x269d   : > { %12015 = vrsqrt.f32 %v9579_v21  ;;  %v9578_v23 = vmul.f32 0.0125, %v9576_v22 }
0x269f   : > { %v9580_v32 = vadd.f32 1e-05, %v9578_v23 }
0x26a1   : > { %12017 = vrsqrt.f32 %v9580_v32 }
0x26a7   : > { %v12016_v12 = vpop.eup %12015 }
0x26a8   : > { %v9583_v29 = vmul.f32 %v12016_v12, %v9567_v60 }
0x26aa   : > { %v9589_v15 = vmul.f32 %v9588_v27, %v9583_v29 }
0x26ab   : > { %v12018_v30 = vpop.eup %12017 }
0x26ac   : > { %v9595_v37 = vadd.f32 %v9594_v35, %v9589_v15  ;;  %v9584_v38 = vmul.f32 %v12018_v30, %v9568_v63  ;;  %9602 = sbr.rel (%p10347_p5) target bundleno = 10155 (0x27ab), region = 120 }
0x26ae   : > { %9597 = vst.msk [vmem:[#allocation2] sm:$0xff] %vm1120_vm4, %v9595_v37  ;;  %v9590_v48 = vmul.f32 %v9588_v27, %v9584_v38  ;;  %11190 = vmatprep.mubr.msk.f32.mxu0 (!%p10347_p5), %vm1120_vm4, %v9595_v37 }
0x26b0   : > { %v9596_v19 = vadd.f32 %v9594_v35, %v9590_v48 }
0x26b2   : > { %9598 = vst.msk [vmem:[#allocation2 + $0x8] sm:$0xf] %vm4069_vm12, %v9596_v19  ;;  %11191 = vmatmul.mubr.msk.f32.vlgmr.msra.gmra.mrb[0].mxu0 (!%p10347_p5), %vm1120_vm4, %v9596_v19 }
0x2785   : > { %v11192_v56 = vpop.f32.mrb[0].mxu0 }
0x2786   : > { %v9698_v11 = vadd.f32 %v11192_v56, %v10348_v55  ;;  %v9692_v57 = vpop.f32.mrb[1].mxu0 }
0x2787   : > { %v9693_v58 = vadd.f32 %v10348_v55, %v9692_v57 }
0x2788   : > { %v9702_v61 = vand.u32 2147483647, %v9698_v11  ;;  %vm9710_vm1 = vcmp.ge.f32.partialorder %v9698_v11, 0.0 }
0x2789   : > { %v9701_v59 = vand.u32 2147483647, %v9693_v58  ;;  %vm9709_vm3 = vcmp.ge.f32.partialorder %v9693_v58, 0.0 }
0x278a   : > { %v9704_v17 = vsub.f32 0.0, %v9702_v61 }
0x278b   : > { %v9703_v41 = vsub.f32 0.0, %v9701_v59 }
0x278c   : > { %v9707_v52 = vmul.f32 1.442695, %v9704_v17 }
0x278d   : > { %v9705_v45 = vmul.f32 1.442695, %v9703_v41 }
0x278e   : > { %12026 = vpow2.f32 %v9707_v52 }
0x278f   : > { %12028 = vpow2.f32 %v9705_v45 }
0x2798   : > { %v12027_v62 = vpop.eup %12026 }
0x2799   : > { %v12029_v26 = vpop.eup %12028  ;;  %v9712_v0 = vadd.f32 1.0, %v12027_v62 }
0x279a   : > { %v9711_v25 = vadd.f32 1.0, %v12029_v26 }
0x279b   : > { %12030 = vrcp.f32 %v9712_v0 }
0x279c   : > { %12032 = vrcp.f32 %v9711_v25 }
0x27a5   : > { %v12031_v1 = vpop.eup %12030 }
0x27a6   : > { %v12033_v54 = vpop.eup %12032  ;;  %v9718_v49 = vmul.f32 %v12031_v1, %v12027_v62 }
0x27a7   : > { %v9717_v39 = vmul.f32 %v12033_v54, %v12029_v26 }
0x27a8   : > { %v9720_v4 = vsel %vm9710_vm1, %v12031_v1, %v9718_v49 }
0x27a9   : > { %9724 = vst.msk [vmem:[%s13462_s30 + $0x8] sm:$0xf] %vm9723_vm0, %v9720_v4  ;;  %v9719_v5 = vsel %vm9709_vm3, %v12033_v54, %v9717_v39 }
0x27aa   : > { %9722 = vst.msk [vmem:[%s13462_s30] sm:$0xff] %vm9721_vm2, %v9719_v5 }
0x27ab PF: > { %s13463_s2 = sld [smem:[#allocation4_spill]] }
0x27b1   : > { %s35_s24 = sadd.s32 1, %s13463_s2  }
0x27b2   : > { %p32_p6 = scmp.ge.s32.totalorder %s35_s24, 10  }
0x27b4   :  { %34 = sbr.rel (!%p32_p6) target bundleno = 18 (0x12), region = 188 }

</bundles_post_ra>
